<compile_context>
chip_gen: v7x
topology: tpu7x:2x2x1
jax: 0.10.0
libtpu: 0.0.40
codegen_flags: <defaults>
</compile_context>

<pallas_src>
import functools

import jax
import jax.numpy as jnp
from jax import lax
from jax.experimental import pallas as pl
from jax.experimental.pallas import tpu as pltpu


# ---------------------------------------------------------------------------
# small helpers
# ---------------------------------------------------------------------------
def _lane_pad(c):
    return ((c + 127) // 128) * 128


def _tpu_vmem_capacity():
    try:
        return int(pltpu.get_tpu_info().vmem_capacity_bytes)
    except Exception:
        return 64 * 1024 * 1024          # v7x per-TC size: safe lower bound


def _pick_pack(spatial, channels, target=128):
    """# spatial positions packed per lane group so lanes are ~128 wide."""
    g = max(1, target // max(channels, 1))
    g = min(g, spatial)
    while g > 1 and spatial % g:
        g -= 1
    return g


def _pick_row_block(rows, per_row_bytes, budget):
    """Row-block (2nd-minor dim): multiple of 8 (or the full extent),
    bounded by the VMEM budget, aiming for >=2 grid steps (v7x megacore)."""
    if rows <= 8:
        return rows
    by_budget = (budget // max(per_row_bytes, 1)) // 8 * 8
    by_cores = (((rows + 1) // 2) + 7) // 8 * 8
    rb = max(8, min(by_budget, by_cores))
    return rows if rb >= rows else rb


def _block_diag(a, k):
    """kron(I_k, a): k independent channel mixes in one lane-dense matmul."""
    return jnp.kron(jnp.eye(k, dtype=a.dtype), a)


# ---------------------------------------------------------------------------
# Kernel A: conv_channel (hoisted) + convDU2 recurrence over H.
#   x_ref : (H, R, G*Cin)  f32   rows = (n, w-group), lanes = (w-in-group, Cin)
#   o_ref : (H, R, G*Cout) bf16  finalized DU result
#   s_ref : (H, R, G*Cout) f32   recurrence scratch (chain stays in f32)
# ---------------------------------------------------------------------------
def _du_kernel(x_ref, wch_ref, m_ref, b_ref, o_ref, s_ref):
    h, r, _ = x_ref.shape
    gc = s_ref.shape[-1]
    wch = wch_ref[...]
    m = m_ref[...]
    bias = jnp.broadcast_to(b_ref[...], (r, gc))        # hoisted broadcast
    unroll = h <= 32

    # Hoisted channel mix: independent matmuls, off the serial chain.
    def fill(i, c):
        s_ref[i] = jnp.dot(x_ref[i], wch, preferred_element_type=jnp.float32)
        return c

    lax.fori_loop(0, h, fill, 0, unroll=unroll)

    # Down pass: s[i] = relu(s[i-1] @ M + b) + y[i]; carry stays in vregs.
    def down(i, prev):
        cur = jnp.maximum(
            jnp.dot(prev, m, preferred_element_type=jnp.float32) + bias, 0.0
        ) + s_ref[i]
        s_ref[i] = cur
        return cur

    last = lax.fori_loop(1, h, down, s_ref[0], unroll=unroll)
    o_ref[h - 1] = last.astype(o_ref.dtype)

    # Up pass: s[i] = relu(s[i+1] @ M + b) + s[i]; emit straight to bf16 out.
    def up(k, nxt):
        i = h - 2 - k
        cur = jnp.maximum(
            jnp.dot(nxt, m, preferred_element_type=jnp.float32) + bias, 0.0
        ) + s_ref[i]
        o_ref[i] = cur.astype(o_ref.dtype)
        return cur

    lax.fori_loop(0, h - 1, up, last, unroll=unroll)


# ---------------------------------------------------------------------------
# Kernel B: convLR2 recurrence over W + batched (conv_w o reshuffle o conv_H).
#   e_ref : (W, R, GH*Cout)            bf16  rows = (n, h-group)
#   z_ref : (W, R, GH*scale*scale*Cout) f32
#   s_ref : (W, R, GH*Cout)            f32
# ---------------------------------------------------------------------------
def _lr_kernel(e_ref, m_ref, b_ref, wcomb_ref, z_ref, s_ref):
    w, r, gc = s_ref.shape
    m = m_ref[...]
    wcomb = wcomb_ref[...]
    bias = jnp.broadcast_to(b_ref[...], (r, gc))
    unroll = w <= 32

    col0 = e_ref[0].astype(jnp.float32)
    s_ref[0] = col0

    def down(j, prev):
        cur = jnp.maximum(
            jnp.dot(prev, m, preferred_element_type=jnp.float32) + bias, 0.0
        ) + e_ref[j].astype(jnp.float32)
        s_ref[j] = cur
        return cur

    last = lax.fori_loop(1, w, down, col0, unroll=unroll)

    def up(k, nxt):
        j = w - 2 - k
        cur = jnp.maximum(
            jnp.dot(nxt, m, preferred_element_type=jnp.float32) + bias, 0.0
        ) + s_ref[j]
        s_ref[j] = cur
        return cur

    lax.fori_loop(0, w - 1, up, last, unroll=unroll)

    # Batched emit: conv_w -> pixel-reshuffle -> conv_H collapsed into one
    # block-diagonal channel-mix; independent matmuls + full-lane stores.
    def emit(j, c):
        z_ref[j] = jnp.dot(s_ref[j], wcomb, preferred_element_type=jnp.float32)
        return c

    lax.fori_loop(0, w, emit, 0, unroll=unroll)


# ---------------------------------------------------------------------------
# Full SSRupsampling2 forward (PyTorch NCHW in / NCHW out).
# ---------------------------------------------------------------------------
@functools.partial(jax.jit, static_argnames=("scale",))
def ssr_upsampling2(x_nchw, params, scale):
    n, cin, h, w = x_nchw.shape
    f32 = jnp.float32
    w_ch = params["w_ch"][:, :, 0, 0].astype(f32)        # (Cout, Cin)
    m_du = params["w_du"][:, :, 1, 0].astype(f32)        # center tap of (3,1)
    b_du = params["b_du"].astype(f32)
    m_lr = params["w_lr"][:, :, 0, 1].astype(f32)        # center tap of (1,3)
    b_lr = params["b_lr"].astype(f32)
    w_w = params["w_w"][:, :, 0, 0].astype(f32)          # (Cout*scale, Cout)
    w_h = params["w_h"][:, :, 0, 0].astype(f32)          # (Cout*scale, Cout)
    cout = w_ch.shape[0]
    s2c = scale * scale * cout
    hp = lax.Precision.HIGHEST

    # Combined conv_w o pixel-reshuffle o conv_H weight: (Cout, scale*scale*Cout)
    #   W_comb[c, s, t, c'] = sum_i w_w[s*Cout + i, c] * w_h[t*Cout + c', i]
    w_w_r = w_w.reshape(scale, cout, cout)               # [s, i, c]
    w_h_r = w_h.reshape(scale, cout, cout)               # [t, c', i]
    w_comb = jnp.einsum("sic,tji->cstj", w_w_r, w_h_r,
                        precision=hp).reshape(cout, s2c)

    # Lane packing factors (review item 1): g W-positions / gh H-positions
    # share a ~128-wide lane group; weights become block-diagonal.
    g = _pick_pack(w, cout)
    gh = _pick_pack(h, cout)
    wgrp, hgrp = w // g, h // gh

    wch_blk = _block_diag(w_ch.T, g)                     # (g*Cin,  g*Cout)
    mdu_blk = _block_diag(m_du.T, g)                     # (g*Cout, g*Cout)
    bdu_blk = jnp.tile(b_du, g).reshape(1, g * cout)
    mlr_blk = _block_diag(m_lr.T, gh)                    # (gh*Cout, gh*Cout)
    blr_blk = jnp.tile(b_lr, gh).reshape(1, gh * cout)
    wcomb_blk = _block_diag(w_comb, gh)                  # (gh*Cout, gh*s2c)

    # Generation-aware VMEM budget (items 5/7): budget ~ capacity/4, scoped
    # limit leaves headroom on v7x's 64 MiB as well as 128 MiB chips.
    cap = _tpu_vmem_capacity()
    budget = cap // 4
    vmem_limit = min(cap - (8 << 20), budget * 2 + (8 << 20))
    cparams = pltpu.CompilerParams(dimension_semantics=("parallel",),
                                   vmem_limit_bytes=vmem_limit)

    # ---- Kernel A: conv_channel + convDU2 (recurrence over H) -------------
    rows_a = n * wgrp
    per_row_a = (2 * h * _lane_pad(g * cin) * 4          # double-buffered input
                 + 2 * h * _lane_pad(g * cout) * 2       # double-buffered bf16 out
                 + h * _lane_pad(g * cout) * 4)          # f32 recurrence scratch
    rb_a = _pick_row_block(rows_a, per_row_a, budget)
    grid_a = (pl.cdiv(rows_a, rb_a),)

    # NCHW -> (H, N, W, Cin) (one XLA pass over the small input), then a FREE
    # reshape into the lane-packed (H, N*Wg, g*Cin) layout.
    x_a = jnp.transpose(x_nchw, (2, 0, 3, 1)).reshape(h, rows_a, g * cin)

    du_cost = pl.CostEstimate(
        flops=2 * n * h * w * cout * (cin + 2 * cout),
        transcendentals=0,
        bytes_accessed=4 * n * h * w * cin + 2 * n * h * w * cout)
    d = pl.pallas_call(
        _du_kernel,
        out_shape=jax.ShapeDtypeStruct((h, rows_a, g * cout), jnp.bfloat16),
        grid=grid_a,
        in_specs=[
            pl.BlockSpec((h, rb_a, g * cin), lambda b: (0, b, 0)),
            pl.BlockSpec((g * cin, g * cout), lambda b: (0, 0)),
            pl.BlockSpec((g * cout, g * cout), lambda b: (0, 0)),
            pl.BlockSpec((1, g * cout), lambda b: (0, 0)),
        ],
        out_specs=pl.BlockSpec((h, rb_a, g * cout), lambda b: (0, b, 0)),
        scratch_shapes=[pltpu.VMEM((h, rb_a, g * cout), jnp.float32)],
        compiler_params=cparams,
        cost_estimate=du_cost,
    )(x_a, wch_blk, mdu_blk, bdu_blk)

    # ---- single H<->W pivot of the bf16 intermediate ------------------------
    # TODO(synk): fold this pivot into a fused kernel (needs an in-VMEM
    # major<->lane repack that Mosaic does not lower reliably today).
    rows_b = n * hgrp
    e = jnp.transpose(d.reshape(h, n, w, cout), (2, 1, 0, 3))   # (W, N, H, Cout)
    e = e.reshape(w, rows_b, gh * cout)                          # free view

    # ---- Kernel B: convLR2 + fused (conv_w o reshuffle o conv_H) -----------
    per_row_b = (2 * w * _lane_pad(gh * cout) * 2
                 + w * _lane_pad(gh * cout) * 4
                 + 2 * w * _lane_pad(gh * s2c) * 4)
    rb_b = _pick_row_block(rows_b, per_row_b, budget)
    grid_b = (pl.cdiv(rows_b, rb_b),)

    lr_cost = pl.CostEstimate(
        flops=2 * n * h * w * cout * (2 * cout + s2c),
        transcendentals=0,
        bytes_accessed=2 * n * h * w * cout + 4 * n * h * w * s2c)
    z = pl.pallas_call(
        _lr_kernel,
        out_shape=jax.ShapeDtypeStruct((w, rows_b, gh * s2c), jnp.float32),
        grid=grid_b,
        in_specs=[
            pl.BlockSpec((w, rb_b, gh * cout), lambda b: (0, b, 0)),
            pl.BlockSpec((gh * cout, gh * cout), lambda b: (0, 0)),
            pl.BlockSpec((1, gh * cout), lambda b: (0, 0)),
            pl.BlockSpec((gh * cout, gh * s2c), lambda b: (0, 0)),
        ],
        out_specs=pl.BlockSpec((w, rb_b, gh * s2c), lambda b: (0, b, 0)),
        scratch_shapes=[pltpu.VMEM((w, rb_b, gh * cout), jnp.float32)],
        compiler_params=cparams,
        cost_estimate=lr_cost,
    )(e, mlr_blk, blr_blk, wcomb_blk)

    # ---- final assembly: z[w, (n,hg), (q,s,t,c')] -> NCHW -------------------
    # TODO(synk): emit directly in NCHW order inside kernel B (needs an
    # in-VMEM W->lane transpose of the LR state) to drop this output pass.
    z7 = z.reshape(w, n, hgrp, gh, scale, scale, cout)
    out = jnp.transpose(z7, (1, 6, 2, 3, 4, 0, 5)).reshape(
        n, cout, h * scale, w * scale)
    return out


# ---------------------------------------------------------------------------
# Pure-JAX reference mirroring the PyTorch module step by step (unfused).
# ---------------------------------------------------------------------------
def _reference(x, params, scale):
    hp = lax.Precision.HIGHEST
    w_ch = params["w_ch"][:, :, 0, 0]
    m_du = params["w_du"][:, :, 1, 0]
    b_du = params["b_du"]
    m_lr = params["w_lr"][:, :, 0, 1]
    b_lr = params["b_lr"]
    w_w = params["w_w"][:, :, 0, 0]
    w_h = params["w_h"][:, :, 0, 0]

    def mix(v, m, bias):       # v: (N, C, L) -> (N, C, L)
        return jax.nn.relu(
            jnp.einsum("oc,ncl->nol", m, v, precision=hp)
            + bias[None, :, None])

    y = jnp.einsum("oc,nchw->nohw", w_ch, x, precision=hp)
    n, c, h, w = y.shape

    # convDU2
    stack = [y[:, :, 0, :]]
    for i in range(1, h):
        stack.append(mix(stack[i - 1], m_du, b_du) + y[:, :, i, :])
    for i in range(h - 2, -1, -1):
        stack[i] = mix(stack[i + 1], m_du, b_du) + stack[i]
    y = jnp.stack(stack, axis=2)

    # convLR2
    stack = [y[:, :, :, 0]]
    for j in range(1, w):
        stack.append(mix(stack[j - 1], m_lr, b_lr) + y[:, :, :, j])
    for j in range(w - 2, -1, -1):
        stack[j] = mix(stack[j + 1], m_lr, b_lr) + stack[j]
    y = jnp.stack(stack, axis=3)

    # conv_w -> reshuffle -> conv_H -> reshuffle, exactly as the PyTorch code
    z = jnp.einsum("oc,nchw->nohw", w_w, y, precision=hp)
    c1 = z.shape[1]
    zp = jnp.transpose(z, (0, 3, 2, 1)).reshape(n, w, h * scale, c1 // scale)
    zp = jnp.transpose(zp, (0, 3, 2, 1))
    xh = jnp.einsum("oc,nchw->nohw", w_h, zp, precision=hp)
    xh = jnp.transpose(xh, (0, 2, 3, 1)).reshape(
        n, h * scale, w * scale, c1 // scale)
    return jnp.transpose(xh, (0, 3, 1, 2))


if __name__ == "__main__":
    n, inplanes, h, w = 2, 4, 16, 16
    outplanes, scale = 8, 2

    key = jax.random.PRNGKey(0)
    ks = jax.random.split(key, 8)
    x = jax.random.normal(ks[0], (n, inplanes, h, w), jnp.float32)
    params = {
        "w_ch": 0.2 * jax.random.normal(ks[1], (outplanes, inplanes, 1, 1), jnp.float32),
        "w_du": 0.2 * jax.random.normal(ks[2], (outplanes, outplanes, 3, 1), jnp.float32),
        "b_du": 0.1 * jax.random.normal(ks[3], (outplanes,), jnp.float32),
        "w_lr": 0.2 * jax.random.normal(ks[4], (outplanes, outplanes, 1, 3), jnp.float32),
        "b_lr": 0.1 * jax.random.normal(ks[5], (outplanes,), jnp.float32),
        "w_w": 0.2 * jax.random.normal(ks[6], (outplanes * scale, outplanes, 1, 1), jnp.float32),
        "w_h": 0.2 * jax.random.normal(ks[7], (outplanes * scale, outplanes, 1, 1), jnp.float32),
    }

    out = jax.block_until_ready(ssr_upsampling2(x, params, scale=scale))
    assert out.shape == (n, outplanes, h * scale, w * scale), out.shape
    assert bool(jnp.isfinite(out).all())

    ref = jax.block_until_ready(_reference(x, params, scale))
    err = float(jnp.max(jnp.abs(out - ref)))
    ref_mag = float(jnp.max(jnp.abs(ref)))
    assert err <= 1e-2 * max(ref_mag, 1.0), (err, ref_mag)

    print("KERNEL_OK")
</pallas_src>

<mosaic_0001>
module attributes {stable_mosaic.version = 11 : i64} {
  func.func @_du_kernel(%arg0: i32, %arg1: memref<16x2x64xf32, #tpu.memory_space<vmem>>, %arg2: memref<64x128xf32, #tpu.memory_space<vmem>>, %arg3: memref<128x128xf32, #tpu.memory_space<vmem>>, %arg4: memref<1x128xf32, #tpu.memory_space<vmem>>, %arg5: memref<16x2x128xbf16, #tpu.memory_space<vmem>>, %arg6: memref<16x2x128xf32, #tpu.memory_space<vmem>>) attributes {dimension_semantics = [#tpu.dimension_semantics<parallel>], iteration_bounds = array<i64: 1>, scalar_prefetch = 0 : i64, scratch_operands = 1 : i64, tpu.core_type = #tpu.core_type<tc>, window_params = [{transform_indices = @transform_0, window_bounds = array<i64: 16, 2, 64>}, {pipeline_mode = #tpu.pipeline_mode<synchronous>, transform_indices = @transform_1, window_bounds = array<i64: 64, 128>}, {pipeline_mode = #tpu.pipeline_mode<synchronous>, transform_indices = @transform_2, window_bounds = array<i64: 128, 128>}, {pipeline_mode = #tpu.pipeline_mode<synchronous>, transform_indices = @transform_3, window_bounds = array<i64: 1, 128>}, {transform_indices = @transform_4, window_bounds = array<i64: 16, 2, 128>}]} {
    %c0 = arith.constant 0 : index
    %c0_0 = arith.constant 0 : index
    %0 = vector.load %arg2[%c0, %c0_0] : memref<64x128xf32, #tpu.memory_space<vmem>>, vector<64x128xf32>
    %c0_1 = arith.constant 0 : index
    %c0_2 = arith.constant 0 : index
    %1 = vector.load %arg3[%c0_1, %c0_2] : memref<128x128xf32, #tpu.memory_space<vmem>>, vector<128x128xf32>
    %c0_3 = arith.constant 0 : index
    %c0_4 = arith.constant 0 : index
    %2 = vector.load %arg4[%c0_3, %c0_4] : memref<1x128xf32, #tpu.memory_space<vmem>>, vector<1x128xf32>
    %3 = vector.shape_cast %2 : vector<1x128xf32> to vector<1x128xf32>
    %4 = vector.broadcast %3 : vector<1x128xf32> to vector<2x128xf32>
    %c0_i32 = arith.constant 0 : i32
    %5 = arith.index_cast %c0_i32 : i32 to index
    %c0_5 = arith.constant 0 : index
    %c0_6 = arith.constant 0 : index
    %6 = vector.load %arg1[%5, %c0_5, %c0_6] : memref<16x2x64xf32, #tpu.memory_space<vmem>>, vector<1x2x64xf32>
    %7 = vector.shape_cast %6 : vector<1x2x64xf32> to vector<2x64xf32>
    %cst = arith.constant dense<0.000000e+00> : vector<2x128xf32>
    %8 = tpu.matmul %7, %0, %cst {dimension_numbers = #tpu.dot_dimension_numbers<[1], [0], [0], [1], [0, 0, 1, 1], [], []>} : vector<2x64xf32>, vector<64x128xf32>, vector<2x128xf32> -> vector<2x128xf32>
    %9 = arith.index_cast %c0_i32 : i32 to index
    %c0_7 = arith.constant 0 : index
    %c0_8 = arith.constant 0 : index
    %10 = vector.load %arg6[%9, %c0_7, %c0_8] : memref<16x2x128xf32, #tpu.memory_space<vmem>>, vector<1x2x128xf32>
    %11 = vector.shape_cast %10 : vector<1x2x128xf32> to vector<2x128xf32>
    %12 = vector.shape_cast %8 : vector<2x128xf32> to vector<1x2x128xf32>
    tpu.vector_store %arg6[%9, %c0_7, %c0_8], %12 {strides = array<i32>} : memref<16x2x128xf32, #tpu.memory_space<vmem>>, vector<1x2x128xf32>,
    %c1_i32 = arith.constant 1 : i32
    %13 = arith.index_cast %c1_i32 : i32 to index
    %c0_9 = arith.constant 0 : index
    %c0_10 = arith.constant 0 : index
    %14 = vector.load %arg1[%13, %c0_9, %c0_10] : memref<16x2x64xf32, #tpu.memory_space<vmem>>, vector<1x2x64xf32>
    %15 = vector.shape_cast %14 : vector<1x2x64xf32> to vector<2x64xf32>
    %cst_11 = arith.constant dense<0.000000e+00> : vector<2x128xf32>
    %16 = tpu.matmul %15, %0, %cst_11 {dimension_numbers = #tpu.dot_dimension_numbers<[1], [0], [0], [1], [0, 0, 1, 1], [], []>} : vector<2x64xf32>, vector<64x128xf32>, vector<2x128xf32> -> vector<2x128xf32>
    %17 = arith.index_cast %c1_i32 : i32 to index
    %c0_12 = arith.constant 0 : index
    %c0_13 = arith.constant 0 : index
    %18 = vector.load %arg6[%17, %c0_12, %c0_13] : memref<16x2x128xf32, #tpu.memory_space<vmem>>, vector<1x2x128xf32>
    %19 = vector.shape_cast %18 : vector<1x2x128xf32> to vector<2x128xf32>
    %20 = vector.shape_cast %16 : vector<2x128xf32> to vector<1x2x128xf32>
    tpu.vector_store %arg6[%17, %c0_12, %c0_13], %20 {strides = array<i32>} : memref<16x2x128xf32, #tpu.memory_space<vmem>>, vector<1x2x128xf32>,
    %c2_i32 = arith.constant 2 : i32
    %21 = arith.index_cast %c2_i32 : i32 to index
    %c0_14 = arith.constant 0 : index
    %c0_15 = arith.constant 0 : index
    %22 = vector.load %arg1[%21, %c0_14, %c0_15] : memref<16x2x64xf32, #tpu.memory_space<vmem>>, vector<1x2x64xf32>
    %23 = vector.shape_cast %22 : vector<1x2x64xf32> to vector<2x64xf32>
    %cst_16 = arith.constant dense<0.000000e+00> : vector<2x128xf32>
    %24 = tpu.matmul %23, %0, %cst_16 {dimension_numbers = #tpu.dot_dimension_numbers<[1], [0], [0], [1], [0, 0, 1, 1], [], []>} : vector<2x64xf32>, vector<64x128xf32>, vector<2x128xf32> -> vector<2x128xf32>
    %25 = arith.index_cast %c2_i32 : i32 to index
    %c0_17 = arith.constant 0 : index
    %c0_18 = arith.constant 0 : index
    %26 = vector.load %arg6[%25, %c0_17, %c0_18] : memref<16x2x128xf32, #tpu.memory_space<vmem>>, vector<1x2x128xf32>
    %27 = vector.shape_cast %26 : vector<1x2x128xf32> to vector<2x128xf32>
    %28 = vector.shape_cast %24 : vector<2x128xf32> to vector<1x2x128xf32>
    tpu.vector_store %arg6[%25, %c0_17, %c0_18], %28 {strides = array<i32>} : memref<16x2x128xf32, #tpu.memory_space<vmem>>, vector<1x2x128xf32>,
    %c3_i32 = arith.constant 3 : i32
    %29 = arith.index_cast %c3_i32 : i32 to index
    %c0_19 = arith.constant 0 : index
    %c0_20 = arith.constant 0 : index
    %30 = vector.load %arg1[%29, %c0_19, %c0_20] : memref<16x2x64xf32, #tpu.memory_space<vmem>>, vector<1x2x64xf32>
    %31 = vector.shape_cast %30 : vector<1x2x64xf32> to vector<2x64xf32>
    %cst_21 = arith.constant dense<0.000000e+00> : vector<2x128xf32>
    %32 = tpu.matmul %31, %0, %cst_21 {dimension_numbers = #tpu.dot_dimension_numbers<[1], [0], [0], [1], [0, 0, 1, 1], [], []>} : vector<2x64xf32>, vector<64x128xf32>, vector<2x128xf32> -> vector<2x128xf32>
    %33 = arith.index_cast %c3_i32 : i32 to index
    %c0_22 = arith.constant 0 : index
    %c0_23 = arith.constant 0 : index
    %34 = vector.load %arg6[%33, %c0_22, %c0_23] : memref<16x2x128xf32, #tpu.memory_space<vmem>>, vector<1x2x128xf32>
    %35 = vector.shape_cast %34 : vector<1x2x128xf32> to vector<2x128xf32>
    %36 = vector.shape_cast %32 : vector<2x128xf32> to vector<1x2x128xf32>
    tpu.vector_store %arg6[%33, %c0_22, %c0_23], %36 {strides = array<i32>} : memref<16x2x128xf32, #tpu.memory_space<vmem>>, vector<1x2x128xf32>,
    %c4_i32 = arith.constant 4 : i32
    %37 = arith.index_cast %c4_i32 : i32 to index
    %c0_24 = arith.constant 0 : index
    %c0_25 = arith.constant 0 : index
    %38 = vector.load %arg1[%37, %c0_24, %c0_25] : memref<16x2x64xf32, #tpu.memory_space<vmem>>, vector<1x2x64xf32>
    %39 = vector.shape_cast %38 : vector<1x2x64xf32> to vector<2x64xf32>
    %cst_26 = arith.constant dense<0.000000e+00> : vector<2x128xf32>
    %40 = tpu.matmul %39, %0, %cst_26 {dimension_numbers = #tpu.dot_dimension_numbers<[1], [0], [0], [1], [0, 0, 1, 1], [], []>} : vector<2x64xf32>, vector<64x128xf32>, vector<2x128xf32> -> vector<2x128xf32>
    %41 = arith.index_cast %c4_i32 : i32 to index
    %c0_27 = arith.constant 0 : index
    %c0_28 = arith.constant 0 : index
    %42 = vector.load %arg6[%41, %c0_27, %c0_28] : memref<16x2x128xf32, #tpu.memory_space<vmem>>, vector<1x2x128xf32>
    %43 = vector.shape_cast %42 : vector<1x2x128xf32> to vector<2x128xf32>
    %44 = vector.shape_cast %40 : vector<2x128xf32> to vector<1x2x128xf32>
    tpu.vector_store %arg6[%41, %c0_27, %c0_28], %44 {strides = array<i32>} : memref<16x2x128xf32, #tpu.memory_space<vmem>>, vector<1x2x128xf32>,
    %c5_i32 = arith.constant 5 : i32
    %45 = arith.index_cast %c5_i32 : i32 to index
    %c0_29 = arith.constant 0 : index
    %c0_30 = arith.constant 0 : index
    %46 = vector.load %arg1[%45, %c0_29, %c0_30] : memref<16x2x64xf32, #tpu.memory_space<vmem>>, vector<1x2x64xf32>
    %47 = vector.shape_cast %46 : vector<1x2x64xf32> to vector<2x64xf32>
    %cst_31 = arith.constant dense<0.000000e+00> : vector<2x128xf32>
    %48 = tpu.matmul %47, %0, %cst_31 {dimension_numbers = #tpu.dot_dimension_numbers<[1], [0], [0], [1], [0, 0, 1, 1], [], []>} : vector<2x64xf32>, vector<64x128xf32>, vector<2x128xf32> -> vector<2x128xf32>
    %49 = arith.index_cast %c5_i32 : i32 to index
    %c0_32 = arith.constant 0 : index
    %c0_33 = arith.constant 0 : index
    %50 = vector.load %arg6[%49, %c0_32, %c0_33] : memref<16x2x128xf32, #tpu.memory_space<vmem>>, vector<1x2x128xf32>
    %51 = vector.shape_cast %50 : vector<1x2x128xf32> to vector<2x128xf32>
    %52 = vector.shape_cast %48 : vector<2x128xf32> to vector<1x2x128xf32>
    tpu.vector_store %arg6[%49, %c0_32, %c0_33], %52 {strides = array<i32>} : memref<16x2x128xf32, #tpu.memory_space<vmem>>, vector<1x2x128xf32>,
    %c6_i32 = arith.constant 6 : i32
    %53 = arith.index_cast %c6_i32 : i32 to index
    %c0_34 = arith.constant 0 : index
    %c0_35 = arith.constant 0 : index
    %54 = vector.load %arg1[%53, %c0_34, %c0_35] : memref<16x2x64xf32, #tpu.memory_space<vmem>>, vector<1x2x64xf32>
    %55 = vector.shape_cast %54 : vector<1x2x64xf32> to vector<2x64xf32>
    %cst_36 = arith.constant dense<0.000000e+00> : vector<2x128xf32>
    %56 = tpu.matmul %55, %0, %cst_36 {dimension_numbers = #tpu.dot_dimension_numbers<[1], [0], [0], [1], [0, 0, 1, 1], [], []>} : vector<2x64xf32>, vector<64x128xf32>, vector<2x128xf32> -> vector<2x128xf32>
    %57 = arith.index_cast %c6_i32 : i32 to index
    %c0_37 = arith.constant 0 : index
    %c0_38 = arith.constant 0 : index
    %58 = vector.load %arg6[%57, %c0_37, %c0_38] : memref<16x2x128xf32, #tpu.memory_space<vmem>>, vector<1x2x128xf32>
    %59 = vector.shape_cast %58 : vector<1x2x128xf32> to vector<2x128xf32>
    %60 = vector.shape_cast %56 : vector<2x128xf32> to vector<1x2x128xf32>
    tpu.vector_store %arg6[%57, %c0_37, %c0_38], %60 {strides = array<i32>} : memref<16x2x128xf32, #tpu.memory_space<vmem>>, vector<1x2x128xf32>,
    %c7_i32 = arith.constant 7 : i32
    %61 = arith.index_cast %c7_i32 : i32 to index
    %c0_39 = arith.constant 0 : index
    %c0_40 = arith.constant 0 : index
    %62 = vector.load %arg1[%61, %c0_39, %c0_40] : memref<16x2x64xf32, #tpu.memory_space<vmem>>, vector<1x2x64xf32>
    %63 = vector.shape_cast %62 : vector<1x2x64xf32> to vector<2x64xf32>
    %cst_41 = arith.constant dense<0.000000e+00> : vector<2x128xf32>
    %64 = tpu.matmul %63, %0, %cst_41 {dimension_numbers = #tpu.dot_dimension_numbers<[1], [0], [0], [1], [0, 0, 1, 1], [], []>} : vector<2x64xf32>, vector<64x128xf32>, vector<2x128xf32> -> vector<2x128xf32>
    %65 = arith.index_cast %c7_i32 : i32 to index
    %c0_42 = arith.constant 0 : index
    %c0_43 = arith.constant 0 : index
    %66 = vector.load %arg6[%65, %c0_42, %c0_43] : memref<16x2x128xf32, #tpu.memory_space<vmem>>, vector<1x2x128xf32>
    %67 = vector.shape_cast %66 : vector<1x2x128xf32> to vector<2x128xf32>
    %68 = vector.shape_cast %64 : vector<2x128xf32> to vector<1x2x128xf32>
    tpu.vector_store %arg6[%65, %c0_42, %c0_43], %68 {strides = array<i32>} : memref<16x2x128xf32, #tpu.memory_space<vmem>>, vector<1x2x128xf32>,
    %c8_i32 = arith.constant 8 : i32
    %69 = arith.index_cast %c8_i32 : i32 to index
    %c0_44 = arith.constant 0 : index
    %c0_45 = arith.constant 0 : index
    %70 = vector.load %arg1[%69, %c0_44, %c0_45] : memref<16x2x64xf32, #tpu.memory_space<vmem>>, vector<1x2x64xf32>
    %71 = vector.shape_cast %70 : vector<1x2x64xf32> to vector<2x64xf32>
    %cst_46 = arith.constant dense<0.000000e+00> : vector<2x128xf32>
    %72 = tpu.matmul %71, %0, %cst_46 {dimension_numbers = #tpu.dot_dimension_numbers<[1], [0], [0], [1], [0, 0, 1, 1], [], []>} : vector<2x64xf32>, vector<64x128xf32>, vector<2x128xf32> -> vector<2x128xf32>
    %73 = arith.index_cast %c8_i32 : i32 to index
    %c0_47 = arith.constant 0 : index
    %c0_48 = arith.constant 0 : index
    %74 = vector.load %arg6[%73, %c0_47, %c0_48] : memref<16x2x128xf32, #tpu.memory_space<vmem>>, vector<1x2x128xf32>
    %75 = vector.shape_cast %74 : vector<1x2x128xf32> to vector<2x128xf32>
    %76 = vector.shape_cast %72 : vector<2x128xf32> to vector<1x2x128xf32>
    tpu.vector_store %arg6[%73, %c0_47, %c0_48], %76 {strides = array<i32>} : memref<16x2x128xf32, #tpu.memory_space<vmem>>, vector<1x2x128xf32>,
    %c9_i32 = arith.constant 9 : i32
    %77 = arith.index_cast %c9_i32 : i32 to index
    %c0_49 = arith.constant 0 : index
    %c0_50 = arith.constant 0 : index
    %78 = vector.load %arg1[%77, %c0_49, %c0_50] : memref<16x2x64xf32, #tpu.memory_space<vmem>>, vector<1x2x64xf32>
    %79 = vector.shape_cast %78 : vector<1x2x64xf32> to vector<2x64xf32>
    %cst_51 = arith.constant dense<0.000000e+00> : vector<2x128xf32>
    %80 = tpu.matmul %79, %0, %cst_51 {dimension_numbers = #tpu.dot_dimension_numbers<[1], [0], [0], [1], [0, 0, 1, 1], [], []>} : vector<2x64xf32>, vector<64x128xf32>, vector<2x128xf32> -> vector<2x128xf32>
    %81 = arith.index_cast %c9_i32 : i32 to index
    %c0_52 = arith.constant 0 : index
    %c0_53 = arith.constant 0 : index
    %82 = vector.load %arg6[%81, %c0_52, %c0_53] : memref<16x2x128xf32, #tpu.memory_space<vmem>>, vector<1x2x128xf32>
    %83 = vector.shape_cast %82 : vector<1x2x128xf32> to vector<2x128xf32>
    %84 = vector.shape_cast %80 : vector<2x128xf32> to vector<1x2x128xf32>
    tpu.vector_store %arg6[%81, %c0_52, %c0_53], %84 {strides = array<i32>} : memref<16x2x128xf32, #tpu.memory_space<vmem>>, vector<1x2x128xf32>,
    %c10_i32 = arith.constant 10 : i32
    %85 = arith.index_cast %c10_i32 : i32 to index
    %c0_54 = arith.constant 0 : index
    %c0_55 = arith.constant 0 : index
    %86 = vector.load %arg1[%85, %c0_54, %c0_55] : memref<16x2x64xf32, #tpu.memory_space<vmem>>, vector<1x2x64xf32>
    %87 = vector.shape_cast %86 : vector<1x2x64xf32> to vector<2x64xf32>
    %cst_56 = arith.constant dense<0.000000e+00> : vector<2x128xf32>
    %88 = tpu.matmul %87, %0, %cst_56 {dimension_numbers = #tpu.dot_dimension_numbers<[1], [0], [0], [1], [0, 0, 1, 1], [], []>} : vector<2x64xf32>, vector<64x128xf32>, vector<2x128xf32> -> vector<2x128xf32>
    %89 = arith.index_cast %c10_i32 : i32 to index
    %c0_57 = arith.constant 0 : index
    %c0_58 = arith.constant 0 : index
    %90 = vector.load %arg6[%89, %c0_57, %c0_58] : memref<16x2x128xf32, #tpu.memory_space<vmem>>, vector<1x2x128xf32>
    %91 = vector.shape_cast %90 : vector<1x2x128xf32> to vector<2x128xf32>
    %92 = vector.shape_cast %88 : vector<2x128xf32> to vector<1x2x128xf32>
    tpu.vector_store %arg6[%89, %c0_57, %c0_58], %92 {strides = array<i32>} : memref<16x2x128xf32, #tpu.memory_space<vmem>>, vector<1x2x128xf32>,
    %c11_i32 = arith.constant 11 : i32
    %93 = arith.index_cast %c11_i32 : i32 to index
    %c0_59 = arith.constant 0 : index
    %c0_60 = arith.constant 0 : index
    %94 = vector.load %arg1[%93, %c0_59, %c0_60] : memref<16x2x64xf32, #tpu.memory_space<vmem>>, vector<1x2x64xf32>
    %95 = vector.shape_cast %94 : vector<1x2x64xf32> to vector<2x64xf32>
    %cst_61 = arith.constant dense<0.000000e+00> : vector<2x128xf32>
    %96 = tpu.matmul %95, %0, %cst_61 {dimension_numbers = #tpu.dot_dimension_numbers<[1], [0], [0], [1], [0, 0, 1, 1], [], []>} : vector<2x64xf32>, vector<64x128xf32>, vector<2x128xf32> -> vector<2x128xf32>
    %97 = arith.index_cast %c11_i32 : i32 to index
    %c0_62 = arith.constant 0 : index
    %c0_63 = arith.constant 0 : index
    %98 = vector.load %arg6[%97, %c0_62, %c0_63] : memref<16x2x128xf32, #tpu.memory_space<vmem>>, vector<1x2x128xf32>
    %99 = vector.shape_cast %98 : vector<1x2x128xf32> to vector<2x128xf32>
    %100 = vector.shape_cast %96 : vector<2x128xf32> to vector<1x2x128xf32>
    tpu.vector_store %arg6[%97, %c0_62, %c0_63], %100 {strides = array<i32>} : memref<16x2x128xf32, #tpu.memory_space<vmem>>, vector<1x2x128xf32>,
    %c12_i32 = arith.constant 12 : i32
    %101 = arith.index_cast %c12_i32 : i32 to index
    %c0_64 = arith.constant 0 : index
    %c0_65 = arith.constant 0 : index
    %102 = vector.load %arg1[%101, %c0_64, %c0_65] : memref<16x2x64xf32, #tpu.memory_space<vmem>>, vector<1x2x64xf32>
    %103 = vector.shape_cast %102 : vector<1x2x64xf32> to vector<2x64xf32>
    %cst_66 = arith.constant dense<0.000000e+00> : vector<2x128xf32>
    %104 = tpu.matmul %103, %0, %cst_66 {dimension_numbers = #tpu.dot_dimension_numbers<[1], [0], [0], [1], [0, 0, 1, 1], [], []>} : vector<2x64xf32>, vector<64x128xf32>, vector<2x128xf32> -> vector<2x128xf32>
    %105 = arith.index_cast %c12_i32 : i32 to index
    %c0_67 = arith.constant 0 : index
    %c0_68 = arith.constant 0 : index
    %106 = vector.load %arg6[%105, %c0_67, %c0_68] : memref<16x2x128xf32, #tpu.memory_space<vmem>>, vector<1x2x128xf32>
    %107 = vector.shape_cast %106 : vector<1x2x128xf32> to vector<2x128xf32>
    %108 = vector.shape_cast %104 : vector<2x128xf32> to vector<1x2x128xf32>
    tpu.vector_store %arg6[%105, %c0_67, %c0_68], %108 {strides = array<i32>} : memref<16x2x128xf32, #tpu.memory_space<vmem>>, vector<1x2x128xf32>,
    %c13_i32 = arith.constant 13 : i32
    %109 = arith.index_cast %c13_i32 : i32 to index
    %c0_69 = arith.constant 0 : index
    %c0_70 = arith.constant 0 : index
    %110 = vector.load %arg1[%109, %c0_69, %c0_70] : memref<16x2x64xf32, #tpu.memory_space<vmem>>, vector<1x2x64xf32>
    %111 = vector.shape_cast %110 : vector<1x2x64xf32> to vector<2x64xf32>
    %cst_71 = arith.constant dense<0.000000e+00> : vector<2x128xf32>
    %112 = tpu.matmul %111, %0, %cst_71 {dimension_numbers = #tpu.dot_dimension_numbers<[1], [0], [0], [1], [0, 0, 1, 1], [], []>} : vector<2x64xf32>, vector<64x128xf32>, vector<2x128xf32> -> vector<2x128xf32>
    %113 = arith.index_cast %c13_i32 : i32 to index
    %c0_72 = arith.constant 0 : index
    %c0_73 = arith.constant 0 : index
    %114 = vector.load %arg6[%113, %c0_72, %c0_73] : memref<16x2x128xf32, #tpu.memory_space<vmem>>, vector<1x2x128xf32>
    %115 = vector.shape_cast %114 : vector<1x2x128xf32> to vector<2x128xf32>
    %116 = vector.shape_cast %112 : vector<2x128xf32> to vector<1x2x128xf32>
    tpu.vector_store %arg6[%113, %c0_72, %c0_73], %116 {strides = array<i32>} : memref<16x2x128xf32, #tpu.memory_space<vmem>>, vector<1x2x128xf32>,
    %c14_i32 = arith.constant 14 : i32
    %117 = arith.index_cast %c14_i32 : i32 to index
    %c0_74 = arith.constant 0 : index
    %c0_75 = arith.constant 0 : index
    %118 = vector.load %arg1[%117, %c0_74, %c0_75] : memref<16x2x64xf32, #tpu.memory_space<vmem>>, vector<1x2x64xf32>
    %119 = vector.shape_cast %118 : vector<1x2x64xf32> to vector<2x64xf32>
    %cst_76 = arith.constant dense<0.000000e+00> : vector<2x128xf32>
    %120 = tpu.matmul %119, %0, %cst_76 {dimension_numbers = #tpu.dot_dimension_numbers<[1], [0], [0], [1], [0, 0, 1, 1], [], []>} : vector<2x64xf32>, vector<64x128xf32>, vector<2x128xf32> -> vector<2x128xf32>
    %121 = arith.index_cast %c14_i32 : i32 to index
    %c0_77 = arith.constant 0 : index
    %c0_78 = arith.constant 0 : index
    %122 = vector.load %arg6[%121, %c0_77, %c0_78] : memref<16x2x128xf32, #tpu.memory_space<vmem>>, vector<1x2x128xf32>
    %123 = vector.shape_cast %122 : vector<1x2x128xf32> to vector<2x128xf32>
    %124 = vector.shape_cast %120 : vector<2x128xf32> to vector<1x2x128xf32>
    tpu.vector_store %arg6[%121, %c0_77, %c0_78], %124 {strides = array<i32>} : memref<16x2x128xf32, #tpu.memory_space<vmem>>, vector<1x2x128xf32>,
    %c15_i32 = arith.constant 15 : i32
    %125 = arith.index_cast %c15_i32 : i32 to index
    %c0_79 = arith.constant 0 : index
    %c0_80 = arith.constant 0 : index
    %126 = vector.load %arg1[%125, %c0_79, %c0_80] : memref<16x2x64xf32, #tpu.memory_space<vmem>>, vector<1x2x64xf32>
    %127 = vector.shape_cast %126 : vector<1x2x64xf32> to vector<2x64xf32>
    %cst_81 = arith.constant dense<0.000000e+00> : vector<2x128xf32>
    %128 = tpu.matmul %127, %0, %cst_81 {dimension_numbers = #tpu.dot_dimension_numbers<[1], [0], [0], [1], [0, 0, 1, 1], [], []>} : vector<2x64xf32>, vector<64x128xf32>, vector<2x128xf32> -> vector<2x128xf32>
    %129 = arith.index_cast %c15_i32 : i32 to index
    %c0_82 = arith.constant 0 : index
    %c0_83 = arith.constant 0 : index
    %130 = vector.load %arg6[%129, %c0_82, %c0_83] : memref<16x2x128xf32, #tpu.memory_space<vmem>>, vector<1x2x128xf32>
    %131 = vector.shape_cast %130 : vector<1x2x128xf32> to vector<2x128xf32>
    %132 = vector.shape_cast %128 : vector<2x128xf32> to vector<1x2x128xf32>
    tpu.vector_store %arg6[%129, %c0_82, %c0_83], %132 {strides = array<i32>} : memref<16x2x128xf32, #tpu.memory_space<vmem>>, vector<1x2x128xf32>,
    %c16_i32 = arith.constant 16 : i32
    %c0_84 = arith.constant 0 : index
    %c0_85 = arith.constant 0 : index
    %c0_86 = arith.constant 0 : index
    %133 = vector.load %arg6[%c0_84, %c0_85, %c0_86] : memref<16x2x128xf32, #tpu.memory_space<vmem>>, vector<1x2x128xf32>
    %134 = vector.shape_cast %133 : vector<1x2x128xf32> to vector<2x128xf32>
    %c1_i32_87 = arith.constant 1 : i32
    %cst_88 = arith.constant dense<0.000000e+00> : vector<2x128xf32>
    %135 = tpu.matmul %134, %1, %cst_88 {dimension_numbers = #tpu.dot_dimension_numbers<[1], [0], [0], [1], [0, 0, 1, 1], [], []>} : vector<2x128xf32>, vector<128x128xf32>, vector<2x128xf32> -> vector<2x128xf32>
    %136 = arith.addf %135, %4 : vector<2x128xf32>
    %cst_89 = arith.constant 0.000000e+00 : f32
    %137 = vector.broadcast %cst_89 : f32 to vector<2x128xf32>
    %138 = arith.maximumf %136, %137 : vector<2x128xf32>
    %139 = arith.index_cast %c1_i32_87 : i32 to index
    %c0_90 = arith.constant 0 : index
    %c0_91 = arith.constant 0 : index
    %140 = vector.load %arg6[%139, %c0_90, %c0_91] : memref<16x2x128xf32, #tpu.memory_space<vmem>>, vector<1x2x128xf32>
    %141 = vector.shape_cast %140 : vector<1x2x128xf32> to vector<2x128xf32>
    %142 = arith.addf %138, %141 : vector<2x128xf32>
    %143 = arith.index_cast %c1_i32_87 : i32 to index
    %c0_92 = arith.constant 0 : index
    %c0_93 = arith.constant 0 : index
    %144 = vector.load %arg6[%143, %c0_92, %c0_93] : memref<16x2x128xf32, #tpu.memory_space<vmem>>, vector<1x2x128xf32>
    %145 = vector.shape_cast %144 : vector<1x2x128xf32> to vector<2x128xf32>
    %146 = vector.shape_cast %142 : vector<2x128xf32> to vector<1x2x128xf32>
    tpu.vector_store %arg6[%143, %c0_92, %c0_93], %146 {strides = array<i32>} : memref<16x2x128xf32, #tpu.memory_space<vmem>>, vector<1x2x128xf32>,
    %c2_i32_94 = arith.constant 2 : i32
    %cst_95 = arith.constant dense<0.000000e+00> : vector<2x128xf32>
    %147 = tpu.matmul %142, %1, %cst_95 {dimension_numbers = #tpu.dot_dimension_numbers<[1], [0], [0], [1], [0, 0, 1, 1], [], []>} : vector<2x128xf32>, vector<128x128xf32>, vector<2x128xf32> -> vector<2x128xf32>
    %148 = arith.addf %147, %4 : vector<2x128xf32>
    %cst_96 = arith.constant 0.000000e+00 : f32
    %149 = vector.broadcast %cst_96 : f32 to vector<2x128xf32>
    %150 = arith.maximumf %148, %149 : vector<2x128xf32>
    %151 = arith.index_cast %c2_i32_94 : i32 to index
    %c0_97 = arith.constant 0 : index
    %c0_98 = arith.constant 0 : index
    %152 = vector.load %arg6[%151, %c0_97, %c0_98] : memref<16x2x128xf32, #tpu.memory_space<vmem>>, vector<1x2x128xf32>
    %153 = vector.shape_cast %152 : vector<1x2x128xf32> to vector<2x128xf32>
    %154 = arith.addf %150, %153 : vector<2x128xf32>
    %155 = arith.index_cast %c2_i32_94 : i32 to index
    %c0_99 = arith.constant 0 : index
    %c0_100 = arith.constant 0 : index
    %156 = vector.load %arg6[%155, %c0_99, %c0_100] : memref<16x2x128xf32, #tpu.memory_space<vmem>>, vector<1x2x128xf32>
    %157 = vector.shape_cast %156 : vector<1x2x128xf32> to vector<2x128xf32>
    %158 = vector.shape_cast %154 : vector<2x128xf32> to vector<1x2x128xf32>
    tpu.vector_store %arg6[%155, %c0_99, %c0_100], %158 {strides = array<i32>} : memref<16x2x128xf32, #tpu.memory_space<vmem>>, vector<1x2x128xf32>,
    %c3_i32_101 = arith.constant 3 : i32
    %cst_102 = arith.constant dense<0.000000e+00> : vector<2x128xf32>
    %159 = tpu.matmul %154, %1, %cst_102 {dimension_numbers = #tpu.dot_dimension_numbers<[1], [0], [0], [1], [0, 0, 1, 1], [], []>} : vector<2x128xf32>, vector<128x128xf32>, vector<2x128xf32> -> vector<2x128xf32>
    %160 = arith.addf %159, %4 : vector<2x128xf32>
    %cst_103 = arith.constant 0.000000e+00 : f32
    %161 = vector.broadcast %cst_103 : f32 to vector<2x128xf32>
    %162 = arith.maximumf %160, %161 : vector<2x128xf32>
    %163 = arith.index_cast %c3_i32_101 : i32 to index
    %c0_104 = arith.constant 0 : index
    %c0_105 = arith.constant 0 : index
    %164 = vector.load %arg6[%163, %c0_104, %c0_105] : memref<16x2x128xf32, #tpu.memory_space<vmem>>, vector<1x2x128xf32>
    %165 = vector.shape_cast %164 : vector<1x2x128xf32> to vector<2x128xf32>
    %166 = arith.addf %162, %165 : vector<2x128xf32>
    %167 = arith.index_cast %c3_i32_101 : i32 to index
    %c0_106 = arith.constant 0 : index
    %c0_107 = arith.constant 0 : index
    %168 = vector.load %arg6[%167, %c0_106, %c0_107] : memref<16x2x128xf32, #tpu.memory_space<vmem>>, vector<1x2x128xf32>
    %169 = vector.shape_cast %168 : vector<1x2x128xf32> to vector<2x128xf32>
    %170 = vector.shape_cast %166 : vector<2x128xf32> to vector<1x2x128xf32>
    tpu.vector_store %arg6[%167, %c0_106, %c0_107], %170 {strides = array<i32>} : memref<16x2x128xf32, #tpu.memory_space<vmem>>, vector<1x2x128xf32>,
    %c4_i32_108 = arith.constant 4 : i32
    %cst_109 = arith.constant dense<0.000000e+00> : vector<2x128xf32>
    %171 = tpu.matmul %166, %1, %cst_109 {dimension_numbers = #tpu.dot_dimension_numbers<[1], [0], [0], [1], [0, 0, 1, 1], [], []>} : vector<2x128xf32>, vector<128x128xf32>, vector<2x128xf32> -> vector<2x128xf32>
    %172 = arith.addf %171, %4 : vector<2x128xf32>
    %cst_110 = arith.constant 0.000000e+00 : f32
    %173 = vector.broadcast %cst_110 : f32 to vector<2x128xf32>
    %174 = arith.maximumf %172, %173 : vector<2x128xf32>
    %175 = arith.index_cast %c4_i32_108 : i32 to index
    %c0_111 = arith.constant 0 : index
    %c0_112 = arith.constant 0 : index
    %176 = vector.load %arg6[%175, %c0_111, %c0_112] : memref<16x2x128xf32, #tpu.memory_space<vmem>>, vector<1x2x128xf32>
    %177 = vector.shape_cast %176 : vector<1x2x128xf32> to vector<2x128xf32>
    %178 = arith.addf %174, %177 : vector<2x128xf32>
    %179 = arith.index_cast %c4_i32_108 : i32 to index
    %c0_113 = arith.constant 0 : index
    %c0_114 = arith.constant 0 : index
    %180 = vector.load %arg6[%179, %c0_113, %c0_114] : memref<16x2x128xf32, #tpu.memory_space<vmem>>, vector<1x2x128xf32>
    %181 = vector.shape_cast %180 : vector<1x2x128xf32> to vector<2x128xf32>
    %182 = vector.shape_cast %178 : vector<2x128xf32> to vector<1x2x128xf32>
    tpu.vector_store %arg6[%179, %c0_113, %c0_114], %182 {strides = array<i32>} : memref<16x2x128xf32, #tpu.memory_space<vmem>>, vector<1x2x128xf32>,
    %c5_i32_115 = arith.constant 5 : i32
    %cst_116 = arith.constant dense<0.000000e+00> : vector<2x128xf32>
    %183 = tpu.matmul %178, %1, %cst_116 {dimension_numbers = #tpu.dot_dimension_numbers<[1], [0], [0], [1], [0, 0, 1, 1], [], []>} : vector<2x128xf32>, vector<128x128xf32>, vector<2x128xf32> -> vector<2x128xf32>
    %184 = arith.addf %183, %4 : vector<2x128xf32>
    %cst_117 = arith.constant 0.000000e+00 : f32
    %185 = vector.broadcast %cst_117 : f32 to vector<2x128xf32>
    %186 = arith.maximumf %184, %185 : vector<2x128xf32>
    %187 = arith.index_cast %c5_i32_115 : i32 to index
    %c0_118 = arith.constant 0 : index
    %c0_119 = arith.constant 0 : index
    %188 = vector.load %arg6[%187, %c0_118, %c0_119] : memref<16x2x128xf32, #tpu.memory_space<vmem>>, vector<1x2x128xf32>
    %189 = vector.shape_cast %188 : vector<1x2x128xf32> to vector<2x128xf32>
    %190 = arith.addf %186, %189 : vector<2x128xf32>
    %191 = arith.index_cast %c5_i32_115 : i32 to index
    %c0_120 = arith.constant 0 : index
    %c0_121 = arith.constant 0 : index
    %192 = vector.load %arg6[%191, %c0_120, %c0_121] : memref<16x2x128xf32, #tpu.memory_space<vmem>>, vector<1x2x128xf32>
    %193 = vector.shape_cast %192 : vector<1x2x128xf32> to vector<2x128xf32>
    %194 = vector.shape_cast %190 : vector<2x128xf32> to vector<1x2x128xf32>
    tpu.vector_store %arg6[%191, %c0_120, %c0_121], %194 {strides = array<i32>} : memref<16x2x128xf32, #tpu.memory_space<vmem>>, vector<1x2x128xf32>,
    %c6_i32_122 = arith.constant 6 : i32
    %cst_123 = arith.constant dense<0.000000e+00> : vector<2x128xf32>
    %195 = tpu.matmul %190, %1, %cst_123 {dimension_numbers = #tpu.dot_dimension_numbers<[1], [0], [0], [1], [0, 0, 1, 1], [], []>} : vector<2x128xf32>, vector<128x128xf32>, vector<2x128xf32> -> vector<2x128xf32>
    %196 = arith.addf %195, %4 : vector<2x128xf32>
    %cst_124 = arith.constant 0.000000e+00 : f32
    %197 = vector.broadcast %cst_124 : f32 to vector<2x128xf32>
    %198 = arith.maximumf %196, %197 : vector<2x128xf32>
    %199 = arith.index_cast %c6_i32_122 : i32 to index
    %c0_125 = arith.constant 0 : index
    %c0_126 = arith.constant 0 : index
    %200 = vector.load %arg6[%199, %c0_125, %c0_126] : memref<16x2x128xf32, #tpu.memory_space<vmem>>, vector<1x2x128xf32>
    %201 = vector.shape_cast %200 : vector<1x2x128xf32> to vector<2x128xf32>
    %202 = arith.addf %198, %201 : vector<2x128xf32>
    %203 = arith.index_cast %c6_i32_122 : i32 to index
    %c0_127 = arith.constant 0 : index
    %c0_128 = arith.constant 0 : index
    %204 = vector.load %arg6[%203, %c0_127, %c0_128] : memref<16x2x128xf32, #tpu.memory_space<vmem>>, vector<1x2x128xf32>
    %205 = vector.shape_cast %204 : vector<1x2x128xf32> to vector<2x128xf32>
    %206 = vector.shape_cast %202 : vector<2x128xf32> to vector<1x2x128xf32>
    tpu.vector_store %arg6[%203, %c0_127, %c0_128], %206 {strides = array<i32>} : memref<16x2x128xf32, #tpu.memory_space<vmem>>, vector<1x2x128xf32>,
    %c7_i32_129 = arith.constant 7 : i32
    %cst_130 = arith.constant dense<0.000000e+00> : vector<2x128xf32>
    %207 = tpu.matmul %202, %1, %cst_130 {dimension_numbers = #tpu.dot_dimension_numbers<[1], [0], [0], [1], [0, 0, 1, 1], [], []>} : vector<2x128xf32>, vector<128x128xf32>, vector<2x128xf32> -> vector<2x128xf32>
    %208 = arith.addf %207, %4 : vector<2x128xf32>
    %cst_131 = arith.constant 0.000000e+00 : f32
    %209 = vector.broadcast %cst_131 : f32 to vector<2x128xf32>
    %210 = arith.maximumf %208, %209 : vector<2x128xf32>
    %211 = arith.index_cast %c7_i32_129 : i32 to index
    %c0_132 = arith.constant 0 : index
    %c0_133 = arith.constant 0 : index
    %212 = vector.load %arg6[%211, %c0_132, %c0_133] : memref<16x2x128xf32, #tpu.memory_space<vmem>>, vector<1x2x128xf32>
    %213 = vector.shape_cast %212 : vector<1x2x128xf32> to vector<2x128xf32>
    %214 = arith.addf %210, %213 : vector<2x128xf32>
    %215 = arith.index_cast %c7_i32_129 : i32 to index
    %c0_134 = arith.constant 0 : index
    %c0_135 = arith.constant 0 : index
    %216 = vector.load %arg6[%215, %c0_134, %c0_135] : memref<16x2x128xf32, #tpu.memory_space<vmem>>, vector<1x2x128xf32>
    %217 = vector.shape_cast %216 : vector<1x2x128xf32> to vector<2x128xf32>
    %218 = vector.shape_cast %214 : vector<2x128xf32> to vector<1x2x128xf32>
    tpu.vector_store %arg6[%215, %c0_134, %c0_135], %218 {strides = array<i32>} : memref<16x2x128xf32, #tpu.memory_space<vmem>>, vector<1x2x128xf32>,
    %c8_i32_136 = arith.constant 8 : i32
    %cst_137 = arith.constant dense<0.000000e+00> : vector<2x128xf32>
    %219 = tpu.matmul %214, %1, %cst_137 {dimension_numbers = #tpu.dot_dimension_numbers<[1], [0], [0], [1], [0, 0, 1, 1], [], []>} : vector<2x128xf32>, vector<128x128xf32>, vector<2x128xf32> -> vector<2x128xf32>
    %220 = arith.addf %219, %4 : vector<2x128xf32>
    %cst_138 = arith.constant 0.000000e+00 : f32
    %221 = vector.broadcast %cst_138 : f32 to vector<2x128xf32>
    %222 = arith.maximumf %220, %221 : vector<2x128xf32>
    %223 = arith.index_cast %c8_i32_136 : i32 to index
    %c0_139 = arith.constant 0 : index
    %c0_140 = arith.constant 0 : index
    %224 = vector.load %arg6[%223, %c0_139, %c0_140] : memref<16x2x128xf32, #tpu.memory_space<vmem>>, vector<1x2x128xf32>
    %225 = vector.shape_cast %224 : vector<1x2x128xf32> to vector<2x128xf32>
    %226 = arith.addf %222, %225 : vector<2x128xf32>
    %227 = arith.index_cast %c8_i32_136 : i32 to index
    %c0_141 = arith.constant 0 : index
    %c0_142 = arith.constant 0 : index
    %228 = vector.load %arg6[%227, %c0_141, %c0_142] : memref<16x2x128xf32, #tpu.memory_space<vmem>>, vector<1x2x128xf32>
    %229 = vector.shape_cast %228 : vector<1x2x128xf32> to vector<2x128xf32>
    %230 = vector.shape_cast %226 : vector<2x128xf32> to vector<1x2x128xf32>
    tpu.vector_store %arg6[%227, %c0_141, %c0_142], %230 {strides = array<i32>} : memref<16x2x128xf32, #tpu.memory_space<vmem>>, vector<1x2x128xf32>,
    %c9_i32_143 = arith.constant 9 : i32
    %cst_144 = arith.constant dense<0.000000e+00> : vector<2x128xf32>
    %231 = tpu.matmul %226, %1, %cst_144 {dimension_numbers = #tpu.dot_dimension_numbers<[1], [0], [0], [1], [0, 0, 1, 1], [], []>} : vector<2x128xf32>, vector<128x128xf32>, vector<2x128xf32> -> vector<2x128xf32>
    %232 = arith.addf %231, %4 : vector<2x128xf32>
    %cst_145 = arith.constant 0.000000e+00 : f32
    %233 = vector.broadcast %cst_145 : f32 to vector<2x128xf32>
    %234 = arith.maximumf %232, %233 : vector<2x128xf32>
    %235 = arith.index_cast %c9_i32_143 : i32 to index
    %c0_146 = arith.constant 0 : index
    %c0_147 = arith.constant 0 : index
    %236 = vector.load %arg6[%235, %c0_146, %c0_147] : memref<16x2x128xf32, #tpu.memory_space<vmem>>, vector<1x2x128xf32>
    %237 = vector.shape_cast %236 : vector<1x2x128xf32> to vector<2x128xf32>
    %238 = arith.addf %234, %237 : vector<2x128xf32>
    %239 = arith.index_cast %c9_i32_143 : i32 to index
    %c0_148 = arith.constant 0 : index
    %c0_149 = arith.constant 0 : index
    %240 = vector.load %arg6[%239, %c0_148, %c0_149] : memref<16x2x128xf32, #tpu.memory_space<vmem>>, vector<1x2x128xf32>
    %241 = vector.shape_cast %240 : vector<1x2x128xf32> to vector<2x128xf32>
    %242 = vector.shape_cast %238 : vector<2x128xf32> to vector<1x2x128xf32>
    tpu.vector_store %arg6[%239, %c0_148, %c0_149], %242 {strides = array<i32>} : memref<16x2x128xf32, #tpu.memory_space<vmem>>, vector<1x2x128xf32>,
    %c10_i32_150 = arith.constant 10 : i32
    %cst_151 = arith.constant dense<0.000000e+00> : vector<2x128xf32>
    %243 = tpu.matmul %238, %1, %cst_151 {dimension_numbers = #tpu.dot_dimension_numbers<[1], [0], [0], [1], [0, 0, 1, 1], [], []>} : vector<2x128xf32>, vector<128x128xf32>, vector<2x128xf32> -> vector<2x128xf32>
    %244 = arith.addf %243, %4 : vector<2x128xf32>
    %cst_152 = arith.constant 0.000000e+00 : f32
    %245 = vector.broadcast %cst_152 : f32 to vector<2x128xf32>
    %246 = arith.maximumf %244, %245 : vector<2x128xf32>
    %247 = arith.index_cast %c10_i32_150 : i32 to index
    %c0_153 = arith.constant 0 : index
    %c0_154 = arith.constant 0 : index
    %248 = vector.load %arg6[%247, %c0_153, %c0_154] : memref<16x2x128xf32, #tpu.memory_space<vmem>>, vector<1x2x128xf32>
    %249 = vector.shape_cast %248 : vector<1x2x128xf32> to vector<2x128xf32>
    %250 = arith.addf %246, %249 : vector<2x128xf32>
    %251 = arith.index_cast %c10_i32_150 : i32 to index
    %c0_155 = arith.constant 0 : index
    %c0_156 = arith.constant 0 : index
    %252 = vector.load %arg6[%251, %c0_155, %c0_156] : memref<16x2x128xf32, #tpu.memory_space<vmem>>, vector<1x2x128xf32>
    %253 = vector.shape_cast %252 : vector<1x2x128xf32> to vector<2x128xf32>
    %254 = vector.shape_cast %250 : vector<2x128xf32> to vector<1x2x128xf32>
    tpu.vector_store %arg6[%251, %c0_155, %c0_156], %254 {strides = array<i32>} : memref<16x2x128xf32, #tpu.memory_space<vmem>>, vector<1x2x128xf32>,
    %c11_i32_157 = arith.constant 11 : i32
    %cst_158 = arith.constant dense<0.000000e+00> : vector<2x128xf32>
    %255 = tpu.matmul %250, %1, %cst_158 {dimension_numbers = #tpu.dot_dimension_numbers<[1], [0], [0], [1], [0, 0, 1, 1], [], []>} : vector<2x128xf32>, vector<128x128xf32>, vector<2x128xf32> -> vector<2x128xf32>
    %256 = arith.addf %255, %4 : vector<2x128xf32>
    %cst_159 = arith.constant 0.000000e+00 : f32
    %257 = vector.broadcast %cst_159 : f32 to vector<2x128xf32>
    %258 = arith.maximumf %256, %257 : vector<2x128xf32>
    %259 = arith.index_cast %c11_i32_157 : i32 to index
    %c0_160 = arith.constant 0 : index
    %c0_161 = arith.constant 0 : index
    %260 = vector.load %arg6[%259, %c0_160, %c0_161] : memref<16x2x128xf32, #tpu.memory_space<vmem>>, vector<1x2x128xf32>
    %261 = vector.shape_cast %260 : vector<1x2x128xf32> to vector<2x128xf32>
    %262 = arith.addf %258, %261 : vector<2x128xf32>
    %263 = arith.index_cast %c11_i32_157 : i32 to index
    %c0_162 = arith.constant 0 : index
    %c0_163 = arith.constant 0 : index
    %264 = vector.load %arg6[%263, %c0_162, %c0_163] : memref<16x2x128xf32, #tpu.memory_space<vmem>>, vector<1x2x128xf32>
    %265 = vector.shape_cast %264 : vector<1x2x128xf32> to vector<2x128xf32>
    %266 = vector.shape_cast %262 : vector<2x128xf32> to vector<1x2x128xf32>
    tpu.vector_store %arg6[%263, %c0_162, %c0_163], %266 {strides = array<i32>} : memref<16x2x128xf32, #tpu.memory_space<vmem>>, vector<1x2x128xf32>,
    %c12_i32_164 = arith.constant 12 : i32
    %cst_165 = arith.constant dense<0.000000e+00> : vector<2x128xf32>
    %267 = tpu.matmul %262, %1, %cst_165 {dimension_numbers = #tpu.dot_dimension_numbers<[1], [0], [0], [1], [0, 0, 1, 1], [], []>} : vector<2x128xf32>, vector<128x128xf32>, vector<2x128xf32> -> vector<2x128xf32>
    %268 = arith.addf %267, %4 : vector<2x128xf32>
    %cst_166 = arith.constant 0.000000e+00 : f32
    %269 = vector.broadcast %cst_166 : f32 to vector<2x128xf32>
    %270 = arith.maximumf %268, %269 : vector<2x128xf32>
    %271 = arith.index_cast %c12_i32_164 : i32 to index
    %c0_167 = arith.constant 0 : index
    %c0_168 = arith.constant 0 : index
    %272 = vector.load %arg6[%271, %c0_167, %c0_168] : memref<16x2x128xf32, #tpu.memory_space<vmem>>, vector<1x2x128xf32>
    %273 = vector.shape_cast %272 : vector<1x2x128xf32> to vector<2x128xf32>
    %274 = arith.addf %270, %273 : vector<2x128xf32>
    %275 = arith.index_cast %c12_i32_164 : i32 to index
    %c0_169 = arith.constant 0 : index
    %c0_170 = arith.constant 0 : index
    %276 = vector.load %arg6[%275, %c0_169, %c0_170] : memref<16x2x128xf32, #tpu.memory_space<vmem>>, vector<1x2x128xf32>
    %277 = vector.shape_cast %276 : vector<1x2x128xf32> to vector<2x128xf32>
    %278 = vector.shape_cast %274 : vector<2x128xf32> to vector<1x2x128xf32>
    tpu.vector_store %arg6[%275, %c0_169, %c0_170], %278 {strides = array<i32>} : memref<16x2x128xf32, #tpu.memory_space<vmem>>, vector<1x2x128xf32>,
    %c13_i32_171 = arith.constant 13 : i32
    %cst_172 = arith.constant dense<0.000000e+00> : vector<2x128xf32>
    %279 = tpu.matmul %274, %1, %cst_172 {dimension_numbers = #tpu.dot_dimension_numbers<[1], [0], [0], [1], [0, 0, 1, 1], [], []>} : vector<2x128xf32>, vector<128x128xf32>, vector<2x128xf32> -> vector<2x128xf32>
    %280 = arith.addf %279, %4 : vector<2x128xf32>
    %cst_173 = arith.constant 0.000000e+00 : f32
    %281 = vector.broadcast %cst_173 : f32 to vector<2x128xf32>
    %282 = arith.maximumf %280, %281 : vector<2x128xf32>
    %283 = arith.index_cast %c13_i32_171 : i32 to index
    %c0_174 = arith.constant 0 : index
    %c0_175 = arith.constant 0 : index
    %284 = vector.load %arg6[%283, %c0_174, %c0_175] : memref<16x2x128xf32, #tpu.memory_space<vmem>>, vector<1x2x128xf32>
    %285 = vector.shape_cast %284 : vector<1x2x128xf32> to vector<2x128xf32>
    %286 = arith.addf %282, %285 : vector<2x128xf32>
    %287 = arith.index_cast %c13_i32_171 : i32 to index
    %c0_176 = arith.constant 0 : index
    %c0_177 = arith.constant 0 : index
    %288 = vector.load %arg6[%287, %c0_176, %c0_177] : memref<16x2x128xf32, #tpu.memory_space<vmem>>, vector<1x2x128xf32>
    %289 = vector.shape_cast %288 : vector<1x2x128xf32> to vector<2x128xf32>
    %290 = vector.shape_cast %286 : vector<2x128xf32> to vector<1x2x128xf32>
    tpu.vector_store %arg6[%287, %c0_176, %c0_177], %290 {strides = array<i32>} : memref<16x2x128xf32, #tpu.memory_space<vmem>>, vector<1x2x128xf32>,
    %c14_i32_178 = arith.constant 14 : i32
    %cst_179 = arith.constant dense<0.000000e+00> : vector<2x128xf32>
    %291 = tpu.matmul %286, %1, %cst_179 {dimension_numbers = #tpu.dot_dimension_numbers<[1], [0], [0], [1], [0, 0, 1, 1], [], []>} : vector<2x128xf32>, vector<128x128xf32>, vector<2x128xf32> -> vector<2x128xf32>
    %292 = arith.addf %291, %4 : vector<2x128xf32>
    %cst_180 = arith.constant 0.000000e+00 : f32
    %293 = vector.broadcast %cst_180 : f32 to vector<2x128xf32>
    %294 = arith.maximumf %292, %293 : vector<2x128xf32>
    %295 = arith.index_cast %c14_i32_178 : i32 to index
    %c0_181 = arith.constant 0 : index
    %c0_182 = arith.constant 0 : index
    %296 = vector.load %arg6[%295, %c0_181, %c0_182] : memref<16x2x128xf32, #tpu.memory_space<vmem>>, vector<1x2x128xf32>
    %297 = vector.shape_cast %296 : vector<1x2x128xf32> to vector<2x128xf32>
    %298 = arith.addf %294, %297 : vector<2x128xf32>
    %299 = arith.index_cast %c14_i32_178 : i32 to index
    %c0_183 = arith.constant 0 : index
    %c0_184 = arith.constant 0 : index
    %300 = vector.load %arg6[%299, %c0_183, %c0_184] : memref<16x2x128xf32, #tpu.memory_space<vmem>>, vector<1x2x128xf32>
    %301 = vector.shape_cast %300 : vector<1x2x128xf32> to vector<2x128xf32>
    %302 = vector.shape_cast %298 : vector<2x128xf32> to vector<1x2x128xf32>
    tpu.vector_store %arg6[%299, %c0_183, %c0_184], %302 {strides = array<i32>} : memref<16x2x128xf32, #tpu.memory_space<vmem>>, vector<1x2x128xf32>,
    %c15_i32_185 = arith.constant 15 : i32
    %cst_186 = arith.constant dense<0.000000e+00> : vector<2x128xf32>
    %303 = tpu.matmul %298, %1, %cst_186 {dimension_numbers = #tpu.dot_dimension_numbers<[1], [0], [0], [1], [0, 0, 1, 1], [], []>} : vector<2x128xf32>, vector<128x128xf32>, vector<2x128xf32> -> vector<2x128xf32>
    %304 = arith.addf %303, %4 : vector<2x128xf32>
    %cst_187 = arith.constant 0.000000e+00 : f32
    %305 = vector.broadcast %cst_187 : f32 to vector<2x128xf32>
    %306 = arith.maximumf %304, %305 : vector<2x128xf32>
    %307 = arith.index_cast %c15_i32_185 : i32 to index
    %c0_188 = arith.constant 0 : index
    %c0_189 = arith.constant 0 : index
    %308 = vector.load %arg6[%307, %c0_188, %c0_189] : memref<16x2x128xf32, #tpu.memory_space<vmem>>, vector<1x2x128xf32>
    %309 = vector.shape_cast %308 : vector<1x2x128xf32> to vector<2x128xf32>
    %310 = arith.addf %306, %309 : vector<2x128xf32>
    %311 = arith.index_cast %c15_i32_185 : i32 to index
    %c0_190 = arith.constant 0 : index
    %c0_191 = arith.constant 0 : index
    %312 = vector.load %arg6[%311, %c0_190, %c0_191] : memref<16x2x128xf32, #tpu.memory_space<vmem>>, vector<1x2x128xf32>
    %313 = vector.shape_cast %312 : vector<1x2x128xf32> to vector<2x128xf32>
    %314 = vector.shape_cast %310 : vector<2x128xf32> to vector<1x2x128xf32>
    tpu.vector_store %arg6[%311, %c0_190, %c0_191], %314 {strides = array<i32>} : memref<16x2x128xf32, #tpu.memory_space<vmem>>, vector<1x2x128xf32>,
    %c15_i32_192 = arith.constant 15 : i32
    %315 = arith.truncf %310 : vector<2x128xf32> to vector<2x128xbf16>
    %c15 = arith.constant 15 : index
    %c0_193 = arith.constant 0 : index
    %c0_194 = arith.constant 0 : index
    %316 = vector.load %arg5[%c15, %c0_193, %c0_194] : memref<16x2x128xbf16, #tpu.memory_space<vmem>>, vector<1x2x128xbf16>
    %317 = vector.shape_cast %316 : vector<1x2x128xbf16> to vector<2x128xbf16>
    %318 = vector.shape_cast %315 : vector<2x128xbf16> to vector<1x2x128xbf16>
    tpu.vector_store %arg5[%c15, %c0_193, %c0_194], %318 {strides = array<i32>} : memref<16x2x128xbf16, #tpu.memory_space<vmem>>, vector<1x2x128xbf16>,
    %c0_i32_195 = arith.constant 0 : i32
    %c14_i32_196 = arith.constant 14 : i32
    %319 = arith.subi %c14_i32_196, %c0_i32_195 : i32
    %cst_197 = arith.constant dense<0.000000e+00> : vector<2x128xf32>
    %320 = tpu.matmul %310, %1, %cst_197 {dimension_numbers = #tpu.dot_dimension_numbers<[1], [0], [0], [1], [0, 0, 1, 1], [], []>} : vector<2x128xf32>, vector<128x128xf32>, vector<2x128xf32> -> vector<2x128xf32>
    %321 = arith.addf %320, %4 : vector<2x128xf32>
    %cst_198 = arith.constant 0.000000e+00 : f32
    %322 = vector.broadcast %cst_198 : f32 to vector<2x128xf32>
    %323 = arith.maximumf %321, %322 : vector<2x128xf32>
    %324 = arith.index_cast %319 : i32 to index
    %c0_199 = arith.constant 0 : index
    %c0_200 = arith.constant 0 : index
    %325 = vector.load %arg6[%324, %c0_199, %c0_200] : memref<16x2x128xf32, #tpu.memory_space<vmem>>, vector<1x2x128xf32>
    %326 = vector.shape_cast %325 : vector<1x2x128xf32> to vector<2x128xf32>
    %327 = arith.addf %323, %326 : vector<2x128xf32>
    %328 = arith.truncf %327 : vector<2x128xf32> to vector<2x128xbf16>
    %329 = arith.index_cast %319 : i32 to index
    %c0_201 = arith.constant 0 : index
    %c0_202 = arith.constant 0 : index
    %330 = vector.load %arg5[%329, %c0_201, %c0_202] : memref<16x2x128xbf16, #tpu.memory_space<vmem>>, vector<1x2x128xbf16>
    %331 = vector.shape_cast %330 : vector<1x2x128xbf16> to vector<2x128xbf16>
    %332 = vector.shape_cast %328 : vector<2x128xbf16> to vector<1x2x128xbf16>
    tpu.vector_store %arg5[%329, %c0_201, %c0_202], %332 {strides = array<i32>} : memref<16x2x128xbf16, #tpu.memory_space<vmem>>, vector<1x2x128xbf16>,
    %c1_i32_203 = arith.constant 1 : i32
    %c14_i32_204 = arith.constant 14 : i32
    %333 = arith.subi %c14_i32_204, %c1_i32_203 : i32
    %cst_205 = arith.constant dense<0.000000e+00> : vector<2x128xf32>
    %334 = tpu.matmul %327, %1, %cst_205 {dimension_numbers = #tpu.dot_dimension_numbers<[1], [0], [0], [1], [0, 0, 1, 1], [], []>} : vector<2x128xf32>, vector<128x128xf32>, vector<2x128xf32> -> vector<2x128xf32>
    %335 = arith.addf %334, %4 : vector<2x128xf32>
    %cst_206 = arith.constant 0.000000e+00 : f32
    %336 = vector.broadcast %cst_206 : f32 to vector<2x128xf32>
    %337 = arith.maximumf %335, %336 : vector<2x128xf32>
    %338 = arith.index_cast %333 : i32 to index
    %c0_207 = arith.constant 0 : index
    %c0_208 = arith.constant 0 : index
    %339 = vector.load %arg6[%338, %c0_207, %c0_208] : memref<16x2x128xf32, #tpu.memory_space<vmem>>, vector<1x2x128xf32>
    %340 = vector.shape_cast %339 : vector<1x2x128xf32> to vector<2x128xf32>
    %341 = arith.addf %337, %340 : vector<2x128xf32>
    %342 = arith.truncf %341 : vector<2x128xf32> to vector<2x128xbf16>
    %343 = arith.index_cast %333 : i32 to index
    %c0_209 = arith.constant 0 : index
    %c0_210 = arith.constant 0 : index
    %344 = vector.load %arg5[%343, %c0_209, %c0_210] : memref<16x2x128xbf16, #tpu.memory_space<vmem>>, vector<1x2x128xbf16>
    %345 = vector.shape_cast %344 : vector<1x2x128xbf16> to vector<2x128xbf16>
    %346 = vector.shape_cast %342 : vector<2x128xbf16> to vector<1x2x128xbf16>
    tpu.vector_store %arg5[%343, %c0_209, %c0_210], %346 {strides = array<i32>} : memref<16x2x128xbf16, #tpu.memory_space<vmem>>, vector<1x2x128xbf16>,
    %c2_i32_211 = arith.constant 2 : i32
    %c14_i32_212 = arith.constant 14 : i32
    %347 = arith.subi %c14_i32_212, %c2_i32_211 : i32
    %cst_213 = arith.constant dense<0.000000e+00> : vector<2x128xf32>
    %348 = tpu.matmul %341, %1, %cst_213 {dimension_numbers = #tpu.dot_dimension_numbers<[1], [0], [0], [1], [0, 0, 1, 1], [], []>} : vector<2x128xf32>, vector<128x128xf32>, vector<2x128xf32> -> vector<2x128xf32>
    %349 = arith.addf %348, %4 : vector<2x128xf32>
    %cst_214 = arith.constant 0.000000e+00 : f32
    %350 = vector.broadcast %cst_214 : f32 to vector<2x128xf32>
    %351 = arith.maximumf %349, %350 : vector<2x128xf32>
    %352 = arith.index_cast %347 : i32 to index
    %c0_215 = arith.constant 0 : index
    %c0_216 = arith.constant 0 : index
    %353 = vector.load %arg6[%352, %c0_215, %c0_216] : memref<16x2x128xf32, #tpu.memory_space<vmem>>, vector<1x2x128xf32>
    %354 = vector.shape_cast %353 : vector<1x2x128xf32> to vector<2x128xf32>
    %355 = arith.addf %351, %354 : vector<2x128xf32>
    %356 = arith.truncf %355 : vector<2x128xf32> to vector<2x128xbf16>
    %357 = arith.index_cast %347 : i32 to index
    %c0_217 = arith.constant 0 : index
    %c0_218 = arith.constant 0 : index
    %358 = vector.load %arg5[%357, %c0_217, %c0_218] : memref<16x2x128xbf16, #tpu.memory_space<vmem>>, vector<1x2x128xbf16>
    %359 = vector.shape_cast %358 : vector<1x2x128xbf16> to vector<2x128xbf16>
    %360 = vector.shape_cast %356 : vector<2x128xbf16> to vector<1x2x128xbf16>
    tpu.vector_store %arg5[%357, %c0_217, %c0_218], %360 {strides = array<i32>} : memref<16x2x128xbf16, #tpu.memory_space<vmem>>, vector<1x2x128xbf16>,
    %c3_i32_219 = arith.constant 3 : i32
    %c14_i32_220 = arith.constant 14 : i32
    %361 = arith.subi %c14_i32_220, %c3_i32_219 : i32
    %cst_221 = arith.constant dense<0.000000e+00> : vector<2x128xf32>
    %362 = tpu.matmul %355, %1, %cst_221 {dimension_numbers = #tpu.dot_dimension_numbers<[1], [0], [0], [1], [0, 0, 1, 1], [], []>} : vector<2x128xf32>, vector<128x128xf32>, vector<2x128xf32> -> vector<2x128xf32>
    %363 = arith.addf %362, %4 : vector<2x128xf32>
    %cst_222 = arith.constant 0.000000e+00 : f32
    %364 = vector.broadcast %cst_222 : f32 to vector<2x128xf32>
    %365 = arith.maximumf %363, %364 : vector<2x128xf32>
    %366 = arith.index_cast %361 : i32 to index
    %c0_223 = arith.constant 0 : index
    %c0_224 = arith.constant 0 : index
    %367 = vector.load %arg6[%366, %c0_223, %c0_224] : memref<16x2x128xf32, #tpu.memory_space<vmem>>, vector<1x2x128xf32>
    %368 = vector.shape_cast %367 : vector<1x2x128xf32> to vector<2x128xf32>
    %369 = arith.addf %365, %368 : vector<2x128xf32>
    %370 = arith.truncf %369 : vector<2x128xf32> to vector<2x128xbf16>
    %371 = arith.index_cast %361 : i32 to index
    %c0_225 = arith.constant 0 : index
    %c0_226 = arith.constant 0 : index
    %372 = vector.load %arg5[%371, %c0_225, %c0_226] : memref<16x2x128xbf16, #tpu.memory_space<vmem>>, vector<1x2x128xbf16>
    %373 = vector.shape_cast %372 : vector<1x2x128xbf16> to vector<2x128xbf16>
    %374 = vector.shape_cast %370 : vector<2x128xbf16> to vector<1x2x128xbf16>
    tpu.vector_store %arg5[%371, %c0_225, %c0_226], %374 {strides = array<i32>} : memref<16x2x128xbf16, #tpu.memory_space<vmem>>, vector<1x2x128xbf16>,
    %c4_i32_227 = arith.constant 4 : i32
    %c14_i32_228 = arith.constant 14 : i32
    %375 = arith.subi %c14_i32_228, %c4_i32_227 : i32
    %cst_229 = arith.constant dense<0.000000e+00> : vector<2x128xf32>
    %376 = tpu.matmul %369, %1, %cst_229 {dimension_numbers = #tpu.dot_dimension_numbers<[1], [0], [0], [1], [0, 0, 1, 1], [], []>} : vector<2x128xf32>, vector<128x128xf32>, vector<2x128xf32> -> vector<2x128xf32>
    %377 = arith.addf %376, %4 : vector<2x128xf32>
    %cst_230 = arith.constant 0.000000e+00 : f32
    %378 = vector.broadcast %cst_230 : f32 to vector<2x128xf32>
    %379 = arith.maximumf %377, %378 : vector<2x128xf32>
    %380 = arith.index_cast %375 : i32 to index
    %c0_231 = arith.constant 0 : index
    %c0_232 = arith.constant 0 : index
    %381 = vector.load %arg6[%380, %c0_231, %c0_232] : memref<16x2x128xf32, #tpu.memory_space<vmem>>, vector<1x2x128xf32>
    %382 = vector.shape_cast %381 : vector<1x2x128xf32> to vector<2x128xf32>
    %383 = arith.addf %379, %382 : vector<2x128xf32>
    %384 = arith.truncf %383 : vector<2x128xf32> to vector<2x128xbf16>
    %385 = arith.index_cast %375 : i32 to index
    %c0_233 = arith.constant 0 : index
    %c0_234 = arith.constant 0 : index
    %386 = vector.load %arg5[%385, %c0_233, %c0_234] : memref<16x2x128xbf16, #tpu.memory_space<vmem>>, vector<1x2x128xbf16>
    %387 = vector.shape_cast %386 : vector<1x2x128xbf16> to vector<2x128xbf16>
    %388 = vector.shape_cast %384 : vector<2x128xbf16> to vector<1x2x128xbf16>
    tpu.vector_store %arg5[%385, %c0_233, %c0_234], %388 {strides = array<i32>} : memref<16x2x128xbf16, #tpu.memory_space<vmem>>, vector<1x2x128xbf16>,
    %c5_i32_235 = arith.constant 5 : i32
    %c14_i32_236 = arith.constant 14 : i32
    %389 = arith.subi %c14_i32_236, %c5_i32_235 : i32
    %cst_237 = arith.constant dense<0.000000e+00> : vector<2x128xf32>
    %390 = tpu.matmul %383, %1, %cst_237 {dimension_numbers = #tpu.dot_dimension_numbers<[1], [0], [0], [1], [0, 0, 1, 1], [], []>} : vector<2x128xf32>, vector<128x128xf32>, vector<2x128xf32> -> vector<2x128xf32>
    %391 = arith.addf %390, %4 : vector<2x128xf32>
    %cst_238 = arith.constant 0.000000e+00 : f32
    %392 = vector.broadcast %cst_238 : f32 to vector<2x128xf32>
    %393 = arith.maximumf %391, %392 : vector<2x128xf32>
    %394 = arith.index_cast %389 : i32 to index
    %c0_239 = arith.constant 0 : index
    %c0_240 = arith.constant 0 : index
    %395 = vector.load %arg6[%394, %c0_239, %c0_240] : memref<16x2x128xf32, #tpu.memory_space<vmem>>, vector<1x2x128xf32>
    %396 = vector.shape_cast %395 : vector<1x2x128xf32> to vector<2x128xf32>
    %397 = arith.addf %393, %396 : vector<2x128xf32>
    %398 = arith.truncf %397 : vector<2x128xf32> to vector<2x128xbf16>
    %399 = arith.index_cast %389 : i32 to index
    %c0_241 = arith.constant 0 : index
    %c0_242 = arith.constant 0 : index
    %400 = vector.load %arg5[%399, %c0_241, %c0_242] : memref<16x2x128xbf16, #tpu.memory_space<vmem>>, vector<1x2x128xbf16>
    %401 = vector.shape_cast %400 : vector<1x2x128xbf16> to vector<2x128xbf16>
    %402 = vector.shape_cast %398 : vector<2x128xbf16> to vector<1x2x128xbf16>
    tpu.vector_store %arg5[%399, %c0_241, %c0_242], %402 {strides = array<i32>} : memref<16x2x128xbf16, #tpu.memory_space<vmem>>, vector<1x2x128xbf16>,
    %c6_i32_243 = arith.constant 6 : i32
    %c14_i32_244 = arith.constant 14 : i32
    %403 = arith.subi %c14_i32_244, %c6_i32_243 : i32
    %cst_245 = arith.constant dense<0.000000e+00> : vector<2x128xf32>
    %404 = tpu.matmul %397, %1, %cst_245 {dimension_numbers = #tpu.dot_dimension_numbers<[1], [0], [0], [1], [0, 0, 1, 1], [], []>} : vector<2x128xf32>, vector<128x128xf32>, vector<2x128xf32> -> vector<2x128xf32>
    %405 = arith.addf %404, %4 : vector<2x128xf32>
    %cst_246 = arith.constant 0.000000e+00 : f32
    %406 = vector.broadcast %cst_246 : f32 to vector<2x128xf32>
    %407 = arith.maximumf %405, %406 : vector<2x128xf32>
    %408 = arith.index_cast %403 : i32 to index
    %c0_247 = arith.constant 0 : index
    %c0_248 = arith.constant 0 : index
    %409 = vector.load %arg6[%408, %c0_247, %c0_248] : memref<16x2x128xf32, #tpu.memory_space<vmem>>, vector<1x2x128xf32>
    %410 = vector.shape_cast %409 : vector<1x2x128xf32> to vector<2x128xf32>
    %411 = arith.addf %407, %410 : vector<2x128xf32>
    %412 = arith.truncf %411 : vector<2x128xf32> to vector<2x128xbf16>
    %413 = arith.index_cast %403 : i32 to index
    %c0_249 = arith.constant 0 : index
    %c0_250 = arith.constant 0 : index
    %414 = vector.load %arg5[%413, %c0_249, %c0_250] : memref<16x2x128xbf16, #tpu.memory_space<vmem>>, vector<1x2x128xbf16>
    %415 = vector.shape_cast %414 : vector<1x2x128xbf16> to vector<2x128xbf16>
    %416 = vector.shape_cast %412 : vector<2x128xbf16> to vector<1x2x128xbf16>
    tpu.vector_store %arg5[%413, %c0_249, %c0_250], %416 {strides = array<i32>} : memref<16x2x128xbf16, #tpu.memory_space<vmem>>, vector<1x2x128xbf16>,
    %c7_i32_251 = arith.constant 7 : i32
    %c14_i32_252 = arith.constant 14 : i32
    %417 = arith.subi %c14_i32_252, %c7_i32_251 : i32
    %cst_253 = arith.constant dense<0.000000e+00> : vector<2x128xf32>
    %418 = tpu.matmul %411, %1, %cst_253 {dimension_numbers = #tpu.dot_dimension_numbers<[1], [0], [0], [1], [0, 0, 1, 1], [], []>} : vector<2x128xf32>, vector<128x128xf32>, vector<2x128xf32> -> vector<2x128xf32>
    %419 = arith.addf %418, %4 : vector<2x128xf32>
    %cst_254 = arith.constant 0.000000e+00 : f32
    %420 = vector.broadcast %cst_254 : f32 to vector<2x128xf32>
    %421 = arith.maximumf %419, %420 : vector<2x128xf32>
    %422 = arith.index_cast %417 : i32 to index
    %c0_255 = arith.constant 0 : index
    %c0_256 = arith.constant 0 : index
    %423 = vector.load %arg6[%422, %c0_255, %c0_256] : memref<16x2x128xf32, #tpu.memory_space<vmem>>, vector<1x2x128xf32>
    %424 = vector.shape_cast %423 : vector<1x2x128xf32> to vector<2x128xf32>
    %425 = arith.addf %421, %424 : vector<2x128xf32>
    %426 = arith.truncf %425 : vector<2x128xf32> to vector<2x128xbf16>
    %427 = arith.index_cast %417 : i32 to index
    %c0_257 = arith.constant 0 : index
    %c0_258 = arith.constant 0 : index
    %428 = vector.load %arg5[%427, %c0_257, %c0_258] : memref<16x2x128xbf16, #tpu.memory_space<vmem>>, vector<1x2x128xbf16>
    %429 = vector.shape_cast %428 : vector<1x2x128xbf16> to vector<2x128xbf16>
    %430 = vector.shape_cast %426 : vector<2x128xbf16> to vector<1x2x128xbf16>
    tpu.vector_store %arg5[%427, %c0_257, %c0_258], %430 {strides = array<i32>} : memref<16x2x128xbf16, #tpu.memory_space<vmem>>, vector<1x2x128xbf16>,
    %c8_i32_259 = arith.constant 8 : i32
    %c14_i32_260 = arith.constant 14 : i32
    %431 = arith.subi %c14_i32_260, %c8_i32_259 : i32
    %cst_261 = arith.constant dense<0.000000e+00> : vector<2x128xf32>
    %432 = tpu.matmul %425, %1, %cst_261 {dimension_numbers = #tpu.dot_dimension_numbers<[1], [0], [0], [1], [0, 0, 1, 1], [], []>} : vector<2x128xf32>, vector<128x128xf32>, vector<2x128xf32> -> vector<2x128xf32>
    %433 = arith.addf %432, %4 : vector<2x128xf32>
    %cst_262 = arith.constant 0.000000e+00 : f32
    %434 = vector.broadcast %cst_262 : f32 to vector<2x128xf32>
    %435 = arith.maximumf %433, %434 : vector<2x128xf32>
    %436 = arith.index_cast %431 : i32 to index
    %c0_263 = arith.constant 0 : index
    %c0_264 = arith.constant 0 : index
    %437 = vector.load %arg6[%436, %c0_263, %c0_264] : memref<16x2x128xf32, #tpu.memory_space<vmem>>, vector<1x2x128xf32>
    %438 = vector.shape_cast %437 : vector<1x2x128xf32> to vector<2x128xf32>
    %439 = arith.addf %435, %438 : vector<2x128xf32>
    %440 = arith.truncf %439 : vector<2x128xf32> to vector<2x128xbf16>
    %441 = arith.index_cast %431 : i32 to index
    %c0_265 = arith.constant 0 : index
    %c0_266 = arith.constant 0 : index
    %442 = vector.load %arg5[%441, %c0_265, %c0_266] : memref<16x2x128xbf16, #tpu.memory_space<vmem>>, vector<1x2x128xbf16>
    %443 = vector.shape_cast %442 : vector<1x2x128xbf16> to vector<2x128xbf16>
    %444 = vector.shape_cast %440 : vector<2x128xbf16> to vector<1x2x128xbf16>
    tpu.vector_store %arg5[%441, %c0_265, %c0_266], %444 {strides = array<i32>} : memref<16x2x128xbf16, #tpu.memory_space<vmem>>, vector<1x2x128xbf16>,
    %c9_i32_267 = arith.constant 9 : i32
    %c14_i32_268 = arith.constant 14 : i32
    %445 = arith.subi %c14_i32_268, %c9_i32_267 : i32
    %cst_269 = arith.constant dense<0.000000e+00> : vector<2x128xf32>
    %446 = tpu.matmul %439, %1, %cst_269 {dimension_numbers = #tpu.dot_dimension_numbers<[1], [0], [0], [1], [0, 0, 1, 1], [], []>} : vector<2x128xf32>, vector<128x128xf32>, vector<2x128xf32> -> vector<2x128xf32>
    %447 = arith.addf %446, %4 : vector<2x128xf32>
    %cst_270 = arith.constant 0.000000e+00 : f32
    %448 = vector.broadcast %cst_270 : f32 to vector<2x128xf32>
    %449 = arith.maximumf %447, %448 : vector<2x128xf32>
    %450 = arith.index_cast %445 : i32 to index
    %c0_271 = arith.constant 0 : index
    %c0_272 = arith.constant 0 : index
    %451 = vector.load %arg6[%450, %c0_271, %c0_272] : memref<16x2x128xf32, #tpu.memory_space<vmem>>, vector<1x2x128xf32>
    %452 = vector.shape_cast %451 : vector<1x2x128xf32> to vector<2x128xf32>
    %453 = arith.addf %449, %452 : vector<2x128xf32>
    %454 = arith.truncf %453 : vector<2x128xf32> to vector<2x128xbf16>
    %455 = arith.index_cast %445 : i32 to index
    %c0_273 = arith.constant 0 : index
    %c0_274 = arith.constant 0 : index
    %456 = vector.load %arg5[%455, %c0_273, %c0_274] : memref<16x2x128xbf16, #tpu.memory_space<vmem>>, vector<1x2x128xbf16>
    %457 = vector.shape_cast %456 : vector<1x2x128xbf16> to vector<2x128xbf16>
    %458 = vector.shape_cast %454 : vector<2x128xbf16> to vector<1x2x128xbf16>
    tpu.vector_store %arg5[%455, %c0_273, %c0_274], %458 {strides = array<i32>} : memref<16x2x128xbf16, #tpu.memory_space<vmem>>, vector<1x2x128xbf16>,
    %c10_i32_275 = arith.constant 10 : i32
    %c14_i32_276 = arith.constant 14 : i32
    %459 = arith.subi %c14_i32_276, %c10_i32_275 : i32
    %cst_277 = arith.constant dense<0.000000e+00> : vector<2x128xf32>
    %460 = tpu.matmul %453, %1, %cst_277 {dimension_numbers = #tpu.dot_dimension_numbers<[1], [0], [0], [1], [0, 0, 1, 1], [], []>} : vector<2x128xf32>, vector<128x128xf32>, vector<2x128xf32> -> vector<2x128xf32>
    %461 = arith.addf %460, %4 : vector<2x128xf32>
    %cst_278 = arith.constant 0.000000e+00 : f32
    %462 = vector.broadcast %cst_278 : f32 to vector<2x128xf32>
    %463 = arith.maximumf %461, %462 : vector<2x128xf32>
    %464 = arith.index_cast %459 : i32 to index
    %c0_279 = arith.constant 0 : index
    %c0_280 = arith.constant 0 : index
    %465 = vector.load %arg6[%464, %c0_279, %c0_280] : memref<16x2x128xf32, #tpu.memory_space<vmem>>, vector<1x2x128xf32>
    %466 = vector.shape_cast %465 : vector<1x2x128xf32> to vector<2x128xf32>
    %467 = arith.addf %463, %466 : vector<2x128xf32>
    %468 = arith.truncf %467 : vector<2x128xf32> to vector<2x128xbf16>
    %469 = arith.index_cast %459 : i32 to index
    %c0_281 = arith.constant 0 : index
    %c0_282 = arith.constant 0 : index
    %470 = vector.load %arg5[%469, %c0_281, %c0_282] : memref<16x2x128xbf16, #tpu.memory_space<vmem>>, vector<1x2x128xbf16>
    %471 = vector.shape_cast %470 : vector<1x2x128xbf16> to vector<2x128xbf16>
    %472 = vector.shape_cast %468 : vector<2x128xbf16> to vector<1x2x128xbf16>
    tpu.vector_store %arg5[%469, %c0_281, %c0_282], %472 {strides = array<i32>} : memref<16x2x128xbf16, #tpu.memory_space<vmem>>, vector<1x2x128xbf16>,
    %c11_i32_283 = arith.constant 11 : i32
    %c14_i32_284 = arith.constant 14 : i32
    %473 = arith.subi %c14_i32_284, %c11_i32_283 : i32
    %cst_285 = arith.constant dense<0.000000e+00> : vector<2x128xf32>
    %474 = tpu.matmul %467, %1, %cst_285 {dimension_numbers = #tpu.dot_dimension_numbers<[1], [0], [0], [1], [0, 0, 1, 1], [], []>} : vector<2x128xf32>, vector<128x128xf32>, vector<2x128xf32> -> vector<2x128xf32>
    %475 = arith.addf %474, %4 : vector<2x128xf32>
    %cst_286 = arith.constant 0.000000e+00 : f32
    %476 = vector.broadcast %cst_286 : f32 to vector<2x128xf32>
    %477 = arith.maximumf %475, %476 : vector<2x128xf32>
    %478 = arith.index_cast %473 : i32 to index
    %c0_287 = arith.constant 0 : index
    %c0_288 = arith.constant 0 : index
    %479 = vector.load %arg6[%478, %c0_287, %c0_288] : memref<16x2x128xf32, #tpu.memory_space<vmem>>, vector<1x2x128xf32>
    %480 = vector.shape_cast %479 : vector<1x2x128xf32> to vector<2x128xf32>
    %481 = arith.addf %477, %480 : vector<2x128xf32>
    %482 = arith.truncf %481 : vector<2x128xf32> to vector<2x128xbf16>
    %483 = arith.index_cast %473 : i32 to index
    %c0_289 = arith.constant 0 : index
    %c0_290 = arith.constant 0 : index
    %484 = vector.load %arg5[%483, %c0_289, %c0_290] : memref<16x2x128xbf16, #tpu.memory_space<vmem>>, vector<1x2x128xbf16>
    %485 = vector.shape_cast %484 : vector<1x2x128xbf16> to vector<2x128xbf16>
    %486 = vector.shape_cast %482 : vector<2x128xbf16> to vector<1x2x128xbf16>
    tpu.vector_store %arg5[%483, %c0_289, %c0_290], %486 {strides = array<i32>} : memref<16x2x128xbf16, #tpu.memory_space<vmem>>, vector<1x2x128xbf16>,
    %c12_i32_291 = arith.constant 12 : i32
    %c14_i32_292 = arith.constant 14 : i32
    %487 = arith.subi %c14_i32_292, %c12_i32_291 : i32
    %cst_293 = arith.constant dense<0.000000e+00> : vector<2x128xf32>
    %488 = tpu.matmul %481, %1, %cst_293 {dimension_numbers = #tpu.dot_dimension_numbers<[1], [0], [0], [1], [0, 0, 1, 1], [], []>} : vector<2x128xf32>, vector<128x128xf32>, vector<2x128xf32> -> vector<2x128xf32>
    %489 = arith.addf %488, %4 : vector<2x128xf32>
    %cst_294 = arith.constant 0.000000e+00 : f32
    %490 = vector.broadcast %cst_294 : f32 to vector<2x128xf32>
    %491 = arith.maximumf %489, %490 : vector<2x128xf32>
    %492 = arith.index_cast %487 : i32 to index
    %c0_295 = arith.constant 0 : index
    %c0_296 = arith.constant 0 : index
    %493 = vector.load %arg6[%492, %c0_295, %c0_296] : memref<16x2x128xf32, #tpu.memory_space<vmem>>, vector<1x2x128xf32>
    %494 = vector.shape_cast %493 : vector<1x2x128xf32> to vector<2x128xf32>
    %495 = arith.addf %491, %494 : vector<2x128xf32>
    %496 = arith.truncf %495 : vector<2x128xf32> to vector<2x128xbf16>
    %497 = arith.index_cast %487 : i32 to index
    %c0_297 = arith.constant 0 : index
    %c0_298 = arith.constant 0 : index
    %498 = vector.load %arg5[%497, %c0_297, %c0_298] : memref<16x2x128xbf16, #tpu.memory_space<vmem>>, vector<1x2x128xbf16>
    %499 = vector.shape_cast %498 : vector<1x2x128xbf16> to vector<2x128xbf16>
    %500 = vector.shape_cast %496 : vector<2x128xbf16> to vector<1x2x128xbf16>
    tpu.vector_store %arg5[%497, %c0_297, %c0_298], %500 {strides = array<i32>} : memref<16x2x128xbf16, #tpu.memory_space<vmem>>, vector<1x2x128xbf16>,
    %c13_i32_299 = arith.constant 13 : i32
    %c14_i32_300 = arith.constant 14 : i32
    %501 = arith.subi %c14_i32_300, %c13_i32_299 : i32
    %cst_301 = arith.constant dense<0.000000e+00> : vector<2x128xf32>
    %502 = tpu.matmul %495, %1, %cst_301 {dimension_numbers = #tpu.dot_dimension_numbers<[1], [0], [0], [1], [0, 0, 1, 1], [], []>} : vector<2x128xf32>, vector<128x128xf32>, vector<2x128xf32> -> vector<2x128xf32>
    %503 = arith.addf %502, %4 : vector<2x128xf32>
    %cst_302 = arith.constant 0.000000e+00 : f32
    %504 = vector.broadcast %cst_302 : f32 to vector<2x128xf32>
    %505 = arith.maximumf %503, %504 : vector<2x128xf32>
    %506 = arith.index_cast %501 : i32 to index
    %c0_303 = arith.constant 0 : index
    %c0_304 = arith.constant 0 : index
    %507 = vector.load %arg6[%506, %c0_303, %c0_304] : memref<16x2x128xf32, #tpu.memory_space<vmem>>, vector<1x2x128xf32>
    %508 = vector.shape_cast %507 : vector<1x2x128xf32> to vector<2x128xf32>
    %509 = arith.addf %505, %508 : vector<2x128xf32>
    %510 = arith.truncf %509 : vector<2x128xf32> to vector<2x128xbf16>
    %511 = arith.index_cast %501 : i32 to index
    %c0_305 = arith.constant 0 : index
    %c0_306 = arith.constant 0 : index
    %512 = vector.load %arg5[%511, %c0_305, %c0_306] : memref<16x2x128xbf16, #tpu.memory_space<vmem>>, vector<1x2x128xbf16>
    %513 = vector.shape_cast %512 : vector<1x2x128xbf16> to vector<2x128xbf16>
    %514 = vector.shape_cast %510 : vector<2x128xbf16> to vector<1x2x128xbf16>
    tpu.vector_store %arg5[%511, %c0_305, %c0_306], %514 {strides = array<i32>} : memref<16x2x128xbf16, #tpu.memory_space<vmem>>, vector<1x2x128xbf16>,
    %c14_i32_307 = arith.constant 14 : i32
    %c14_i32_308 = arith.constant 14 : i32
    %515 = arith.subi %c14_i32_308, %c14_i32_307 : i32
    %cst_309 = arith.constant dense<0.000000e+00> : vector<2x128xf32>
    %516 = tpu.matmul %509, %1, %cst_309 {dimension_numbers = #tpu.dot_dimension_numbers<[1], [0], [0], [1], [0, 0, 1, 1], [], []>} : vector<2x128xf32>, vector<128x128xf32>, vector<2x128xf32> -> vector<2x128xf32>
    %517 = arith.addf %516, %4 : vector<2x128xf32>
    %cst_310 = arith.constant 0.000000e+00 : f32
    %518 = vector.broadcast %cst_310 : f32 to vector<2x128xf32>
    %519 = arith.maximumf %517, %518 : vector<2x128xf32>
    %520 = arith.index_cast %515 : i32 to index
    %c0_311 = arith.constant 0 : index
    %c0_312 = arith.constant 0 : index
    %521 = vector.load %arg6[%520, %c0_311, %c0_312] : memref<16x2x128xf32, #tpu.memory_space<vmem>>, vector<1x2x128xf32>
    %522 = vector.shape_cast %521 : vector<1x2x128xf32> to vector<2x128xf32>
    %523 = arith.addf %519, %522 : vector<2x128xf32>
    %524 = arith.truncf %523 : vector<2x128xf32> to vector<2x128xbf16>
    %525 = arith.index_cast %515 : i32 to index
    %c0_313 = arith.constant 0 : index
    %c0_314 = arith.constant 0 : index
    %526 = vector.load %arg5[%525, %c0_313, %c0_314] : memref<16x2x128xbf16, #tpu.memory_space<vmem>>, vector<1x2x128xbf16>
    %527 = vector.shape_cast %526 : vector<1x2x128xbf16> to vector<2x128xbf16>
    %528 = vector.shape_cast %524 : vector<2x128xbf16> to vector<1x2x128xbf16>
    tpu.vector_store %arg5[%525, %c0_313, %c0_314], %528 {strides = array<i32>} : memref<16x2x128xbf16, #tpu.memory_space<vmem>>, vector<1x2x128xbf16>,
    %c15_i32_315 = arith.constant 15 : i32
    return
  }
  func.func @transform_0(%arg0: i32) -> (i32, i32, i32) {
    %c0_i32 = arith.constant 0 : i32
    %c0_i32_0 = arith.constant 0 : i32
    %c0_i32_1 = arith.constant 0 : i32
    return %c0_i32, %arg0, %c0_i32_0 : i32, i32, i32
  }
  func.func @transform_1(%arg0: i32) -> (i32, i32) {
    %c0_i32 = arith.constant 0 : i32
    %c0_i32_0 = arith.constant 0 : i32
    %c0_i32_1 = arith.constant 0 : i32
    return %c0_i32, %c0_i32_0 : i32, i32
  }
  func.func @transform_2(%arg0: i32) -> (i32, i32) {
    %c0_i32 = arith.constant 0 : i32
    %c0_i32_0 = arith.constant 0 : i32
    %c0_i32_1 = arith.constant 0 : i32
    return %c0_i32, %c0_i32_0 : i32, i32
  }
  func.func @transform_3(%arg0: i32) -> (i32, i32) {
    %c0_i32 = arith.constant 0 : i32
    %c0_i32_0 = arith.constant 0 : i32
    %c0_i32_1 = arith.constant 0 : i32
    return %c0_i32, %c0_i32_0 : i32, i32
  }
  func.func @transform_4(%arg0: i32) -> (i32, i32, i32) {
    %c0_i32 = arith.constant 0 : i32
    %c0_i32_0 = arith.constant 0 : i32
    %c0_i32_1 = arith.constant 0 : i32
    return %c0_i32, %arg0, %c0_i32_0 : i32, i32, i32
  }
}

module attributes {stable_mosaic.version = 11 : i64} {
  func.func @_lr_kernel(%arg0: i32, %arg1: memref<16x2x128xbf16, #tpu.memory_space<vmem>>, %arg2: memref<128x128xf32, #tpu.memory_space<vmem>>, %arg3: memref<1x128xf32, #tpu.memory_space<vmem>>, %arg4: memref<128x512xf32, #tpu.memory_space<vmem>>, %arg5: memref<16x2x512xf32, #tpu.memory_space<vmem>>, %arg6: memref<16x2x128xf32, #tpu.memory_space<vmem>>) attributes {dimension_semantics = [#tpu.dimension_semantics<parallel>], iteration_bounds = array<i64: 1>, scalar_prefetch = 0 : i64, scratch_operands = 1 : i64, tpu.core_type = #tpu.core_type<tc>, window_params = [{transform_indices = @transform_0, window_bounds = array<i64: 16, 2, 128>}, {pipeline_mode = #tpu.pipeline_mode<synchronous>, transform_indices = @transform_1, window_bounds = array<i64: 128, 128>}, {pipeline_mode = #tpu.pipeline_mode<synchronous>, transform_indices = @transform_2, window_bounds = array<i64: 1, 128>}, {pipeline_mode = #tpu.pipeline_mode<synchronous>, transform_indices = @transform_3, window_bounds = array<i64: 128, 512>}, {transform_indices = @transform_4, window_bounds = array<i64: 16, 2, 512>}]} {
    %c0 = arith.constant 0 : index
    %c0_0 = arith.constant 0 : index
    %0 = vector.load %arg2[%c0, %c0_0] : memref<128x128xf32, #tpu.memory_space<vmem>>, vector<128x128xf32>
    %c0_1 = arith.constant 0 : index
    %c0_2 = arith.constant 0 : index
    %1 = vector.load %arg4[%c0_1, %c0_2] : memref<128x512xf32, #tpu.memory_space<vmem>>, vector<128x512xf32>
    %c0_3 = arith.constant 0 : index
    %c0_4 = arith.constant 0 : index
    %2 = vector.load %arg3[%c0_3, %c0_4] : memref<1x128xf32, #tpu.memory_space<vmem>>, vector<1x128xf32>
    %3 = vector.shape_cast %2 : vector<1x128xf32> to vector<1x128xf32>
    %4 = vector.broadcast %3 : vector<1x128xf32> to vector<2x128xf32>
    %c0_5 = arith.constant 0 : index
    %c0_6 = arith.constant 0 : index
    %c0_7 = arith.constant 0 : index
    %5 = vector.load %arg1[%c0_5, %c0_6, %c0_7] : memref<16x2x128xbf16, #tpu.memory_space<vmem>>, vector<1x2x128xbf16>
    %6 = vector.shape_cast %5 : vector<1x2x128xbf16> to vector<2x128xbf16>
    %7 = arith.extf %6 : vector<2x128xbf16> to vector<2x128xf32>
    %c0_8 = arith.constant 0 : index
    %c0_9 = arith.constant 0 : index
    %c0_10 = arith.constant 0 : index
    %8 = vector.load %arg6[%c0_8, %c0_9, %c0_10] : memref<16x2x128xf32, #tpu.memory_space<vmem>>, vector<1x2x128xf32>
    %9 = vector.shape_cast %8 : vector<1x2x128xf32> to vector<2x128xf32>
    %10 = vector.shape_cast %7 : vector<2x128xf32> to vector<1x2x128xf32>
    tpu.vector_store %arg6[%c0_8, %c0_9, %c0_10], %10 {strides = array<i32>} : memref<16x2x128xf32, #tpu.memory_space<vmem>>, vector<1x2x128xf32>,
    %c1_i32 = arith.constant 1 : i32
    %cst = arith.constant dense<0.000000e+00> : vector<2x128xf32>
    %11 = tpu.matmul %7, %0, %cst {dimension_numbers = #tpu.dot_dimension_numbers<[1], [0], [0], [1], [0, 0, 1, 1], [], []>} : vector<2x128xf32>, vector<128x128xf32>, vector<2x128xf32> -> vector<2x128xf32>
    %12 = arith.addf %11, %4 : vector<2x128xf32>
    %cst_11 = arith.constant 0.000000e+00 : f32
    %13 = vector.broadcast %cst_11 : f32 to vector<2x128xf32>
    %14 = arith.maximumf %12, %13 : vector<2x128xf32>
    %15 = arith.index_cast %c1_i32 : i32 to index
    %c0_12 = arith.constant 0 : index
    %c0_13 = arith.constant 0 : index
    %16 = vector.load %arg1[%15, %c0_12, %c0_13] : memref<16x2x128xbf16, #tpu.memory_space<vmem>>, vector<1x2x128xbf16>
    %17 = vector.shape_cast %16 : vector<1x2x128xbf16> to vector<2x128xbf16>
    %18 = arith.extf %17 : vector<2x128xbf16> to vector<2x128xf32>
    %19 = arith.addf %14, %18 : vector<2x128xf32>
    %20 = arith.index_cast %c1_i32 : i32 to index
    %c0_14 = arith.constant 0 : index
    %c0_15 = arith.constant 0 : index
    %21 = vector.load %arg6[%20, %c0_14, %c0_15] : memref<16x2x128xf32, #tpu.memory_space<vmem>>, vector<1x2x128xf32>
    %22 = vector.shape_cast %21 : vector<1x2x128xf32> to vector<2x128xf32>
    %23 = vector.shape_cast %19 : vector<2x128xf32> to vector<1x2x128xf32>
    tpu.vector_store %arg6[%20, %c0_14, %c0_15], %23 {strides = array<i32>} : memref<16x2x128xf32, #tpu.memory_space<vmem>>, vector<1x2x128xf32>,
    %c2_i32 = arith.constant 2 : i32
    %cst_16 = arith.constant dense<0.000000e+00> : vector<2x128xf32>
    %24 = tpu.matmul %19, %0, %cst_16 {dimension_numbers = #tpu.dot_dimension_numbers<[1], [0], [0], [1], [0, 0, 1, 1], [], []>} : vector<2x128xf32>, vector<128x128xf32>, vector<2x128xf32> -> vector<2x128xf32>
    %25 = arith.addf %24, %4 : vector<2x128xf32>
    %cst_17 = arith.constant 0.000000e+00 : f32
    %26 = vector.broadcast %cst_17 : f32 to vector<2x128xf32>
    %27 = arith.maximumf %25, %26 : vector<2x128xf32>
    %28 = arith.index_cast %c2_i32 : i32 to index
    %c0_18 = arith.constant 0 : index
    %c0_19 = arith.constant 0 : index
    %29 = vector.load %arg1[%28, %c0_18, %c0_19] : memref<16x2x128xbf16, #tpu.memory_space<vmem>>, vector<1x2x128xbf16>
    %30 = vector.shape_cast %29 : vector<1x2x128xbf16> to vector<2x128xbf16>
    %31 = arith.extf %30 : vector<2x128xbf16> to vector<2x128xf32>
    %32 = arith.addf %27, %31 : vector<2x128xf32>
    %33 = arith.index_cast %c2_i32 : i32 to index
    %c0_20 = arith.constant 0 : index
    %c0_21 = arith.constant 0 : index
    %34 = vector.load %arg6[%33, %c0_20, %c0_21] : memref<16x2x128xf32, #tpu.memory_space<vmem>>, vector<1x2x128xf32>
    %35 = vector.shape_cast %34 : vector<1x2x128xf32> to vector<2x128xf32>
    %36 = vector.shape_cast %32 : vector<2x128xf32> to vector<1x2x128xf32>
    tpu.vector_store %arg6[%33, %c0_20, %c0_21], %36 {strides = array<i32>} : memref<16x2x128xf32, #tpu.memory_space<vmem>>, vector<1x2x128xf32>,
    %c3_i32 = arith.constant 3 : i32
    %cst_22 = arith.constant dense<0.000000e+00> : vector<2x128xf32>
    %37 = tpu.matmul %32, %0, %cst_22 {dimension_numbers = #tpu.dot_dimension_numbers<[1], [0], [0], [1], [0, 0, 1, 1], [], []>} : vector<2x128xf32>, vector<128x128xf32>, vector<2x128xf32> -> vector<2x128xf32>
    %38 = arith.addf %37, %4 : vector<2x128xf32>
    %cst_23 = arith.constant 0.000000e+00 : f32
    %39 = vector.broadcast %cst_23 : f32 to vector<2x128xf32>
    %40 = arith.maximumf %38, %39 : vector<2x128xf32>
    %41 = arith.index_cast %c3_i32 : i32 to index
    %c0_24 = arith.constant 0 : index
    %c0_25 = arith.constant 0 : index
    %42 = vector.load %arg1[%41, %c0_24, %c0_25] : memref<16x2x128xbf16, #tpu.memory_space<vmem>>, vector<1x2x128xbf16>
    %43 = vector.shape_cast %42 : vector<1x2x128xbf16> to vector<2x128xbf16>
    %44 = arith.extf %43 : vector<2x128xbf16> to vector<2x128xf32>
    %45 = arith.addf %40, %44 : vector<2x128xf32>
    %46 = arith.index_cast %c3_i32 : i32 to index
    %c0_26 = arith.constant 0 : index
    %c0_27 = arith.constant 0 : index
    %47 = vector.load %arg6[%46, %c0_26, %c0_27] : memref<16x2x128xf32, #tpu.memory_space<vmem>>, vector<1x2x128xf32>
    %48 = vector.shape_cast %47 : vector<1x2x128xf32> to vector<2x128xf32>
    %49 = vector.shape_cast %45 : vector<2x128xf32> to vector<1x2x128xf32>
    tpu.vector_store %arg6[%46, %c0_26, %c0_27], %49 {strides = array<i32>} : memref<16x2x128xf32, #tpu.memory_space<vmem>>, vector<1x2x128xf32>,
    %c4_i32 = arith.constant 4 : i32
    %cst_28 = arith.constant dense<0.000000e+00> : vector<2x128xf32>
    %50 = tpu.matmul %45, %0, %cst_28 {dimension_numbers = #tpu.dot_dimension_numbers<[1], [0], [0], [1], [0, 0, 1, 1], [], []>} : vector<2x128xf32>, vector<128x128xf32>, vector<2x128xf32> -> vector<2x128xf32>
    %51 = arith.addf %50, %4 : vector<2x128xf32>
    %cst_29 = arith.constant 0.000000e+00 : f32
    %52 = vector.broadcast %cst_29 : f32 to vector<2x128xf32>
    %53 = arith.maximumf %51, %52 : vector<2x128xf32>
    %54 = arith.index_cast %c4_i32 : i32 to index
    %c0_30 = arith.constant 0 : index
    %c0_31 = arith.constant 0 : index
    %55 = vector.load %arg1[%54, %c0_30, %c0_31] : memref<16x2x128xbf16, #tpu.memory_space<vmem>>, vector<1x2x128xbf16>
    %56 = vector.shape_cast %55 : vector<1x2x128xbf16> to vector<2x128xbf16>
    %57 = arith.extf %56 : vector<2x128xbf16> to vector<2x128xf32>
    %58 = arith.addf %53, %57 : vector<2x128xf32>
    %59 = arith.index_cast %c4_i32 : i32 to index
    %c0_32 = arith.constant 0 : index
    %c0_33 = arith.constant 0 : index
    %60 = vector.load %arg6[%59, %c0_32, %c0_33] : memref<16x2x128xf32, #tpu.memory_space<vmem>>, vector<1x2x128xf32>
    %61 = vector.shape_cast %60 : vector<1x2x128xf32> to vector<2x128xf32>
    %62 = vector.shape_cast %58 : vector<2x128xf32> to vector<1x2x128xf32>
    tpu.vector_store %arg6[%59, %c0_32, %c0_33], %62 {strides = array<i32>} : memref<16x2x128xf32, #tpu.memory_space<vmem>>, vector<1x2x128xf32>,
    %c5_i32 = arith.constant 5 : i32
    %cst_34 = arith.constant dense<0.000000e+00> : vector<2x128xf32>
    %63 = tpu.matmul %58, %0, %cst_34 {dimension_numbers = #tpu.dot_dimension_numbers<[1], [0], [0], [1], [0, 0, 1, 1], [], []>} : vector<2x128xf32>, vector<128x128xf32>, vector<2x128xf32> -> vector<2x128xf32>
    %64 = arith.addf %63, %4 : vector<2x128xf32>
    %cst_35 = arith.constant 0.000000e+00 : f32
    %65 = vector.broadcast %cst_35 : f32 to vector<2x128xf32>
    %66 = arith.maximumf %64, %65 : vector<2x128xf32>
    %67 = arith.index_cast %c5_i32 : i32 to index
    %c0_36 = arith.constant 0 : index
    %c0_37 = arith.constant 0 : index
    %68 = vector.load %arg1[%67, %c0_36, %c0_37] : memref<16x2x128xbf16, #tpu.memory_space<vmem>>, vector<1x2x128xbf16>
    %69 = vector.shape_cast %68 : vector<1x2x128xbf16> to vector<2x128xbf16>
    %70 = arith.extf %69 : vector<2x128xbf16> to vector<2x128xf32>
    %71 = arith.addf %66, %70 : vector<2x128xf32>
    %72 = arith.index_cast %c5_i32 : i32 to index
    %c0_38 = arith.constant 0 : index
    %c0_39 = arith.constant 0 : index
    %73 = vector.load %arg6[%72, %c0_38, %c0_39] : memref<16x2x128xf32, #tpu.memory_space<vmem>>, vector<1x2x128xf32>
    %74 = vector.shape_cast %73 : vector<1x2x128xf32> to vector<2x128xf32>
    %75 = vector.shape_cast %71 : vector<2x128xf32> to vector<1x2x128xf32>
    tpu.vector_store %arg6[%72, %c0_38, %c0_39], %75 {strides = array<i32>} : memref<16x2x128xf32, #tpu.memory_space<vmem>>, vector<1x2x128xf32>,
    %c6_i32 = arith.constant 6 : i32
    %cst_40 = arith.constant dense<0.000000e+00> : vector<2x128xf32>
    %76 = tpu.matmul %71, %0, %cst_40 {dimension_numbers = #tpu.dot_dimension_numbers<[1], [0], [0], [1], [0, 0, 1, 1], [], []>} : vector<2x128xf32>, vector<128x128xf32>, vector<2x128xf32> -> vector<2x128xf32>
    %77 = arith.addf %76, %4 : vector<2x128xf32>
    %cst_41 = arith.constant 0.000000e+00 : f32
    %78 = vector.broadcast %cst_41 : f32 to vector<2x128xf32>
    %79 = arith.maximumf %77, %78 : vector<2x128xf32>
    %80 = arith.index_cast %c6_i32 : i32 to index
    %c0_42 = arith.constant 0 : index
    %c0_43 = arith.constant 0 : index
    %81 = vector.load %arg1[%80, %c0_42, %c0_43] : memref<16x2x128xbf16, #tpu.memory_space<vmem>>, vector<1x2x128xbf16>
    %82 = vector.shape_cast %81 : vector<1x2x128xbf16> to vector<2x128xbf16>
    %83 = arith.extf %82 : vector<2x128xbf16> to vector<2x128xf32>
    %84 = arith.addf %79, %83 : vector<2x128xf32>
    %85 = arith.index_cast %c6_i32 : i32 to index
    %c0_44 = arith.constant 0 : index
    %c0_45 = arith.constant 0 : index
    %86 = vector.load %arg6[%85, %c0_44, %c0_45] : memref<16x2x128xf32, #tpu.memory_space<vmem>>, vector<1x2x128xf32>
    %87 = vector.shape_cast %86 : vector<1x2x128xf32> to vector<2x128xf32>
    %88 = vector.shape_cast %84 : vector<2x128xf32> to vector<1x2x128xf32>
    tpu.vector_store %arg6[%85, %c0_44, %c0_45], %88 {strides = array<i32>} : memref<16x2x128xf32, #tpu.memory_space<vmem>>, vector<1x2x128xf32>,
    %c7_i32 = arith.constant 7 : i32
    %cst_46 = arith.constant dense<0.000000e+00> : vector<2x128xf32>
    %89 = tpu.matmul %84, %0, %cst_46 {dimension_numbers = #tpu.dot_dimension_numbers<[1], [0], [0], [1], [0, 0, 1, 1], [], []>} : vector<2x128xf32>, vector<128x128xf32>, vector<2x128xf32> -> vector<2x128xf32>
    %90 = arith.addf %89, %4 : vector<2x128xf32>
    %cst_47 = arith.constant 0.000000e+00 : f32
    %91 = vector.broadcast %cst_47 : f32 to vector<2x128xf32>
    %92 = arith.maximumf %90, %91 : vector<2x128xf32>
    %93 = arith.index_cast %c7_i32 : i32 to index
    %c0_48 = arith.constant 0 : index
    %c0_49 = arith.constant 0 : index
    %94 = vector.load %arg1[%93, %c0_48, %c0_49] : memref<16x2x128xbf16, #tpu.memory_space<vmem>>, vector<1x2x128xbf16>
    %95 = vector.shape_cast %94 : vector<1x2x128xbf16> to vector<2x128xbf16>
    %96 = arith.extf %95 : vector<2x128xbf16> to vector<2x128xf32>
    %97 = arith.addf %92, %96 : vector<2x128xf32>
    %98 = arith.index_cast %c7_i32 : i32 to index
    %c0_50 = arith.constant 0 : index
    %c0_51 = arith.constant 0 : index
    %99 = vector.load %arg6[%98, %c0_50, %c0_51] : memref<16x2x128xf32, #tpu.memory_space<vmem>>, vector<1x2x128xf32>
    %100 = vector.shape_cast %99 : vector<1x2x128xf32> to vector<2x128xf32>
    %101 = vector.shape_cast %97 : vector<2x128xf32> to vector<1x2x128xf32>
    tpu.vector_store %arg6[%98, %c0_50, %c0_51], %101 {strides = array<i32>} : memref<16x2x128xf32, #tpu.memory_space<vmem>>, vector<1x2x128xf32>,
    %c8_i32 = arith.constant 8 : i32
    %cst_52 = arith.constant dense<0.000000e+00> : vector<2x128xf32>
    %102 = tpu.matmul %97, %0, %cst_52 {dimension_numbers = #tpu.dot_dimension_numbers<[1], [0], [0], [1], [0, 0, 1, 1], [], []>} : vector<2x128xf32>, vector<128x128xf32>, vector<2x128xf32> -> vector<2x128xf32>
    %103 = arith.addf %102, %4 : vector<2x128xf32>
    %cst_53 = arith.constant 0.000000e+00 : f32
    %104 = vector.broadcast %cst_53 : f32 to vector<2x128xf32>
    %105 = arith.maximumf %103, %104 : vector<2x128xf32>
    %106 = arith.index_cast %c8_i32 : i32 to index
    %c0_54 = arith.constant 0 : index
    %c0_55 = arith.constant 0 : index
    %107 = vector.load %arg1[%106, %c0_54, %c0_55] : memref<16x2x128xbf16, #tpu.memory_space<vmem>>, vector<1x2x128xbf16>
    %108 = vector.shape_cast %107 : vector<1x2x128xbf16> to vector<2x128xbf16>
    %109 = arith.extf %108 : vector<2x128xbf16> to vector<2x128xf32>
    %110 = arith.addf %105, %109 : vector<2x128xf32>
    %111 = arith.index_cast %c8_i32 : i32 to index
    %c0_56 = arith.constant 0 : index
    %c0_57 = arith.constant 0 : index
    %112 = vector.load %arg6[%111, %c0_56, %c0_57] : memref<16x2x128xf32, #tpu.memory_space<vmem>>, vector<1x2x128xf32>
    %113 = vector.shape_cast %112 : vector<1x2x128xf32> to vector<2x128xf32>
    %114 = vector.shape_cast %110 : vector<2x128xf32> to vector<1x2x128xf32>
    tpu.vector_store %arg6[%111, %c0_56, %c0_57], %114 {strides = array<i32>} : memref<16x2x128xf32, #tpu.memory_space<vmem>>, vector<1x2x128xf32>,
    %c9_i32 = arith.constant 9 : i32
    %cst_58 = arith.constant dense<0.000000e+00> : vector<2x128xf32>
    %115 = tpu.matmul %110, %0, %cst_58 {dimension_numbers = #tpu.dot_dimension_numbers<[1], [0], [0], [1], [0, 0, 1, 1], [], []>} : vector<2x128xf32>, vector<128x128xf32>, vector<2x128xf32> -> vector<2x128xf32>
    %116 = arith.addf %115, %4 : vector<2x128xf32>
    %cst_59 = arith.constant 0.000000e+00 : f32
    %117 = vector.broadcast %cst_59 : f32 to vector<2x128xf32>
    %118 = arith.maximumf %116, %117 : vector<2x128xf32>
    %119 = arith.index_cast %c9_i32 : i32 to index
    %c0_60 = arith.constant 0 : index
    %c0_61 = arith.constant 0 : index
    %120 = vector.load %arg1[%119, %c0_60, %c0_61] : memref<16x2x128xbf16, #tpu.memory_space<vmem>>, vector<1x2x128xbf16>
    %121 = vector.shape_cast %120 : vector<1x2x128xbf16> to vector<2x128xbf16>
    %122 = arith.extf %121 : vector<2x128xbf16> to vector<2x128xf32>
    %123 = arith.addf %118, %122 : vector<2x128xf32>
    %124 = arith.index_cast %c9_i32 : i32 to index
    %c0_62 = arith.constant 0 : index
    %c0_63 = arith.constant 0 : index
    %125 = vector.load %arg6[%124, %c0_62, %c0_63] : memref<16x2x128xf32, #tpu.memory_space<vmem>>, vector<1x2x128xf32>
    %126 = vector.shape_cast %125 : vector<1x2x128xf32> to vector<2x128xf32>
    %127 = vector.shape_cast %123 : vector<2x128xf32> to vector<1x2x128xf32>
    tpu.vector_store %arg6[%124, %c0_62, %c0_63], %127 {strides = array<i32>} : memref<16x2x128xf32, #tpu.memory_space<vmem>>, vector<1x2x128xf32>,
    %c10_i32 = arith.constant 10 : i32
    %cst_64 = arith.constant dense<0.000000e+00> : vector<2x128xf32>
    %128 = tpu.matmul %123, %0, %cst_64 {dimension_numbers = #tpu.dot_dimension_numbers<[1], [0], [0], [1], [0, 0, 1, 1], [], []>} : vector<2x128xf32>, vector<128x128xf32>, vector<2x128xf32> -> vector<2x128xf32>
    %129 = arith.addf %128, %4 : vector<2x128xf32>
    %cst_65 = arith.constant 0.000000e+00 : f32
    %130 = vector.broadcast %cst_65 : f32 to vector<2x128xf32>
    %131 = arith.maximumf %129, %130 : vector<2x128xf32>
    %132 = arith.index_cast %c10_i32 : i32 to index
    %c0_66 = arith.constant 0 : index
    %c0_67 = arith.constant 0 : index
    %133 = vector.load %arg1[%132, %c0_66, %c0_67] : memref<16x2x128xbf16, #tpu.memory_space<vmem>>, vector<1x2x128xbf16>
    %134 = vector.shape_cast %133 : vector<1x2x128xbf16> to vector<2x128xbf16>
    %135 = arith.extf %134 : vector<2x128xbf16> to vector<2x128xf32>
    %136 = arith.addf %131, %135 : vector<2x128xf32>
    %137 = arith.index_cast %c10_i32 : i32 to index
    %c0_68 = arith.constant 0 : index
    %c0_69 = arith.constant 0 : index
    %138 = vector.load %arg6[%137, %c0_68, %c0_69] : memref<16x2x128xf32, #tpu.memory_space<vmem>>, vector<1x2x128xf32>
    %139 = vector.shape_cast %138 : vector<1x2x128xf32> to vector<2x128xf32>
    %140 = vector.shape_cast %136 : vector<2x128xf32> to vector<1x2x128xf32>
    tpu.vector_store %arg6[%137, %c0_68, %c0_69], %140 {strides = array<i32>} : memref<16x2x128xf32, #tpu.memory_space<vmem>>, vector<1x2x128xf32>,
    %c11_i32 = arith.constant 11 : i32
    %cst_70 = arith.constant dense<0.000000e+00> : vector<2x128xf32>
    %141 = tpu.matmul %136, %0, %cst_70 {dimension_numbers = #tpu.dot_dimension_numbers<[1], [0], [0], [1], [0, 0, 1, 1], [], []>} : vector<2x128xf32>, vector<128x128xf32>, vector<2x128xf32> -> vector<2x128xf32>
    %142 = arith.addf %141, %4 : vector<2x128xf32>
    %cst_71 = arith.constant 0.000000e+00 : f32
    %143 = vector.broadcast %cst_71 : f32 to vector<2x128xf32>
    %144 = arith.maximumf %142, %143 : vector<2x128xf32>
    %145 = arith.index_cast %c11_i32 : i32 to index
    %c0_72 = arith.constant 0 : index
    %c0_73 = arith.constant 0 : index
    %146 = vector.load %arg1[%145, %c0_72, %c0_73] : memref<16x2x128xbf16, #tpu.memory_space<vmem>>, vector<1x2x128xbf16>
    %147 = vector.shape_cast %146 : vector<1x2x128xbf16> to vector<2x128xbf16>
    %148 = arith.extf %147 : vector<2x128xbf16> to vector<2x128xf32>
    %149 = arith.addf %144, %148 : vector<2x128xf32>
    %150 = arith.index_cast %c11_i32 : i32 to index
    %c0_74 = arith.constant 0 : index
    %c0_75 = arith.constant 0 : index
    %151 = vector.load %arg6[%150, %c0_74, %c0_75] : memref<16x2x128xf32, #tpu.memory_space<vmem>>, vector<1x2x128xf32>
    %152 = vector.shape_cast %151 : vector<1x2x128xf32> to vector<2x128xf32>
    %153 = vector.shape_cast %149 : vector<2x128xf32> to vector<1x2x128xf32>
    tpu.vector_store %arg6[%150, %c0_74, %c0_75], %153 {strides = array<i32>} : memref<16x2x128xf32, #tpu.memory_space<vmem>>, vector<1x2x128xf32>,
    %c12_i32 = arith.constant 12 : i32
    %cst_76 = arith.constant dense<0.000000e+00> : vector<2x128xf32>
    %154 = tpu.matmul %149, %0, %cst_76 {dimension_numbers = #tpu.dot_dimension_numbers<[1], [0], [0], [1], [0, 0, 1, 1], [], []>} : vector<2x128xf32>, vector<128x128xf32>, vector<2x128xf32> -> vector<2x128xf32>
    %155 = arith.addf %154, %4 : vector<2x128xf32>
    %cst_77 = arith.constant 0.000000e+00 : f32
    %156 = vector.broadcast %cst_77 : f32 to vector<2x128xf32>
    %157 = arith.maximumf %155, %156 : vector<2x128xf32>
    %158 = arith.index_cast %c12_i32 : i32 to index
    %c0_78 = arith.constant 0 : index
    %c0_79 = arith.constant 0 : index
    %159 = vector.load %arg1[%158, %c0_78, %c0_79] : memref<16x2x128xbf16, #tpu.memory_space<vmem>>, vector<1x2x128xbf16>
    %160 = vector.shape_cast %159 : vector<1x2x128xbf16> to vector<2x128xbf16>
    %161 = arith.extf %160 : vector<2x128xbf16> to vector<2x128xf32>
    %162 = arith.addf %157, %161 : vector<2x128xf32>
    %163 = arith.index_cast %c12_i32 : i32 to index
    %c0_80 = arith.constant 0 : index
    %c0_81 = arith.constant 0 : index
    %164 = vector.load %arg6[%163, %c0_80, %c0_81] : memref<16x2x128xf32, #tpu.memory_space<vmem>>, vector<1x2x128xf32>
    %165 = vector.shape_cast %164 : vector<1x2x128xf32> to vector<2x128xf32>
    %166 = vector.shape_cast %162 : vector<2x128xf32> to vector<1x2x128xf32>
    tpu.vector_store %arg6[%163, %c0_80, %c0_81], %166 {strides = array<i32>} : memref<16x2x128xf32, #tpu.memory_space<vmem>>, vector<1x2x128xf32>,
    %c13_i32 = arith.constant 13 : i32
    %cst_82 = arith.constant dense<0.000000e+00> : vector<2x128xf32>
    %167 = tpu.matmul %162, %0, %cst_82 {dimension_numbers = #tpu.dot_dimension_numbers<[1], [0], [0], [1], [0, 0, 1, 1], [], []>} : vector<2x128xf32>, vector<128x128xf32>, vector<2x128xf32> -> vector<2x128xf32>
    %168 = arith.addf %167, %4 : vector<2x128xf32>
    %cst_83 = arith.constant 0.000000e+00 : f32
    %169 = vector.broadcast %cst_83 : f32 to vector<2x128xf32>
    %170 = arith.maximumf %168, %169 : vector<2x128xf32>
    %171 = arith.index_cast %c13_i32 : i32 to index
    %c0_84 = arith.constant 0 : index
    %c0_85 = arith.constant 0 : index
    %172 = vector.load %arg1[%171, %c0_84, %c0_85] : memref<16x2x128xbf16, #tpu.memory_space<vmem>>, vector<1x2x128xbf16>
    %173 = vector.shape_cast %172 : vector<1x2x128xbf16> to vector<2x128xbf16>
    %174 = arith.extf %173 : vector<2x128xbf16> to vector<2x128xf32>
    %175 = arith.addf %170, %174 : vector<2x128xf32>
    %176 = arith.index_cast %c13_i32 : i32 to index
    %c0_86 = arith.constant 0 : index
    %c0_87 = arith.constant 0 : index
    %177 = vector.load %arg6[%176, %c0_86, %c0_87] : memref<16x2x128xf32, #tpu.memory_space<vmem>>, vector<1x2x128xf32>
    %178 = vector.shape_cast %177 : vector<1x2x128xf32> to vector<2x128xf32>
    %179 = vector.shape_cast %175 : vector<2x128xf32> to vector<1x2x128xf32>
    tpu.vector_store %arg6[%176, %c0_86, %c0_87], %179 {strides = array<i32>} : memref<16x2x128xf32, #tpu.memory_space<vmem>>, vector<1x2x128xf32>,
    %c14_i32 = arith.constant 14 : i32
    %cst_88 = arith.constant dense<0.000000e+00> : vector<2x128xf32>
    %180 = tpu.matmul %175, %0, %cst_88 {dimension_numbers = #tpu.dot_dimension_numbers<[1], [0], [0], [1], [0, 0, 1, 1], [], []>} : vector<2x128xf32>, vector<128x128xf32>, vector<2x128xf32> -> vector<2x128xf32>
    %181 = arith.addf %180, %4 : vector<2x128xf32>
    %cst_89 = arith.constant 0.000000e+00 : f32
    %182 = vector.broadcast %cst_89 : f32 to vector<2x128xf32>
    %183 = arith.maximumf %181, %182 : vector<2x128xf32>
    %184 = arith.index_cast %c14_i32 : i32 to index
    %c0_90 = arith.constant 0 : index
    %c0_91 = arith.constant 0 : index
    %185 = vector.load %arg1[%184, %c0_90, %c0_91] : memref<16x2x128xbf16, #tpu.memory_space<vmem>>, vector<1x2x128xbf16>
    %186 = vector.shape_cast %185 : vector<1x2x128xbf16> to vector<2x128xbf16>
    %187 = arith.extf %186 : vector<2x128xbf16> to vector<2x128xf32>
    %188 = arith.addf %183, %187 : vector<2x128xf32>
    %189 = arith.index_cast %c14_i32 : i32 to index
    %c0_92 = arith.constant 0 : index
    %c0_93 = arith.constant 0 : index
    %190 = vector.load %arg6[%189, %c0_92, %c0_93] : memref<16x2x128xf32, #tpu.memory_space<vmem>>, vector<1x2x128xf32>
    %191 = vector.shape_cast %190 : vector<1x2x128xf32> to vector<2x128xf32>
    %192 = vector.shape_cast %188 : vector<2x128xf32> to vector<1x2x128xf32>
    tpu.vector_store %arg6[%189, %c0_92, %c0_93], %192 {strides = array<i32>} : memref<16x2x128xf32, #tpu.memory_space<vmem>>, vector<1x2x128xf32>,
    %c15_i32 = arith.constant 15 : i32
    %cst_94 = arith.constant dense<0.000000e+00> : vector<2x128xf32>
    %193 = tpu.matmul %188, %0, %cst_94 {dimension_numbers = #tpu.dot_dimension_numbers<[1], [0], [0], [1], [0, 0, 1, 1], [], []>} : vector<2x128xf32>, vector<128x128xf32>, vector<2x128xf32> -> vector<2x128xf32>
    %194 = arith.addf %193, %4 : vector<2x128xf32>
    %cst_95 = arith.constant 0.000000e+00 : f32
    %195 = vector.broadcast %cst_95 : f32 to vector<2x128xf32>
    %196 = arith.maximumf %194, %195 : vector<2x128xf32>
    %197 = arith.index_cast %c15_i32 : i32 to index
    %c0_96 = arith.constant 0 : index
    %c0_97 = arith.constant 0 : index
    %198 = vector.load %arg1[%197, %c0_96, %c0_97] : memref<16x2x128xbf16, #tpu.memory_space<vmem>>, vector<1x2x128xbf16>
    %199 = vector.shape_cast %198 : vector<1x2x128xbf16> to vector<2x128xbf16>
    %200 = arith.extf %199 : vector<2x128xbf16> to vector<2x128xf32>
    %201 = arith.addf %196, %200 : vector<2x128xf32>
    %202 = arith.index_cast %c15_i32 : i32 to index
    %c0_98 = arith.constant 0 : index
    %c0_99 = arith.constant 0 : index
    %203 = vector.load %arg6[%202, %c0_98, %c0_99] : memref<16x2x128xf32, #tpu.memory_space<vmem>>, vector<1x2x128xf32>
    %204 = vector.shape_cast %203 : vector<1x2x128xf32> to vector<2x128xf32>
    %205 = vector.shape_cast %201 : vector<2x128xf32> to vector<1x2x128xf32>
    tpu.vector_store %arg6[%202, %c0_98, %c0_99], %205 {strides = array<i32>} : memref<16x2x128xf32, #tpu.memory_space<vmem>>, vector<1x2x128xf32>,
    %c15_i32_100 = arith.constant 15 : i32
    %c0_i32 = arith.constant 0 : i32
    %c14_i32_101 = arith.constant 14 : i32
    %206 = arith.subi %c14_i32_101, %c0_i32 : i32
    %cst_102 = arith.constant dense<0.000000e+00> : vector<2x128xf32>
    %207 = tpu.matmul %201, %0, %cst_102 {dimension_numbers = #tpu.dot_dimension_numbers<[1], [0], [0], [1], [0, 0, 1, 1], [], []>} : vector<2x128xf32>, vector<128x128xf32>, vector<2x128xf32> -> vector<2x128xf32>
    %208 = arith.addf %207, %4 : vector<2x128xf32>
    %cst_103 = arith.constant 0.000000e+00 : f32
    %209 = vector.broadcast %cst_103 : f32 to vector<2x128xf32>
    %210 = arith.maximumf %208, %209 : vector<2x128xf32>
    %211 = arith.index_cast %206 : i32 to index
    %c0_104 = arith.constant 0 : index
    %c0_105 = arith.constant 0 : index
    %212 = vector.load %arg6[%211, %c0_104, %c0_105] : memref<16x2x128xf32, #tpu.memory_space<vmem>>, vector<1x2x128xf32>
    %213 = vector.shape_cast %212 : vector<1x2x128xf32> to vector<2x128xf32>
    %214 = arith.addf %210, %213 : vector<2x128xf32>
    %215 = arith.index_cast %206 : i32 to index
    %c0_106 = arith.constant 0 : index
    %c0_107 = arith.constant 0 : index
    %216 = vector.load %arg6[%215, %c0_106, %c0_107] : memref<16x2x128xf32, #tpu.memory_space<vmem>>, vector<1x2x128xf32>
    %217 = vector.shape_cast %216 : vector<1x2x128xf32> to vector<2x128xf32>
    %218 = vector.shape_cast %214 : vector<2x128xf32> to vector<1x2x128xf32>
    tpu.vector_store %arg6[%215, %c0_106, %c0_107], %218 {strides = array<i32>} : memref<16x2x128xf32, #tpu.memory_space<vmem>>, vector<1x2x128xf32>,
    %c1_i32_108 = arith.constant 1 : i32
    %c14_i32_109 = arith.constant 14 : i32
    %219 = arith.subi %c14_i32_109, %c1_i32_108 : i32
    %cst_110 = arith.constant dense<0.000000e+00> : vector<2x128xf32>
    %220 = tpu.matmul %214, %0, %cst_110 {dimension_numbers = #tpu.dot_dimension_numbers<[1], [0], [0], [1], [0, 0, 1, 1], [], []>} : vector<2x128xf32>, vector<128x128xf32>, vector<2x128xf32> -> vector<2x128xf32>
    %221 = arith.addf %220, %4 : vector<2x128xf32>
    %cst_111 = arith.constant 0.000000e+00 : f32
    %222 = vector.broadcast %cst_111 : f32 to vector<2x128xf32>
    %223 = arith.maximumf %221, %222 : vector<2x128xf32>
    %224 = arith.index_cast %219 : i32 to index
    %c0_112 = arith.constant 0 : index
    %c0_113 = arith.constant 0 : index
    %225 = vector.load %arg6[%224, %c0_112, %c0_113] : memref<16x2x128xf32, #tpu.memory_space<vmem>>, vector<1x2x128xf32>
    %226 = vector.shape_cast %225 : vector<1x2x128xf32> to vector<2x128xf32>
    %227 = arith.addf %223, %226 : vector<2x128xf32>
    %228 = arith.index_cast %219 : i32 to index
    %c0_114 = arith.constant 0 : index
    %c0_115 = arith.constant 0 : index
    %229 = vector.load %arg6[%228, %c0_114, %c0_115] : memref<16x2x128xf32, #tpu.memory_space<vmem>>, vector<1x2x128xf32>
    %230 = vector.shape_cast %229 : vector<1x2x128xf32> to vector<2x128xf32>
    %231 = vector.shape_cast %227 : vector<2x128xf32> to vector<1x2x128xf32>
    tpu.vector_store %arg6[%228, %c0_114, %c0_115], %231 {strides = array<i32>} : memref<16x2x128xf32, #tpu.memory_space<vmem>>, vector<1x2x128xf32>,
    %c2_i32_116 = arith.constant 2 : i32
    %c14_i32_117 = arith.constant 14 : i32
    %232 = arith.subi %c14_i32_117, %c2_i32_116 : i32
    %cst_118 = arith.constant dense<0.000000e+00> : vector<2x128xf32>
    %233 = tpu.matmul %227, %0, %cst_118 {dimension_numbers = #tpu.dot_dimension_numbers<[1], [0], [0], [1], [0, 0, 1, 1], [], []>} : vector<2x128xf32>, vector<128x128xf32>, vector<2x128xf32> -> vector<2x128xf32>
    %234 = arith.addf %233, %4 : vector<2x128xf32>
    %cst_119 = arith.constant 0.000000e+00 : f32
    %235 = vector.broadcast %cst_119 : f32 to vector<2x128xf32>
    %236 = arith.maximumf %234, %235 : vector<2x128xf32>
    %237 = arith.index_cast %232 : i32 to index
    %c0_120 = arith.constant 0 : index
    %c0_121 = arith.constant 0 : index
    %238 = vector.load %arg6[%237, %c0_120, %c0_121] : memref<16x2x128xf32, #tpu.memory_space<vmem>>, vector<1x2x128xf32>
    %239 = vector.shape_cast %238 : vector<1x2x128xf32> to vector<2x128xf32>
    %240 = arith.addf %236, %239 : vector<2x128xf32>
    %241 = arith.index_cast %232 : i32 to index
    %c0_122 = arith.constant 0 : index
    %c0_123 = arith.constant 0 : index
    %242 = vector.load %arg6[%241, %c0_122, %c0_123] : memref<16x2x128xf32, #tpu.memory_space<vmem>>, vector<1x2x128xf32>
    %243 = vector.shape_cast %242 : vector<1x2x128xf32> to vector<2x128xf32>
    %244 = vector.shape_cast %240 : vector<2x128xf32> to vector<1x2x128xf32>
    tpu.vector_store %arg6[%241, %c0_122, %c0_123], %244 {strides = array<i32>} : memref<16x2x128xf32, #tpu.memory_space<vmem>>, vector<1x2x128xf32>,
    %c3_i32_124 = arith.constant 3 : i32
    %c14_i32_125 = arith.constant 14 : i32
    %245 = arith.subi %c14_i32_125, %c3_i32_124 : i32
    %cst_126 = arith.constant dense<0.000000e+00> : vector<2x128xf32>
    %246 = tpu.matmul %240, %0, %cst_126 {dimension_numbers = #tpu.dot_dimension_numbers<[1], [0], [0], [1], [0, 0, 1, 1], [], []>} : vector<2x128xf32>, vector<128x128xf32>, vector<2x128xf32> -> vector<2x128xf32>
    %247 = arith.addf %246, %4 : vector<2x128xf32>
    %cst_127 = arith.constant 0.000000e+00 : f32
    %248 = vector.broadcast %cst_127 : f32 to vector<2x128xf32>
    %249 = arith.maximumf %247, %248 : vector<2x128xf32>
    %250 = arith.index_cast %245 : i32 to index
    %c0_128 = arith.constant 0 : index
    %c0_129 = arith.constant 0 : index
    %251 = vector.load %arg6[%250, %c0_128, %c0_129] : memref<16x2x128xf32, #tpu.memory_space<vmem>>, vector<1x2x128xf32>
    %252 = vector.shape_cast %251 : vector<1x2x128xf32> to vector<2x128xf32>
    %253 = arith.addf %249, %252 : vector<2x128xf32>
    %254 = arith.index_cast %245 : i32 to index
    %c0_130 = arith.constant 0 : index
    %c0_131 = arith.constant 0 : index
    %255 = vector.load %arg6[%254, %c0_130, %c0_131] : memref<16x2x128xf32, #tpu.memory_space<vmem>>, vector<1x2x128xf32>
    %256 = vector.shape_cast %255 : vector<1x2x128xf32> to vector<2x128xf32>
    %257 = vector.shape_cast %253 : vector<2x128xf32> to vector<1x2x128xf32>
    tpu.vector_store %arg6[%254, %c0_130, %c0_131], %257 {strides = array<i32>} : memref<16x2x128xf32, #tpu.memory_space<vmem>>, vector<1x2x128xf32>,
    %c4_i32_132 = arith.constant 4 : i32
    %c14_i32_133 = arith.constant 14 : i32
    %258 = arith.subi %c14_i32_133, %c4_i32_132 : i32
    %cst_134 = arith.constant dense<0.000000e+00> : vector<2x128xf32>
    %259 = tpu.matmul %253, %0, %cst_134 {dimension_numbers = #tpu.dot_dimension_numbers<[1], [0], [0], [1], [0, 0, 1, 1], [], []>} : vector<2x128xf32>, vector<128x128xf32>, vector<2x128xf32> -> vector<2x128xf32>
    %260 = arith.addf %259, %4 : vector<2x128xf32>
    %cst_135 = arith.constant 0.000000e+00 : f32
    %261 = vector.broadcast %cst_135 : f32 to vector<2x128xf32>
    %262 = arith.maximumf %260, %261 : vector<2x128xf32>
    %263 = arith.index_cast %258 : i32 to index
    %c0_136 = arith.constant 0 : index
    %c0_137 = arith.constant 0 : index
    %264 = vector.load %arg6[%263, %c0_136, %c0_137] : memref<16x2x128xf32, #tpu.memory_space<vmem>>, vector<1x2x128xf32>
    %265 = vector.shape_cast %264 : vector<1x2x128xf32> to vector<2x128xf32>
    %266 = arith.addf %262, %265 : vector<2x128xf32>
    %267 = arith.index_cast %258 : i32 to index
    %c0_138 = arith.constant 0 : index
    %c0_139 = arith.constant 0 : index
    %268 = vector.load %arg6[%267, %c0_138, %c0_139] : memref<16x2x128xf32, #tpu.memory_space<vmem>>, vector<1x2x128xf32>
    %269 = vector.shape_cast %268 : vector<1x2x128xf32> to vector<2x128xf32>
    %270 = vector.shape_cast %266 : vector<2x128xf32> to vector<1x2x128xf32>
    tpu.vector_store %arg6[%267, %c0_138, %c0_139], %270 {strides = array<i32>} : memref<16x2x128xf32, #tpu.memory_space<vmem>>, vector<1x2x128xf32>,
    %c5_i32_140 = arith.constant 5 : i32
    %c14_i32_141 = arith.constant 14 : i32
    %271 = arith.subi %c14_i32_141, %c5_i32_140 : i32
    %cst_142 = arith.constant dense<0.000000e+00> : vector<2x128xf32>
    %272 = tpu.matmul %266, %0, %cst_142 {dimension_numbers = #tpu.dot_dimension_numbers<[1], [0], [0], [1], [0, 0, 1, 1], [], []>} : vector<2x128xf32>, vector<128x128xf32>, vector<2x128xf32> -> vector<2x128xf32>
    %273 = arith.addf %272, %4 : vector<2x128xf32>
    %cst_143 = arith.constant 0.000000e+00 : f32
    %274 = vector.broadcast %cst_143 : f32 to vector<2x128xf32>
    %275 = arith.maximumf %273, %274 : vector<2x128xf32>
    %276 = arith.index_cast %271 : i32 to index
    %c0_144 = arith.constant 0 : index
    %c0_145 = arith.constant 0 : index
    %277 = vector.load %arg6[%276, %c0_144, %c0_145] : memref<16x2x128xf32, #tpu.memory_space<vmem>>, vector<1x2x128xf32>
    %278 = vector.shape_cast %277 : vector<1x2x128xf32> to vector<2x128xf32>
    %279 = arith.addf %275, %278 : vector<2x128xf32>
    %280 = arith.index_cast %271 : i32 to index
    %c0_146 = arith.constant 0 : index
    %c0_147 = arith.constant 0 : index
    %281 = vector.load %arg6[%280, %c0_146, %c0_147] : memref<16x2x128xf32, #tpu.memory_space<vmem>>, vector<1x2x128xf32>
    %282 = vector.shape_cast %281 : vector<1x2x128xf32> to vector<2x128xf32>
    %283 = vector.shape_cast %279 : vector<2x128xf32> to vector<1x2x128xf32>
    tpu.vector_store %arg6[%280, %c0_146, %c0_147], %283 {strides = array<i32>} : memref<16x2x128xf32, #tpu.memory_space<vmem>>, vector<1x2x128xf32>,
    %c6_i32_148 = arith.constant 6 : i32
    %c14_i32_149 = arith.constant 14 : i32
    %284 = arith.subi %c14_i32_149, %c6_i32_148 : i32
    %cst_150 = arith.constant dense<0.000000e+00> : vector<2x128xf32>
    %285 = tpu.matmul %279, %0, %cst_150 {dimension_numbers = #tpu.dot_dimension_numbers<[1], [0], [0], [1], [0, 0, 1, 1], [], []>} : vector<2x128xf32>, vector<128x128xf32>, vector<2x128xf32> -> vector<2x128xf32>
    %286 = arith.addf %285, %4 : vector<2x128xf32>
    %cst_151 = arith.constant 0.000000e+00 : f32
    %287 = vector.broadcast %cst_151 : f32 to vector<2x128xf32>
    %288 = arith.maximumf %286, %287 : vector<2x128xf32>
    %289 = arith.index_cast %284 : i32 to index
    %c0_152 = arith.constant 0 : index
    %c0_153 = arith.constant 0 : index
    %290 = vector.load %arg6[%289, %c0_152, %c0_153] : memref<16x2x128xf32, #tpu.memory_space<vmem>>, vector<1x2x128xf32>
    %291 = vector.shape_cast %290 : vector<1x2x128xf32> to vector<2x128xf32>
    %292 = arith.addf %288, %291 : vector<2x128xf32>
    %293 = arith.index_cast %284 : i32 to index
    %c0_154 = arith.constant 0 : index
    %c0_155 = arith.constant 0 : index
    %294 = vector.load %arg6[%293, %c0_154, %c0_155] : memref<16x2x128xf32, #tpu.memory_space<vmem>>, vector<1x2x128xf32>
    %295 = vector.shape_cast %294 : vector<1x2x128xf32> to vector<2x128xf32>
    %296 = vector.shape_cast %292 : vector<2x128xf32> to vector<1x2x128xf32>
    tpu.vector_store %arg6[%293, %c0_154, %c0_155], %296 {strides = array<i32>} : memref<16x2x128xf32, #tpu.memory_space<vmem>>, vector<1x2x128xf32>,
    %c7_i32_156 = arith.constant 7 : i32
    %c14_i32_157 = arith.constant 14 : i32
    %297 = arith.subi %c14_i32_157, %c7_i32_156 : i32
    %cst_158 = arith.constant dense<0.000000e+00> : vector<2x128xf32>
    %298 = tpu.matmul %292, %0, %cst_158 {dimension_numbers = #tpu.dot_dimension_numbers<[1], [0], [0], [1], [0, 0, 1, 1], [], []>} : vector<2x128xf32>, vector<128x128xf32>, vector<2x128xf32> -> vector<2x128xf32>
    %299 = arith.addf %298, %4 : vector<2x128xf32>
    %cst_159 = arith.constant 0.000000e+00 : f32
    %300 = vector.broadcast %cst_159 : f32 to vector<2x128xf32>
    %301 = arith.maximumf %299, %300 : vector<2x128xf32>
    %302 = arith.index_cast %297 : i32 to index
    %c0_160 = arith.constant 0 : index
    %c0_161 = arith.constant 0 : index
    %303 = vector.load %arg6[%302, %c0_160, %c0_161] : memref<16x2x128xf32, #tpu.memory_space<vmem>>, vector<1x2x128xf32>
    %304 = vector.shape_cast %303 : vector<1x2x128xf32> to vector<2x128xf32>
    %305 = arith.addf %301, %304 : vector<2x128xf32>
    %306 = arith.index_cast %297 : i32 to index
    %c0_162 = arith.constant 0 : index
    %c0_163 = arith.constant 0 : index
    %307 = vector.load %arg6[%306, %c0_162, %c0_163] : memref<16x2x128xf32, #tpu.memory_space<vmem>>, vector<1x2x128xf32>
    %308 = vector.shape_cast %307 : vector<1x2x128xf32> to vector<2x128xf32>
    %309 = vector.shape_cast %305 : vector<2x128xf32> to vector<1x2x128xf32>
    tpu.vector_store %arg6[%306, %c0_162, %c0_163], %309 {strides = array<i32>} : memref<16x2x128xf32, #tpu.memory_space<vmem>>, vector<1x2x128xf32>,
    %c8_i32_164 = arith.constant 8 : i32
    %c14_i32_165 = arith.constant 14 : i32
    %310 = arith.subi %c14_i32_165, %c8_i32_164 : i32
    %cst_166 = arith.constant dense<0.000000e+00> : vector<2x128xf32>
    %311 = tpu.matmul %305, %0, %cst_166 {dimension_numbers = #tpu.dot_dimension_numbers<[1], [0], [0], [1], [0, 0, 1, 1], [], []>} : vector<2x128xf32>, vector<128x128xf32>, vector<2x128xf32> -> vector<2x128xf32>
    %312 = arith.addf %311, %4 : vector<2x128xf32>
    %cst_167 = arith.constant 0.000000e+00 : f32
    %313 = vector.broadcast %cst_167 : f32 to vector<2x128xf32>
    %314 = arith.maximumf %312, %313 : vector<2x128xf32>
    %315 = arith.index_cast %310 : i32 to index
    %c0_168 = arith.constant 0 : index
    %c0_169 = arith.constant 0 : index
    %316 = vector.load %arg6[%315, %c0_168, %c0_169] : memref<16x2x128xf32, #tpu.memory_space<vmem>>, vector<1x2x128xf32>
    %317 = vector.shape_cast %316 : vector<1x2x128xf32> to vector<2x128xf32>
    %318 = arith.addf %314, %317 : vector<2x128xf32>
    %319 = arith.index_cast %310 : i32 to index
    %c0_170 = arith.constant 0 : index
    %c0_171 = arith.constant 0 : index
    %320 = vector.load %arg6[%319, %c0_170, %c0_171] : memref<16x2x128xf32, #tpu.memory_space<vmem>>, vector<1x2x128xf32>
    %321 = vector.shape_cast %320 : vector<1x2x128xf32> to vector<2x128xf32>
    %322 = vector.shape_cast %318 : vector<2x128xf32> to vector<1x2x128xf32>
    tpu.vector_store %arg6[%319, %c0_170, %c0_171], %322 {strides = array<i32>} : memref<16x2x128xf32, #tpu.memory_space<vmem>>, vector<1x2x128xf32>,
    %c9_i32_172 = arith.constant 9 : i32
    %c14_i32_173 = arith.constant 14 : i32
    %323 = arith.subi %c14_i32_173, %c9_i32_172 : i32
    %cst_174 = arith.constant dense<0.000000e+00> : vector<2x128xf32>
    %324 = tpu.matmul %318, %0, %cst_174 {dimension_numbers = #tpu.dot_dimension_numbers<[1], [0], [0], [1], [0, 0, 1, 1], [], []>} : vector<2x128xf32>, vector<128x128xf32>, vector<2x128xf32> -> vector<2x128xf32>
    %325 = arith.addf %324, %4 : vector<2x128xf32>
    %cst_175 = arith.constant 0.000000e+00 : f32
    %326 = vector.broadcast %cst_175 : f32 to vector<2x128xf32>
    %327 = arith.maximumf %325, %326 : vector<2x128xf32>
    %328 = arith.index_cast %323 : i32 to index
    %c0_176 = arith.constant 0 : index
    %c0_177 = arith.constant 0 : index
    %329 = vector.load %arg6[%328, %c0_176, %c0_177] : memref<16x2x128xf32, #tpu.memory_space<vmem>>, vector<1x2x128xf32>
    %330 = vector.shape_cast %329 : vector<1x2x128xf32> to vector<2x128xf32>
    %331 = arith.addf %327, %330 : vector<2x128xf32>
    %332 = arith.index_cast %323 : i32 to index
    %c0_178 = arith.constant 0 : index
    %c0_179 = arith.constant 0 : index
    %333 = vector.load %arg6[%332, %c0_178, %c0_179] : memref<16x2x128xf32, #tpu.memory_space<vmem>>, vector<1x2x128xf32>
    %334 = vector.shape_cast %333 : vector<1x2x128xf32> to vector<2x128xf32>
    %335 = vector.shape_cast %331 : vector<2x128xf32> to vector<1x2x128xf32>
    tpu.vector_store %arg6[%332, %c0_178, %c0_179], %335 {strides = array<i32>} : memref<16x2x128xf32, #tpu.memory_space<vmem>>, vector<1x2x128xf32>,
    %c10_i32_180 = arith.constant 10 : i32
    %c14_i32_181 = arith.constant 14 : i32
    %336 = arith.subi %c14_i32_181, %c10_i32_180 : i32
    %cst_182 = arith.constant dense<0.000000e+00> : vector<2x128xf32>
    %337 = tpu.matmul %331, %0, %cst_182 {dimension_numbers = #tpu.dot_dimension_numbers<[1], [0], [0], [1], [0, 0, 1, 1], [], []>} : vector<2x128xf32>, vector<128x128xf32>, vector<2x128xf32> -> vector<2x128xf32>
    %338 = arith.addf %337, %4 : vector<2x128xf32>
    %cst_183 = arith.constant 0.000000e+00 : f32
    %339 = vector.broadcast %cst_183 : f32 to vector<2x128xf32>
    %340 = arith.maximumf %338, %339 : vector<2x128xf32>
    %341 = arith.index_cast %336 : i32 to index
    %c0_184 = arith.constant 0 : index
    %c0_185 = arith.constant 0 : index
    %342 = vector.load %arg6[%341, %c0_184, %c0_185] : memref<16x2x128xf32, #tpu.memory_space<vmem>>, vector<1x2x128xf32>
    %343 = vector.shape_cast %342 : vector<1x2x128xf32> to vector<2x128xf32>
    %344 = arith.addf %340, %343 : vector<2x128xf32>
    %345 = arith.index_cast %336 : i32 to index
    %c0_186 = arith.constant 0 : index
    %c0_187 = arith.constant 0 : index
    %346 = vector.load %arg6[%345, %c0_186, %c0_187] : memref<16x2x128xf32, #tpu.memory_space<vmem>>, vector<1x2x128xf32>
    %347 = vector.shape_cast %346 : vector<1x2x128xf32> to vector<2x128xf32>
    %348 = vector.shape_cast %344 : vector<2x128xf32> to vector<1x2x128xf32>
    tpu.vector_store %arg6[%345, %c0_186, %c0_187], %348 {strides = array<i32>} : memref<16x2x128xf32, #tpu.memory_space<vmem>>, vector<1x2x128xf32>,
    %c11_i32_188 = arith.constant 11 : i32
    %c14_i32_189 = arith.constant 14 : i32
    %349 = arith.subi %c14_i32_189, %c11_i32_188 : i32
    %cst_190 = arith.constant dense<0.000000e+00> : vector<2x128xf32>
    %350 = tpu.matmul %344, %0, %cst_190 {dimension_numbers = #tpu.dot_dimension_numbers<[1], [0], [0], [1], [0, 0, 1, 1], [], []>} : vector<2x128xf32>, vector<128x128xf32>, vector<2x128xf32> -> vector<2x128xf32>
    %351 = arith.addf %350, %4 : vector<2x128xf32>
    %cst_191 = arith.constant 0.000000e+00 : f32
    %352 = vector.broadcast %cst_191 : f32 to vector<2x128xf32>
    %353 = arith.maximumf %351, %352 : vector<2x128xf32>
    %354 = arith.index_cast %349 : i32 to index
    %c0_192 = arith.constant 0 : index
    %c0_193 = arith.constant 0 : index
    %355 = vector.load %arg6[%354, %c0_192, %c0_193] : memref<16x2x128xf32, #tpu.memory_space<vmem>>, vector<1x2x128xf32>
    %356 = vector.shape_cast %355 : vector<1x2x128xf32> to vector<2x128xf32>
    %357 = arith.addf %353, %356 : vector<2x128xf32>
    %358 = arith.index_cast %349 : i32 to index
    %c0_194 = arith.constant 0 : index
    %c0_195 = arith.constant 0 : index
    %359 = vector.load %arg6[%358, %c0_194, %c0_195] : memref<16x2x128xf32, #tpu.memory_space<vmem>>, vector<1x2x128xf32>
    %360 = vector.shape_cast %359 : vector<1x2x128xf32> to vector<2x128xf32>
    %361 = vector.shape_cast %357 : vector<2x128xf32> to vector<1x2x128xf32>
    tpu.vector_store %arg6[%358, %c0_194, %c0_195], %361 {strides = array<i32>} : memref<16x2x128xf32, #tpu.memory_space<vmem>>, vector<1x2x128xf32>,
    %c12_i32_196 = arith.constant 12 : i32
    %c14_i32_197 = arith.constant 14 : i32
    %362 = arith.subi %c14_i32_197, %c12_i32_196 : i32
    %cst_198 = arith.constant dense<0.000000e+00> : vector<2x128xf32>
    %363 = tpu.matmul %357, %0, %cst_198 {dimension_numbers = #tpu.dot_dimension_numbers<[1], [0], [0], [1], [0, 0, 1, 1], [], []>} : vector<2x128xf32>, vector<128x128xf32>, vector<2x128xf32> -> vector<2x128xf32>
    %364 = arith.addf %363, %4 : vector<2x128xf32>
    %cst_199 = arith.constant 0.000000e+00 : f32
    %365 = vector.broadcast %cst_199 : f32 to vector<2x128xf32>
    %366 = arith.maximumf %364, %365 : vector<2x128xf32>
    %367 = arith.index_cast %362 : i32 to index
    %c0_200 = arith.constant 0 : index
    %c0_201 = arith.constant 0 : index
    %368 = vector.load %arg6[%367, %c0_200, %c0_201] : memref<16x2x128xf32, #tpu.memory_space<vmem>>, vector<1x2x128xf32>
    %369 = vector.shape_cast %368 : vector<1x2x128xf32> to vector<2x128xf32>
    %370 = arith.addf %366, %369 : vector<2x128xf32>
    %371 = arith.index_cast %362 : i32 to index
    %c0_202 = arith.constant 0 : index
    %c0_203 = arith.constant 0 : index
    %372 = vector.load %arg6[%371, %c0_202, %c0_203] : memref<16x2x128xf32, #tpu.memory_space<vmem>>, vector<1x2x128xf32>
    %373 = vector.shape_cast %372 : vector<1x2x128xf32> to vector<2x128xf32>
    %374 = vector.shape_cast %370 : vector<2x128xf32> to vector<1x2x128xf32>
    tpu.vector_store %arg6[%371, %c0_202, %c0_203], %374 {strides = array<i32>} : memref<16x2x128xf32, #tpu.memory_space<vmem>>, vector<1x2x128xf32>,
    %c13_i32_204 = arith.constant 13 : i32
    %c14_i32_205 = arith.constant 14 : i32
    %375 = arith.subi %c14_i32_205, %c13_i32_204 : i32
    %cst_206 = arith.constant dense<0.000000e+00> : vector<2x128xf32>
    %376 = tpu.matmul %370, %0, %cst_206 {dimension_numbers = #tpu.dot_dimension_numbers<[1], [0], [0], [1], [0, 0, 1, 1], [], []>} : vector<2x128xf32>, vector<128x128xf32>, vector<2x128xf32> -> vector<2x128xf32>
    %377 = arith.addf %376, %4 : vector<2x128xf32>
    %cst_207 = arith.constant 0.000000e+00 : f32
    %378 = vector.broadcast %cst_207 : f32 to vector<2x128xf32>
    %379 = arith.maximumf %377, %378 : vector<2x128xf32>
    %380 = arith.index_cast %375 : i32 to index
    %c0_208 = arith.constant 0 : index
    %c0_209 = arith.constant 0 : index
    %381 = vector.load %arg6[%380, %c0_208, %c0_209] : memref<16x2x128xf32, #tpu.memory_space<vmem>>, vector<1x2x128xf32>
    %382 = vector.shape_cast %381 : vector<1x2x128xf32> to vector<2x128xf32>
    %383 = arith.addf %379, %382 : vector<2x128xf32>
    %384 = arith.index_cast %375 : i32 to index
    %c0_210 = arith.constant 0 : index
    %c0_211 = arith.constant 0 : index
    %385 = vector.load %arg6[%384, %c0_210, %c0_211] : memref<16x2x128xf32, #tpu.memory_space<vmem>>, vector<1x2x128xf32>
    %386 = vector.shape_cast %385 : vector<1x2x128xf32> to vector<2x128xf32>
    %387 = vector.shape_cast %383 : vector<2x128xf32> to vector<1x2x128xf32>
    tpu.vector_store %arg6[%384, %c0_210, %c0_211], %387 {strides = array<i32>} : memref<16x2x128xf32, #tpu.memory_space<vmem>>, vector<1x2x128xf32>,
    %c14_i32_212 = arith.constant 14 : i32
    %c14_i32_213 = arith.constant 14 : i32
    %388 = arith.subi %c14_i32_213, %c14_i32_212 : i32
    %cst_214 = arith.constant dense<0.000000e+00> : vector<2x128xf32>
    %389 = tpu.matmul %383, %0, %cst_214 {dimension_numbers = #tpu.dot_dimension_numbers<[1], [0], [0], [1], [0, 0, 1, 1], [], []>} : vector<2x128xf32>, vector<128x128xf32>, vector<2x128xf32> -> vector<2x128xf32>
    %390 = arith.addf %389, %4 : vector<2x128xf32>
    %cst_215 = arith.constant 0.000000e+00 : f32
    %391 = vector.broadcast %cst_215 : f32 to vector<2x128xf32>
    %392 = arith.maximumf %390, %391 : vector<2x128xf32>
    %393 = arith.index_cast %388 : i32 to index
    %c0_216 = arith.constant 0 : index
    %c0_217 = arith.constant 0 : index
    %394 = vector.load %arg6[%393, %c0_216, %c0_217] : memref<16x2x128xf32, #tpu.memory_space<vmem>>, vector<1x2x128xf32>
    %395 = vector.shape_cast %394 : vector<1x2x128xf32> to vector<2x128xf32>
    %396 = arith.addf %392, %395 : vector<2x128xf32>
    %397 = arith.index_cast %388 : i32 to index
    %c0_218 = arith.constant 0 : index
    %c0_219 = arith.constant 0 : index
    %398 = vector.load %arg6[%397, %c0_218, %c0_219] : memref<16x2x128xf32, #tpu.memory_space<vmem>>, vector<1x2x128xf32>
    %399 = vector.shape_cast %398 : vector<1x2x128xf32> to vector<2x128xf32>
    %400 = vector.shape_cast %396 : vector<2x128xf32> to vector<1x2x128xf32>
    tpu.vector_store %arg6[%397, %c0_218, %c0_219], %400 {strides = array<i32>} : memref<16x2x128xf32, #tpu.memory_space<vmem>>, vector<1x2x128xf32>,
    %c15_i32_220 = arith.constant 15 : i32
    %c0_i32_221 = arith.constant 0 : i32
    %401 = arith.index_cast %c0_i32_221 : i32 to index
    %c0_222 = arith.constant 0 : index
    %c0_223 = arith.constant 0 : index
    %402 = vector.load %arg6[%401, %c0_222, %c0_223] : memref<16x2x128xf32, #tpu.memory_space<vmem>>, vector<1x2x128xf32>
    %403 = vector.shape_cast %402 : vector<1x2x128xf32> to vector<2x128xf32>
    %cst_224 = arith.constant dense<0.000000e+00> : vector<2x512xf32>
    %404 = tpu.matmul %403, %1, %cst_224 {dimension_numbers = #tpu.dot_dimension_numbers<[1], [0], [0], [1], [0, 0, 1, 1], [], []>} : vector<2x128xf32>, vector<128x512xf32>, vector<2x512xf32> -> vector<2x512xf32>
    %405 = arith.index_cast %c0_i32_221 : i32 to index
    %c0_225 = arith.constant 0 : index
    %c0_226 = arith.constant 0 : index
    %406 = vector.load %arg5[%405, %c0_225, %c0_226] : memref<16x2x512xf32, #tpu.memory_space<vmem>>, vector<1x2x512xf32>
    %407 = vector.shape_cast %406 : vector<1x2x512xf32> to vector<2x512xf32>
    %408 = vector.shape_cast %404 : vector<2x512xf32> to vector<1x2x512xf32>
    tpu.vector_store %arg5[%405, %c0_225, %c0_226], %408 {strides = array<i32>} : memref<16x2x512xf32, #tpu.memory_space<vmem>>, vector<1x2x512xf32>,
    %c1_i32_227 = arith.constant 1 : i32
    %409 = arith.index_cast %c1_i32_227 : i32 to index
    %c0_228 = arith.constant 0 : index
    %c0_229 = arith.constant 0 : index
    %410 = vector.load %arg6[%409, %c0_228, %c0_229] : memref<16x2x128xf32, #tpu.memory_space<vmem>>, vector<1x2x128xf32>
    %411 = vector.shape_cast %410 : vector<1x2x128xf32> to vector<2x128xf32>
    %cst_230 = arith.constant dense<0.000000e+00> : vector<2x512xf32>
    %412 = tpu.matmul %411, %1, %cst_230 {dimension_numbers = #tpu.dot_dimension_numbers<[1], [0], [0], [1], [0, 0, 1, 1], [], []>} : vector<2x128xf32>, vector<128x512xf32>, vector<2x512xf32> -> vector<2x512xf32>
    %413 = arith.index_cast %c1_i32_227 : i32 to index
    %c0_231 = arith.constant 0 : index
    %c0_232 = arith.constant 0 : index
    %414 = vector.load %arg5[%413, %c0_231, %c0_232] : memref<16x2x512xf32, #tpu.memory_space<vmem>>, vector<1x2x512xf32>
    %415 = vector.shape_cast %414 : vector<1x2x512xf32> to vector<2x512xf32>
    %416 = vector.shape_cast %412 : vector<2x512xf32> to vector<1x2x512xf32>
    tpu.vector_store %arg5[%413, %c0_231, %c0_232], %416 {strides = array<i32>} : memref<16x2x512xf32, #tpu.memory_space<vmem>>, vector<1x2x512xf32>,
    %c2_i32_233 = arith.constant 2 : i32
    %417 = arith.index_cast %c2_i32_233 : i32 to index
    %c0_234 = arith.constant 0 : index
    %c0_235 = arith.constant 0 : index
    %418 = vector.load %arg6[%417, %c0_234, %c0_235] : memref<16x2x128xf32, #tpu.memory_space<vmem>>, vector<1x2x128xf32>
    %419 = vector.shape_cast %418 : vector<1x2x128xf32> to vector<2x128xf32>
    %cst_236 = arith.constant dense<0.000000e+00> : vector<2x512xf32>
    %420 = tpu.matmul %419, %1, %cst_236 {dimension_numbers = #tpu.dot_dimension_numbers<[1], [0], [0], [1], [0, 0, 1, 1], [], []>} : vector<2x128xf32>, vector<128x512xf32>, vector<2x512xf32> -> vector<2x512xf32>
    %421 = arith.index_cast %c2_i32_233 : i32 to index
    %c0_237 = arith.constant 0 : index
    %c0_238 = arith.constant 0 : index
    %422 = vector.load %arg5[%421, %c0_237, %c0_238] : memref<16x2x512xf32, #tpu.memory_space<vmem>>, vector<1x2x512xf32>
    %423 = vector.shape_cast %422 : vector<1x2x512xf32> to vector<2x512xf32>
    %424 = vector.shape_cast %420 : vector<2x512xf32> to vector<1x2x512xf32>
    tpu.vector_store %arg5[%421, %c0_237, %c0_238], %424 {strides = array<i32>} : memref<16x2x512xf32, #tpu.memory_space<vmem>>, vector<1x2x512xf32>,
    %c3_i32_239 = arith.constant 3 : i32
    %425 = arith.index_cast %c3_i32_239 : i32 to index
    %c0_240 = arith.constant 0 : index
    %c0_241 = arith.constant 0 : index
    %426 = vector.load %arg6[%425, %c0_240, %c0_241] : memref<16x2x128xf32, #tpu.memory_space<vmem>>, vector<1x2x128xf32>
    %427 = vector.shape_cast %426 : vector<1x2x128xf32> to vector<2x128xf32>
    %cst_242 = arith.constant dense<0.000000e+00> : vector<2x512xf32>
    %428 = tpu.matmul %427, %1, %cst_242 {dimension_numbers = #tpu.dot_dimension_numbers<[1], [0], [0], [1], [0, 0, 1, 1], [], []>} : vector<2x128xf32>, vector<128x512xf32>, vector<2x512xf32> -> vector<2x512xf32>
    %429 = arith.index_cast %c3_i32_239 : i32 to index
    %c0_243 = arith.constant 0 : index
    %c0_244 = arith.constant 0 : index
    %430 = vector.load %arg5[%429, %c0_243, %c0_244] : memref<16x2x512xf32, #tpu.memory_space<vmem>>, vector<1x2x512xf32>
    %431 = vector.shape_cast %430 : vector<1x2x512xf32> to vector<2x512xf32>
    %432 = vector.shape_cast %428 : vector<2x512xf32> to vector<1x2x512xf32>
    tpu.vector_store %arg5[%429, %c0_243, %c0_244], %432 {strides = array<i32>} : memref<16x2x512xf32, #tpu.memory_space<vmem>>, vector<1x2x512xf32>,
    %c4_i32_245 = arith.constant 4 : i32
    %433 = arith.index_cast %c4_i32_245 : i32 to index
    %c0_246 = arith.constant 0 : index
    %c0_247 = arith.constant 0 : index
    %434 = vector.load %arg6[%433, %c0_246, %c0_247] : memref<16x2x128xf32, #tpu.memory_space<vmem>>, vector<1x2x128xf32>
    %435 = vector.shape_cast %434 : vector<1x2x128xf32> to vector<2x128xf32>
    %cst_248 = arith.constant dense<0.000000e+00> : vector<2x512xf32>
    %436 = tpu.matmul %435, %1, %cst_248 {dimension_numbers = #tpu.dot_dimension_numbers<[1], [0], [0], [1], [0, 0, 1, 1], [], []>} : vector<2x128xf32>, vector<128x512xf32>, vector<2x512xf32> -> vector<2x512xf32>
    %437 = arith.index_cast %c4_i32_245 : i32 to index
    %c0_249 = arith.constant 0 : index
    %c0_250 = arith.constant 0 : index
    %438 = vector.load %arg5[%437, %c0_249, %c0_250] : memref<16x2x512xf32, #tpu.memory_space<vmem>>, vector<1x2x512xf32>
    %439 = vector.shape_cast %438 : vector<1x2x512xf32> to vector<2x512xf32>
    %440 = vector.shape_cast %436 : vector<2x512xf32> to vector<1x2x512xf32>
    tpu.vector_store %arg5[%437, %c0_249, %c0_250], %440 {strides = array<i32>} : memref<16x2x512xf32, #tpu.memory_space<vmem>>, vector<1x2x512xf32>,
    %c5_i32_251 = arith.constant 5 : i32
    %441 = arith.index_cast %c5_i32_251 : i32 to index
    %c0_252 = arith.constant 0 : index
    %c0_253 = arith.constant 0 : index
    %442 = vector.load %arg6[%441, %c0_252, %c0_253] : memref<16x2x128xf32, #tpu.memory_space<vmem>>, vector<1x2x128xf32>
    %443 = vector.shape_cast %442 : vector<1x2x128xf32> to vector<2x128xf32>
    %cst_254 = arith.constant dense<0.000000e+00> : vector<2x512xf32>
    %444 = tpu.matmul %443, %1, %cst_254 {dimension_numbers = #tpu.dot_dimension_numbers<[1], [0], [0], [1], [0, 0, 1, 1], [], []>} : vector<2x128xf32>, vector<128x512xf32>, vector<2x512xf32> -> vector<2x512xf32>
    %445 = arith.index_cast %c5_i32_251 : i32 to index
    %c0_255 = arith.constant 0 : index
    %c0_256 = arith.constant 0 : index
    %446 = vector.load %arg5[%445, %c0_255, %c0_256] : memref<16x2x512xf32, #tpu.memory_space<vmem>>, vector<1x2x512xf32>
    %447 = vector.shape_cast %446 : vector<1x2x512xf32> to vector<2x512xf32>
    %448 = vector.shape_cast %444 : vector<2x512xf32> to vector<1x2x512xf32>
    tpu.vector_store %arg5[%445, %c0_255, %c0_256], %448 {strides = array<i32>} : memref<16x2x512xf32, #tpu.memory_space<vmem>>, vector<1x2x512xf32>,
    %c6_i32_257 = arith.constant 6 : i32
    %449 = arith.index_cast %c6_i32_257 : i32 to index
    %c0_258 = arith.constant 0 : index
    %c0_259 = arith.constant 0 : index
    %450 = vector.load %arg6[%449, %c0_258, %c0_259] : memref<16x2x128xf32, #tpu.memory_space<vmem>>, vector<1x2x128xf32>
    %451 = vector.shape_cast %450 : vector<1x2x128xf32> to vector<2x128xf32>
    %cst_260 = arith.constant dense<0.000000e+00> : vector<2x512xf32>
    %452 = tpu.matmul %451, %1, %cst_260 {dimension_numbers = #tpu.dot_dimension_numbers<[1], [0], [0], [1], [0, 0, 1, 1], [], []>} : vector<2x128xf32>, vector<128x512xf32>, vector<2x512xf32> -> vector<2x512xf32>
    %453 = arith.index_cast %c6_i32_257 : i32 to index
    %c0_261 = arith.constant 0 : index
    %c0_262 = arith.constant 0 : index
    %454 = vector.load %arg5[%453, %c0_261, %c0_262] : memref<16x2x512xf32, #tpu.memory_space<vmem>>, vector<1x2x512xf32>
    %455 = vector.shape_cast %454 : vector<1x2x512xf32> to vector<2x512xf32>
    %456 = vector.shape_cast %452 : vector<2x512xf32> to vector<1x2x512xf32>
    tpu.vector_store %arg5[%453, %c0_261, %c0_262], %456 {strides = array<i32>} : memref<16x2x512xf32, #tpu.memory_space<vmem>>, vector<1x2x512xf32>,
    %c7_i32_263 = arith.constant 7 : i32
    %457 = arith.index_cast %c7_i32_263 : i32 to index
    %c0_264 = arith.constant 0 : index
    %c0_265 = arith.constant 0 : index
    %458 = vector.load %arg6[%457, %c0_264, %c0_265] : memref<16x2x128xf32, #tpu.memory_space<vmem>>, vector<1x2x128xf32>
    %459 = vector.shape_cast %458 : vector<1x2x128xf32> to vector<2x128xf32>
    %cst_266 = arith.constant dense<0.000000e+00> : vector<2x512xf32>
    %460 = tpu.matmul %459, %1, %cst_266 {dimension_numbers = #tpu.dot_dimension_numbers<[1], [0], [0], [1], [0, 0, 1, 1], [], []>} : vector<2x128xf32>, vector<128x512xf32>, vector<2x512xf32> -> vector<2x512xf32>
    %461 = arith.index_cast %c7_i32_263 : i32 to index
    %c0_267 = arith.constant 0 : index
    %c0_268 = arith.constant 0 : index
    %462 = vector.load %arg5[%461, %c0_267, %c0_268] : memref<16x2x512xf32, #tpu.memory_space<vmem>>, vector<1x2x512xf32>
    %463 = vector.shape_cast %462 : vector<1x2x512xf32> to vector<2x512xf32>
    %464 = vector.shape_cast %460 : vector<2x512xf32> to vector<1x2x512xf32>
    tpu.vector_store %arg5[%461, %c0_267, %c0_268], %464 {strides = array<i32>} : memref<16x2x512xf32, #tpu.memory_space<vmem>>, vector<1x2x512xf32>,
    %c8_i32_269 = arith.constant 8 : i32
    %465 = arith.index_cast %c8_i32_269 : i32 to index
    %c0_270 = arith.constant 0 : index
    %c0_271 = arith.constant 0 : index
    %466 = vector.load %arg6[%465, %c0_270, %c0_271] : memref<16x2x128xf32, #tpu.memory_space<vmem>>, vector<1x2x128xf32>
    %467 = vector.shape_cast %466 : vector<1x2x128xf32> to vector<2x128xf32>
    %cst_272 = arith.constant dense<0.000000e+00> : vector<2x512xf32>
    %468 = tpu.matmul %467, %1, %cst_272 {dimension_numbers = #tpu.dot_dimension_numbers<[1], [0], [0], [1], [0, 0, 1, 1], [], []>} : vector<2x128xf32>, vector<128x512xf32>, vector<2x512xf32> -> vector<2x512xf32>
    %469 = arith.index_cast %c8_i32_269 : i32 to index
    %c0_273 = arith.constant 0 : index
    %c0_274 = arith.constant 0 : index
    %470 = vector.load %arg5[%469, %c0_273, %c0_274] : memref<16x2x512xf32, #tpu.memory_space<vmem>>, vector<1x2x512xf32>
    %471 = vector.shape_cast %470 : vector<1x2x512xf32> to vector<2x512xf32>
    %472 = vector.shape_cast %468 : vector<2x512xf32> to vector<1x2x512xf32>
    tpu.vector_store %arg5[%469, %c0_273, %c0_274], %472 {strides = array<i32>} : memref<16x2x512xf32, #tpu.memory_space<vmem>>, vector<1x2x512xf32>,
    %c9_i32_275 = arith.constant 9 : i32
    %473 = arith.index_cast %c9_i32_275 : i32 to index
    %c0_276 = arith.constant 0 : index
    %c0_277 = arith.constant 0 : index
    %474 = vector.load %arg6[%473, %c0_276, %c0_277] : memref<16x2x128xf32, #tpu.memory_space<vmem>>, vector<1x2x128xf32>
    %475 = vector.shape_cast %474 : vector<1x2x128xf32> to vector<2x128xf32>
    %cst_278 = arith.constant dense<0.000000e+00> : vector<2x512xf32>
    %476 = tpu.matmul %475, %1, %cst_278 {dimension_numbers = #tpu.dot_dimension_numbers<[1], [0], [0], [1], [0, 0, 1, 1], [], []>} : vector<2x128xf32>, vector<128x512xf32>, vector<2x512xf32> -> vector<2x512xf32>
    %477 = arith.index_cast %c9_i32_275 : i32 to index
    %c0_279 = arith.constant 0 : index
    %c0_280 = arith.constant 0 : index
    %478 = vector.load %arg5[%477, %c0_279, %c0_280] : memref<16x2x512xf32, #tpu.memory_space<vmem>>, vector<1x2x512xf32>
    %479 = vector.shape_cast %478 : vector<1x2x512xf32> to vector<2x512xf32>
    %480 = vector.shape_cast %476 : vector<2x512xf32> to vector<1x2x512xf32>
    tpu.vector_store %arg5[%477, %c0_279, %c0_280], %480 {strides = array<i32>} : memref<16x2x512xf32, #tpu.memory_space<vmem>>, vector<1x2x512xf32>,
    %c10_i32_281 = arith.constant 10 : i32
    %481 = arith.index_cast %c10_i32_281 : i32 to index
    %c0_282 = arith.constant 0 : index
    %c0_283 = arith.constant 0 : index
    %482 = vector.load %arg6[%481, %c0_282, %c0_283] : memref<16x2x128xf32, #tpu.memory_space<vmem>>, vector<1x2x128xf32>
    %483 = vector.shape_cast %482 : vector<1x2x128xf32> to vector<2x128xf32>
    %cst_284 = arith.constant dense<0.000000e+00> : vector<2x512xf32>
    %484 = tpu.matmul %483, %1, %cst_284 {dimension_numbers = #tpu.dot_dimension_numbers<[1], [0], [0], [1], [0, 0, 1, 1], [], []>} : vector<2x128xf32>, vector<128x512xf32>, vector<2x512xf32> -> vector<2x512xf32>
    %485 = arith.index_cast %c10_i32_281 : i32 to index
    %c0_285 = arith.constant 0 : index
    %c0_286 = arith.constant 0 : index
    %486 = vector.load %arg5[%485, %c0_285, %c0_286] : memref<16x2x512xf32, #tpu.memory_space<vmem>>, vector<1x2x512xf32>
    %487 = vector.shape_cast %486 : vector<1x2x512xf32> to vector<2x512xf32>
    %488 = vector.shape_cast %484 : vector<2x512xf32> to vector<1x2x512xf32>
    tpu.vector_store %arg5[%485, %c0_285, %c0_286], %488 {strides = array<i32>} : memref<16x2x512xf32, #tpu.memory_space<vmem>>, vector<1x2x512xf32>,
    %c11_i32_287 = arith.constant 11 : i32
    %489 = arith.index_cast %c11_i32_287 : i32 to index
    %c0_288 = arith.constant 0 : index
    %c0_289 = arith.constant 0 : index
    %490 = vector.load %arg6[%489, %c0_288, %c0_289] : memref<16x2x128xf32, #tpu.memory_space<vmem>>, vector<1x2x128xf32>
    %491 = vector.shape_cast %490 : vector<1x2x128xf32> to vector<2x128xf32>
    %cst_290 = arith.constant dense<0.000000e+00> : vector<2x512xf32>
    %492 = tpu.matmul %491, %1, %cst_290 {dimension_numbers = #tpu.dot_dimension_numbers<[1], [0], [0], [1], [0, 0, 1, 1], [], []>} : vector<2x128xf32>, vector<128x512xf32>, vector<2x512xf32> -> vector<2x512xf32>
    %493 = arith.index_cast %c11_i32_287 : i32 to index
    %c0_291 = arith.constant 0 : index
    %c0_292 = arith.constant 0 : index
    %494 = vector.load %arg5[%493, %c0_291, %c0_292] : memref<16x2x512xf32, #tpu.memory_space<vmem>>, vector<1x2x512xf32>
    %495 = vector.shape_cast %494 : vector<1x2x512xf32> to vector<2x512xf32>
    %496 = vector.shape_cast %492 : vector<2x512xf32> to vector<1x2x512xf32>
    tpu.vector_store %arg5[%493, %c0_291, %c0_292], %496 {strides = array<i32>} : memref<16x2x512xf32, #tpu.memory_space<vmem>>, vector<1x2x512xf32>,
    %c12_i32_293 = arith.constant 12 : i32
    %497 = arith.index_cast %c12_i32_293 : i32 to index
    %c0_294 = arith.constant 0 : index
    %c0_295 = arith.constant 0 : index
    %498 = vector.load %arg6[%497, %c0_294, %c0_295] : memref<16x2x128xf32, #tpu.memory_space<vmem>>, vector<1x2x128xf32>
    %499 = vector.shape_cast %498 : vector<1x2x128xf32> to vector<2x128xf32>
    %cst_296 = arith.constant dense<0.000000e+00> : vector<2x512xf32>
    %500 = tpu.matmul %499, %1, %cst_296 {dimension_numbers = #tpu.dot_dimension_numbers<[1], [0], [0], [1], [0, 0, 1, 1], [], []>} : vector<2x128xf32>, vector<128x512xf32>, vector<2x512xf32> -> vector<2x512xf32>
    %501 = arith.index_cast %c12_i32_293 : i32 to index
    %c0_297 = arith.constant 0 : index
    %c0_298 = arith.constant 0 : index
    %502 = vector.load %arg5[%501, %c0_297, %c0_298] : memref<16x2x512xf32, #tpu.memory_space<vmem>>, vector<1x2x512xf32>
    %503 = vector.shape_cast %502 : vector<1x2x512xf32> to vector<2x512xf32>
    %504 = vector.shape_cast %500 : vector<2x512xf32> to vector<1x2x512xf32>
    tpu.vector_store %arg5[%501, %c0_297, %c0_298], %504 {strides = array<i32>} : memref<16x2x512xf32, #tpu.memory_space<vmem>>, vector<1x2x512xf32>,
    %c13_i32_299 = arith.constant 13 : i32
    %505 = arith.index_cast %c13_i32_299 : i32 to index
    %c0_300 = arith.constant 0 : index
    %c0_301 = arith.constant 0 : index
    %506 = vector.load %arg6[%505, %c0_300, %c0_301] : memref<16x2x128xf32, #tpu.memory_space<vmem>>, vector<1x2x128xf32>
    %507 = vector.shape_cast %506 : vector<1x2x128xf32> to vector<2x128xf32>
    %cst_302 = arith.constant dense<0.000000e+00> : vector<2x512xf32>
    %508 = tpu.matmul %507, %1, %cst_302 {dimension_numbers = #tpu.dot_dimension_numbers<[1], [0], [0], [1], [0, 0, 1, 1], [], []>} : vector<2x128xf32>, vector<128x512xf32>, vector<2x512xf32> -> vector<2x512xf32>
    %509 = arith.index_cast %c13_i32_299 : i32 to index
    %c0_303 = arith.constant 0 : index
    %c0_304 = arith.constant 0 : index
    %510 = vector.load %arg5[%509, %c0_303, %c0_304] : memref<16x2x512xf32, #tpu.memory_space<vmem>>, vector<1x2x512xf32>
    %511 = vector.shape_cast %510 : vector<1x2x512xf32> to vector<2x512xf32>
    %512 = vector.shape_cast %508 : vector<2x512xf32> to vector<1x2x512xf32>
    tpu.vector_store %arg5[%509, %c0_303, %c0_304], %512 {strides = array<i32>} : memref<16x2x512xf32, #tpu.memory_space<vmem>>, vector<1x2x512xf32>,
    %c14_i32_305 = arith.constant 14 : i32
    %513 = arith.index_cast %c14_i32_305 : i32 to index
    %c0_306 = arith.constant 0 : index
    %c0_307 = arith.constant 0 : index
    %514 = vector.load %arg6[%513, %c0_306, %c0_307] : memref<16x2x128xf32, #tpu.memory_space<vmem>>, vector<1x2x128xf32>
    %515 = vector.shape_cast %514 : vector<1x2x128xf32> to vector<2x128xf32>
    %cst_308 = arith.constant dense<0.000000e+00> : vector<2x512xf32>
    %516 = tpu.matmul %515, %1, %cst_308 {dimension_numbers = #tpu.dot_dimension_numbers<[1], [0], [0], [1], [0, 0, 1, 1], [], []>} : vector<2x128xf32>, vector<128x512xf32>, vector<2x512xf32> -> vector<2x512xf32>
    %517 = arith.index_cast %c14_i32_305 : i32 to index
    %c0_309 = arith.constant 0 : index
    %c0_310 = arith.constant 0 : index
    %518 = vector.load %arg5[%517, %c0_309, %c0_310] : memref<16x2x512xf32, #tpu.memory_space<vmem>>, vector<1x2x512xf32>
    %519 = vector.shape_cast %518 : vector<1x2x512xf32> to vector<2x512xf32>
    %520 = vector.shape_cast %516 : vector<2x512xf32> to vector<1x2x512xf32>
    tpu.vector_store %arg5[%517, %c0_309, %c0_310], %520 {strides = array<i32>} : memref<16x2x512xf32, #tpu.memory_space<vmem>>, vector<1x2x512xf32>,
    %c15_i32_311 = arith.constant 15 : i32
    %521 = arith.index_cast %c15_i32_311 : i32 to index
    %c0_312 = arith.constant 0 : index
    %c0_313 = arith.constant 0 : index
    %522 = vector.load %arg6[%521, %c0_312, %c0_313] : memref<16x2x128xf32, #tpu.memory_space<vmem>>, vector<1x2x128xf32>
    %523 = vector.shape_cast %522 : vector<1x2x128xf32> to vector<2x128xf32>
    %cst_314 = arith.constant dense<0.000000e+00> : vector<2x512xf32>
    %524 = tpu.matmul %523, %1, %cst_314 {dimension_numbers = #tpu.dot_dimension_numbers<[1], [0], [0], [1], [0, 0, 1, 1], [], []>} : vector<2x128xf32>, vector<128x512xf32>, vector<2x512xf32> -> vector<2x512xf32>
    %525 = arith.index_cast %c15_i32_311 : i32 to index
    %c0_315 = arith.constant 0 : index
    %c0_316 = arith.constant 0 : index
    %526 = vector.load %arg5[%525, %c0_315, %c0_316] : memref<16x2x512xf32, #tpu.memory_space<vmem>>, vector<1x2x512xf32>
    %527 = vector.shape_cast %526 : vector<1x2x512xf32> to vector<2x512xf32>
    %528 = vector.shape_cast %524 : vector<2x512xf32> to vector<1x2x512xf32>
    tpu.vector_store %arg5[%525, %c0_315, %c0_316], %528 {strides = array<i32>} : memref<16x2x512xf32, #tpu.memory_space<vmem>>, vector<1x2x512xf32>,
    %c16_i32 = arith.constant 16 : i32
    return
  }
  func.func @transform_0(%arg0: i32) -> (i32, i32, i32) {
    %c0_i32 = arith.constant 0 : i32
    %c0_i32_0 = arith.constant 0 : i32
    %c0_i32_1 = arith.constant 0 : i32
    return %c0_i32, %arg0, %c0_i32_0 : i32, i32, i32
  }
  func.func @transform_1(%arg0: i32) -> (i32, i32) {
    %c0_i32 = arith.constant 0 : i32
    %c0_i32_0 = arith.constant 0 : i32
    %c0_i32_1 = arith.constant 0 : i32
    return %c0_i32, %c0_i32_0 : i32, i32
  }
  func.func @transform_2(%arg0: i32) -> (i32, i32) {
    %c0_i32 = arith.constant 0 : i32
    %c0_i32_0 = arith.constant 0 : i32
    %c0_i32_1 = arith.constant 0 : i32
    return %c0_i32, %c0_i32_0 : i32, i32
  }
  func.func @transform_3(%arg0: i32) -> (i32, i32) {
    %c0_i32 = arith.constant 0 : i32
    %c0_i32_0 = arith.constant 0 : i32
    %c0_i32_1 = arith.constant 0 : i32
    return %c0_i32, %c0_i32_0 : i32, i32
  }
  func.func @transform_4(%arg0: i32) -> (i32, i32, i32) {
    %c0_i32 = arith.constant 0 : i32
    %c0_i32_0 = arith.constant 0 : i32
    %c0_i32_1 = arith.constant 0 : i32
    return %c0_i32, %arg0, %c0_i32_0 : i32, i32, i32
  }
}

</mosaic_0001>

<bundles_post_ra>
// kernel: tile.13
= control target key start
LH: loop header
LB: loop body
LE: loop exit
PB: predicated region body
PF: predicated region fallthrough
CT: control target
= control target key end

     0   :  { %s28_s0 = inlined_call_operand.vmem [shape: f32[8], index: 0, kind: input, shape index: {}]   ;;  %s29_s1 = inlined_call_operand.vmem [shape: f32[16,8], index: 1, kind: output, shape index: {}]  }
   0x1   :  { %v4_v0 = vld [vmem:[%s28_s0] ss:$0 sm:$0xff] }
   0x2   :  { %5 = vst [vmem:[%s29_s1] sm:$0xff] %v4_v0  ;;  %8 = vst [vmem:[%s29_s1 + $0x8] sm:$0xff] %v4_v0 }

// kernel: tile.14
= control target key start
LH: loop header
LB: loop body
LE: loop exit
PB: predicated region body
PF: predicated region fallthrough
CT: control target
= control target key end

     0   :  { %s131_s10 = smov 120   ;;  %s132_s11 = smov 104   ;;  %vm3_vm0 = vcmask 64512   ;;  %vm9_vm1 = vcmask 1048512   ;;  %vm15_vm2 = vcmask 982912   ;;  %vm21_vm3 = vcmask 917312   ;;  %s207_s0 = inlined_call_operand.vmem [shape: f32[16,8], index: 0, kind: input, shape index: {}]   ;;  %s208_s1 = inlined_call_operand.vmem [shape: f32[1,128], index: 1, kind: output, shape index: {}]  }
   0x1   :  { %v101_v0 = vld [vmem:[%s207_s0 + $0xf] sm:$0x1]   ;;  %v103_v1 = vld [vmem:[%s207_s0 + $0xd] sm:$0x1]   ;;  %v102_v2 = vld [vmem:[%s207_s0 + $0xe] sm:$0x1]  }
   0x2   :  { %7 = vrot.lane.b32.xlu0 %v101_v0, %s131_s10  ;;  %19 = vrot.lane.b32.xlu1 %v103_v1, %s132_s11  ;;  %v104_v3 = vld [vmem:[%s207_s0 + $0xc] sm:$0x1]   ;;  %s133_s16 = smov 112   ;;  %s134_s17 = smov 96   ;;  %v105_v4 = vld [vmem:[%s207_s0 + $0xb] sm:$0x1]  }
   0x3   :  { %v106_v5 = vld [vmem:[%s207_s0 + $0xa] sm:$0x1]   ;;  %v2_v6 = vld [vmem:[%s207_s0] sm:$0x1]   ;;  %s135_s24 = smov 88   ;;  %s136_s25 = smov 80  }
   0x4   :  { %4 = vst.msk [vmem:[#allocation0] sm:$0x1] %vm3_vm0, %v2_v6   ;;  %v107_v7 = vld [vmem:[%s207_s0 + $0x9] sm:$0x1]   ;;  %v108_v8 = vld [vmem:[%s207_s0 + $0x8] sm:$0x1]  }
   0x5   :  { %s137_s30 = smov 72   ;;  %s138_s2 = smov 64   ;;  %v109_v9 = vld [vmem:[%s207_s0 + $0x7] sm:$0x1]   ;;  %v110_v10 = vld [vmem:[%s207_s0 + $0x6] sm:$0x1]  }
   0x6   :  { %13 = vrot.lane.b32.xlu0 %v102_v2, %s133_s16  ;;  %25 = vrot.lane.b32.xlu1 %v104_v3, %s134_s17  ;;  %s139_s7 = smov 56   ;;  %s140_s8 = smov 48   ;;  %v111_v11 = vld [vmem:[%s207_s0 + $0x5] sm:$0x1]   ;;  %v112_v12 = vld [vmem:[%s207_s0 + $0x4] sm:$0x1]  }
   0x7   :  { %s141_s13 = smov 40   ;;  %s142_s14 = smov 32   ;;  %v113_v13 = vld [vmem:[%s207_s0 + $0x3] sm:$0x1]   ;;  %v114_v14 = vld [vmem:[%s207_s0 + $0x2] sm:$0x1]  }
   0x8   :  { %s143_s19 = smov 24   ;;  %s144_s20 = smov 16   ;;  %v115_v15 = vld [vmem:[%s207_s0 + $0x1] sm:$0x1]   ;;  %vm27_vm4 = vcmask 851712   ;;  %vm33_vm5 = vcmask 786112  }
   0x9   :  { %s145_s0 = smov 8   ;;  %vm39_vm6 = vcmask 720512   ;;  %vm45_vm7 = vcmask 654912   ;;  %vm51_vm8 = vcmask 589312   ;;  %vm57_vm9 = vcmask 523712  }
   0xa   :  { %31 = vrot.lane.b32.xlu0 %v105_v4, %s135_s24  ;;  %37 = vrot.lane.b32.xlu1 %v106_v5, %s136_s25  ;;  %vm63_vm10 = vcmask 458112   ;;  %vm69_vm11 = vcmask 392512   ;;  %vm75_vm12 = vcmask 326912   ;;  %vm81_vm13 = vcmask 261312  }
   0xb   :  { %vm87_vm14 = vcmask 195712   ;;  %vm93_vm15 = vcmask 130112  }
   0xe   :  { %43 = vrot.lane.b32.xlu0 %v107_v7, %s137_s30  ;;  %49 = vrot.lane.b32.xlu1 %v108_v8, %s138_s2 }
  0x12   :  { %55 = vrot.lane.b32.xlu0 %v109_v9, %s139_s7  ;;  %61 = vrot.lane.b32.xlu1 %v110_v10, %s140_s8 }
  0x16   :  { %67 = vrot.lane.b32.xlu0 %v111_v11, %s141_s13  ;;  %73 = vrot.lane.b32.xlu1 %v112_v12, %s142_s14 }
  0x1a   :  { %79 = vrot.lane.b32.xlu0 %v113_v13, %s143_s19  ;;  %85 = vrot.lane.b32.xlu1 %v114_v14, %s144_s20 }
  0x1e   :  { %91 = vrot.lane.b32.xlu0 %v115_v15, %s145_s0 }
  0x74   :  { %v8_v16 = vpop.permute.xlu0 %7   ;;  %v20_v17 = vpop.permute.xlu1 %19  }
  0x75   :  { %10 = vst.msk [vmem:[#allocation0] sm:$0x1] %vm9_vm1, %v8_v16  }
  0x78   :  { %v14_v18 = vpop.permute.xlu0 %13   ;;  %v26_v19 = vpop.permute.xlu1 %25  }
  0x79   :  { %16 = vst.msk [vmem:[#allocation0] sm:$0x1] %vm15_vm2, %v14_v18  }
  0x7a   :  { %22 = vst.msk [vmem:[#allocation0] sm:$0x1] %vm21_vm3, %v20_v17  }
  0x7b   :  { %28 = vst.msk [vmem:[#allocation0] sm:$0x1] %vm27_vm4, %v26_v19  }
  0x7c   :  { %v32_v20 = vpop.permute.xlu0 %31   ;;  %v38_v21 = vpop.permute.xlu1 %37  }
  0x7d   :  { %34 = vst.msk [vmem:[#allocation0] sm:$0x1] %vm33_vm5, %v32_v20  }
  0x7e   :  { %40 = vst.msk [vmem:[#allocation0] sm:$0x1] %vm39_vm6, %v38_v21  }
  0x80   :  { %v44_v22 = vpop.permute.xlu0 %43   ;;  %v50_v23 = vpop.permute.xlu1 %49  }
  0x81   :  { %46 = vst.msk [vmem:[#allocation0] sm:$0x1] %vm45_vm7, %v44_v22  }
  0x82   :  { %52 = vst.msk [vmem:[#allocation0] sm:$0x1] %vm51_vm8, %v50_v23  }
  0x84   :  { %v56_v24 = vpop.permute.xlu0 %55   ;;  %v62_v25 = vpop.permute.xlu1 %61  }
  0x85   :  { %58 = vst.msk [vmem:[#allocation0] sm:$0x1] %vm57_vm9, %v56_v24  }
  0x86   :  { %64 = vst.msk [vmem:[#allocation0] sm:$0x1] %vm63_vm10, %v62_v25  }
  0x88   :  { %v68_v26 = vpop.permute.xlu0 %67   ;;  %v74_v27 = vpop.permute.xlu1 %73  }
  0x89   :  { %70 = vst.msk [vmem:[#allocation0] sm:$0x1] %vm69_vm11, %v68_v26  }
  0x8a   :  { %76 = vst.msk [vmem:[#allocation0] sm:$0x1] %vm75_vm12, %v74_v27  }
  0x8c   :  { %v80_v28 = vpop.permute.xlu0 %79   ;;  %v86_v29 = vpop.permute.xlu1 %85  }
  0x8d   :  { %82 = vst.msk [vmem:[#allocation0] sm:$0x1] %vm81_vm13, %v80_v28  }
  0x8e   :  { %88 = vst.msk [vmem:[#allocation0] sm:$0x1] %vm87_vm14, %v86_v29  }
  0x90   :  { %v92_v30 = vpop.permute.xlu0 %91  }
  0x91   :  { %94 = vst.msk [vmem:[#allocation0] sm:$0x1] %vm93_vm15, %v92_v30  }
  0x98   :  { %v98_v31 = vld [vmem:[#allocation0] sm:$0x1] }
  0x99   :  { %100 = vst [vmem:[%s208_s1] sm:$0x1] %v98_v31 }

// kernel: mul.46
= control target key start
LH: loop header
LB: loop body
LE: loop exit
PB: predicated region body
PF: predicated region fallthrough
CT: control target
= control target key end

     0   :  { %s97_s22 = smov 3  ;;  %s100_s25 = smov 12  ;;  %vm84_vm0 = vcmask 1043458   ;;  %vm88_vm1 = vcmask 1045508   ;;  %vm92_vm2 = vcmask 1047558   ;;  %vm94_vm3 = vcmask 64512   ;;  %s279_s0 = inlined_call_operand.vmem [shape: f32[8,2,2,8], index: 0, kind: input, shape index: {}]   ;;  %s280_s1 = inlined_call_operand.vmem [shape: f32[8,32], index: 1, kind: output, shape index: {}]  }
   0x1   :  { %v176_v0 = vld [vmem:[%s279_s0 + $0x1e] sm:$0x3]  ;;  %v178_v1 = vld [vmem:[%s279_s0 + $0x1a] sm:$0x3]  ;;  %v180_v2 = vld [vmem:[%s279_s0 + $0x16] sm:$0x3] }
   0x2   :  { %8 = vst [vmem:[#allocation0 + $0x78] sm:$0x3] %v176_v0  ;;  %18 = vst [vmem:[#allocation0 + $0x68] sm:$0x3] %v178_v1  ;;  %v182_v3 = vld [vmem:[%s279_s0 + $0x12] sm:$0x3] }
   0x3   :  { %28 = vst [vmem:[#allocation0 + $0x58] sm:$0x3] %v180_v2  ;;  %v184_v4 = vld [vmem:[%s279_s0 + $0xe] sm:$0x3]  ;;  %v186_v5 = vld [vmem:[%s279_s0 + $0xa] sm:$0x3] }
   0x4   :  { %38 = vst [vmem:[#allocation0 + $0x48] sm:$0x3] %v182_v3  ;;  %48 = vst [vmem:[#allocation0 + $0x38] sm:$0x3] %v184_v4  ;;  %v188_v6 = vld [vmem:[%s279_s0 + $0x6] sm:$0x3] }
   0x5   :  { %58 = vst [vmem:[#allocation0 + $0x28] sm:$0x3] %v186_v5  ;;  %v190_v7 = vld [vmem:[%s279_s0 + $0x2] sm:$0x3]  ;;  %68 = vst [vmem:[#allocation0 + $0x18] sm:$0x3] %v188_v6 }
   0x6   :  { %77 = vst [vmem:[#allocation0 + $0x8] sm:$0x3] %v190_v7  ;;  %v177_v8 = vld [vmem:[%s279_s0 + $0x1c] sm:$0x3]  ;;  %s105_s26 = smov 48  ;;  %s110_s2 = smov 192 }
   0x7   :  { %13 = vst [vmem:[#allocation0 + $0x70] sm:$0x3] %v177_v8  ;;  %v179_v9 = vld [vmem:[%s279_s0 + $0x18] sm:$0x3]  ;;  %v181_v10 = vld [vmem:[%s279_s0 + $0x14] sm:$0x3] }
   0x8   :  { %23 = vst [vmem:[#allocation0 + $0x60] sm:$0x3] %v179_v9  ;;  %33 = vst [vmem:[#allocation0 + $0x50] sm:$0x3] %v181_v10  ;;  %v183_v11 = vld [vmem:[%s279_s0 + $0x10] sm:$0x3] }
   0x9   :  { %v185_v12 = vld [vmem:[%s279_s0 + $0xc] sm:$0x3]  ;;  %s119_s7 = smov 3  ;;  %s122_s8 = smov 12  ;;  %43 = vst [vmem:[#allocation0 + $0x40] sm:$0x3] %v183_v11 }
   0xa   :  { %53 = vst [vmem:[#allocation0 + $0x30] sm:$0x3] %v185_v12  ;;  %v187_v13 = vld [vmem:[%s279_s0 + $0x8] sm:$0x3]  ;;  %v189_v14 = vld [vmem:[%s279_s0 + $0x4] sm:$0x3] }
   0xb   :  { %s127_s13 = smov 48  ;;  %s132_s14 = smov 192  ;;  %63 = vst [vmem:[#allocation0 + $0x20] sm:$0x3] %v187_v13  ;;  %73 = vst [vmem:[#allocation0 + $0x10] sm:$0x3] %v189_v14 }
   0xc   :  { %v78_v15 = vld [vmem:[%s279_s0] sm:$0x3]  ;;  %s141_s0 = smov 3  ;;  %s144_s17 = smov 12  ;;  %vm116_vm4 = vcmask 261312   ;;  %vm138_vm5 = vcmask 195712  }
   0xd   :  { %79 = vst [vmem:[#allocation0] sm:$0x3] %v78_v15  ;;  %s149_s18 = smov 48  ;;  %v98_v16 = vld [vmem:[#allocation0 + $0x9] ss:$16 sm:%s97_s22]   ;;  %s154_s19 = smov 192 }
   0xe   :  { %v101_v17 = vld [vmem:[#allocation0 + $0x9] ss:$16 sm:%s100_s25]   ;;  %v120_v21 = vld [vmem:[#allocation0 + $0x8] ss:$16 sm:%s119_s7]   ;;  %s80_s20 = smov 3  ;;  %s82_s21 = smov 12 }
   0xf   :  { %v106_v18 = vld [vmem:[#allocation0 + $0x9] ss:$16 sm:%s105_s26]   ;;  %v103_v19 = vsel %vm84_vm0, %v101_v17, %v98_v16  ;;  %v123_v22 = vld [vmem:[#allocation0 + $0x8] ss:$16 sm:%s122_s8]   ;;  %s194_s22 = smov 24   ;;  %s86_s23 = smov 48 }
  0x10   :  { %v111_v20 = vld [vmem:[#allocation0 + $0x9] ss:$16 sm:%s110_s2]   ;;  %v108_v23 = vsel %vm88_vm1, %v106_v18, %v103_v19  ;;  %v125_v24 = vsel %vm84_vm0, %v123_v22, %v120_v21  ;;  %v128_v25 = vld [vmem:[#allocation0 + $0x8] ss:$16 sm:%s127_s13]   ;;  %s90_s24 = smov 192  ;;  %s195_s25 = smov 16  }
  0x11   :  { %v133_v26 = vld [vmem:[#allocation0 + $0x8] ss:$16 sm:%s132_s14]   ;;  %v113_v27 = vsel %vm92_vm2, %v111_v20, %v108_v23  ;;  %v130_v28 = vsel %vm88_vm1, %v128_v25, %v125_v24  ;;  %s196_s26 = smov 8   ;;  %vm160_vm6 = vcmask 130112  }
  0x12   :  { %114 = vrot.lane.b32.xlu0 %v113_v27, %s194_s22  ;;  %v135_v29 = vsel %vm92_vm2, %v133_v26, %v130_v28 }
  0x14   :  { %v142_v30 = vld [vmem:[#allocation0 + $0x1] ss:$16 sm:%s141_s0]   ;;  %v81_v35 = vld [vmem:[#allocation0] ss:$16 sm:%s80_s20]  }
  0x15   :  { %v145_v31 = vld [vmem:[#allocation0 + $0x1] ss:$16 sm:%s144_s17]   ;;  %v83_v36 = vld [vmem:[#allocation0] ss:$16 sm:%s82_s21]  }
  0x16   :  { %v150_v32 = vld [vmem:[#allocation0 + $0x1] ss:$16 sm:%s149_s18]   ;;  %v147_v33 = vsel %vm84_vm0, %v145_v31, %v142_v30  ;;  %v85_v38 = vsel %vm84_vm0, %v83_v36, %v81_v35  ;;  %v87_v39 = vld [vmem:[#allocation0] ss:$16 sm:%s86_s23]   ;;  %136 = vrot.lane.b32.xlu0 %v135_v29, %s195_s25 }
  0x17   :  { %v155_v34 = vld [vmem:[#allocation0 + $0x1] ss:$16 sm:%s154_s19]   ;;  %v152_v37 = vsel %vm88_vm1, %v150_v32, %v147_v33  ;;  %v91_v40 = vld [vmem:[#allocation0] ss:$16 sm:%s90_s24]   ;;  %v89_v42 = vsel %vm88_vm1, %v87_v39, %v85_v38 }
  0x18   :  { %v157_v41 = vsel %vm92_vm2, %v155_v34, %v152_v37  ;;  %v93_v43 = vsel %vm92_vm2, %v91_v40, %v89_v42 }
  0x19   :  { %158 = vrot.lane.b32.xlu1 %v157_v41, %s196_s26  ;;  %95 = vst.msk [vmem:[%s280_s1] sm:$0xff] %vm94_vm3, %v93_v43  }
  0x84   :  { %v115_v44 = vpop.permute.xlu0 %114  }
  0x85   :  { %117 = vst.msk [vmem:[%s280_s1] sm:$0xff] %vm116_vm4, %v115_v44  }
  0x88   :  { %v137_v45 = vpop.permute.xlu0 %136  }
  0x89   :  { %139 = vst.msk [vmem:[%s280_s1] sm:$0xff] %vm138_vm5, %v137_v45  }
  0x8b   :  { %v159_v46 = vpop.permute.xlu1 %158  }
  0x8c   :  { %161 = vst.msk [vmem:[%s280_s1] sm:$0xff] %vm160_vm6, %v159_v46  }

// kernel: ssr_upsampling2.2
= control target key start
LH: loop header
LB: loop body
LE: loop exit
PB: predicated region body
PF: predicated region fallthrough
CT: control target
= control target key end

     0   :  { %v6507_v0 = vmov 0.0|0.0   ;;  %vm6508_vm0 = vmmov 0   ;;  %v6509_v4 = vmov 0.0   ;;  %vm49_vm1 = vcmask 523264   ;;  %s7483_s1 = inlined_call_operand.vmem [shape: f32[64,128], index: 1, kind: input, shape index: {}]   ;;  %s7484_s0 = inlined_call_operand.vmem [shape: f32[16,2,64], index: 0, kind: input, shape index: {}]   ;;  %s7485_s2 = inlined_call_operand.vmem [shape: f32[128,128], index: 2, kind: input, shape index: {}]   ;;  %s7486_s3 = inlined_call_operand.vmem [shape: f32[1,128], index: 3, kind: input, shape index: {}]   ;;  %s7487_s4 = inlined_call_operand.vmem [shape: bf16[16,2,128], index: 4, kind: output, shape index: {}]  }
   0x1   :  { %5591 = vmatprep.subr.bf16.mxu0 %v6507_v0  ;;  %v17_v1 = vld [vmem:[%s7483_s1] sm:$0xff]  ;;  %v18_v2 = vld [vmem:[%s7483_s1 + $0x8] sm:$0xff]  ;;  %v19_v3 = vld [vmem:[%s7483_s1 + $0x10] sm:$0xff]  ;;  %4253 = vmatprep.mubr.msk.f32.mxu0 %vm6508_vm0, %v6509_v4 }
   0x2   :  { %v6547_v5 = vpack.c.bf16 %v18_v2, %v17_v1  ;;  %v20_v6 = vld [vmem:[%s7483_s1 + $0x18] sm:$0xff]  ;;  %5603 = vmatprep.subr.bf16.mxu1 %v6507_v0  ;;  %4272 = vmatprep.mubr.msk.f32.mxu1 %vm6508_vm0, %v6509_v4  ;;  %v21_v8 = vld [vmem:[%s7483_s1 + $0x20] sm:$0xff]  ;;  %v22_v9 = vld [vmem:[%s7483_s1 + $0x28] sm:$0xff] }
   0x3   :  { %v6556_v7 = vpack.c.bf16 %v20_v6, %v19_v3  ;;  %v6568_v10 = vpack.c.bf16 %v22_v9, %v21_v8  ;;  %v23_v11 = vld [vmem:[%s7483_s1 + $0x30] sm:$0xff]  ;;  %v24_v12 = vld [vmem:[%s7483_s1 + $0x38] sm:$0xff]  ;;  %v48_v14 = vld [vmem:[%s7484_s0] sm:$0x3] }
   0x4   :  { %5593 = vmatpush3.bf16.msra.mxu0 %v6547_v5  ;;  %5605 = vmatpush3.bf16.msra.mxu1 %v6547_v5  ;;  %v6580_v13 = vpack.c.bf16 %v24_v12, %v23_v11  ;;  %v3540_v15 = vld [vmem:[%s7484_s0 + $0x4] sm:$0x3]  ;;  %v3544_v16 = vld [vmem:[%s7484_s0 + $0x8] sm:$0x3]  ;;  %v3548_v17 = vld [vmem:[%s7484_s0 + $0xc] sm:$0x3] }
   0x5   :  { %5594 = vmatprep.subr.bf16.mxu0 %v6507_v0  ;;  %5606 = vmatprep.subr.bf16.mxu1 %v6507_v0  ;;  %v3552_v18 = vld [vmem:[%s7484_s0 + $0x10] sm:$0x3]  ;;  %v3556_v19 = vld [vmem:[%s7484_s0 + $0x14] sm:$0x3]  ;;  %v3538_v20 = vld [vmem:[%s7484_s0 + $0x2] sm:$0x3] }
   0x6   :  { %v3560_v21 = vld [vmem:[%s7484_s0 + $0x18] sm:$0x3]  ;;  %v3542_v22 = vld [vmem:[%s7484_s0 + $0x6] sm:$0x3]  ;;  %v26_v24 = vld [vmem:[%s7485_s2 + $0x8] sm:$0xff] }
   0x7   :  { %v25_v23 = vld [vmem:[%s7485_s2] sm:$0xff]  ;;  %v3564_v25 = vld [vmem:[%s7484_s0 + $0x1c] sm:$0x3]  ;;  %v27_v27 = vld [vmem:[%s7485_s2 + $0x10] sm:$0xff] }
   0x8   :  { %5596 = vmatpush3.bf16.msra.mxu0 %v6556_v7  ;;  %5608 = vmatpush3.bf16.msra.mxu1 %v6556_v7  ;;  %v6719_v26 = vpack.c.bf16 %v26_v24, %v25_v23  ;;  %v28_v28 = vld [vmem:[%s7485_s2 + $0x18] sm:$0xff]  ;;  %v29_v30 = vld [vmem:[%s7485_s2 + $0x20] sm:$0xff]  ;;  %v30_v31 = vld [vmem:[%s7485_s2 + $0x28] sm:$0xff] }
   0x9   :  { %5597 = vmatprep.subr.bf16.mxu0 %v6507_v0  ;;  %5609 = vmatprep.subr.bf16.mxu1 %v6507_v0  ;;  %v6732_v29 = vpack.c.bf16 %v28_v28, %v27_v27  ;;  %v3546_v32 = vld [vmem:[%s7484_s0 + $0xa] sm:$0x3]  ;;  %v6749_v33 = vpack.c.bf16 %v30_v31, %v29_v30  ;;  %v31_v34 = vld [vmem:[%s7485_s2 + $0x30] sm:$0xff]  ;;  %v32_v35 = vld [vmem:[%s7485_s2 + $0x38] sm:$0xff] }
   0xa   :  { %v6764_v36 = vpack.c.bf16 %v32_v35, %v31_v34  ;;  %v33_v37 = vld [vmem:[%s7485_s2 + $0x40] sm:$0xff]  ;;  %v34_v38 = vld [vmem:[%s7485_s2 + $0x48] sm:$0xff]  ;;  %v35_v40 = vld [vmem:[%s7485_s2 + $0x50] sm:$0xff] }
   0xb   :  { %v6776_v39 = vpack.c.bf16 %v34_v38, %v33_v37  ;;  %v36_v41 = vld [vmem:[%s7485_s2 + $0x58] sm:$0xff]  ;;  %v37_v43 = vld [vmem:[%s7485_s2 + $0x60] sm:$0xff]  ;;  %v38_v44 = vld [vmem:[%s7485_s2 + $0x68] sm:$0xff] }
   0xc   :  { %5599 = vmatpush3.bf16.msra.mxu0 %v6568_v10  ;;  %5611 = vmatpush3.bf16.msra.mxu1 %v6568_v10  ;;  %v6788_v42 = vpack.c.bf16 %v36_v41, %v35_v40  ;;  %v3550_v45 = vld [vmem:[%s7484_s0 + $0xe] sm:$0x3]  ;;  %v6803_v46 = vpack.c.bf16 %v38_v44, %v37_v43  ;;  %v39_v47 = vld [vmem:[%s7485_s2 + $0x70] sm:$0xff]  ;;  %v40_v48 = vld [vmem:[%s7485_s2 + $0x78] sm:$0xff] }
   0xd   :  { %5600 = vmatprep.subr.bf16.mxu0 %v6507_v0  ;;  %5612 = vmatprep.subr.bf16.mxu1 %v6507_v0  ;;  %v6818_v49 = vpack.c.bf16 %v40_v48, %v39_v47  ;;  %v3554_v50 = vld [vmem:[%s7484_s0 + $0x12] sm:$0x3]  ;;  %v3558_v51 = vld [vmem:[%s7484_s0 + $0x16] sm:$0x3]  ;;  %v3562_v52 = vld [vmem:[%s7484_s0 + $0x1a] sm:$0x3] }
   0xe   :  { %v3566_v53 = vld [vmem:[%s7484_s0 + $0x1e] sm:$0x3] }
  0x10   :  { %5602 = vmatpush3.bf16.msra.mxu0 %v6580_v13  ;;  %5614 = vmatpush3.bf16.msra.mxu1 %v6580_v13 }
  0x11   :  { %5615 = vmatprep.subr.bf16.mxu0 %v6507_v0  ;;  %5627 = vmatprep.subr.bf16.mxu1 %v6507_v0 }
  0x13   :  { %4254 = vmatmul.mubr.msk.f32.vlgmr.msra.gmra.mrb[0].mxu0 %vm49_vm1, %v48_v14  ;;  %4273 = vmatmul.mubr.msk.f32.vlgmr.msra.gmra.mrb[0].mxu1 %vm49_vm1, %v3538_v20 }
  0x14   :  { %5617 = vmatpush3.bf16.msra.mxu0 %v6547_v5  ;;  %4291 = vmatprep.mubr.msk.f32.mxu0 %vm6508_vm0, %v6509_v4 }
  0x15   :  { %5618 = vmatprep.subr.bf16.mxu0 %v6507_v0  ;;  %5629 = vmatpush3.bf16.msra.mxu1 %v6547_v5 }
  0x16   :  { %5630 = vmatprep.subr.bf16.mxu1 %v6507_v0  ;;  %4310 = vmatprep.mubr.msk.f32.mxu1 %vm6508_vm0, %v6509_v4 }
  0x18   :  { %5620 = vmatpush3.bf16.msra.mxu0 %v6556_v7 }
  0x19   :  { %5621 = vmatprep.subr.bf16.mxu0 %v6507_v0  ;;  %5632 = vmatpush3.bf16.msra.mxu1 %v6556_v7 }
  0x1a   :  { %5633 = vmatprep.subr.bf16.mxu1 %v6507_v0 }
  0x1c   :  { %5623 = vmatpush3.bf16.msra.mxu0 %v6568_v10 }
  0x1d   :  { %5624 = vmatprep.subr.bf16.mxu0 %v6507_v0  ;;  %5635 = vmatpush3.bf16.msra.mxu1 %v6568_v10 }
  0x1e   :  { %5636 = vmatprep.subr.bf16.mxu1 %v6507_v0 }
  0x20   :  { %5626 = vmatpush3.bf16.msra.mxu0 %v6580_v13 }
  0x21   :  { %5639 = vmatprep.subr.bf16.mxu0 %v6507_v0  ;;  %5638 = vmatpush3.bf16.msra.mxu1 %v6580_v13 }
  0x22   :  { %5651 = vmatprep.subr.bf16.mxu1 %v6507_v0 }
  0x23   :  { %4292 = vmatmul.mubr.msk.f32.vlgmr.msra.gmra.mrb[2].mxu0 %vm49_vm1, %v3540_v15 }
  0x24   :  { %5641 = vmatpush3.bf16.msra.mxu0 %v6547_v5  ;;  %4329 = vmatprep.mubr.msk.f32.mxu0 %vm6508_vm0, %v6509_v4 }
  0x25   :  { %5642 = vmatprep.subr.bf16.mxu0 %v6507_v0  ;;  %4311 = vmatmul.mubr.msk.f32.vlgmr.msra.gmra.mrb[2].mxu1 %vm49_vm1, %v3542_v22 }
  0x26   :  { %5653 = vmatpush3.bf16.msra.mxu1 %v6547_v5  ;;  %4348 = vmatprep.mubr.msk.f32.mxu1 %vm6508_vm0, %v6509_v4 }
  0x27   :  { %5654 = vmatprep.subr.bf16.mxu1 %v6507_v0 }
  0x28   :  { %5644 = vmatpush3.bf16.msra.mxu0 %v6556_v7 }
  0x29   :  { %5645 = vmatprep.subr.bf16.mxu0 %v6507_v0 }
  0x2a   :  { %5656 = vmatpush3.bf16.msra.mxu1 %v6556_v7 }
  0x2b   :  { %5657 = vmatprep.subr.bf16.mxu1 %v6507_v0 }
  0x2c   :  { %5647 = vmatpush3.bf16.msra.mxu0 %v6568_v10 }
  0x2d   :  { %5648 = vmatprep.subr.bf16.mxu0 %v6507_v0 }
  0x2e   :  { %5659 = vmatpush3.bf16.msra.mxu1 %v6568_v10 }
  0x2f   :  { %5660 = vmatprep.subr.bf16.mxu1 %v6507_v0 }
  0x30   :  { %5650 = vmatpush3.bf16.msra.mxu0 %v6580_v13 }
  0x31   :  { %5663 = vmatprep.subr.bf16.mxu0 %v6507_v0 }
  0x32   :  { %5662 = vmatpush3.bf16.msra.mxu1 %v6580_v13 }
  0x33   :  { %4330 = vmatmul.mubr.msk.f32.vlgmr.msra.gmra.mrb[4].mxu0 %vm49_vm1, %v3544_v16  ;;  %5675 = vmatprep.subr.bf16.mxu1 %v6507_v0 }
  0x34   :  { %5665 = vmatpush3.bf16.msra.mxu0 %v6547_v5  ;;  %4367 = vmatprep.mubr.msk.f32.mxu0 %vm6508_vm0, %v6509_v4 }
  0x35   :  { %5666 = vmatprep.subr.bf16.mxu0 %v6507_v0  ;;  %4349 = vmatmul.mubr.msk.f32.vlgmr.msra.gmra.mrb[4].mxu1 %vm49_vm1, %v3546_v32 }
  0x36   :  { %5677 = vmatpush3.bf16.msra.mxu1 %v6547_v5  ;;  %4386 = vmatprep.mubr.msk.f32.mxu1 %vm6508_vm0, %v6509_v4 }
  0x37   :  { %5678 = vmatprep.subr.bf16.mxu1 %v6507_v0 }
  0x38   :  { %5668 = vmatpush3.bf16.msra.mxu0 %v6556_v7 }
  0x39   :  { %5669 = vmatprep.subr.bf16.mxu0 %v6507_v0 }
  0x3a   :  { %5680 = vmatpush3.bf16.msra.mxu1 %v6556_v7 }
  0x3b   :  { %5681 = vmatprep.subr.bf16.mxu1 %v6507_v0 }
  0x3c   :  { %5671 = vmatpush3.bf16.msra.mxu0 %v6568_v10 }
  0x3d   :  { %5672 = vmatprep.subr.bf16.mxu0 %v6507_v0 }
  0x3e   :  { %5683 = vmatpush3.bf16.msra.mxu1 %v6568_v10 }
  0x3f   :  { %5684 = vmatprep.subr.bf16.mxu1 %v6507_v0 }
  0x40   :  { %5674 = vmatpush3.bf16.msra.mxu0 %v6580_v13 }
  0x41   :  { %5687 = vmatprep.subr.bf16.mxu0 %v6507_v0 }
  0x42   :  { %5686 = vmatpush3.bf16.msra.mxu1 %v6580_v13 }
  0x43   :  { %4368 = vmatmul.mubr.msk.f32.vlgmr.msra.gmra.mrb[6].mxu0 %vm49_vm1, %v3548_v17  ;;  %5699 = vmatprep.subr.bf16.mxu1 %v6507_v0 }
  0x44   :  { %5689 = vmatpush3.bf16.msra.mxu0 %v6547_v5  ;;  %4405 = vmatprep.mubr.msk.f32.mxu0 %vm6508_vm0, %v6509_v4 }
  0x45   :  { %5690 = vmatprep.subr.bf16.mxu0 %v6507_v0  ;;  %4387 = vmatmul.mubr.msk.f32.vlgmr.msra.gmra.mrb[6].mxu1 %vm49_vm1, %v3550_v45 }
  0x46   :  { %5701 = vmatpush3.bf16.msra.mxu1 %v6547_v5  ;;  %4424 = vmatprep.mubr.msk.f32.mxu1 %vm6508_vm0, %v6509_v4 }
  0x47   :  { %5702 = vmatprep.subr.bf16.mxu1 %v6507_v0 }
  0x48   :  { %5692 = vmatpush3.bf16.msra.mxu0 %v6556_v7 }
  0x49   :  { %5693 = vmatprep.subr.bf16.mxu0 %v6507_v0 }
  0x4a   :  { %5704 = vmatpush3.bf16.msra.mxu1 %v6556_v7 }
  0x4b   :  { %5705 = vmatprep.subr.bf16.mxu1 %v6507_v0 }
  0x4c   :  { %5695 = vmatpush3.bf16.msra.mxu0 %v6568_v10 }
  0x4d   :  { %5696 = vmatprep.subr.bf16.mxu0 %v6507_v0 }
  0x4e   :  { %5707 = vmatpush3.bf16.msra.mxu1 %v6568_v10 }
  0x4f   :  { %5708 = vmatprep.subr.bf16.mxu1 %v6507_v0 }
  0x50   :  { %5698 = vmatpush3.bf16.msra.mxu0 %v6580_v13 }
  0x51   :  { %5711 = vmatprep.subr.bf16.mxu0 %v6507_v0 }
  0x52   :  { %5710 = vmatpush3.bf16.msra.mxu1 %v6580_v13 }
  0x53   :  { %4406 = vmatmul.mubr.msk.f32.vlgmr.msra.gmra.mrb[8].mxu0 %vm49_vm1, %v3552_v18  ;;  %5723 = vmatprep.subr.bf16.mxu1 %v6507_v0 }
  0x54   :  { %5713 = vmatpush3.bf16.msra.mxu0 %v6547_v5  ;;  %4443 = vmatprep.mubr.msk.f32.mxu0 %vm6508_vm0, %v6509_v4 }
  0x55   :  { %5714 = vmatprep.subr.bf16.mxu0 %v6507_v0  ;;  %4425 = vmatmul.mubr.msk.f32.vlgmr.msra.gmra.mrb[8].mxu1 %vm49_vm1, %v3554_v50 }
  0x56   :  { %5725 = vmatpush3.bf16.msra.mxu1 %v6547_v5  ;;  %4462 = vmatprep.mubr.msk.f32.mxu1 %vm6508_vm0, %v6509_v4 }
  0x57   :  { %5726 = vmatprep.subr.bf16.mxu1 %v6507_v0 }
  0x58   :  { %5716 = vmatpush3.bf16.msra.mxu0 %v6556_v7 }
  0x59   :  { %5717 = vmatprep.subr.bf16.mxu0 %v6507_v0 }
  0x5a   :  { %5728 = vmatpush3.bf16.msra.mxu1 %v6556_v7 }
  0x5b   :  { %5729 = vmatprep.subr.bf16.mxu1 %v6507_v0 }
  0x5c   :  { %5719 = vmatpush3.bf16.msra.mxu0 %v6568_v10 }
  0x5d   :  { %5720 = vmatprep.subr.bf16.mxu0 %v6507_v0 }
  0x5e   :  { %5731 = vmatpush3.bf16.msra.mxu1 %v6568_v10 }
  0x5f   :  { %5732 = vmatprep.subr.bf16.mxu1 %v6507_v0 }
  0x60   :  { %5722 = vmatpush3.bf16.msra.mxu0 %v6580_v13 }
  0x61   :  { %5735 = vmatprep.subr.bf16.mxu0 %v6507_v0 }
  0x62   :  { %5734 = vmatpush3.bf16.msra.mxu1 %v6580_v13 }
  0x63   :  { %4444 = vmatmul.mubr.msk.f32.vlgmr.msra.gmra.mrb[10].mxu0 %vm49_vm1, %v3556_v19  ;;  %5747 = vmatprep.subr.bf16.mxu1 %v6507_v0 }
  0x64   :  { %5737 = vmatpush3.bf16.msra.mxu0 %v6547_v5  ;;  %4481 = vmatprep.mubr.msk.f32.mxu0 %vm6508_vm0, %v6509_v4 }
  0x65   :  { %5738 = vmatprep.subr.bf16.mxu0 %v6507_v0  ;;  %4463 = vmatmul.mubr.msk.f32.vlgmr.msra.gmra.mrb[10].mxu1 %vm49_vm1, %v3558_v51 }
  0x66   :  { %5749 = vmatpush3.bf16.msra.mxu1 %v6547_v5  ;;  %4500 = vmatprep.mubr.msk.f32.mxu1 %vm6508_vm0, %v6509_v4 }
  0x67   :  { %5750 = vmatprep.subr.bf16.mxu1 %v6507_v0 }
  0x68   :  { %5740 = vmatpush3.bf16.msra.mxu0 %v6556_v7 }
  0x69   :  { %5741 = vmatprep.subr.bf16.mxu0 %v6507_v0 }
  0x6a   :  { %5752 = vmatpush3.bf16.msra.mxu1 %v6556_v7 }
  0x6b   :  { %5753 = vmatprep.subr.bf16.mxu1 %v6507_v0 }
  0x6c   :  { %5743 = vmatpush3.bf16.msra.mxu0 %v6568_v10 }
  0x6d   :  { %5744 = vmatprep.subr.bf16.mxu0 %v6507_v0 }
  0x6e   :  { %5755 = vmatpush3.bf16.msra.mxu1 %v6568_v10 }
  0x6f   :  { %5756 = vmatprep.subr.bf16.mxu1 %v6507_v0 }
  0x70   :  { %5746 = vmatpush3.bf16.msra.mxu0 %v6580_v13 }
  0x71   :  { %5759 = vmatprep.subr.bf16.mxu0 %v6507_v0 }
  0x72   :  { %5758 = vmatpush3.bf16.msra.mxu1 %v6580_v13 }
  0x73   :  { %4482 = vmatmul.mubr.msk.f32.vlgmr.msra.gmra.mrb[12].mxu0 %vm49_vm1, %v3560_v21  ;;  %5771 = vmatprep.subr.bf16.mxu1 %v6507_v0 }
  0x74   :  { %5761 = vmatpush3.bf16.msra.mxu0 %v6547_v5  ;;  %4519 = vmatprep.mubr.msk.f32.mxu0 %vm6508_vm0, %v6509_v4 }
  0x75   :  { %5762 = vmatprep.subr.bf16.mxu0 %v6507_v0  ;;  %4501 = vmatmul.mubr.msk.f32.vlgmr.msra.gmra.mrb[12].mxu1 %vm49_vm1, %v3562_v52 }
  0x76   :  { %5773 = vmatpush3.bf16.msra.mxu1 %v6547_v5  ;;  %4538 = vmatprep.mubr.msk.f32.mxu1 %vm6508_vm0, %v6509_v4 }
  0x77   :  { %5774 = vmatprep.subr.bf16.mxu1 %v6507_v0 }
  0x78   :  { %5764 = vmatpush3.bf16.msra.mxu0 %v6556_v7 }
  0x79   :  { %5765 = vmatprep.subr.bf16.mxu0 %v6507_v0 }
  0x7a   :  { %5776 = vmatpush3.bf16.msra.mxu1 %v6556_v7 }
  0x7b   :  { %5777 = vmatprep.subr.bf16.mxu1 %v6507_v0 }
  0x7c   :  { %5767 = vmatpush3.bf16.msra.mxu0 %v6568_v10 }
  0x7d   :  { %5768 = vmatprep.subr.bf16.mxu0 %v6507_v0 }
  0x7e   :  { %5779 = vmatpush3.bf16.msra.mxu1 %v6568_v10 }
  0x7f   :  { %5780 = vmatprep.subr.bf16.mxu1 %v6507_v0 }
  0x80   :  { %5770 = vmatpush3.bf16.msra.mxu0 %v6580_v13 }
  0x81   :  { %5783 = vmatprep.subr.bf16.mxu0 %v6507_v0 }
  0x82   :  { %5782 = vmatpush3.bf16.msra.mxu1 %v6580_v13 }
  0x83   :  { %4520 = vmatmul.mubr.msk.f32.vlgmr.msra.gmra.mrb[14].mxu0 %vm49_vm1, %v3564_v25  ;;  %5807 = vmatprep.subr.bf16.mxu1 %v6507_v0  ;;  %v6914_v25 = vld [vmem:[%s7486_s3] ss:$0 sm:$0xff] }
  0x84   :  { %5785 = vmatpush3.bf16.msra.mxu0 %v6719_v26  ;;  %4573 = vmatprep.mubr.msk.f32.mxu0 %vm6508_vm0, %v6509_v4 }
  0x85   :  { %5786 = vmatprep.subr.bf16.mxu0 %v6507_v0  ;;  %4539 = vmatmul.mubr.msk.f32.vlgmr.msra.gmra.mrb[14].mxu1 %vm49_vm1, %v3566_v53 }
  0x86   :  { %5809 = vmatpush3.bf16.msra.mxu1 %v6719_v26  ;;  %4608 = vmatprep.mubr.msk.f32.mxu1 %vm6508_vm0, %v6509_v4 }
  0x87   :  { %5810 = vmatprep.subr.bf16.mxu1 %v6507_v0 }
  0x88   :  { %5788 = vmatpush3.bf16.msra.mxu0 %v6732_v29 }
  0x89   :  { %5789 = vmatprep.subr.bf16.mxu0 %v6507_v0 }
  0x8a   :  { %5812 = vmatpush3.bf16.msra.mxu1 %v6732_v29 }
  0x8b   :  { %5813 = vmatprep.subr.bf16.mxu1 %v6507_v0 }
  0x8c   :  { %5791 = vmatpush3.bf16.msra.mxu0 %v6749_v33 }
  0x8d   :  { %5792 = vmatprep.subr.bf16.mxu0 %v6507_v0 }
  0x8e   :  { %5815 = vmatpush3.bf16.msra.mxu1 %v6749_v33 }
  0x8f   :  { %5816 = vmatprep.subr.bf16.mxu1 %v6507_v0 }
  0x90   :  { %5794 = vmatpush3.bf16.msra.mxu0 %v6764_v36 }
  0x91   :  { %5795 = vmatprep.subr.bf16.mxu0 %v6507_v0 }
  0x92   :  { %5818 = vmatpush3.bf16.msra.mxu1 %v6764_v36 }
  0x93   :  { %5819 = vmatprep.subr.bf16.mxu1 %v6507_v0 }
  0x94   :  { %5797 = vmatpush3.bf16.msra.mxu0 %v6776_v39 }
  0x95   :  { %5798 = vmatprep.subr.bf16.mxu0 %v6507_v0 }
  0x96   :  { %5821 = vmatpush3.bf16.msra.mxu1 %v6776_v39 }
  0x97   :  { %5822 = vmatprep.subr.bf16.mxu1 %v6507_v0 }
  0x98   :  { %5800 = vmatpush3.bf16.msra.mxu0 %v6788_v42 }
  0x99   :  { %5801 = vmatprep.subr.bf16.mxu0 %v6507_v0 }
  0x9a   :  { %5824 = vmatpush3.bf16.msra.mxu1 %v6788_v42 }
  0x9b   :  { %5825 = vmatprep.subr.bf16.mxu1 %v6507_v0 }
  0x9c   :  { %5803 = vmatpush3.bf16.msra.mxu0 %v6803_v46 }
  0x9d   :  { %5804 = vmatprep.subr.bf16.mxu0 %v6507_v0 }
  0x9e   :  { %5827 = vmatpush3.bf16.msra.mxu1 %v6803_v46 }
  0x9f   :  { %5828 = vmatprep.subr.bf16.mxu1 %v6507_v0 }
  0xa0   :  { %5806 = vmatpush3.bf16.msra.mxu0 %v6818_v49 }
  0xa1   :  { %5831 = vmatprep.subr.bf16.mxu0 %v6507_v0 }
  0xa2   :  { %5830 = vmatpush3.bf16.msra.mxu1 %v6818_v49 }
  0xa3   :  { %5855 = vmatprep.subr.bf16.mxu1 %v6507_v0 }
  0xe6   :  { %v119_v54 = vpop.f32.mrb[0].mxu0  ;;  %v195_v5 = vpop.f32.mrb[0].mxu1 }
  0xe7   :  { %123 = vst [vmem:[#allocation2] sm:$0x3] %v119_v54  ;;  %v4255_v55 = vpop.f32.mrb[1].mxu0  ;;  %200 = vst [vmem:[#allocation2 + $0x2] sm:$0x3] %v195_v5  ;;  %v4274_v6 = vpop.f32.mrb[1].mxu1 }
  0xee   :  { %v1279_v56 = vld [vmem:[#allocation2] sm:$0x3]  ;;  %v1351_v31 = vld [vmem:[#allocation2 + $0x2] sm:$0x3] }
  0xef   :  { %4574 = vmatmul.mubr.f32.vlgmr.msra.gmra.mrb[16].mxu0 %v1279_v56 }
  0xf0   :  { %5833 = vmatpush3.bf16.msra.mxu0 %v6719_v26  ;;  %4643 = vmatprep.mubr.msk.f32.mxu0 %vm6508_vm0, %v6509_v4 }
  0xf1   :  { %5834 = vmatprep.subr.bf16.mxu0 %v6507_v0 }
  0xf4   :  { %5836 = vmatpush3.bf16.msra.mxu0 %v6732_v29 }
  0xf5   :  { %5837 = vmatprep.subr.bf16.mxu0 %v6507_v0 }
  0xf6   :  { %v272_v57 = vpop.f32.mrb[2].mxu0 }
  0xf7   :  { %277 = vst [vmem:[#allocation2 + $0x4] sm:$0x3] %v272_v57  ;;  %v4293_v58 = vpop.f32.mrb[3].mxu0 }
  0xf8   :  { %5839 = vmatpush3.bf16.msra.mxu0 %v6749_v33  ;;  %v349_v9 = vpop.f32.mrb[2].mxu1 }
  0xf9   :  { %5840 = vmatprep.subr.bf16.mxu0 %v6507_v0  ;;  %354 = vst [vmem:[#allocation2 + $0x6] sm:$0x3] %v349_v9  ;;  %v4312_v10 = vpop.f32.mrb[3].mxu1 }
  0xfc   :  { %5842 = vmatpush3.bf16.msra.mxu0 %v6764_v36 }
  0xfd   :  { %5843 = vmatprep.subr.bf16.mxu0 %v6507_v0 }
  0xfe   :  { %v1425_v41 = vld [vmem:[#allocation2 + $0x4] sm:$0x3] }
 0x100   :  { %5845 = vmatpush3.bf16.msra.mxu0 %v6776_v39  ;;  %v1499_v50 = vld [vmem:[#allocation2 + $0x6] sm:$0x3] }
 0x101   :  { %5846 = vmatprep.subr.bf16.mxu0 %v6507_v0 }
 0x104   :  { %5848 = vmatpush3.bf16.msra.mxu0 %v6788_v42 }
 0x105   :  { %5849 = vmatprep.subr.bf16.mxu0 %v6507_v0 }
 0x106   :  { %v426_v59 = vpop.f32.mrb[4].mxu0 }
 0x107   :  { %431 = vst [vmem:[#allocation2 + $0x8] sm:$0x3] %v426_v59  ;;  %v4331_v60 = vpop.f32.mrb[5].mxu0 }
 0x108   :  { %5851 = vmatpush3.bf16.msra.mxu0 %v6803_v46  ;;  %v503_v13 = vpop.f32.mrb[4].mxu1 }
 0x109   :  { %5852 = vmatprep.subr.bf16.mxu0 %v6507_v0  ;;  %508 = vst [vmem:[#allocation2 + $0xa] sm:$0x3] %v503_v13  ;;  %v4350_v14 = vpop.f32.mrb[5].mxu1 }
 0x10c   :  { %5854 = vmatpush3.bf16.msra.mxu0 %v6818_v49 }
 0x10d   :  { %5879 = vmatprep.subr.bf16.mxu0 %v6507_v0 }
 0x10e   :  { %v1573_v56 = vld [vmem:[#allocation2 + $0x8] sm:$0x3] }
 0x116   :  { %v580_v61 = vpop.f32.mrb[6].mxu0 }
 0x117   :  { %585 = vst [vmem:[#allocation2 + $0xc] sm:$0x3] %v580_v61  ;;  %v4369_v62 = vpop.f32.mrb[7].mxu0 }
 0x118   :  { %v657_v15 = vpop.f32.mrb[6].mxu1  ;;  %v1647_v62 = vld [vmem:[#allocation2 + $0xa] sm:$0x3] }
 0x119   :  { %662 = vst [vmem:[#allocation2 + $0xe] sm:$0x3] %v657_v15  ;;  %v4388_v16 = vpop.f32.mrb[7].mxu1 }
 0x11e   :  { %v1721_v6 = vld [vmem:[#allocation2 + $0xc] sm:$0x3] }
 0x126   :  { %v734_v63 = vpop.f32.mrb[8].mxu0 }
 0x127   :  { %739 = vst [vmem:[#allocation2 + $0x10] sm:$0x3] %v734_v63  ;;  %v4407_v1 = vpop.f32.mrb[9].mxu0 }
 0x128   :  { %v811_v17 = vpop.f32.mrb[8].mxu1 }
 0x129   :  { %816 = vst [vmem:[#allocation2 + $0x12] sm:$0x3] %v811_v17  ;;  %v4426_v18 = vpop.f32.mrb[9].mxu1 }
 0x12e   :  { %v1869_v18 = vld [vmem:[#allocation2 + $0x10] sm:$0x3] }
 0x136   :  { %v888_v2 = vpop.f32.mrb[10].mxu0 }
 0x137   :  { %893 = vst [vmem:[#allocation2 + $0x14] sm:$0x3] %v888_v2  ;;  %v4445_v3 = vpop.f32.mrb[11].mxu0 }
 0x138   :  { %v965_v19 = vpop.f32.mrb[10].mxu1 }
 0x139   :  { %970 = vst [vmem:[#allocation2 + $0x16] sm:$0x3] %v965_v19  ;;  %v4464_v20 = vpop.f32.mrb[11].mxu1 }
 0x146   :  { %v1042_v7 = vpop.f32.mrb[12].mxu0 }
 0x147   :  { %1047 = vst [vmem:[#allocation2 + $0x18] sm:$0x3] %v1042_v7  ;;  %v4483_v8 = vpop.f32.mrb[13].mxu0 }
 0x148   :  { %v1119_v21 = vpop.f32.mrb[12].mxu1 }
 0x149   :  { %1124 = vst [vmem:[#allocation2 + $0x1a] sm:$0x3] %v1119_v21  ;;  %v4502_v22 = vpop.f32.mrb[13].mxu1 }
 0x156   :  { %v1196_v11 = vpop.f32.mrb[14].mxu0 }
 0x157   :  { %1201 = vst [vmem:[#allocation2 + $0x1c] sm:$0x3] %v1196_v11  ;;  %v4521_v12 = vpop.f32.mrb[15].mxu0 }
 0x158   :  { %v1273_v23 = vpop.f32.mrb[14].mxu1  ;;  %v1795_v12 = vld [vmem:[#allocation2 + $0xe] sm:$0x3] }
 0x159   :  { %1278 = vst [vmem:[#allocation2 + $0x1e] sm:$0x3] %v1273_v23  ;;  %v4540_v24 = vpop.f32.mrb[15].mxu1 }
 0x15a   :  { %v1943_v24 = vld [vmem:[#allocation2 + $0x12] sm:$0x3] }
 0x1c2   :  { %v1346_v27 = vpop.f32.mrb[16].mxu0 }
 0x1c3   :  { %v1347_v28 = vadd.f32 %v6914_v25, %v1346_v27  ;;  %v4575_v30 = vpop.f32.mrb[17].mxu0 }
 0x1c5   :  { %v1350_v32 = vmax.f32 %v1347_v28, 0.0 }
 0x1c7   :  { %v1352_v34 = vadd.f32 %v1351_v31, %v1350_v32 }
 0x1c9   :  { %1353 = vst [vmem:[#allocation2 + $0x2] sm:$0x3] %v1352_v34  ;;  %4609 = vmatmul.mubr.f32.vlgmr.msra.gmra.mrb[16].mxu1 %v1352_v34  ;;  %v2017_v34 = vld [vmem:[#allocation2 + $0x14] sm:$0x3] }
 0x1ca   :  { %5857 = vmatpush3.bf16.msra.mxu1 %v6719_v26  ;;  %4678 = vmatprep.mubr.msk.f32.mxu1 %vm6508_vm0, %v6509_v4 }
 0x1cb   :  { %5858 = vmatprep.subr.bf16.mxu1 %v6507_v0 }
 0x1ce   :  { %5860 = vmatpush3.bf16.msra.mxu1 %v6732_v29 }
 0x1cf   :  { %5861 = vmatprep.subr.bf16.mxu1 %v6507_v0 }
 0x1d2   :  { %5863 = vmatpush3.bf16.msra.mxu1 %v6749_v33 }
 0x1d3   :  { %5864 = vmatprep.subr.bf16.mxu1 %v6507_v0 }
 0x1d6   :  { %5866 = vmatpush3.bf16.msra.mxu1 %v6764_v36 }
 0x1d7   :  { %5867 = vmatprep.subr.bf16.mxu1 %v6507_v0 }
 0x1da   :  { %5869 = vmatpush3.bf16.msra.mxu1 %v6776_v39 }
 0x1db   :  { %5870 = vmatprep.subr.bf16.mxu1 %v6507_v0 }
 0x1de   :  { %5872 = vmatpush3.bf16.msra.mxu1 %v6788_v42 }
 0x1df   :  { %5873 = vmatprep.subr.bf16.mxu1 %v6507_v0 }
 0x1e2   :  { %5875 = vmatpush3.bf16.msra.mxu1 %v6803_v46 }
 0x1e3   :  { %5876 = vmatprep.subr.bf16.mxu1 %v6507_v0 }
 0x1e6   :  { %5878 = vmatpush3.bf16.msra.mxu1 %v6818_v49 }
 0x1e7   :  { %5903 = vmatprep.subr.bf16.mxu1 %v6507_v0 }
 0x29c   :  { %v1420_v35 = vpop.f32.mrb[16].mxu1 }
 0x29d   :  { %v1421_v37 = vadd.f32 %v6914_v25, %v1420_v35  ;;  %v4610_v38 = vpop.f32.mrb[17].mxu1 }
 0x29f   :  { %v1424_v40 = vmax.f32 %v1421_v37, 0.0 }
 0x2a1   :  { %v1426_v43 = vadd.f32 %v1425_v41, %v1424_v40 }
 0x2a3   :  { %1427 = vst [vmem:[#allocation2 + $0x4] sm:$0x3] %v1426_v43  ;;  %4644 = vmatmul.mubr.f32.vlgmr.msra.gmra.mrb[18].mxu0 %v1426_v43  ;;  %v2091_v43 = vld [vmem:[#allocation2 + $0x16] sm:$0x3] }
 0x2a4   :  { %5881 = vmatpush3.bf16.msra.mxu0 %v6719_v26  ;;  %4713 = vmatprep.mubr.msk.f32.mxu0 %vm6508_vm0, %v6509_v4 }
 0x2a5   :  { %5882 = vmatprep.subr.bf16.mxu0 %v6507_v0 }
 0x2a8   :  { %5884 = vmatpush3.bf16.msra.mxu0 %v6732_v29 }
 0x2a9   :  { %5885 = vmatprep.subr.bf16.mxu0 %v6507_v0 }
 0x2ac   :  { %5887 = vmatpush3.bf16.msra.mxu0 %v6749_v33 }
 0x2ad   :  { %5888 = vmatprep.subr.bf16.mxu0 %v6507_v0 }
 0x2b0   :  { %5890 = vmatpush3.bf16.msra.mxu0 %v6764_v36 }
 0x2b1   :  { %5891 = vmatprep.subr.bf16.mxu0 %v6507_v0 }
 0x2b4   :  { %5893 = vmatpush3.bf16.msra.mxu0 %v6776_v39 }
 0x2b5   :  { %5894 = vmatprep.subr.bf16.mxu0 %v6507_v0 }
 0x2b8   :  { %5896 = vmatpush3.bf16.msra.mxu0 %v6788_v42 }
 0x2b9   :  { %5897 = vmatprep.subr.bf16.mxu0 %v6507_v0 }
 0x2bc   :  { %5899 = vmatpush3.bf16.msra.mxu0 %v6803_v46 }
 0x2bd   :  { %5900 = vmatprep.subr.bf16.mxu0 %v6507_v0 }
 0x2c0   :  { %5902 = vmatpush3.bf16.msra.mxu0 %v6818_v49 }
 0x2c1   :  { %5927 = vmatprep.subr.bf16.mxu0 %v6507_v0 }
 0x376   :  { %v1494_v44 = vpop.f32.mrb[18].mxu0 }
 0x377   :  { %v1495_v45 = vadd.f32 %v6914_v25, %v1494_v44  ;;  %v4645_v47 = vpop.f32.mrb[19].mxu0 }
 0x379   :  { %v1498_v48 = vmax.f32 %v1495_v45, 0.0 }
 0x37b   :  { %v1500_v51 = vadd.f32 %v1499_v50, %v1498_v48 }
 0x37d   :  { %1501 = vst [vmem:[#allocation2 + $0x6] sm:$0x3] %v1500_v51  ;;  %4679 = vmatmul.mubr.f32.vlgmr.msra.gmra.mrb[18].mxu1 %v1500_v51  ;;  %v2165_v51 = vld [vmem:[#allocation2 + $0x18] sm:$0x3] }
 0x37e   :  { %5905 = vmatpush3.bf16.msra.mxu1 %v6719_v26  ;;  %4748 = vmatprep.mubr.msk.f32.mxu1 %vm6508_vm0, %v6509_v4 }
 0x37f   :  { %5906 = vmatprep.subr.bf16.mxu1 %v6507_v0 }
 0x382   :  { %5908 = vmatpush3.bf16.msra.mxu1 %v6732_v29 }
 0x383   :  { %5909 = vmatprep.subr.bf16.mxu1 %v6507_v0 }
 0x386   :  { %5911 = vmatpush3.bf16.msra.mxu1 %v6749_v33 }
 0x387   :  { %5912 = vmatprep.subr.bf16.mxu1 %v6507_v0 }
 0x38a   :  { %5914 = vmatpush3.bf16.msra.mxu1 %v6764_v36 }
 0x38b   :  { %5915 = vmatprep.subr.bf16.mxu1 %v6507_v0 }
 0x38e   :  { %5917 = vmatpush3.bf16.msra.mxu1 %v6776_v39 }
 0x38f   :  { %5918 = vmatprep.subr.bf16.mxu1 %v6507_v0 }
 0x392   :  { %5920 = vmatpush3.bf16.msra.mxu1 %v6788_v42 }
 0x393   :  { %5921 = vmatprep.subr.bf16.mxu1 %v6507_v0 }
 0x396   :  { %5923 = vmatpush3.bf16.msra.mxu1 %v6803_v46 }
 0x397   :  { %5924 = vmatprep.subr.bf16.mxu1 %v6507_v0 }
 0x39a   :  { %5926 = vmatpush3.bf16.msra.mxu1 %v6818_v49 }
 0x39b   :  { %5951 = vmatprep.subr.bf16.mxu1 %v6507_v0 }
 0x450   :  { %v1568_v52 = vpop.f32.mrb[18].mxu1 }
 0x451   :  { %v1569_v53 = vadd.f32 %v6914_v25, %v1568_v52  ;;  %v4680_v54 = vpop.f32.mrb[19].mxu1 }
 0x453   :  { %v1572_v55 = vmax.f32 %v1569_v53, 0.0 }
 0x455   :  { %v1574_v57 = vadd.f32 %v1573_v56, %v1572_v55 }
 0x457   :  { %1575 = vst [vmem:[#allocation2 + $0x8] sm:$0x3] %v1574_v57  ;;  %4714 = vmatmul.mubr.f32.vlgmr.msra.gmra.mrb[20].mxu0 %v1574_v57  ;;  %v2239_v57 = vld [vmem:[#allocation2 + $0x1a] sm:$0x3] }
 0x458   :  { %5929 = vmatpush3.bf16.msra.mxu0 %v6719_v26  ;;  %4783 = vmatprep.mubr.msk.f32.mxu0 %vm6508_vm0, %v6509_v4 }
 0x459   :  { %5930 = vmatprep.subr.bf16.mxu0 %v6507_v0 }
 0x45c   :  { %5932 = vmatpush3.bf16.msra.mxu0 %v6732_v29 }
 0x45d   :  { %5933 = vmatprep.subr.bf16.mxu0 %v6507_v0 }
 0x460   :  { %5935 = vmatpush3.bf16.msra.mxu0 %v6749_v33 }
 0x461   :  { %5936 = vmatprep.subr.bf16.mxu0 %v6507_v0 }
 0x464   :  { %5938 = vmatpush3.bf16.msra.mxu0 %v6764_v36 }
 0x465   :  { %5939 = vmatprep.subr.bf16.mxu0 %v6507_v0 }
 0x468   :  { %5941 = vmatpush3.bf16.msra.mxu0 %v6776_v39 }
 0x469   :  { %5942 = vmatprep.subr.bf16.mxu0 %v6507_v0 }
 0x46c   :  { %5944 = vmatpush3.bf16.msra.mxu0 %v6788_v42 }
 0x46d   :  { %5945 = vmatprep.subr.bf16.mxu0 %v6507_v0 }
 0x470   :  { %5947 = vmatpush3.bf16.msra.mxu0 %v6803_v46 }
 0x471   :  { %5948 = vmatprep.subr.bf16.mxu0 %v6507_v0 }
 0x474   :  { %5950 = vmatpush3.bf16.msra.mxu0 %v6818_v49 }
 0x475   :  { %5975 = vmatprep.subr.bf16.mxu0 %v6507_v0 }
 0x52a   :  { %v1642_v58 = vpop.f32.mrb[20].mxu0 }
 0x52b   :  { %v1643_v59 = vadd.f32 %v6914_v25, %v1642_v58  ;;  %v4715_v60 = vpop.f32.mrb[21].mxu0 }
 0x52d   :  { %v1646_v61 = vmax.f32 %v1643_v59, 0.0 }
 0x52f   :  { %v1648_v63 = vadd.f32 %v1647_v62, %v1646_v61 }
 0x531   :  { %1649 = vst [vmem:[#allocation2 + $0xa] sm:$0x3] %v1648_v63  ;;  %4749 = vmatmul.mubr.f32.vlgmr.msra.gmra.mrb[20].mxu1 %v1648_v63  ;;  %v2313_v63 = vld [vmem:[#allocation2 + $0x1c] sm:$0x3] }
 0x532   :  { %5953 = vmatpush3.bf16.msra.mxu1 %v6719_v26  ;;  %4818 = vmatprep.mubr.msk.f32.mxu1 %vm6508_vm0, %v6509_v4 }
 0x533   :  { %5954 = vmatprep.subr.bf16.mxu1 %v6507_v0 }
 0x536   :  { %5956 = vmatpush3.bf16.msra.mxu1 %v6732_v29 }
 0x537   :  { %5957 = vmatprep.subr.bf16.mxu1 %v6507_v0 }
 0x53a   :  { %5959 = vmatpush3.bf16.msra.mxu1 %v6749_v33 }
 0x53b   :  { %5960 = vmatprep.subr.bf16.mxu1 %v6507_v0 }
 0x53e   :  { %5962 = vmatpush3.bf16.msra.mxu1 %v6764_v36 }
 0x53f   :  { %5963 = vmatprep.subr.bf16.mxu1 %v6507_v0 }
 0x542   :  { %5965 = vmatpush3.bf16.msra.mxu1 %v6776_v39 }
 0x543   :  { %5966 = vmatprep.subr.bf16.mxu1 %v6507_v0 }
 0x546   :  { %5968 = vmatpush3.bf16.msra.mxu1 %v6788_v42 }
 0x547   :  { %5969 = vmatprep.subr.bf16.mxu1 %v6507_v0 }
 0x54a   :  { %5971 = vmatpush3.bf16.msra.mxu1 %v6803_v46 }
 0x54b   :  { %5972 = vmatprep.subr.bf16.mxu1 %v6507_v0 }
 0x54e   :  { %5974 = vmatpush3.bf16.msra.mxu1 %v6818_v49 }
 0x54f   :  { %5999 = vmatprep.subr.bf16.mxu1 %v6507_v0 }
 0x604   :  { %v1716_v1 = vpop.f32.mrb[20].mxu1 }
 0x605   :  { %v1717_v2 = vadd.f32 %v6914_v25, %v1716_v1  ;;  %v4750_v3 = vpop.f32.mrb[21].mxu1 }
 0x607   :  { %v1720_v5 = vmax.f32 %v1717_v2, 0.0 }
 0x609   :  { %v1722_v7 = vadd.f32 %v1721_v6, %v1720_v5 }
 0x60b   :  { %1723 = vst [vmem:[#allocation2 + $0xc] sm:$0x3] %v1722_v7  ;;  %4784 = vmatmul.mubr.f32.vlgmr.msra.gmra.mrb[22].mxu0 %v1722_v7  ;;  %v2387_v7 = vld [vmem:[#allocation2 + $0x1e] sm:$0x3] }
 0x60c   :  { %5977 = vmatpush3.bf16.msra.mxu0 %v6719_v26  ;;  %4853 = vmatprep.mubr.msk.f32.mxu0 %vm6508_vm0, %v6509_v4 }
 0x60d   :  { %5978 = vmatprep.subr.bf16.mxu0 %v6507_v0 }
 0x610   :  { %5980 = vmatpush3.bf16.msra.mxu0 %v6732_v29 }
 0x611   :  { %5981 = vmatprep.subr.bf16.mxu0 %v6507_v0 }
 0x614   :  { %5983 = vmatpush3.bf16.msra.mxu0 %v6749_v33 }
 0x615   :  { %5984 = vmatprep.subr.bf16.mxu0 %v6507_v0 }
 0x618   :  { %5986 = vmatpush3.bf16.msra.mxu0 %v6764_v36 }
 0x619   :  { %5987 = vmatprep.subr.bf16.mxu0 %v6507_v0 }
 0x61c   :  { %5989 = vmatpush3.bf16.msra.mxu0 %v6776_v39 }
 0x61d   :  { %5990 = vmatprep.subr.bf16.mxu0 %v6507_v0 }
 0x620   :  { %5992 = vmatpush3.bf16.msra.mxu0 %v6788_v42 }
 0x621   :  { %5993 = vmatprep.subr.bf16.mxu0 %v6507_v0 }
 0x624   :  { %5995 = vmatpush3.bf16.msra.mxu0 %v6803_v46 }
 0x625   :  { %5996 = vmatprep.subr.bf16.mxu0 %v6507_v0 }
 0x628   :  { %5998 = vmatpush3.bf16.msra.mxu0 %v6818_v49 }
 0x629   :  { %6023 = vmatprep.subr.bf16.mxu0 %v6507_v0 }
 0x6de   :  { %v1790_v8 = vpop.f32.mrb[22].mxu0 }
 0x6df   :  { %v1791_v9 = vadd.f32 %v6914_v25, %v1790_v8  ;;  %v4785_v10 = vpop.f32.mrb[23].mxu0 }
 0x6e1   :  { %v1794_v11 = vmax.f32 %v1791_v9, 0.0 }
 0x6e3   :  { %v1796_v13 = vadd.f32 %v1795_v12, %v1794_v11 }
 0x6e5   :  { %1797 = vst [vmem:[#allocation2 + $0xe] sm:$0x3] %v1796_v13  ;;  %4819 = vmatmul.mubr.f32.vlgmr.msra.gmra.mrb[22].mxu1 %v1796_v13 }
 0x6e6   :  { %6001 = vmatpush3.bf16.msra.mxu1 %v6719_v26  ;;  %4888 = vmatprep.mubr.msk.f32.mxu1 %vm6508_vm0, %v6509_v4 }
 0x6e7   :  { %6002 = vmatprep.subr.bf16.mxu1 %v6507_v0 }
 0x6ea   :  { %6004 = vmatpush3.bf16.msra.mxu1 %v6732_v29 }
 0x6eb   :  { %6005 = vmatprep.subr.bf16.mxu1 %v6507_v0 }
 0x6ee   :  { %6007 = vmatpush3.bf16.msra.mxu1 %v6749_v33 }
 0x6ef   :  { %6008 = vmatprep.subr.bf16.mxu1 %v6507_v0 }
 0x6f2   :  { %6010 = vmatpush3.bf16.msra.mxu1 %v6764_v36 }
 0x6f3   :  { %6011 = vmatprep.subr.bf16.mxu1 %v6507_v0 }
 0x6f6   :  { %6013 = vmatpush3.bf16.msra.mxu1 %v6776_v39 }
 0x6f7   :  { %6014 = vmatprep.subr.bf16.mxu1 %v6507_v0 }
 0x6fa   :  { %6016 = vmatpush3.bf16.msra.mxu1 %v6788_v42 }
 0x6fb   :  { %6017 = vmatprep.subr.bf16.mxu1 %v6507_v0 }
 0x6fe   :  { %6019 = vmatpush3.bf16.msra.mxu1 %v6803_v46 }
 0x6ff   :  { %6020 = vmatprep.subr.bf16.mxu1 %v6507_v0 }
 0x702   :  { %6022 = vmatpush3.bf16.msra.mxu1 %v6818_v49 }
 0x703   :  { %6047 = vmatprep.subr.bf16.mxu1 %v6507_v0 }
 0x7b8   :  { %v1864_v14 = vpop.f32.mrb[22].mxu1 }
 0x7b9   :  { %v1865_v15 = vadd.f32 %v6914_v25, %v1864_v14  ;;  %v4820_v16 = vpop.f32.mrb[23].mxu1 }
 0x7bb   :  { %v1868_v17 = vmax.f32 %v1865_v15, 0.0 }
 0x7bd   :  { %v1870_v19 = vadd.f32 %v1869_v18, %v1868_v17 }
 0x7bf   :  { %1871 = vst [vmem:[#allocation2 + $0x10] sm:$0x3] %v1870_v19  ;;  %4854 = vmatmul.mubr.f32.vlgmr.msra.gmra.mrb[24].mxu0 %v1870_v19 }
 0x7c0   :  { %6025 = vmatpush3.bf16.msra.mxu0 %v6719_v26  ;;  %4923 = vmatprep.mubr.msk.f32.mxu0 %vm6508_vm0, %v6509_v4 }
 0x7c1   :  { %6026 = vmatprep.subr.bf16.mxu0 %v6507_v0 }
 0x7c4   :  { %6028 = vmatpush3.bf16.msra.mxu0 %v6732_v29 }
 0x7c5   :  { %6029 = vmatprep.subr.bf16.mxu0 %v6507_v0 }
 0x7c8   :  { %6031 = vmatpush3.bf16.msra.mxu0 %v6749_v33 }
 0x7c9   :  { %6032 = vmatprep.subr.bf16.mxu0 %v6507_v0 }
 0x7cc   :  { %6034 = vmatpush3.bf16.msra.mxu0 %v6764_v36 }
 0x7cd   :  { %6035 = vmatprep.subr.bf16.mxu0 %v6507_v0 }
 0x7d0   :  { %6037 = vmatpush3.bf16.msra.mxu0 %v6776_v39 }
 0x7d1   :  { %6038 = vmatprep.subr.bf16.mxu0 %v6507_v0 }
 0x7d4   :  { %6040 = vmatpush3.bf16.msra.mxu0 %v6788_v42 }
 0x7d5   :  { %6041 = vmatprep.subr.bf16.mxu0 %v6507_v0 }
 0x7d8   :  { %6043 = vmatpush3.bf16.msra.mxu0 %v6803_v46 }
 0x7d9   :  { %6044 = vmatprep.subr.bf16.mxu0 %v6507_v0 }
 0x7dc   :  { %6046 = vmatpush3.bf16.msra.mxu0 %v6818_v49 }
 0x7dd   :  { %6071 = vmatprep.subr.bf16.mxu0 %v6507_v0 }
 0x892   :  { %v1938_v20 = vpop.f32.mrb[24].mxu0 }
 0x893   :  { %v1939_v21 = vadd.f32 %v6914_v25, %v1938_v20  ;;  %v4855_v22 = vpop.f32.mrb[25].mxu0 }
 0x895   :  { %v1942_v23 = vmax.f32 %v1939_v21, 0.0 }
 0x897   :  { %v1944_v27 = vadd.f32 %v1943_v24, %v1942_v23 }
 0x899   :  { %1945 = vst [vmem:[#allocation2 + $0x12] sm:$0x3] %v1944_v27  ;;  %4889 = vmatmul.mubr.f32.vlgmr.msra.gmra.mrb[24].mxu1 %v1944_v27 }
 0x89a   :  { %6049 = vmatpush3.bf16.msra.mxu1 %v6719_v26  ;;  %4958 = vmatprep.mubr.msk.f32.mxu1 %vm6508_vm0, %v6509_v4 }
 0x89b   :  { %6050 = vmatprep.subr.bf16.mxu1 %v6507_v0 }
 0x89e   :  { %6052 = vmatpush3.bf16.msra.mxu1 %v6732_v29 }
 0x89f   :  { %6053 = vmatprep.subr.bf16.mxu1 %v6507_v0 }
 0x8a2   :  { %6055 = vmatpush3.bf16.msra.mxu1 %v6749_v33 }
 0x8a3   :  { %6056 = vmatprep.subr.bf16.mxu1 %v6507_v0 }
 0x8a6   :  { %6058 = vmatpush3.bf16.msra.mxu1 %v6764_v36 }
 0x8a7   :  { %6059 = vmatprep.subr.bf16.mxu1 %v6507_v0 }
 0x8aa   :  { %6061 = vmatpush3.bf16.msra.mxu1 %v6776_v39 }
 0x8ab   :  { %6062 = vmatprep.subr.bf16.mxu1 %v6507_v0 }
 0x8ae   :  { %6064 = vmatpush3.bf16.msra.mxu1 %v6788_v42 }
 0x8af   :  { %6065 = vmatprep.subr.bf16.mxu1 %v6507_v0 }
 0x8b2   :  { %6067 = vmatpush3.bf16.msra.mxu1 %v6803_v46 }
 0x8b3   :  { %6068 = vmatprep.subr.bf16.mxu1 %v6507_v0 }
 0x8b6   :  { %6070 = vmatpush3.bf16.msra.mxu1 %v6818_v49 }
 0x8b7   :  { %6095 = vmatprep.subr.bf16.mxu1 %v6507_v0 }
 0x96c   :  { %v2012_v28 = vpop.f32.mrb[24].mxu1 }
 0x96d   :  { %v2013_v30 = vadd.f32 %v6914_v25, %v2012_v28  ;;  %v4890_v31 = vpop.f32.mrb[25].mxu1 }
 0x96f   :  { %v2016_v32 = vmax.f32 %v2013_v30, 0.0 }
 0x971   :  { %v2018_v35 = vadd.f32 %v2017_v34, %v2016_v32 }
 0x973   :  { %2019 = vst [vmem:[#allocation2 + $0x14] sm:$0x3] %v2018_v35  ;;  %4924 = vmatmul.mubr.f32.vlgmr.msra.gmra.mrb[26].mxu0 %v2018_v35 }
 0x974   :  { %6073 = vmatpush3.bf16.msra.mxu0 %v6719_v26  ;;  %4993 = vmatprep.mubr.msk.f32.mxu0 %vm6508_vm0, %v6509_v4 }
 0x975   :  { %6074 = vmatprep.subr.bf16.mxu0 %v6507_v0 }
 0x978   :  { %6076 = vmatpush3.bf16.msra.mxu0 %v6732_v29 }
 0x979   :  { %6077 = vmatprep.subr.bf16.mxu0 %v6507_v0 }
 0x97c   :  { %6079 = vmatpush3.bf16.msra.mxu0 %v6749_v33 }
 0x97d   :  { %6080 = vmatprep.subr.bf16.mxu0 %v6507_v0 }
 0x980   :  { %6082 = vmatpush3.bf16.msra.mxu0 %v6764_v36 }
 0x981   :  { %6083 = vmatprep.subr.bf16.mxu0 %v6507_v0 }
 0x984   :  { %6085 = vmatpush3.bf16.msra.mxu0 %v6776_v39 }
 0x985   :  { %6086 = vmatprep.subr.bf16.mxu0 %v6507_v0 }
 0x988   :  { %6088 = vmatpush3.bf16.msra.mxu0 %v6788_v42 }
 0x989   :  { %6089 = vmatprep.subr.bf16.mxu0 %v6507_v0 }
 0x98c   :  { %6091 = vmatpush3.bf16.msra.mxu0 %v6803_v46 }
 0x98d   :  { %6092 = vmatprep.subr.bf16.mxu0 %v6507_v0 }
 0x990   :  { %6094 = vmatpush3.bf16.msra.mxu0 %v6818_v49 }
 0x991   :  { %6119 = vmatprep.subr.bf16.mxu0 %v6507_v0 }
 0xa46   :  { %v2086_v37 = vpop.f32.mrb[26].mxu0 }
 0xa47   :  { %v2087_v38 = vadd.f32 %v6914_v25, %v2086_v37  ;;  %v4925_v40 = vpop.f32.mrb[27].mxu0 }
 0xa49   :  { %v2090_v41 = vmax.f32 %v2087_v38, 0.0 }
 0xa4b   :  { %v2092_v44 = vadd.f32 %v2091_v43, %v2090_v41 }
 0xa4d   :  { %2093 = vst [vmem:[#allocation2 + $0x16] sm:$0x3] %v2092_v44  ;;  %4959 = vmatmul.mubr.f32.vlgmr.msra.gmra.mrb[26].mxu1 %v2092_v44 }
 0xa4e   :  { %6097 = vmatpush3.bf16.msra.mxu1 %v6719_v26  ;;  %5028 = vmatprep.mubr.msk.f32.mxu1 %vm6508_vm0, %v6509_v4 }
 0xa4f   :  { %6098 = vmatprep.subr.bf16.mxu1 %v6507_v0 }
 0xa52   :  { %6100 = vmatpush3.bf16.msra.mxu1 %v6732_v29 }
 0xa53   :  { %6101 = vmatprep.subr.bf16.mxu1 %v6507_v0 }
 0xa54   :  { %v2692_v41 = vld [vmem:[#allocation2 + $0x16] sm:$0x3] }
 0xa56   :  { %6103 = vmatpush3.bf16.msra.mxu1 %v6749_v33 }
 0xa57   :  { %6104 = vmatprep.subr.bf16.mxu1 %v6507_v0 }
 0xa5a   :  { %6106 = vmatpush3.bf16.msra.mxu1 %v6764_v36 }
 0xa5b   :  { %6107 = vmatprep.subr.bf16.mxu1 %v6507_v0 }
 0xa5e   :  { %6109 = vmatpush3.bf16.msra.mxu1 %v6776_v39 }
 0xa5f   :  { %6110 = vmatprep.subr.bf16.mxu1 %v6507_v0 }
 0xa62   :  { %6112 = vmatpush3.bf16.msra.mxu1 %v6788_v42 }
 0xa63   :  { %6113 = vmatprep.subr.bf16.mxu1 %v6507_v0 }
 0xa66   :  { %6115 = vmatpush3.bf16.msra.mxu1 %v6803_v46 }
 0xa67   :  { %6116 = vmatprep.subr.bf16.mxu1 %v6507_v0 }
 0xa6a   :  { %6118 = vmatpush3.bf16.msra.mxu1 %v6818_v49 }
 0xa6b   :  { %6143 = vmatprep.subr.bf16.mxu1 %v6507_v0 }
 0xb20   :  { %v2160_v45 = vpop.f32.mrb[26].mxu1 }
 0xb21   :  { %v2161_v47 = vadd.f32 %v6914_v25, %v2160_v45  ;;  %v4960_v48 = vpop.f32.mrb[27].mxu1 }
 0xb23   :  { %v2164_v50 = vmax.f32 %v2161_v47, 0.0 }
 0xb25   :  { %v2166_v52 = vadd.f32 %v2165_v51, %v2164_v50  ;;  %v2768_v51 = vld [vmem:[#allocation2 + $0x14] sm:$0x3] }
 0xb27   :  { %2167 = vst [vmem:[#allocation2 + $0x18] sm:$0x3] %v2166_v52  ;;  %4994 = vmatmul.mubr.f32.vlgmr.msra.gmra.mrb[28].mxu0 %v2166_v52 }
 0xb28   :  { %6121 = vmatpush3.bf16.msra.mxu0 %v6719_v26  ;;  %5063 = vmatprep.mubr.msk.f32.mxu0 %vm6508_vm0, %v6509_v4 }
 0xb29   :  { %6122 = vmatprep.subr.bf16.mxu0 %v6507_v0 }
 0xb2c   :  { %6124 = vmatpush3.bf16.msra.mxu0 %v6732_v29 }
 0xb2d   :  { %6125 = vmatprep.subr.bf16.mxu0 %v6507_v0 }
 0xb2e   :  { %v2616_v31 = vld [vmem:[#allocation2 + $0x18] sm:$0x3] }
 0xb30   :  { %6127 = vmatpush3.bf16.msra.mxu0 %v6749_v33 }
 0xb31   :  { %6128 = vmatprep.subr.bf16.mxu0 %v6507_v0 }
 0xb34   :  { %6130 = vmatpush3.bf16.msra.mxu0 %v6764_v36 }
 0xb35   :  { %6131 = vmatprep.subr.bf16.mxu0 %v6507_v0 }
 0xb38   :  { %6133 = vmatpush3.bf16.msra.mxu0 %v6776_v39 }
 0xb39   :  { %6134 = vmatprep.subr.bf16.mxu0 %v6507_v0 }
 0xb3c   :  { %6136 = vmatpush3.bf16.msra.mxu0 %v6788_v42 }
 0xb3d   :  { %6137 = vmatprep.subr.bf16.mxu0 %v6507_v0 }
 0xb40   :  { %6139 = vmatpush3.bf16.msra.mxu0 %v6803_v46 }
 0xb41   :  { %6140 = vmatprep.subr.bf16.mxu0 %v6507_v0 }
 0xb44   :  { %6142 = vmatpush3.bf16.msra.mxu0 %v6818_v49 }
 0xb45   :  { %6167 = vmatprep.subr.bf16.mxu0 %v6507_v0 }
 0xbfa   :  { %v2234_v53 = vpop.f32.mrb[28].mxu0 }
 0xbfb   :  { %v2235_v54 = vadd.f32 %v6914_v25, %v2234_v53  ;;  %v4995_v55 = vpop.f32.mrb[29].mxu0 }
 0xbfd   :  { %v2238_v56 = vmax.f32 %v2235_v54, 0.0 }
 0xbff   :  { %v2240_v58 = vadd.f32 %v2239_v57, %v2238_v56 }
 0xc01   :  { %2241 = vst [vmem:[#allocation2 + $0x1a] sm:$0x3] %v2240_v58  ;;  %5029 = vmatmul.mubr.f32.vlgmr.msra.gmra.mrb[28].mxu1 %v2240_v58  ;;  %v2844_v58 = vld [vmem:[#allocation2 + $0x12] sm:$0x3] }
 0xc02   :  { %6145 = vmatpush3.bf16.msra.mxu1 %v6719_v26  ;;  %5098 = vmatprep.mubr.msk.f32.mxu1 %vm6508_vm0, %v6509_v4 }
 0xc03   :  { %6146 = vmatprep.subr.bf16.mxu1 %v6507_v0 }
 0xc06   :  { %6148 = vmatpush3.bf16.msra.mxu1 %v6732_v29 }
 0xc07   :  { %6149 = vmatprep.subr.bf16.mxu1 %v6507_v0 }
 0xc08   :  { %v2540_v21 = vld [vmem:[#allocation2 + $0x1a] sm:$0x3] }
 0xc0a   :  { %6151 = vmatpush3.bf16.msra.mxu1 %v6749_v33 }
 0xc0b   :  { %6152 = vmatprep.subr.bf16.mxu1 %v6507_v0 }
 0xc0e   :  { %6154 = vmatpush3.bf16.msra.mxu1 %v6764_v36 }
 0xc0f   :  { %6155 = vmatprep.subr.bf16.mxu1 %v6507_v0 }
 0xc12   :  { %6157 = vmatpush3.bf16.msra.mxu1 %v6776_v39 }
 0xc13   :  { %6158 = vmatprep.subr.bf16.mxu1 %v6507_v0 }
 0xc16   :  { %6160 = vmatpush3.bf16.msra.mxu1 %v6788_v42 }
 0xc17   :  { %6161 = vmatprep.subr.bf16.mxu1 %v6507_v0 }
 0xc1a   :  { %6163 = vmatpush3.bf16.msra.mxu1 %v6803_v46 }
 0xc1b   :  { %6164 = vmatprep.subr.bf16.mxu1 %v6507_v0 }
 0xc1e   :  { %6166 = vmatpush3.bf16.msra.mxu1 %v6818_v49 }
 0xc1f   :  { %6191 = vmatprep.subr.bf16.mxu1 %v6507_v0 }
 0xcd4   :  { %v2308_v59 = vpop.f32.mrb[28].mxu1 }
 0xcd5   :  { %v2309_v60 = vadd.f32 %v6914_v25, %v2308_v59  ;;  %v5030_v61 = vpop.f32.mrb[29].mxu1 }
 0xcd6   :  { %v7339_v61 = vld [vmem:[%s7486_s3] ss:$0 sm:$0xff] }
 0xcd7   :  { %v2312_v62 = vmax.f32 %v2309_v60, 0.0 }
 0xcd9   :  { %v2314_v1 = vadd.f32 %v2313_v63, %v2312_v62 }
 0xcdb   :  { %2315 = vst [vmem:[#allocation2 + $0x1c] sm:$0x3] %v2314_v1  ;;  %5064 = vmatmul.mubr.f32.vlgmr.msra.gmra.mrb[30].mxu0 %v2314_v1 }
 0xcdc   :  { %6169 = vmatpush3.bf16.msra.mxu0 %v6719_v26  ;;  %5133 = vmatprep.mubr.msk.f32.mxu0 %vm6508_vm0, %v6509_v4 }
 0xcdd   :  { %6170 = vmatprep.subr.bf16.mxu0 %v6507_v0 }
 0xce0   :  { %6172 = vmatpush3.bf16.msra.mxu0 %v6732_v29 }
 0xce1   :  { %6173 = vmatprep.subr.bf16.mxu0 %v6507_v0 }
 0xce2   :  { %v2464_v14 = vld [vmem:[#allocation2 + $0x1c] sm:$0x3] }
 0xce4   :  { %6175 = vmatpush3.bf16.msra.mxu0 %v6749_v33 }
 0xce5   :  { %6176 = vmatprep.subr.bf16.mxu0 %v6507_v0 }
 0xce8   :  { %6178 = vmatpush3.bf16.msra.mxu0 %v6764_v36 }
 0xce9   :  { %6179 = vmatprep.subr.bf16.mxu0 %v6507_v0 }
 0xcec   :  { %6181 = vmatpush3.bf16.msra.mxu0 %v6776_v39 }
 0xced   :  { %6182 = vmatprep.subr.bf16.mxu0 %v6507_v0 }
 0xcf0   :  { %6184 = vmatpush3.bf16.msra.mxu0 %v6788_v42 }
 0xcf1   :  { %6185 = vmatprep.subr.bf16.mxu0 %v6507_v0 }
 0xcf4   :  { %6187 = vmatpush3.bf16.msra.mxu0 %v6803_v46 }
 0xcf5   :  { %6188 = vmatprep.subr.bf16.mxu0 %v6507_v0 }
 0xcf8   :  { %6190 = vmatpush3.bf16.msra.mxu0 %v6818_v49 }
 0xcf9   :  { %6215 = vmatprep.subr.bf16.mxu0 %v6507_v0 }
 0xdae   :  { %v2382_v2 = vpop.f32.mrb[30].mxu0 }
 0xdaf   :  { %v2383_v3 = vadd.f32 %v6914_v25, %v2382_v2  ;;  %v5065_v5 = vpop.f32.mrb[31].mxu0  ;;  %v2920_v2 = vld [vmem:[#allocation2 + $0x10] sm:$0x3] }
 0xdb1   :  { %v2386_v6 = vmax.f32 %v2383_v3, 0.0 }
 0xdb3   :  { %v2388_v8 = vadd.f32 %v2387_v7, %v2386_v6 }
 0xdb5   :  { %2389 = vst [vmem:[#allocation2 + $0x1e] sm:$0x3] %v2388_v8  ;;  %v2390_v9 = vpack.c.bf16 %v2388_v8, %v2388_v8  ;;  %5099 = vmatmul.mubr.f32.vlgmr.msra.gmra.mrb[30].mxu1 %v2388_v8 }
 0xdb6   :  { %6193 = vmatpush3.bf16.msra.mxu1 %v6719_v26  ;;  %5168 = vmatprep.mubr.msk.f32.mxu1 %vm6508_vm0, %v6509_v4 }
 0xdb7   :  { %3568 = vst [vmem:[%s7487_s4 + $0xf] sm:$0x1] %v2390_v9  ;;  %6194 = vmatprep.subr.bf16.mxu1 %v6507_v0 }
 0xdba   :  { %6196 = vmatpush3.bf16.msra.mxu1 %v6732_v29 }
 0xdbb   :  { %6197 = vmatprep.subr.bf16.mxu1 %v6507_v0 }
 0xdbe   :  { %6199 = vmatpush3.bf16.msra.mxu1 %v6749_v33 }
 0xdbf   :  { %6200 = vmatprep.subr.bf16.mxu1 %v6507_v0 }
 0xdc2   :  { %6202 = vmatpush3.bf16.msra.mxu1 %v6764_v36 }
 0xdc3   :  { %6203 = vmatprep.subr.bf16.mxu1 %v6507_v0 }
 0xdc6   :  { %6205 = vmatpush3.bf16.msra.mxu1 %v6776_v39 }
 0xdc7   :  { %6206 = vmatprep.subr.bf16.mxu1 %v6507_v0 }
 0xdca   :  { %6208 = vmatpush3.bf16.msra.mxu1 %v6788_v42 }
 0xdcb   :  { %6209 = vmatprep.subr.bf16.mxu1 %v6507_v0 }
 0xdce   :  { %6211 = vmatpush3.bf16.msra.mxu1 %v6803_v46 }
 0xdcf   :  { %6212 = vmatprep.subr.bf16.mxu1 %v6507_v0 }
 0xdd2   :  { %6214 = vmatpush3.bf16.msra.mxu1 %v6818_v49 }
 0xdd3   :  { %6239 = vmatprep.subr.bf16.mxu1 %v6507_v0 }
 0xe88   :  { %v2459_v10 = vpop.f32.mrb[30].mxu1 }
 0xe89   :  { %v2460_v11 = vadd.f32 %v6914_v25, %v2459_v10  ;;  %v5100_v12 = vpop.f32.mrb[31].mxu1  ;;  %v2996_v10 = vld [vmem:[#allocation2 + $0xe] sm:$0x3] }
 0xe8b   :  { %v2463_v13 = vmax.f32 %v2460_v11, 0.0 }
 0xe8d   :  { %v2465_v15 = vadd.f32 %v2464_v14, %v2463_v13 }
 0xe8f   :  { %v2466_v16 = vpack.c.bf16 %v2465_v15, %v2465_v15  ;;  %5134 = vmatmul.mubr.f32.vlgmr.msra.gmra.mrb[32].mxu0 %v2465_v15 }
 0xe90   :  { %6217 = vmatpush3.bf16.msra.mxu0 %v6719_v26  ;;  %5203 = vmatprep.mubr.msk.f32.mxu0 %vm6508_vm0, %v6509_v4 }
 0xe91   :  { %3569 = vst [vmem:[%s7487_s4 + $0xe] sm:$0x1] %v2466_v16  ;;  %6218 = vmatprep.subr.bf16.mxu0 %v6507_v0 }
 0xe94   :  { %6220 = vmatpush3.bf16.msra.mxu0 %v6732_v29 }
 0xe95   :  { %6221 = vmatprep.subr.bf16.mxu0 %v6507_v0 }
 0xe98   :  { %6223 = vmatpush3.bf16.msra.mxu0 %v6749_v33 }
 0xe99   :  { %6224 = vmatprep.subr.bf16.mxu0 %v6507_v0 }
 0xe9c   :  { %6226 = vmatpush3.bf16.msra.mxu0 %v6764_v36 }
 0xe9d   :  { %6227 = vmatprep.subr.bf16.mxu0 %v6507_v0 }
 0xea0   :  { %6229 = vmatpush3.bf16.msra.mxu0 %v6776_v39 }
 0xea1   :  { %6230 = vmatprep.subr.bf16.mxu0 %v6507_v0 }
 0xea4   :  { %6232 = vmatpush3.bf16.msra.mxu0 %v6788_v42 }
 0xea5   :  { %6233 = vmatprep.subr.bf16.mxu0 %v6507_v0 }
 0xea8   :  { %6235 = vmatpush3.bf16.msra.mxu0 %v6803_v46 }
 0xea9   :  { %6236 = vmatprep.subr.bf16.mxu0 %v6507_v0 }
 0xeac   :  { %6238 = vmatpush3.bf16.msra.mxu0 %v6818_v49 }
 0xead   :  { %6263 = vmatprep.subr.bf16.mxu0 %v6507_v0 }
 0xf62   :  { %v2535_v17 = vpop.f32.mrb[32].mxu0 }
 0xf63   :  { %v2536_v18 = vadd.f32 %v6914_v25, %v2535_v17  ;;  %v5135_v19 = vpop.f32.mrb[33].mxu0  ;;  %v3072_v17 = vld [vmem:[#allocation2 + $0xc] sm:$0x3] }
 0xf65   :  { %v2539_v20 = vmax.f32 %v2536_v18, 0.0 }
 0xf67   :  { %v2541_v22 = vadd.f32 %v2540_v21, %v2539_v20 }
 0xf69   :  { %v2542_v23 = vpack.c.bf16 %v2541_v22, %v2541_v22  ;;  %5169 = vmatmul.mubr.f32.vlgmr.msra.gmra.mrb[32].mxu1 %v2541_v22 }
 0xf6a   :  { %6241 = vmatpush3.bf16.msra.mxu1 %v6719_v26  ;;  %5238 = vmatprep.mubr.msk.f32.mxu1 %vm6508_vm0, %v6509_v4 }
 0xf6b   :  { %3570 = vst [vmem:[%s7487_s4 + $0xd] sm:$0x1] %v2542_v23  ;;  %6242 = vmatprep.subr.bf16.mxu1 %v6507_v0 }
 0xf6e   :  { %6244 = vmatpush3.bf16.msra.mxu1 %v6732_v29 }
 0xf6f   :  { %6245 = vmatprep.subr.bf16.mxu1 %v6507_v0 }
 0xf72   :  { %6247 = vmatpush3.bf16.msra.mxu1 %v6749_v33 }
 0xf73   :  { %6248 = vmatprep.subr.bf16.mxu1 %v6507_v0 }
 0xf76   :  { %6250 = vmatpush3.bf16.msra.mxu1 %v6764_v36 }
 0xf77   :  { %6251 = vmatprep.subr.bf16.mxu1 %v6507_v0 }
 0xf7a   :  { %6253 = vmatpush3.bf16.msra.mxu1 %v6776_v39 }
 0xf7b   :  { %6254 = vmatprep.subr.bf16.mxu1 %v6507_v0 }
 0xf7e   :  { %6256 = vmatpush3.bf16.msra.mxu1 %v6788_v42 }
 0xf7f   :  { %6257 = vmatprep.subr.bf16.mxu1 %v6507_v0 }
 0xf82   :  { %6259 = vmatpush3.bf16.msra.mxu1 %v6803_v46 }
 0xf83   :  { %6260 = vmatprep.subr.bf16.mxu1 %v6507_v0 }
 0xf86   :  { %6262 = vmatpush3.bf16.msra.mxu1 %v6818_v49 }
 0xf87   :  { %6287 = vmatprep.subr.bf16.mxu1 %v6507_v0 }
0x103c   :  { %v2611_v24 = vpop.f32.mrb[32].mxu1 }
0x103d   :  { %v2612_v27 = vadd.f32 %v6914_v25, %v2611_v24  ;;  %v5170_v28 = vpop.f32.mrb[33].mxu1  ;;  %v3148_v24 = vld [vmem:[#allocation2 + $0xa] sm:$0x3] }
0x103f   :  { %v2615_v30 = vmax.f32 %v2612_v27, 0.0 }
0x1041   :  { %v2617_v32 = vadd.f32 %v2616_v31, %v2615_v30 }
0x1043   :  { %v2618_v34 = vpack.c.bf16 %v2617_v32, %v2617_v32  ;;  %5204 = vmatmul.mubr.f32.vlgmr.msra.gmra.mrb[34].mxu0 %v2617_v32 }
0x1044   :  { %6265 = vmatpush3.bf16.msra.mxu0 %v6719_v26  ;;  %5273 = vmatprep.mubr.msk.f32.mxu0 %vm6508_vm0, %v6509_v4 }
0x1045   :  { %3571 = vst [vmem:[%s7487_s4 + $0xc] sm:$0x1] %v2618_v34  ;;  %6266 = vmatprep.subr.bf16.mxu0 %v6507_v0 }
0x1048   :  { %6268 = vmatpush3.bf16.msra.mxu0 %v6732_v29 }
0x1049   :  { %6269 = vmatprep.subr.bf16.mxu0 %v6507_v0 }
0x104c   :  { %6271 = vmatpush3.bf16.msra.mxu0 %v6749_v33 }
0x104d   :  { %6272 = vmatprep.subr.bf16.mxu0 %v6507_v0 }
0x1050   :  { %6274 = vmatpush3.bf16.msra.mxu0 %v6764_v36 }
0x1051   :  { %6275 = vmatprep.subr.bf16.mxu0 %v6507_v0 }
0x1054   :  { %6277 = vmatpush3.bf16.msra.mxu0 %v6776_v39 }
0x1055   :  { %6278 = vmatprep.subr.bf16.mxu0 %v6507_v0 }
0x1058   :  { %6280 = vmatpush3.bf16.msra.mxu0 %v6788_v42 }
0x1059   :  { %6281 = vmatprep.subr.bf16.mxu0 %v6507_v0 }
0x105c   :  { %6283 = vmatpush3.bf16.msra.mxu0 %v6803_v46 }
0x105d   :  { %6284 = vmatprep.subr.bf16.mxu0 %v6507_v0 }
0x1060   :  { %6286 = vmatpush3.bf16.msra.mxu0 %v6818_v49 }
0x1061   :  { %6311 = vmatprep.subr.bf16.mxu0 %v6507_v0 }
0x1116   :  { %v2687_v35 = vpop.f32.mrb[34].mxu0 }
0x1117   :  { %v2688_v37 = vadd.f32 %v6914_v25, %v2687_v35  ;;  %v5205_v38 = vpop.f32.mrb[35].mxu0  ;;  %v3224_v35 = vld [vmem:[#allocation2 + $0x8] sm:$0x3] }
0x1119   :  { %v2691_v40 = vmax.f32 %v2688_v37, 0.0 }
0x111b   :  { %v2693_v43 = vadd.f32 %v2692_v41, %v2691_v40 }
0x111d   :  { %v2694_v44 = vpack.c.bf16 %v2693_v43, %v2693_v43  ;;  %5239 = vmatmul.mubr.f32.vlgmr.msra.gmra.mrb[34].mxu1 %v2693_v43 }
0x111e   :  { %6289 = vmatpush3.bf16.msra.mxu1 %v6719_v26  ;;  %5308 = vmatprep.mubr.msk.f32.mxu1 %vm6508_vm0, %v6509_v4 }
0x111f   :  { %3572 = vst [vmem:[%s7487_s4 + $0xb] sm:$0x1] %v2694_v44  ;;  %6290 = vmatprep.subr.bf16.mxu1 %v6507_v0 }
0x1122   :  { %6292 = vmatpush3.bf16.msra.mxu1 %v6732_v29 }
0x1123   :  { %6293 = vmatprep.subr.bf16.mxu1 %v6507_v0 }
0x1126   :  { %6295 = vmatpush3.bf16.msra.mxu1 %v6749_v33 }
0x1127   :  { %6296 = vmatprep.subr.bf16.mxu1 %v6507_v0 }
0x112a   :  { %6298 = vmatpush3.bf16.msra.mxu1 %v6764_v36 }
0x112b   :  { %6299 = vmatprep.subr.bf16.mxu1 %v6507_v0 }
0x112e   :  { %6301 = vmatpush3.bf16.msra.mxu1 %v6776_v39 }
0x112f   :  { %6302 = vmatprep.subr.bf16.mxu1 %v6507_v0 }
0x1132   :  { %6304 = vmatpush3.bf16.msra.mxu1 %v6788_v42 }
0x1133   :  { %6305 = vmatprep.subr.bf16.mxu1 %v6507_v0 }
0x1136   :  { %6307 = vmatpush3.bf16.msra.mxu1 %v6803_v46 }
0x1137   :  { %6308 = vmatprep.subr.bf16.mxu1 %v6507_v0 }
0x113a   :  { %6310 = vmatpush3.bf16.msra.mxu1 %v6818_v49 }
0x113b   :  { %6335 = vmatprep.subr.bf16.mxu1 %v6507_v0 }
0x11f0   :  { %v2763_v45 = vpop.f32.mrb[34].mxu1 }
0x11f1   :  { %v2764_v47 = vadd.f32 %v6914_v25, %v2763_v45  ;;  %v5240_v48 = vpop.f32.mrb[35].mxu1  ;;  %v3300_v45 = vld [vmem:[#allocation2 + $0x6] sm:$0x3] }
0x11f3   :  { %v2767_v50 = vmax.f32 %v2764_v47, 0.0 }
0x11f5   :  { %v2769_v52 = vadd.f32 %v2768_v51, %v2767_v50 }
0x11f7   :  { %v2770_v53 = vpack.c.bf16 %v2769_v52, %v2769_v52  ;;  %5274 = vmatmul.mubr.f32.vlgmr.msra.gmra.mrb[36].mxu0 %v2769_v52  ;;  %v3452_v52 = vld [vmem:[#allocation2 + $0x2] sm:$0x3] }
0x11f8   :  { %6313 = vmatpush3.bf16.msra.mxu0 %v6719_v26  ;;  %5343 = vmatprep.mubr.msk.f32.mxu0 %vm6508_vm0, %v6509_v4 }
0x11f9   :  { %3573 = vst [vmem:[%s7487_s4 + $0xa] sm:$0x1] %v2770_v53  ;;  %6314 = vmatprep.subr.bf16.mxu0 %v6507_v0 }
0x11fc   :  { %6316 = vmatpush3.bf16.msra.mxu0 %v6732_v29 }
0x11fd   :  { %6317 = vmatprep.subr.bf16.mxu0 %v6507_v0 }
0x1200   :  { %6319 = vmatpush3.bf16.msra.mxu0 %v6749_v33 }
0x1201   :  { %6320 = vmatprep.subr.bf16.mxu0 %v6507_v0 }
0x1204   :  { %6322 = vmatpush3.bf16.msra.mxu0 %v6764_v36 }
0x1205   :  { %6323 = vmatprep.subr.bf16.mxu0 %v6507_v0 }
0x1208   :  { %6325 = vmatpush3.bf16.msra.mxu0 %v6776_v39 }
0x1209   :  { %6326 = vmatprep.subr.bf16.mxu0 %v6507_v0 }
0x120c   :  { %6328 = vmatpush3.bf16.msra.mxu0 %v6788_v42 }
0x120d   :  { %6329 = vmatprep.subr.bf16.mxu0 %v6507_v0 }
0x1210   :  { %6331 = vmatpush3.bf16.msra.mxu0 %v6803_v46 }
0x1211   :  { %6332 = vmatprep.subr.bf16.mxu0 %v6507_v0 }
0x1214   :  { %6334 = vmatpush3.bf16.msra.mxu0 %v6818_v49 }
0x1215   :  { %6359 = vmatprep.subr.bf16.mxu0 %v6507_v0 }
0x12ca   :  { %v2839_v54 = vpop.f32.mrb[36].mxu0 }
0x12cb   :  { %v2840_v55 = vadd.f32 %v6914_v25, %v2839_v54  ;;  %v5275_v56 = vpop.f32.mrb[37].mxu0 }
0x12cd   :  { %v2843_v57 = vmax.f32 %v2840_v55, 0.0 }
0x12cf   :  { %v2845_v59 = vadd.f32 %v2844_v58, %v2843_v57  ;;  %v3528_v58 = vld [vmem:[#allocation2] sm:$0x3] }
0x12d1   :  { %v2846_v60 = vpack.c.bf16 %v2845_v59, %v2845_v59  ;;  %5309 = vmatmul.mubr.f32.vlgmr.msra.gmra.mrb[36].mxu1 %v2845_v59 }
0x12d2   :  { %6337 = vmatpush3.bf16.msra.mxu1 %v6719_v26  ;;  %5378 = vmatprep.mubr.msk.f32.mxu1 %vm6508_vm0, %v6509_v4 }
0x12d3   :  { %3574 = vst [vmem:[%s7487_s4 + $0x9] sm:$0x1] %v2846_v60  ;;  %6338 = vmatprep.subr.bf16.mxu1 %v6507_v0 }
0x12d6   :  { %6340 = vmatpush3.bf16.msra.mxu1 %v6732_v29 }
0x12d7   :  { %6341 = vmatprep.subr.bf16.mxu1 %v6507_v0 }
0x12da   :  { %6343 = vmatpush3.bf16.msra.mxu1 %v6749_v33 }
0x12db   :  { %6344 = vmatprep.subr.bf16.mxu1 %v6507_v0 }
0x12de   :  { %6346 = vmatpush3.bf16.msra.mxu1 %v6764_v36 }
0x12df   :  { %6347 = vmatprep.subr.bf16.mxu1 %v6507_v0 }
0x12e2   :  { %6349 = vmatpush3.bf16.msra.mxu1 %v6776_v39 }
0x12e3   :  { %6350 = vmatprep.subr.bf16.mxu1 %v6507_v0 }
0x12e6   :  { %6352 = vmatpush3.bf16.msra.mxu1 %v6788_v42 }
0x12e7   :  { %6353 = vmatprep.subr.bf16.mxu1 %v6507_v0 }
0x12ea   :  { %6355 = vmatpush3.bf16.msra.mxu1 %v6803_v46 }
0x12eb   :  { %6356 = vmatprep.subr.bf16.mxu1 %v6507_v0 }
0x12ee   :  { %6358 = vmatpush3.bf16.msra.mxu1 %v6818_v49 }
0x12ef   :  { %6383 = vmatprep.subr.bf16.mxu1 %v6507_v0 }
0x13a4   :  { %v2915_v25 = vpop.f32.mrb[36].mxu1 }
0x13a5   :  { %v2916_v62 = vadd.f32 %v7339_v61, %v2915_v25  ;;  %v5310_v63 = vpop.f32.mrb[37].mxu1 }
0x13a7   :  { %v2919_v1 = vmax.f32 %v2916_v62, 0.0 }
0x13a9   :  { %v2921_v3 = vadd.f32 %v2920_v2, %v2919_v1 }
0x13ab   :  { %v2922_v5 = vpack.c.bf16 %v2921_v3, %v2921_v3  ;;  %5344 = vmatmul.mubr.f32.vlgmr.msra.gmra.mrb[38].mxu0 %v2921_v3 }
0x13ac   :  { %6361 = vmatpush3.bf16.msra.mxu0 %v6719_v26  ;;  %5413 = vmatprep.mubr.msk.f32.mxu0 %vm6508_vm0, %v6509_v4 }
0x13ad   :  { %3575 = vst [vmem:[%s7487_s4 + $0x8] sm:$0x1] %v2922_v5  ;;  %6362 = vmatprep.subr.bf16.mxu0 %v6507_v0 }
0x13b0   :  { %6364 = vmatpush3.bf16.msra.mxu0 %v6732_v29 }
0x13b1   :  { %6365 = vmatprep.subr.bf16.mxu0 %v6507_v0 }
0x13b4   :  { %6367 = vmatpush3.bf16.msra.mxu0 %v6749_v33 }
0x13b5   :  { %6368 = vmatprep.subr.bf16.mxu0 %v6507_v0 }
0x13b8   :  { %6370 = vmatpush3.bf16.msra.mxu0 %v6764_v36 }
0x13b9   :  { %6371 = vmatprep.subr.bf16.mxu0 %v6507_v0 }
0x13bc   :  { %6373 = vmatpush3.bf16.msra.mxu0 %v6776_v39 }
0x13bd   :  { %6374 = vmatprep.subr.bf16.mxu0 %v6507_v0 }
0x13c0   :  { %6376 = vmatpush3.bf16.msra.mxu0 %v6788_v42 }
0x13c1   :  { %6377 = vmatprep.subr.bf16.mxu0 %v6507_v0 }
0x13c4   :  { %6379 = vmatpush3.bf16.msra.mxu0 %v6803_v46 }
0x13c5   :  { %6380 = vmatprep.subr.bf16.mxu0 %v6507_v0 }
0x13c8   :  { %6382 = vmatpush3.bf16.msra.mxu0 %v6818_v49 }
0x13c9   :  { %6407 = vmatprep.subr.bf16.mxu0 %v6507_v0 }
0x147e   :  { %v2991_v6 = vpop.f32.mrb[38].mxu0 }
0x147f   :  { %v2992_v7 = vadd.f32 %v7339_v61, %v2991_v6  ;;  %v5345_v8 = vpop.f32.mrb[39].mxu0 }
0x1481   :  { %v2995_v9 = vmax.f32 %v2992_v7, 0.0 }
0x1483   :  { %v2997_v11 = vadd.f32 %v2996_v10, %v2995_v9 }
0x1485   :  { %v2998_v12 = vpack.c.bf16 %v2997_v11, %v2997_v11  ;;  %5379 = vmatmul.mubr.f32.vlgmr.msra.gmra.mrb[38].mxu1 %v2997_v11 }
0x1486   :  { %6385 = vmatpush3.bf16.msra.mxu1 %v6719_v26  ;;  %5448 = vmatprep.mubr.msk.f32.mxu1 %vm6508_vm0, %v6509_v4 }
0x1487   :  { %3576 = vst [vmem:[%s7487_s4 + $0x7] sm:$0x1] %v2998_v12  ;;  %6386 = vmatprep.subr.bf16.mxu1 %v6507_v0 }
0x148a   :  { %6388 = vmatpush3.bf16.msra.mxu1 %v6732_v29 }
0x148b   :  { %6389 = vmatprep.subr.bf16.mxu1 %v6507_v0 }
0x148e   :  { %6391 = vmatpush3.bf16.msra.mxu1 %v6749_v33 }
0x148f   :  { %6392 = vmatprep.subr.bf16.mxu1 %v6507_v0 }
0x1492   :  { %6394 = vmatpush3.bf16.msra.mxu1 %v6764_v36 }
0x1493   :  { %6395 = vmatprep.subr.bf16.mxu1 %v6507_v0 }
0x1496   :  { %6397 = vmatpush3.bf16.msra.mxu1 %v6776_v39 }
0x1497   :  { %6398 = vmatprep.subr.bf16.mxu1 %v6507_v0 }
0x149a   :  { %6400 = vmatpush3.bf16.msra.mxu1 %v6788_v42 }
0x149b   :  { %6401 = vmatprep.subr.bf16.mxu1 %v6507_v0 }
0x149e   :  { %6403 = vmatpush3.bf16.msra.mxu1 %v6803_v46 }
0x149f   :  { %6404 = vmatprep.subr.bf16.mxu1 %v6507_v0 }
0x14a2   :  { %6406 = vmatpush3.bf16.msra.mxu1 %v6818_v49 }
0x14a3   :  { %6431 = vmatprep.subr.bf16.mxu1 %v6507_v0 }
0x1558   :  { %v3067_v13 = vpop.f32.mrb[38].mxu1 }
0x1559   :  { %v3068_v14 = vadd.f32 %v7339_v61, %v3067_v13  ;;  %v5380_v15 = vpop.f32.mrb[39].mxu1 }
0x155b   :  { %v3071_v16 = vmax.f32 %v3068_v14, 0.0 }
0x155d   :  { %v3073_v18 = vadd.f32 %v3072_v17, %v3071_v16 }
0x155f   :  { %v3074_v19 = vpack.c.bf16 %v3073_v18, %v3073_v18  ;;  %5414 = vmatmul.mubr.f32.vlgmr.msra.gmra.mrb[40].mxu0 %v3073_v18 }
0x1560   :  { %6409 = vmatpush3.bf16.msra.mxu0 %v6719_v26  ;;  %5483 = vmatprep.mubr.msk.f32.mxu0 %vm6508_vm0, %v6509_v4 }
0x1561   :  { %3577 = vst [vmem:[%s7487_s4 + $0x6] sm:$0x1] %v3074_v19  ;;  %6410 = vmatprep.subr.bf16.mxu0 %v6507_v0 }
0x1564   :  { %6412 = vmatpush3.bf16.msra.mxu0 %v6732_v29 }
0x1565   :  { %6413 = vmatprep.subr.bf16.mxu0 %v6507_v0 }
0x1568   :  { %6415 = vmatpush3.bf16.msra.mxu0 %v6749_v33 }
0x1569   :  { %6416 = vmatprep.subr.bf16.mxu0 %v6507_v0 }
0x156c   :  { %6418 = vmatpush3.bf16.msra.mxu0 %v6764_v36 }
0x156d   :  { %6419 = vmatprep.subr.bf16.mxu0 %v6507_v0 }
0x1570   :  { %6421 = vmatpush3.bf16.msra.mxu0 %v6776_v39 }
0x1571   :  { %6422 = vmatprep.subr.bf16.mxu0 %v6507_v0 }
0x1574   :  { %6424 = vmatpush3.bf16.msra.mxu0 %v6788_v42 }
0x1575   :  { %6425 = vmatprep.subr.bf16.mxu0 %v6507_v0 }
0x1578   :  { %6427 = vmatpush3.bf16.msra.mxu0 %v6803_v46 }
0x1579   :  { %6428 = vmatprep.subr.bf16.mxu0 %v6507_v0 }
0x157c   :  { %6430 = vmatpush3.bf16.msra.mxu0 %v6818_v49 }
0x157d   :  { %6455 = vmatprep.subr.bf16.mxu0 %v6507_v0 }
0x1632   :  { %v3143_v20 = vpop.f32.mrb[40].mxu0 }
0x1633   :  { %v3144_v21 = vadd.f32 %v7339_v61, %v3143_v20  ;;  %v5415_v22 = vpop.f32.mrb[41].mxu0 }
0x1635   :  { %v3147_v23 = vmax.f32 %v3144_v21, 0.0 }
0x1637   :  { %v3149_v27 = vadd.f32 %v3148_v24, %v3147_v23 }
0x1639   :  { %v3150_v28 = vpack.c.bf16 %v3149_v27, %v3149_v27  ;;  %5449 = vmatmul.mubr.f32.vlgmr.msra.gmra.mrb[40].mxu1 %v3149_v27 }
0x163a   :  { %6433 = vmatpush3.bf16.msra.mxu1 %v6719_v26  ;;  %5518 = vmatprep.mubr.msk.f32.mxu1 %vm6508_vm0, %v6509_v4 }
0x163b   :  { %3578 = vst [vmem:[%s7487_s4 + $0x5] sm:$0x1] %v3150_v28  ;;  %6434 = vmatprep.subr.bf16.mxu1 %v6507_v0 }
0x163e   :  { %6436 = vmatpush3.bf16.msra.mxu1 %v6732_v29 }
0x163f   :  { %6437 = vmatprep.subr.bf16.mxu1 %v6507_v0 }
0x1642   :  { %6439 = vmatpush3.bf16.msra.mxu1 %v6749_v33 }
0x1643   :  { %6440 = vmatprep.subr.bf16.mxu1 %v6507_v0 }
0x1646   :  { %6442 = vmatpush3.bf16.msra.mxu1 %v6764_v36 }
0x1647   :  { %6443 = vmatprep.subr.bf16.mxu1 %v6507_v0 }
0x164a   :  { %6445 = vmatpush3.bf16.msra.mxu1 %v6776_v39 }
0x164b   :  { %6446 = vmatprep.subr.bf16.mxu1 %v6507_v0 }
0x164e   :  { %6448 = vmatpush3.bf16.msra.mxu1 %v6788_v42 }
0x164f   :  { %6449 = vmatprep.subr.bf16.mxu1 %v6507_v0 }
0x1652   :  { %6451 = vmatpush3.bf16.msra.mxu1 %v6803_v46 }
0x1653   :  { %6452 = vmatprep.subr.bf16.mxu1 %v6507_v0 }
0x1656   :  { %6454 = vmatpush3.bf16.msra.mxu1 %v6818_v49 }
0x1657   :  { %6479 = vmatprep.subr.bf16.mxu1 %v6507_v0 }
0x170c   :  { %v3219_v30 = vpop.f32.mrb[40].mxu1 }
0x170d   :  { %v3220_v31 = vadd.f32 %v7339_v61, %v3219_v30  ;;  %v5450_v32 = vpop.f32.mrb[41].mxu1 }
0x170f   :  { %v3223_v34 = vmax.f32 %v3220_v31, 0.0 }
0x1711   :  { %v3225_v37 = vadd.f32 %v3224_v35, %v3223_v34 }
0x1713   :  { %v3226_v38 = vpack.c.bf16 %v3225_v37, %v3225_v37  ;;  %5484 = vmatmul.mubr.f32.vlgmr.msra.gmra.mrb[42].mxu0 %v3225_v37 }
0x1714   :  { %6457 = vmatpush3.bf16.msra.mxu0 %v6719_v26  ;;  %5553 = vmatprep.mubr.msk.f32.mxu0 %vm6508_vm0, %v6509_v4 }
0x1715   :  { %3579 = vst [vmem:[%s7487_s4 + $0x4] sm:$0x1] %v3226_v38  ;;  %6458 = vmatprep.subr.bf16.mxu0 %v6507_v0 }
0x1718   :  { %6460 = vmatpush3.bf16.msra.mxu0 %v6732_v29 }
0x1719   :  { %6461 = vmatprep.subr.bf16.mxu0 %v6507_v0 }
0x171c   :  { %6463 = vmatpush3.bf16.msra.mxu0 %v6749_v33 }
0x171d   :  { %6464 = vmatprep.subr.bf16.mxu0 %v6507_v0 }
0x1720   :  { %6466 = vmatpush3.bf16.msra.mxu0 %v6764_v36 }
0x1721   :  { %6467 = vmatprep.subr.bf16.mxu0 %v6507_v0 }
0x1724   :  { %6469 = vmatpush3.bf16.msra.mxu0 %v6776_v39 }
0x1725   :  { %6470 = vmatprep.subr.bf16.mxu0 %v6507_v0 }
0x1728   :  { %6472 = vmatpush3.bf16.msra.mxu0 %v6788_v42 }
0x1729   :  { %6473 = vmatprep.subr.bf16.mxu0 %v6507_v0 }
0x172c   :  { %6475 = vmatpush3.bf16.msra.mxu0 %v6803_v46 }
0x172d   :  { %6476 = vmatprep.subr.bf16.mxu0 %v6507_v0 }
0x1730   :  { %6478 = vmatpush3.bf16.msra.mxu0 %v6818_v49 }
0x17e6   :  { %v3295_v40 = vpop.f32.mrb[42].mxu0 }
0x17e7   :  { %v3296_v41 = vadd.f32 %v7339_v61, %v3295_v40  ;;  %v5485_v43 = vpop.f32.mrb[43].mxu0 }
0x17e9   :  { %v3299_v44 = vmax.f32 %v3296_v41, 0.0 }
0x17eb   :  { %v3301_v47 = vadd.f32 %v3300_v45, %v3299_v44 }
0x17ed   :  { %v3302_v48 = vpack.c.bf16 %v3301_v47, %v3301_v47  ;;  %5519 = vmatmul.mubr.f32.vlgmr.msra.gmra.mrb[42].mxu1 %v3301_v47 }
0x17ee   :  { %6481 = vmatpush3.bf16.msra.mxu1 %v6719_v26  ;;  %5588 = vmatprep.mubr.msk.f32.mxu1 %vm6508_vm0, %v6509_v4 }
0x17ef   :  { %3580 = vst [vmem:[%s7487_s4 + $0x3] sm:$0x1] %v3302_v48  ;;  %6482 = vmatprep.subr.bf16.mxu1 %v6507_v0 }
0x17f2   :  { %6484 = vmatpush3.bf16.msra.mxu1 %v6732_v29 }
0x17f3   :  { %6485 = vmatprep.subr.bf16.mxu1 %v6507_v0 }
0x17f6   :  { %6487 = vmatpush3.bf16.msra.mxu1 %v6749_v33 }
0x17f7   :  { %6488 = vmatprep.subr.bf16.mxu1 %v6507_v0 }
0x17fa   :  { %6490 = vmatpush3.bf16.msra.mxu1 %v6764_v36  ;;  %v3376_v36 = vld [vmem:[#allocation2 + $0x4] sm:$0x3] }
0x17fb   :  { %6491 = vmatprep.subr.bf16.mxu1 %v6507_v0 }
0x17fe   :  { %6493 = vmatpush3.bf16.msra.mxu1 %v6776_v39 }
0x17ff   :  { %6494 = vmatprep.subr.bf16.mxu1 %v6507_v0 }
0x1802   :  { %6496 = vmatpush3.bf16.msra.mxu1 %v6788_v42 }
0x1803   :  { %6497 = vmatprep.subr.bf16.mxu1 %v6507_v0 }
0x1806   :  { %6499 = vmatpush3.bf16.msra.mxu1 %v6803_v46 }
0x1807   :  { %6500 = vmatprep.subr.bf16.mxu1 %v6507_v0 }
0x180a   :  { %6502 = vmatpush3.bf16.msra.mxu1 %v6818_v49 }
0x18c0   :  { %v3371_v4 = vpop.f32.mrb[42].mxu1 }
0x18c1   :  { %v3372_v26 = vadd.f32 %v7339_v61, %v3371_v4  ;;  %v5520_v29 = vpop.f32.mrb[43].mxu1 }
0x18c3   :  { %v3375_v33 = vmax.f32 %v3372_v26, 0.0 }
0x18c5   :  { %v3377_v50 = vadd.f32 %v3376_v36, %v3375_v33 }
0x18c7   :  { %v3378_v39 = vpack.c.bf16 %v3377_v50, %v3377_v50  ;;  %5554 = vmatmul.mubr.f32.vlgmr.msra.gmra.mrb[44].mxu0 %v3377_v50 }
0x18c9   :  { %3581 = vst [vmem:[%s7487_s4 + $0x2] sm:$0x1] %v3378_v39 }
0x199a   :  { %v3447_v42 = vpop.f32.mrb[44].mxu0 }
0x199b   :  { %v3448_v46 = vadd.f32 %v7339_v61, %v3447_v42  ;;  %v5555_v51 = vpop.f32.mrb[45].mxu0 }
0x199d   :  { %v3451_v0 = vmax.f32 %v3448_v46, 0.0 }
0x199f   :  { %v3453_v49 = vadd.f32 %v3452_v52, %v3451_v0 }
0x19a1   :  { %v3454_v53 = vpack.c.bf16 %v3453_v49, %v3453_v49  ;;  %5589 = vmatmul.mubr.f32.vlgmr.msra.gmra.mrb[44].mxu1 %v3453_v49 }
0x19a3   :  { %3582 = vst [vmem:[%s7487_s4 + $0x1] sm:$0x1] %v3454_v53 }
0x1a74   :  { %v3523_v54 = vpop.f32.mrb[44].mxu1 }
0x1a75   :  { %v3524_v55 = vadd.f32 %v7339_v61, %v3523_v54  ;;  %v5590_v56 = vpop.f32.mrb[45].mxu1 }
0x1a77   :  { %v3527_v57 = vmax.f32 %v3524_v55, 0.0 }
0x1a79   :  { %v3529_v59 = vadd.f32 %v3528_v58, %v3527_v57 }
0x1a7b   :  { %v3530_v60 = vpack.c.bf16 %v3529_v59, %v3529_v59 }
0x1a7d   :  { %3531 = vst [vmem:[%s7487_s4] sm:$0x1] %v3530_v60 }

// kernel: ssr_upsampling2.3
= control target key start
LH: loop header
LB: loop body
LE: loop exit
PB: predicated region body
PF: predicated region fallthrough
CT: control target
= control target key end

     0   :  { %v8387_v0 = vmov 0.0|0.0   ;;  %vm8388_vm0 = vmmov 0   ;;  %v8389_v4 = vmov 0.0   ;;  %s9990_s1 = inlined_call_operand.vmem [shape: f32[128,128], index: 1, kind: input, shape index: {}]   ;;  %s9991_s0 = inlined_call_operand.vmem [shape: bf16[16,2,128], index: 0, kind: input, shape index: {}]   ;;  %s9992_s2 = inlined_call_operand.vmem [shape: f32[1,128], index: 2, kind: input, shape index: {}]   ;;  %s9993_s3 = inlined_call_operand.vmem [shape: f32[128,512], index: 3, kind: input, shape index: {}]   ;;  %s9994_s4 = inlined_call_operand.vmem [shape: f32[16,2,512], index: 4, kind: output, shape index: {}]  }
   0x1   :  { %6638 = vmatprep.subr.bf16.mxu0 %v8387_v0  ;;  %v17_v1 = vld [vmem:[%s9990_s1] sm:$0xff]  ;;  %v18_v2 = vld [vmem:[%s9990_s1 + $0x8] sm:$0xff]  ;;  %v19_v3 = vld [vmem:[%s9990_s1 + $0x10] sm:$0xff]  ;;  %5620 = vmatprep.mubr.msk.f32.mxu0 %vm8388_vm0, %v8389_v4 }
   0x2   :  { %v8428_v5 = vpack.c.bf16 %v18_v2, %v17_v1  ;;  %v20_v6 = vld [vmem:[%s9990_s1 + $0x18] sm:$0xff]  ;;  %6662 = vmatprep.subr.bf16.mxu1 %v8387_v0  ;;  %5655 = vmatprep.mubr.msk.f32.mxu1 %vm8388_vm0, %v8389_v4  ;;  %v21_v8 = vld [vmem:[%s9990_s1 + $0x20] sm:$0xff]  ;;  %v22_v9 = vld [vmem:[%s9990_s1 + $0x28] sm:$0xff] }
   0x3   :  { %v8437_v7 = vpack.c.bf16 %v20_v6, %v19_v3  ;;  %v104_v10 = vld [vmem:[%s9991_s0] sm:$0x1]  ;;  %v8452_v12 = vpack.c.bf16 %v22_v9, %v21_v8  ;;  %v23_v13 = vld [vmem:[%s9990_s1 + $0x30] sm:$0xff]  ;;  %v24_v14 = vld [vmem:[%s9990_s1 + $0x38] sm:$0xff] }
   0x4   :  { %6640 = vmatpush3.bf16.msra.mxu0 %v8428_v5  ;;  %6664 = vmatpush3.bf16.msra.mxu1 %v8428_v5  ;;  %v105_v11 = vunpack.c.l.bf16 %v104_v10  ;;  %v8464_v15 = vpack.c.bf16 %v24_v14, %v23_v13  ;;  %v25_v16 = vld [vmem:[%s9990_s1 + $0x40] sm:$0xff]  ;;  %v26_v17 = vld [vmem:[%s9990_s1 + $0x48] sm:$0xff]  ;;  %v27_v19 = vld [vmem:[%s9990_s1 + $0x50] sm:$0xff] }
   0x5   :  { %6641 = vmatprep.subr.bf16.mxu0 %v8387_v0  ;;  %6665 = vmatprep.subr.bf16.mxu1 %v8387_v0  ;;  %v8476_v18 = vpack.c.bf16 %v26_v17, %v25_v16  ;;  %v28_v20 = vld [vmem:[%s9990_s1 + $0x58] sm:$0xff]  ;;  %v29_v22 = vld [vmem:[%s9990_s1 + $0x60] sm:$0xff]  ;;  %v30_v23 = vld [vmem:[%s9990_s1 + $0x68] sm:$0xff] }
   0x6   :  { %106 = vst [vmem:[#allocation2] sm:$0x3] %v105_v11  ;;  %v8488_v21 = vpack.c.bf16 %v28_v20, %v27_v19  ;;  %v8500_v24 = vpack.c.bf16 %v30_v23, %v29_v22  ;;  %v31_v25 = vld [vmem:[%s9990_s1 + $0x70] sm:$0xff]  ;;  %v32_v26 = vld [vmem:[%s9990_s1 + $0x78] sm:$0xff]  ;;  %v8542_v28 = vld [vmem:[%s9992_s2] ss:$0 sm:$0xff] }
   0x7   :  { %v8512_v27 = vpack.c.bf16 %v32_v26, %v31_v25  ;;  %v5048_v29 = vld [vmem:[%s9991_s0 + $0x1] sm:$0x1]  ;;  %v5049_v36 = vld [vmem:[%s9991_s0 + $0x2] sm:$0x1]  ;;  %v5050_v43 = vld [vmem:[%s9991_s0 + $0x3] sm:$0x1] }
   0x8   :  { %6643 = vmatpush3.bf16.msra.mxu0 %v8437_v7  ;;  %6667 = vmatpush3.bf16.msra.mxu1 %v8437_v7  ;;  %v180_v32 = vunpack.c.l.bf16 %v5048_v29  ;;  %v257_v39 = vunpack.c.l.bf16 %v5049_v36  ;;  %v334_v46 = vunpack.c.l.bf16 %v5050_v43  ;;  %v5051_v50 = vld [vmem:[%s9991_s0 + $0x4] sm:$0x1]  ;;  %v5052_v57 = vld [vmem:[%s9991_s0 + $0x5] sm:$0x1]  ;;  %v5053_v1 = vld [vmem:[%s9991_s0 + $0x6] sm:$0x1] }
   0x9   :  { %6644 = vmatprep.subr.bf16.mxu0 %v8387_v0  ;;  %6668 = vmatprep.subr.bf16.mxu1 %v8387_v0  ;;  %v411_v53 = vunpack.c.l.bf16 %v5051_v50  ;;  %v488_v60 = vunpack.c.l.bf16 %v5052_v57  ;;  %v565_v6 = vunpack.c.l.bf16 %v5053_v1  ;;  %v5055_v22 = vld [vmem:[%s9991_s0 + $0x8] sm:$0x1] }
   0xa   :  { %v719_v26 = vunpack.c.l.bf16 %v5055_v22 }
   0xc   :  { %6646 = vmatpush3.bf16.msra.mxu0 %v8452_v12  ;;  %6670 = vmatpush3.bf16.msra.mxu1 %v8452_v12 }
   0xd   :  { %6647 = vmatprep.subr.bf16.mxu0 %v8387_v0  ;;  %6671 = vmatprep.subr.bf16.mxu1 %v8387_v0 }
  0x10   :  { %6649 = vmatpush3.bf16.msra.mxu0 %v8464_v15  ;;  %6673 = vmatpush3.bf16.msra.mxu1 %v8464_v15 }
  0x11   :  { %6650 = vmatprep.subr.bf16.mxu0 %v8387_v0  ;;  %6674 = vmatprep.subr.bf16.mxu1 %v8387_v0 }
  0x14   :  { %6652 = vmatpush3.bf16.msra.mxu0 %v8476_v18  ;;  %6676 = vmatpush3.bf16.msra.mxu1 %v8476_v18 }
  0x15   :  { %6653 = vmatprep.subr.bf16.mxu0 %v8387_v0  ;;  %6677 = vmatprep.subr.bf16.mxu1 %v8387_v0 }
  0x18   :  { %6655 = vmatpush3.bf16.msra.mxu0 %v8488_v21  ;;  %6679 = vmatpush3.bf16.msra.mxu1 %v8488_v21 }
  0x19   :  { %6656 = vmatprep.subr.bf16.mxu0 %v8387_v0  ;;  %6680 = vmatprep.subr.bf16.mxu1 %v8387_v0 }
  0x1c   :  { %6658 = vmatpush3.bf16.msra.mxu0 %v8500_v24  ;;  %6682 = vmatpush3.bf16.msra.mxu1 %v8500_v24 }
  0x1d   :  { %6659 = vmatprep.subr.bf16.mxu0 %v8387_v0  ;;  %6683 = vmatprep.subr.bf16.mxu1 %v8387_v0 }
  0x20   :  { %6661 = vmatpush3.bf16.msra.mxu0 %v8512_v27  ;;  %6685 = vmatpush3.bf16.msra.mxu1 %v8512_v27 }
  0x21   :  { %6686 = vmatprep.subr.bf16.mxu0 %v8387_v0  ;;  %6710 = vmatprep.subr.bf16.mxu1 %v8387_v0 }
  0x23   :  { %5621 = vmatmul.mubr.f32.vlgmr.msra.gmra.mrb[0].mxu0 %v105_v11  ;;  %v5054_v11 = vld [vmem:[%s9991_s0 + $0x7] sm:$0x1] }
  0x24   :  { %6688 = vmatpush3.bf16.msra.mxu0 %v8428_v5  ;;  %5690 = vmatprep.mubr.msk.f32.mxu0 %vm8388_vm0, %v8389_v4  ;;  %v642_v16 = vunpack.c.l.bf16 %v5054_v11 }
  0x25   :  { %6689 = vmatprep.subr.bf16.mxu0 %v8387_v0 }
  0x28   :  { %6691 = vmatpush3.bf16.msra.mxu0 %v8437_v7 }
  0x29   :  { %6692 = vmatprep.subr.bf16.mxu0 %v8387_v0 }
  0x2c   :  { %6694 = vmatpush3.bf16.msra.mxu0 %v8452_v12 }
  0x2d   :  { %6695 = vmatprep.subr.bf16.mxu0 %v8387_v0 }
  0x30   :  { %6697 = vmatpush3.bf16.msra.mxu0 %v8464_v15 }
  0x31   :  { %6698 = vmatprep.subr.bf16.mxu0 %v8387_v0 }
  0x34   :  { %6700 = vmatpush3.bf16.msra.mxu0 %v8476_v18 }
  0x35   :  { %6701 = vmatprep.subr.bf16.mxu0 %v8387_v0 }
  0x38   :  { %6703 = vmatpush3.bf16.msra.mxu0 %v8488_v21 }
  0x39   :  { %6704 = vmatprep.subr.bf16.mxu0 %v8387_v0 }
  0x3c   :  { %6706 = vmatpush3.bf16.msra.mxu0 %v8500_v24 }
  0x3d   :  { %6707 = vmatprep.subr.bf16.mxu0 %v8387_v0 }
  0x40   :  { %6709 = vmatpush3.bf16.msra.mxu0 %v8512_v27 }
  0x41   :  { %6734 = vmatprep.subr.bf16.mxu0 %v8387_v0 }
  0xf6   :  { %v173_v30 = vpop.f32.mrb[0].mxu0 }
  0xf7   :  { %v174_v31 = vadd.f32 %v8542_v28, %v173_v30  ;;  %v5622_v33 = vpop.f32.mrb[1].mxu0 }
  0xf9   :  { %v177_v34 = vmax.f32 %v174_v31, 0.0 }
  0xfb   :  { %v181_v35 = vadd.f32 %v180_v32, %v177_v34  ;;  %v5056_v32 = vld [vmem:[%s9991_s0 + $0x9] sm:$0x1] }
  0xfd   :  { %183 = vst [vmem:[#allocation2 + $0x2] sm:$0x3] %v181_v35  ;;  %5656 = vmatmul.mubr.f32.vlgmr.msra.gmra.mrb[0].mxu1 %v181_v35  ;;  %v796_v35 = vunpack.c.l.bf16 %v5056_v32 }
  0xfe   :  { %6712 = vmatpush3.bf16.msra.mxu1 %v8428_v5  ;;  %5725 = vmatprep.mubr.msk.f32.mxu1 %vm8388_vm0, %v8389_v4 }
  0xff   :  { %6713 = vmatprep.subr.bf16.mxu1 %v8387_v0 }
 0x102   :  { %6715 = vmatpush3.bf16.msra.mxu1 %v8437_v7 }
 0x103   :  { %6716 = vmatprep.subr.bf16.mxu1 %v8387_v0 }
 0x106   :  { %6718 = vmatpush3.bf16.msra.mxu1 %v8452_v12 }
 0x107   :  { %6719 = vmatprep.subr.bf16.mxu1 %v8387_v0 }
 0x10a   :  { %6721 = vmatpush3.bf16.msra.mxu1 %v8464_v15 }
 0x10b   :  { %6722 = vmatprep.subr.bf16.mxu1 %v8387_v0 }
 0x10e   :  { %6724 = vmatpush3.bf16.msra.mxu1 %v8476_v18 }
 0x10f   :  { %6725 = vmatprep.subr.bf16.mxu1 %v8387_v0 }
 0x112   :  { %6727 = vmatpush3.bf16.msra.mxu1 %v8488_v21 }
 0x113   :  { %6728 = vmatprep.subr.bf16.mxu1 %v8387_v0 }
 0x116   :  { %6730 = vmatpush3.bf16.msra.mxu1 %v8500_v24 }
 0x117   :  { %6731 = vmatprep.subr.bf16.mxu1 %v8387_v0 }
 0x11a   :  { %6733 = vmatpush3.bf16.msra.mxu1 %v8512_v27 }
 0x11b   :  { %6758 = vmatprep.subr.bf16.mxu1 %v8387_v0 }
 0x1d0   :  { %v250_v37 = vpop.f32.mrb[0].mxu1 }
 0x1d1   :  { %v251_v38 = vadd.f32 %v8542_v28, %v250_v37  ;;  %v5657_v40 = vpop.f32.mrb[1].mxu1 }
 0x1d3   :  { %v254_v41 = vmax.f32 %v251_v38, 0.0 }
 0x1d5   :  { %v258_v42 = vadd.f32 %v257_v39, %v254_v41  ;;  %v5057_v39 = vld [vmem:[%s9991_s0 + $0xa] sm:$0x1] }
 0x1d7   :  { %260 = vst [vmem:[#allocation2 + $0x4] sm:$0x3] %v258_v42  ;;  %5691 = vmatmul.mubr.f32.vlgmr.msra.gmra.mrb[2].mxu0 %v258_v42  ;;  %v873_v42 = vunpack.c.l.bf16 %v5057_v39 }
 0x1d8   :  { %6736 = vmatpush3.bf16.msra.mxu0 %v8428_v5  ;;  %5760 = vmatprep.mubr.msk.f32.mxu0 %vm8388_vm0, %v8389_v4 }
 0x1d9   :  { %6737 = vmatprep.subr.bf16.mxu0 %v8387_v0 }
 0x1dc   :  { %6739 = vmatpush3.bf16.msra.mxu0 %v8437_v7 }
 0x1dd   :  { %6740 = vmatprep.subr.bf16.mxu0 %v8387_v0 }
 0x1e0   :  { %6742 = vmatpush3.bf16.msra.mxu0 %v8452_v12 }
 0x1e1   :  { %6743 = vmatprep.subr.bf16.mxu0 %v8387_v0 }
 0x1e4   :  { %6745 = vmatpush3.bf16.msra.mxu0 %v8464_v15 }
 0x1e5   :  { %6746 = vmatprep.subr.bf16.mxu0 %v8387_v0 }
 0x1e8   :  { %6748 = vmatpush3.bf16.msra.mxu0 %v8476_v18 }
 0x1e9   :  { %6749 = vmatprep.subr.bf16.mxu0 %v8387_v0 }
 0x1ec   :  { %6751 = vmatpush3.bf16.msra.mxu0 %v8488_v21 }
 0x1ed   :  { %6752 = vmatprep.subr.bf16.mxu0 %v8387_v0 }
 0x1f0   :  { %6754 = vmatpush3.bf16.msra.mxu0 %v8500_v24 }
 0x1f1   :  { %6755 = vmatprep.subr.bf16.mxu0 %v8387_v0 }
 0x1f4   :  { %6757 = vmatpush3.bf16.msra.mxu0 %v8512_v27 }
 0x1f5   :  { %6782 = vmatprep.subr.bf16.mxu0 %v8387_v0 }
 0x2aa   :  { %v327_v44 = vpop.f32.mrb[2].mxu0 }
 0x2ab   :  { %v328_v45 = vadd.f32 %v8542_v28, %v327_v44  ;;  %v5692_v47 = vpop.f32.mrb[3].mxu0 }
 0x2ad   :  { %v331_v48 = vmax.f32 %v328_v45, 0.0 }
 0x2af   :  { %v335_v49 = vadd.f32 %v334_v46, %v331_v48  ;;  %v5058_v46 = vld [vmem:[%s9991_s0 + $0xb] sm:$0x1] }
 0x2b1   :  { %337 = vst [vmem:[#allocation2 + $0x6] sm:$0x3] %v335_v49  ;;  %5726 = vmatmul.mubr.f32.vlgmr.msra.gmra.mrb[2].mxu1 %v335_v49  ;;  %v950_v49 = vunpack.c.l.bf16 %v5058_v46 }
 0x2b2   :  { %6760 = vmatpush3.bf16.msra.mxu1 %v8428_v5  ;;  %5795 = vmatprep.mubr.msk.f32.mxu1 %vm8388_vm0, %v8389_v4 }
 0x2b3   :  { %6761 = vmatprep.subr.bf16.mxu1 %v8387_v0 }
 0x2b6   :  { %6763 = vmatpush3.bf16.msra.mxu1 %v8437_v7 }
 0x2b7   :  { %6764 = vmatprep.subr.bf16.mxu1 %v8387_v0 }
 0x2ba   :  { %6766 = vmatpush3.bf16.msra.mxu1 %v8452_v12 }
 0x2bb   :  { %6767 = vmatprep.subr.bf16.mxu1 %v8387_v0 }
 0x2be   :  { %6769 = vmatpush3.bf16.msra.mxu1 %v8464_v15 }
 0x2bf   :  { %6770 = vmatprep.subr.bf16.mxu1 %v8387_v0 }
 0x2c2   :  { %6772 = vmatpush3.bf16.msra.mxu1 %v8476_v18 }
 0x2c3   :  { %6773 = vmatprep.subr.bf16.mxu1 %v8387_v0 }
 0x2c6   :  { %6775 = vmatpush3.bf16.msra.mxu1 %v8488_v21 }
 0x2c7   :  { %6776 = vmatprep.subr.bf16.mxu1 %v8387_v0 }
 0x2ca   :  { %6778 = vmatpush3.bf16.msra.mxu1 %v8500_v24 }
 0x2cb   :  { %6779 = vmatprep.subr.bf16.mxu1 %v8387_v0 }
 0x2ce   :  { %6781 = vmatpush3.bf16.msra.mxu1 %v8512_v27 }
 0x2cf   :  { %6806 = vmatprep.subr.bf16.mxu1 %v8387_v0 }
 0x384   :  { %v404_v51 = vpop.f32.mrb[2].mxu1 }
 0x385   :  { %v405_v52 = vadd.f32 %v8542_v28, %v404_v51  ;;  %v5727_v54 = vpop.f32.mrb[3].mxu1 }
 0x387   :  { %v408_v55 = vmax.f32 %v405_v52, 0.0 }
 0x389   :  { %v412_v56 = vadd.f32 %v411_v53, %v408_v55  ;;  %v5059_v53 = vld [vmem:[%s9991_s0 + $0xc] sm:$0x1] }
 0x38b   :  { %414 = vst [vmem:[#allocation2 + $0x8] sm:$0x3] %v412_v56  ;;  %5761 = vmatmul.mubr.f32.vlgmr.msra.gmra.mrb[4].mxu0 %v412_v56  ;;  %v1027_v56 = vunpack.c.l.bf16 %v5059_v53 }
 0x38c   :  { %6784 = vmatpush3.bf16.msra.mxu0 %v8428_v5  ;;  %5830 = vmatprep.mubr.msk.f32.mxu0 %vm8388_vm0, %v8389_v4 }
 0x38d   :  { %6785 = vmatprep.subr.bf16.mxu0 %v8387_v0 }
 0x390   :  { %6787 = vmatpush3.bf16.msra.mxu0 %v8437_v7 }
 0x391   :  { %6788 = vmatprep.subr.bf16.mxu0 %v8387_v0 }
 0x394   :  { %6790 = vmatpush3.bf16.msra.mxu0 %v8452_v12 }
 0x395   :  { %6791 = vmatprep.subr.bf16.mxu0 %v8387_v0 }
 0x398   :  { %6793 = vmatpush3.bf16.msra.mxu0 %v8464_v15 }
 0x399   :  { %6794 = vmatprep.subr.bf16.mxu0 %v8387_v0 }
 0x39c   :  { %6796 = vmatpush3.bf16.msra.mxu0 %v8476_v18 }
 0x39d   :  { %6797 = vmatprep.subr.bf16.mxu0 %v8387_v0 }
 0x3a0   :  { %6799 = vmatpush3.bf16.msra.mxu0 %v8488_v21 }
 0x3a1   :  { %6800 = vmatprep.subr.bf16.mxu0 %v8387_v0 }
 0x3a4   :  { %6802 = vmatpush3.bf16.msra.mxu0 %v8500_v24 }
 0x3a5   :  { %6803 = vmatprep.subr.bf16.mxu0 %v8387_v0 }
 0x3a8   :  { %6805 = vmatpush3.bf16.msra.mxu0 %v8512_v27 }
 0x3a9   :  { %6830 = vmatprep.subr.bf16.mxu0 %v8387_v0 }
 0x45e   :  { %v481_v58 = vpop.f32.mrb[4].mxu0 }
 0x45f   :  { %v482_v59 = vadd.f32 %v8542_v28, %v481_v58  ;;  %v5762_v61 = vpop.f32.mrb[5].mxu0 }
 0x461   :  { %v485_v62 = vmax.f32 %v482_v59, 0.0 }
 0x463   :  { %v489_v63 = vadd.f32 %v488_v60, %v485_v62  ;;  %v5060_v60 = vld [vmem:[%s9991_s0 + $0xd] sm:$0x1] }
 0x465   :  { %491 = vst [vmem:[#allocation2 + $0xa] sm:$0x3] %v489_v63  ;;  %5796 = vmatmul.mubr.f32.vlgmr.msra.gmra.mrb[4].mxu1 %v489_v63  ;;  %v1104_v63 = vunpack.c.l.bf16 %v5060_v60 }
 0x466   :  { %6808 = vmatpush3.bf16.msra.mxu1 %v8428_v5  ;;  %5865 = vmatprep.mubr.msk.f32.mxu1 %vm8388_vm0, %v8389_v4 }
 0x467   :  { %6809 = vmatprep.subr.bf16.mxu1 %v8387_v0 }
 0x46a   :  { %6811 = vmatpush3.bf16.msra.mxu1 %v8437_v7 }
 0x46b   :  { %6812 = vmatprep.subr.bf16.mxu1 %v8387_v0 }
 0x46e   :  { %6814 = vmatpush3.bf16.msra.mxu1 %v8452_v12 }
 0x46f   :  { %6815 = vmatprep.subr.bf16.mxu1 %v8387_v0 }
 0x472   :  { %6817 = vmatpush3.bf16.msra.mxu1 %v8464_v15 }
 0x473   :  { %6818 = vmatprep.subr.bf16.mxu1 %v8387_v0 }
 0x476   :  { %6820 = vmatpush3.bf16.msra.mxu1 %v8476_v18 }
 0x477   :  { %6821 = vmatprep.subr.bf16.mxu1 %v8387_v0 }
 0x47a   :  { %6823 = vmatpush3.bf16.msra.mxu1 %v8488_v21 }
 0x47b   :  { %6824 = vmatprep.subr.bf16.mxu1 %v8387_v0 }
 0x47e   :  { %6826 = vmatpush3.bf16.msra.mxu1 %v8500_v24 }
 0x47f   :  { %6827 = vmatprep.subr.bf16.mxu1 %v8387_v0 }
 0x482   :  { %6829 = vmatpush3.bf16.msra.mxu1 %v8512_v27 }
 0x483   :  { %6854 = vmatprep.subr.bf16.mxu1 %v8387_v0 }
 0x538   :  { %v558_v2 = vpop.f32.mrb[4].mxu1 }
 0x539   :  { %v559_v3 = vadd.f32 %v8542_v28, %v558_v2  ;;  %v5797_v8 = vpop.f32.mrb[5].mxu1 }
 0x53b   :  { %v562_v9 = vmax.f32 %v559_v3, 0.0 }
 0x53d   :  { %v566_v10 = vadd.f32 %v565_v6, %v562_v9  ;;  %v5061_v6 = vld [vmem:[%s9991_s0 + $0xe] sm:$0x1] }
 0x53f   :  { %568 = vst [vmem:[#allocation2 + $0xc] sm:$0x3] %v566_v10  ;;  %5831 = vmatmul.mubr.f32.vlgmr.msra.gmra.mrb[6].mxu0 %v566_v10  ;;  %v1181_v10 = vunpack.c.l.bf16 %v5061_v6 }
 0x540   :  { %6832 = vmatpush3.bf16.msra.mxu0 %v8428_v5  ;;  %5900 = vmatprep.mubr.msk.f32.mxu0 %vm8388_vm0, %v8389_v4 }
 0x541   :  { %6833 = vmatprep.subr.bf16.mxu0 %v8387_v0 }
 0x544   :  { %6835 = vmatpush3.bf16.msra.mxu0 %v8437_v7 }
 0x545   :  { %6836 = vmatprep.subr.bf16.mxu0 %v8387_v0 }
 0x548   :  { %6838 = vmatpush3.bf16.msra.mxu0 %v8452_v12 }
 0x549   :  { %6839 = vmatprep.subr.bf16.mxu0 %v8387_v0 }
 0x54c   :  { %6841 = vmatpush3.bf16.msra.mxu0 %v8464_v15 }
 0x54d   :  { %6842 = vmatprep.subr.bf16.mxu0 %v8387_v0 }
 0x550   :  { %6844 = vmatpush3.bf16.msra.mxu0 %v8476_v18 }
 0x551   :  { %6845 = vmatprep.subr.bf16.mxu0 %v8387_v0 }
 0x554   :  { %6847 = vmatpush3.bf16.msra.mxu0 %v8488_v21 }
 0x555   :  { %6848 = vmatprep.subr.bf16.mxu0 %v8387_v0 }
 0x558   :  { %6850 = vmatpush3.bf16.msra.mxu0 %v8500_v24 }
 0x559   :  { %6851 = vmatprep.subr.bf16.mxu0 %v8387_v0 }
 0x55c   :  { %6853 = vmatpush3.bf16.msra.mxu0 %v8512_v27 }
 0x55d   :  { %6878 = vmatprep.subr.bf16.mxu0 %v8387_v0 }
 0x612   :  { %v635_v13 = vpop.f32.mrb[6].mxu0 }
 0x613   :  { %v636_v14 = vadd.f32 %v8542_v28, %v635_v13  ;;  %v5832_v17 = vpop.f32.mrb[7].mxu0 }
 0x615   :  { %v639_v19 = vmax.f32 %v636_v14, 0.0 }
 0x617   :  { %v643_v20 = vadd.f32 %v642_v16, %v639_v19  ;;  %v5062_v16 = vld [vmem:[%s9991_s0 + $0xf] sm:$0x1] }
 0x619   :  { %645 = vst [vmem:[#allocation2 + $0xe] sm:$0x3] %v643_v20  ;;  %5866 = vmatmul.mubr.f32.vlgmr.msra.gmra.mrb[6].mxu1 %v643_v20  ;;  %v1258_v20 = vunpack.c.l.bf16 %v5062_v16 }
 0x61a   :  { %6856 = vmatpush3.bf16.msra.mxu1 %v8428_v5  ;;  %5935 = vmatprep.mubr.msk.f32.mxu1 %vm8388_vm0, %v8389_v4 }
 0x61b   :  { %6857 = vmatprep.subr.bf16.mxu1 %v8387_v0 }
 0x61e   :  { %6859 = vmatpush3.bf16.msra.mxu1 %v8437_v7 }
 0x61f   :  { %6860 = vmatprep.subr.bf16.mxu1 %v8387_v0 }
 0x620   :  { %v1851_v16 = vld [vmem:[#allocation2 + $0xe] sm:$0x3] }
 0x622   :  { %6862 = vmatpush3.bf16.msra.mxu1 %v8452_v12 }
 0x623   :  { %6863 = vmatprep.subr.bf16.mxu1 %v8387_v0 }
 0x626   :  { %6865 = vmatpush3.bf16.msra.mxu1 %v8464_v15 }
 0x627   :  { %6866 = vmatprep.subr.bf16.mxu1 %v8387_v0 }
 0x62a   :  { %6868 = vmatpush3.bf16.msra.mxu1 %v8476_v18 }
 0x62b   :  { %6869 = vmatprep.subr.bf16.mxu1 %v8387_v0 }
 0x62e   :  { %6871 = vmatpush3.bf16.msra.mxu1 %v8488_v21 }
 0x62f   :  { %6872 = vmatprep.subr.bf16.mxu1 %v8387_v0 }
 0x632   :  { %6874 = vmatpush3.bf16.msra.mxu1 %v8500_v24 }
 0x633   :  { %6875 = vmatprep.subr.bf16.mxu1 %v8387_v0 }
 0x636   :  { %6877 = vmatpush3.bf16.msra.mxu1 %v8512_v27 }
 0x637   :  { %6902 = vmatprep.subr.bf16.mxu1 %v8387_v0 }
 0x6ec   :  { %v712_v23 = vpop.f32.mrb[6].mxu1 }
 0x6ed   :  { %v713_v25 = vadd.f32 %v8542_v28, %v712_v23  ;;  %v5867_v29 = vpop.f32.mrb[7].mxu1 }
 0x6ef   :  { %v716_v30 = vmax.f32 %v713_v25, 0.0 }
 0x6f1   :  { %v720_v31 = vadd.f32 %v719_v26, %v716_v30 }
 0x6f3   :  { %722 = vst [vmem:[#allocation2 + $0x10] sm:$0x3] %v720_v31  ;;  %5901 = vmatmul.mubr.f32.vlgmr.msra.gmra.mrb[8].mxu0 %v720_v31 }
 0x6f4   :  { %6880 = vmatpush3.bf16.msra.mxu0 %v8428_v5  ;;  %5970 = vmatprep.mubr.msk.f32.mxu0 %vm8388_vm0, %v8389_v4 }
 0x6f5   :  { %6881 = vmatprep.subr.bf16.mxu0 %v8387_v0 }
 0x6f8   :  { %6883 = vmatpush3.bf16.msra.mxu0 %v8437_v7 }
 0x6f9   :  { %6884 = vmatprep.subr.bf16.mxu0 %v8387_v0 }
 0x6fc   :  { %6886 = vmatpush3.bf16.msra.mxu0 %v8452_v12 }
 0x6fd   :  { %6887 = vmatprep.subr.bf16.mxu0 %v8387_v0 }
 0x700   :  { %6889 = vmatpush3.bf16.msra.mxu0 %v8464_v15 }
 0x701   :  { %6890 = vmatprep.subr.bf16.mxu0 %v8387_v0 }
 0x704   :  { %6892 = vmatpush3.bf16.msra.mxu0 %v8476_v18 }
 0x705   :  { %6893 = vmatprep.subr.bf16.mxu0 %v8387_v0 }
 0x708   :  { %6895 = vmatpush3.bf16.msra.mxu0 %v8488_v21 }
 0x709   :  { %6896 = vmatprep.subr.bf16.mxu0 %v8387_v0 }
 0x70c   :  { %6898 = vmatpush3.bf16.msra.mxu0 %v8500_v24 }
 0x70d   :  { %6899 = vmatprep.subr.bf16.mxu0 %v8387_v0 }
 0x710   :  { %6901 = vmatpush3.bf16.msra.mxu0 %v8512_v27 }
 0x711   :  { %6926 = vmatprep.subr.bf16.mxu0 %v8387_v0 }
 0x7c6   :  { %v789_v33 = vpop.f32.mrb[8].mxu0 }
 0x7c7   :  { %v790_v34 = vadd.f32 %v8542_v28, %v789_v33  ;;  %v5902_v36 = vpop.f32.mrb[9].mxu0 }
 0x7c9   :  { %v793_v37 = vmax.f32 %v790_v34, 0.0 }
 0x7cb   :  { %v797_v38 = vadd.f32 %v796_v35, %v793_v37 }
 0x7cd   :  { %799 = vst [vmem:[#allocation2 + $0x12] sm:$0x3] %v797_v38  ;;  %5936 = vmatmul.mubr.f32.vlgmr.msra.gmra.mrb[8].mxu1 %v797_v38 }
 0x7ce   :  { %6904 = vmatpush3.bf16.msra.mxu1 %v8428_v5  ;;  %6005 = vmatprep.mubr.msk.f32.mxu1 %vm8388_vm0, %v8389_v4 }
 0x7cf   :  { %6905 = vmatprep.subr.bf16.mxu1 %v8387_v0 }
 0x7d2   :  { %6907 = vmatpush3.bf16.msra.mxu1 %v8437_v7 }
 0x7d3   :  { %6908 = vmatprep.subr.bf16.mxu1 %v8387_v0 }
 0x7d6   :  { %6910 = vmatpush3.bf16.msra.mxu1 %v8452_v12 }
 0x7d7   :  { %6911 = vmatprep.subr.bf16.mxu1 %v8387_v0 }
 0x7da   :  { %6913 = vmatpush3.bf16.msra.mxu1 %v8464_v15 }
 0x7db   :  { %6914 = vmatprep.subr.bf16.mxu1 %v8387_v0 }
 0x7de   :  { %6916 = vmatpush3.bf16.msra.mxu1 %v8476_v18 }
 0x7df   :  { %6917 = vmatprep.subr.bf16.mxu1 %v8387_v0 }
 0x7e2   :  { %6919 = vmatpush3.bf16.msra.mxu1 %v8488_v21 }
 0x7e3   :  { %6920 = vmatprep.subr.bf16.mxu1 %v8387_v0 }
 0x7e6   :  { %6922 = vmatpush3.bf16.msra.mxu1 %v8500_v24 }
 0x7e7   :  { %6923 = vmatprep.subr.bf16.mxu1 %v8387_v0 }
 0x7ea   :  { %6925 = vmatpush3.bf16.msra.mxu1 %v8512_v27 }
 0x7eb   :  { %6950 = vmatprep.subr.bf16.mxu1 %v8387_v0 }
 0x8a0   :  { %v866_v40 = vpop.f32.mrb[8].mxu1 }
 0x8a1   :  { %v867_v41 = vadd.f32 %v8542_v28, %v866_v40  ;;  %v5937_v43 = vpop.f32.mrb[9].mxu1 }
 0x8a3   :  { %v870_v44 = vmax.f32 %v867_v41, 0.0 }
 0x8a5   :  { %v874_v45 = vadd.f32 %v873_v42, %v870_v44 }
 0x8a7   :  { %876 = vst [vmem:[#allocation2 + $0x14] sm:$0x3] %v874_v45  ;;  %5971 = vmatmul.mubr.f32.vlgmr.msra.gmra.mrb[10].mxu0 %v874_v45 }
 0x8a8   :  { %6928 = vmatpush3.bf16.msra.mxu0 %v8428_v5  ;;  %6040 = vmatprep.mubr.msk.f32.mxu0 %vm8388_vm0, %v8389_v4 }
 0x8a9   :  { %6929 = vmatprep.subr.bf16.mxu0 %v8387_v0 }
 0x8ac   :  { %6931 = vmatpush3.bf16.msra.mxu0 %v8437_v7 }
 0x8ad   :  { %6932 = vmatprep.subr.bf16.mxu0 %v8387_v0 }
 0x8b0   :  { %6934 = vmatpush3.bf16.msra.mxu0 %v8452_v12 }
 0x8b1   :  { %6935 = vmatprep.subr.bf16.mxu0 %v8387_v0 }
 0x8b4   :  { %6937 = vmatpush3.bf16.msra.mxu0 %v8464_v15 }
 0x8b5   :  { %6938 = vmatprep.subr.bf16.mxu0 %v8387_v0 }
 0x8b8   :  { %6940 = vmatpush3.bf16.msra.mxu0 %v8476_v18 }
 0x8b9   :  { %6941 = vmatprep.subr.bf16.mxu0 %v8387_v0 }
 0x8bc   :  { %6943 = vmatpush3.bf16.msra.mxu0 %v8488_v21 }
 0x8bd   :  { %6944 = vmatprep.subr.bf16.mxu0 %v8387_v0 }
 0x8c0   :  { %6946 = vmatpush3.bf16.msra.mxu0 %v8500_v24 }
 0x8c1   :  { %6947 = vmatprep.subr.bf16.mxu0 %v8387_v0 }
 0x8c4   :  { %6949 = vmatpush3.bf16.msra.mxu0 %v8512_v27 }
 0x8c5   :  { %6974 = vmatprep.subr.bf16.mxu0 %v8387_v0 }
 0x97a   :  { %v943_v47 = vpop.f32.mrb[10].mxu0 }
 0x97b   :  { %v944_v48 = vadd.f32 %v8542_v28, %v943_v47  ;;  %v5972_v50 = vpop.f32.mrb[11].mxu0 }
 0x97d   :  { %v947_v51 = vmax.f32 %v944_v48, 0.0 }
 0x97f   :  { %v951_v52 = vadd.f32 %v950_v49, %v947_v51 }
 0x981   :  { %953 = vst [vmem:[#allocation2 + $0x16] sm:$0x3] %v951_v52  ;;  %6006 = vmatmul.mubr.f32.vlgmr.msra.gmra.mrb[10].mxu1 %v951_v52 }
 0x982   :  { %6952 = vmatpush3.bf16.msra.mxu1 %v8428_v5  ;;  %6075 = vmatprep.mubr.msk.f32.mxu1 %vm8388_vm0, %v8389_v4 }
 0x983   :  { %6953 = vmatprep.subr.bf16.mxu1 %v8387_v0 }
 0x986   :  { %6955 = vmatpush3.bf16.msra.mxu1 %v8437_v7 }
 0x987   :  { %6956 = vmatprep.subr.bf16.mxu1 %v8387_v0 }
 0x988   :  { %v1555_v50 = vld [vmem:[#allocation2 + $0x16] sm:$0x3] }
 0x98a   :  { %6958 = vmatpush3.bf16.msra.mxu1 %v8452_v12 }
 0x98b   :  { %6959 = vmatprep.subr.bf16.mxu1 %v8387_v0 }
 0x98e   :  { %6961 = vmatpush3.bf16.msra.mxu1 %v8464_v15 }
 0x98f   :  { %6962 = vmatprep.subr.bf16.mxu1 %v8387_v0 }
 0x992   :  { %6964 = vmatpush3.bf16.msra.mxu1 %v8476_v18 }
 0x993   :  { %6965 = vmatprep.subr.bf16.mxu1 %v8387_v0 }
 0x996   :  { %6967 = vmatpush3.bf16.msra.mxu1 %v8488_v21 }
 0x997   :  { %6968 = vmatprep.subr.bf16.mxu1 %v8387_v0 }
 0x99a   :  { %6970 = vmatpush3.bf16.msra.mxu1 %v8500_v24 }
 0x99b   :  { %6971 = vmatprep.subr.bf16.mxu1 %v8387_v0 }
 0x99e   :  { %6973 = vmatpush3.bf16.msra.mxu1 %v8512_v27 }
 0x99f   :  { %6998 = vmatprep.subr.bf16.mxu1 %v8387_v0 }
 0xa54   :  { %v1020_v54 = vpop.f32.mrb[10].mxu1 }
 0xa55   :  { %v1021_v55 = vadd.f32 %v8542_v28, %v1020_v54  ;;  %v6007_v57 = vpop.f32.mrb[11].mxu1 }
 0xa57   :  { %v1024_v58 = vmax.f32 %v1021_v55, 0.0 }
 0xa59   :  { %v1028_v59 = vadd.f32 %v1027_v56, %v1024_v58  ;;  %v1629_v56 = vld [vmem:[#allocation2 + $0x14] sm:$0x3]  ;;  %v8972_v58 = vld [vmem:[%s9992_s2] ss:$0 sm:$0xff] }
 0xa5b   :  { %1030 = vst [vmem:[#allocation2 + $0x18] sm:$0x3] %v1028_v59  ;;  %6041 = vmatmul.mubr.f32.vlgmr.msra.gmra.mrb[12].mxu0 %v1028_v59 }
 0xa5c   :  { %6976 = vmatpush3.bf16.msra.mxu0 %v8428_v5  ;;  %6110 = vmatprep.mubr.msk.f32.mxu0 %vm8388_vm0, %v8389_v4 }
 0xa5d   :  { %6977 = vmatprep.subr.bf16.mxu0 %v8387_v0 }
 0xa60   :  { %6979 = vmatpush3.bf16.msra.mxu0 %v8437_v7 }
 0xa61   :  { %6980 = vmatprep.subr.bf16.mxu0 %v8387_v0 }
 0xa62   :  { %v1481_v44 = vld [vmem:[#allocation2 + $0x18] sm:$0x3] }
 0xa64   :  { %6982 = vmatpush3.bf16.msra.mxu0 %v8452_v12 }
 0xa65   :  { %6983 = vmatprep.subr.bf16.mxu0 %v8387_v0 }
 0xa68   :  { %6985 = vmatpush3.bf16.msra.mxu0 %v8464_v15 }
 0xa69   :  { %6986 = vmatprep.subr.bf16.mxu0 %v8387_v0 }
 0xa6c   :  { %6988 = vmatpush3.bf16.msra.mxu0 %v8476_v18 }
 0xa6d   :  { %6989 = vmatprep.subr.bf16.mxu0 %v8387_v0 }
 0xa70   :  { %6991 = vmatpush3.bf16.msra.mxu0 %v8488_v21 }
 0xa71   :  { %6992 = vmatprep.subr.bf16.mxu0 %v8387_v0 }
 0xa74   :  { %6994 = vmatpush3.bf16.msra.mxu0 %v8500_v24 }
 0xa75   :  { %6995 = vmatprep.subr.bf16.mxu0 %v8387_v0 }
 0xa78   :  { %6997 = vmatpush3.bf16.msra.mxu0 %v8512_v27 }
 0xa79   :  { %7022 = vmatprep.subr.bf16.mxu0 %v8387_v0 }
 0xb2e   :  { %v1097_v61 = vpop.f32.mrb[12].mxu0 }
 0xb2f   :  { %v1098_v62 = vadd.f32 %v8542_v28, %v1097_v61  ;;  %v6042_v1 = vpop.f32.mrb[13].mxu0 }
 0xb31   :  { %v1101_v2 = vmax.f32 %v1098_v62, 0.0  ;;  %v1703_v62 = vld [vmem:[#allocation2 + $0x12] sm:$0x3] }
 0xb33   :  { %v1105_v3 = vadd.f32 %v1104_v63, %v1101_v2 }
 0xb35   :  { %1107 = vst [vmem:[#allocation2 + $0x1a] sm:$0x3] %v1105_v3  ;;  %6076 = vmatmul.mubr.f32.vlgmr.msra.gmra.mrb[12].mxu1 %v1105_v3 }
 0xb36   :  { %7000 = vmatpush3.bf16.msra.mxu1 %v8428_v5  ;;  %6145 = vmatprep.mubr.msk.f32.mxu1 %vm8388_vm0, %v8389_v4 }
 0xb37   :  { %7001 = vmatprep.subr.bf16.mxu1 %v8387_v0 }
 0xb3a   :  { %7003 = vmatpush3.bf16.msra.mxu1 %v8437_v7 }
 0xb3b   :  { %7004 = vmatprep.subr.bf16.mxu1 %v8387_v0 }
 0xb3c   :  { %v1407_v38 = vld [vmem:[#allocation2 + $0x1a] sm:$0x3] }
 0xb3e   :  { %7006 = vmatpush3.bf16.msra.mxu1 %v8452_v12 }
 0xb3f   :  { %7007 = vmatprep.subr.bf16.mxu1 %v8387_v0 }
 0xb42   :  { %7009 = vmatpush3.bf16.msra.mxu1 %v8464_v15 }
 0xb43   :  { %7010 = vmatprep.subr.bf16.mxu1 %v8387_v0 }
 0xb46   :  { %7012 = vmatpush3.bf16.msra.mxu1 %v8476_v18 }
 0xb47   :  { %7013 = vmatprep.subr.bf16.mxu1 %v8387_v0 }
 0xb4a   :  { %7015 = vmatpush3.bf16.msra.mxu1 %v8488_v21 }
 0xb4b   :  { %7016 = vmatprep.subr.bf16.mxu1 %v8387_v0 }
 0xb4e   :  { %7018 = vmatpush3.bf16.msra.mxu1 %v8500_v24 }
 0xb4f   :  { %7019 = vmatprep.subr.bf16.mxu1 %v8387_v0 }
 0xb52   :  { %7021 = vmatpush3.bf16.msra.mxu1 %v8512_v27 }
 0xb53   :  { %7046 = vmatprep.subr.bf16.mxu1 %v8387_v0 }
 0xc08   :  { %v1174_v8 = vpop.f32.mrb[12].mxu1 }
 0xc09   :  { %v1175_v9 = vadd.f32 %v8542_v28, %v1174_v8  ;;  %v6077_v11 = vpop.f32.mrb[13].mxu1  ;;  %v1777_v8 = vld [vmem:[#allocation2 + $0x10] sm:$0x3] }
 0xc0b   :  { %v1178_v13 = vmax.f32 %v1175_v9, 0.0 }
 0xc0d   :  { %v1182_v14 = vadd.f32 %v1181_v10, %v1178_v13 }
 0xc0f   :  { %1184 = vst [vmem:[#allocation2 + $0x1c] sm:$0x3] %v1182_v14  ;;  %6111 = vmatmul.mubr.f32.vlgmr.msra.gmra.mrb[14].mxu0 %v1182_v14 }
 0xc10   :  { %7024 = vmatpush3.bf16.msra.mxu0 %v8428_v5  ;;  %6180 = vmatprep.mubr.msk.f32.mxu0 %vm8388_vm0, %v8389_v4 }
 0xc11   :  { %7025 = vmatprep.subr.bf16.mxu0 %v8387_v0 }
 0xc14   :  { %7027 = vmatpush3.bf16.msra.mxu0 %v8437_v7 }
 0xc15   :  { %7028 = vmatprep.subr.bf16.mxu0 %v8387_v0 }
 0xc16   :  { %v1333_v32 = vld [vmem:[#allocation2 + $0x1c] sm:$0x3] }
 0xc18   :  { %7030 = vmatpush3.bf16.msra.mxu0 %v8452_v12 }
 0xc19   :  { %7031 = vmatprep.subr.bf16.mxu0 %v8387_v0 }
 0xc1c   :  { %7033 = vmatpush3.bf16.msra.mxu0 %v8464_v15 }
 0xc1d   :  { %7034 = vmatprep.subr.bf16.mxu0 %v8387_v0 }
 0xc20   :  { %7036 = vmatpush3.bf16.msra.mxu0 %v8476_v18 }
 0xc21   :  { %7037 = vmatprep.subr.bf16.mxu0 %v8387_v0 }
 0xc24   :  { %7039 = vmatpush3.bf16.msra.mxu0 %v8488_v21 }
 0xc25   :  { %7040 = vmatprep.subr.bf16.mxu0 %v8387_v0 }
 0xc28   :  { %7042 = vmatpush3.bf16.msra.mxu0 %v8500_v24 }
 0xc29   :  { %7043 = vmatprep.subr.bf16.mxu0 %v8387_v0 }
 0xc2c   :  { %7045 = vmatpush3.bf16.msra.mxu0 %v8512_v27 }
 0xc2d   :  { %7070 = vmatprep.subr.bf16.mxu0 %v8387_v0 }
 0xce2   :  { %v1251_v17 = vpop.f32.mrb[14].mxu0 }
 0xce3   :  { %v1252_v19 = vadd.f32 %v8542_v28, %v1251_v17  ;;  %v6112_v22 = vpop.f32.mrb[15].mxu0 }
 0xce5   :  { %v1255_v23 = vmax.f32 %v1252_v19, 0.0 }
 0xce7   :  { %v1259_v25 = vadd.f32 %v1258_v20, %v1255_v23 }
 0xce9   :  { %1261 = vst [vmem:[#allocation2 + $0x1e] sm:$0x3] %v1259_v25  ;;  %6146 = vmatmul.mubr.f32.vlgmr.msra.gmra.mrb[14].mxu1 %v1259_v25  ;;  %v1925_v25 = vld [vmem:[#allocation2 + $0xc] sm:$0x3] }
 0xcea   :  { %7048 = vmatpush3.bf16.msra.mxu1 %v8428_v5  ;;  %6215 = vmatprep.mubr.msk.f32.mxu1 %vm8388_vm0, %v8389_v4 }
 0xceb   :  { %7049 = vmatprep.subr.bf16.mxu1 %v8387_v0 }
 0xcee   :  { %7051 = vmatpush3.bf16.msra.mxu1 %v8437_v7 }
 0xcef   :  { %7052 = vmatprep.subr.bf16.mxu1 %v8387_v0 }
 0xcf2   :  { %7054 = vmatpush3.bf16.msra.mxu1 %v8452_v12 }
 0xcf3   :  { %7055 = vmatprep.subr.bf16.mxu1 %v8387_v0 }
 0xcf6   :  { %7057 = vmatpush3.bf16.msra.mxu1 %v8464_v15 }
 0xcf7   :  { %7058 = vmatprep.subr.bf16.mxu1 %v8387_v0 }
 0xcfa   :  { %7060 = vmatpush3.bf16.msra.mxu1 %v8476_v18 }
 0xcfb   :  { %7061 = vmatprep.subr.bf16.mxu1 %v8387_v0 }
 0xcfe   :  { %7063 = vmatpush3.bf16.msra.mxu1 %v8488_v21 }
 0xcff   :  { %7064 = vmatprep.subr.bf16.mxu1 %v8387_v0 }
 0xd02   :  { %7066 = vmatpush3.bf16.msra.mxu1 %v8500_v24 }
 0xd03   :  { %7067 = vmatprep.subr.bf16.mxu1 %v8387_v0 }
 0xd06   :  { %7069 = vmatpush3.bf16.msra.mxu1 %v8512_v27 }
 0xd07   :  { %7094 = vmatprep.subr.bf16.mxu1 %v8387_v0 }
 0xdbc   :  { %v1328_v26 = vpop.f32.mrb[14].mxu1 }
 0xdbd   :  { %v1329_v29 = vadd.f32 %v8542_v28, %v1328_v26  ;;  %v6147_v30 = vpop.f32.mrb[15].mxu1 }
 0xdbf   :  { %v1332_v31 = vmax.f32 %v1329_v29, 0.0 }
 0xdc1   :  { %v1334_v33 = vadd.f32 %v1333_v32, %v1332_v31 }
 0xdc3   :  { %1335 = vst [vmem:[#allocation2 + $0x1c] sm:$0x3] %v1334_v33  ;;  %6181 = vmatmul.mubr.f32.vlgmr.msra.gmra.mrb[16].mxu0 %v1334_v33  ;;  %v1999_v33 = vld [vmem:[#allocation2 + $0xa] sm:$0x3] }
 0xdc4   :  { %7072 = vmatpush3.bf16.msra.mxu0 %v8428_v5  ;;  %6250 = vmatprep.mubr.msk.f32.mxu0 %vm8388_vm0, %v8389_v4 }
 0xdc5   :  { %7073 = vmatprep.subr.bf16.mxu0 %v8387_v0 }
 0xdc8   :  { %7075 = vmatpush3.bf16.msra.mxu0 %v8437_v7 }
 0xdc9   :  { %7076 = vmatprep.subr.bf16.mxu0 %v8387_v0 }
 0xdcc   :  { %7078 = vmatpush3.bf16.msra.mxu0 %v8452_v12 }
 0xdcd   :  { %7079 = vmatprep.subr.bf16.mxu0 %v8387_v0 }
 0xdd0   :  { %7081 = vmatpush3.bf16.msra.mxu0 %v8464_v15 }
 0xdd1   :  { %7082 = vmatprep.subr.bf16.mxu0 %v8387_v0 }
 0xdd4   :  { %7084 = vmatpush3.bf16.msra.mxu0 %v8476_v18 }
 0xdd5   :  { %7085 = vmatprep.subr.bf16.mxu0 %v8387_v0 }
 0xdd8   :  { %7087 = vmatpush3.bf16.msra.mxu0 %v8488_v21 }
 0xdd9   :  { %7088 = vmatprep.subr.bf16.mxu0 %v8387_v0 }
 0xddc   :  { %7090 = vmatpush3.bf16.msra.mxu0 %v8500_v24 }
 0xddd   :  { %7091 = vmatprep.subr.bf16.mxu0 %v8387_v0 }
 0xde0   :  { %7093 = vmatpush3.bf16.msra.mxu0 %v8512_v27 }
 0xde1   :  { %7118 = vmatprep.subr.bf16.mxu0 %v8387_v0 }
 0xe96   :  { %v1402_v34 = vpop.f32.mrb[16].mxu0 }
 0xe97   :  { %v1403_v35 = vadd.f32 %v8542_v28, %v1402_v34  ;;  %v6182_v36 = vpop.f32.mrb[17].mxu0 }
 0xe99   :  { %v1406_v37 = vmax.f32 %v1403_v35, 0.0 }
 0xe9b   :  { %v1408_v39 = vadd.f32 %v1407_v38, %v1406_v37 }
 0xe9d   :  { %1409 = vst [vmem:[#allocation2 + $0x1a] sm:$0x3] %v1408_v39  ;;  %6216 = vmatmul.mubr.f32.vlgmr.msra.gmra.mrb[16].mxu1 %v1408_v39  ;;  %v2073_v39 = vld [vmem:[#allocation2 + $0x8] sm:$0x3] }
 0xe9e   :  { %7096 = vmatpush3.bf16.msra.mxu1 %v8428_v5  ;;  %6285 = vmatprep.mubr.msk.f32.mxu1 %vm8388_vm0, %v8389_v4 }
 0xe9f   :  { %7097 = vmatprep.subr.bf16.mxu1 %v8387_v0 }
 0xea2   :  { %7099 = vmatpush3.bf16.msra.mxu1 %v8437_v7 }
 0xea3   :  { %7100 = vmatprep.subr.bf16.mxu1 %v8387_v0 }
 0xea6   :  { %7102 = vmatpush3.bf16.msra.mxu1 %v8452_v12 }
 0xea7   :  { %7103 = vmatprep.subr.bf16.mxu1 %v8387_v0 }
 0xeaa   :  { %7105 = vmatpush3.bf16.msra.mxu1 %v8464_v15 }
 0xeab   :  { %7106 = vmatprep.subr.bf16.mxu1 %v8387_v0 }
 0xeae   :  { %7108 = vmatpush3.bf16.msra.mxu1 %v8476_v18 }
 0xeaf   :  { %7109 = vmatprep.subr.bf16.mxu1 %v8387_v0 }
 0xeb2   :  { %7111 = vmatpush3.bf16.msra.mxu1 %v8488_v21 }
 0xeb3   :  { %7112 = vmatprep.subr.bf16.mxu1 %v8387_v0 }
 0xeb6   :  { %7114 = vmatpush3.bf16.msra.mxu1 %v8500_v24 }
 0xeb7   :  { %7115 = vmatprep.subr.bf16.mxu1 %v8387_v0 }
 0xeba   :  { %7117 = vmatpush3.bf16.msra.mxu1 %v8512_v27 }
 0xebb   :  { %7142 = vmatprep.subr.bf16.mxu1 %v8387_v0 }
 0xf70   :  { %v1476_v40 = vpop.f32.mrb[16].mxu1 }
 0xf71   :  { %v1477_v41 = vadd.f32 %v8542_v28, %v1476_v40  ;;  %v6217_v42 = vpop.f32.mrb[17].mxu1 }
 0xf73   :  { %v1480_v43 = vmax.f32 %v1477_v41, 0.0 }
 0xf75   :  { %v1482_v45 = vadd.f32 %v1481_v44, %v1480_v43 }
 0xf77   :  { %1483 = vst [vmem:[#allocation2 + $0x18] sm:$0x3] %v1482_v45  ;;  %6251 = vmatmul.mubr.f32.vlgmr.msra.gmra.mrb[18].mxu0 %v1482_v45  ;;  %v2147_v45 = vld [vmem:[#allocation2 + $0x6] sm:$0x3] }
 0xf78   :  { %7120 = vmatpush3.bf16.msra.mxu0 %v8428_v5  ;;  %6320 = vmatprep.mubr.msk.f32.mxu0 %vm8388_vm0, %v8389_v4 }
 0xf79   :  { %7121 = vmatprep.subr.bf16.mxu0 %v8387_v0 }
 0xf7c   :  { %7123 = vmatpush3.bf16.msra.mxu0 %v8437_v7 }
 0xf7d   :  { %7124 = vmatprep.subr.bf16.mxu0 %v8387_v0 }
 0xf80   :  { %7126 = vmatpush3.bf16.msra.mxu0 %v8452_v12 }
 0xf81   :  { %7127 = vmatprep.subr.bf16.mxu0 %v8387_v0 }
 0xf84   :  { %7129 = vmatpush3.bf16.msra.mxu0 %v8464_v15 }
 0xf85   :  { %7130 = vmatprep.subr.bf16.mxu0 %v8387_v0 }
 0xf88   :  { %7132 = vmatpush3.bf16.msra.mxu0 %v8476_v18 }
 0xf89   :  { %7133 = vmatprep.subr.bf16.mxu0 %v8387_v0 }
 0xf8c   :  { %7135 = vmatpush3.bf16.msra.mxu0 %v8488_v21 }
 0xf8d   :  { %7136 = vmatprep.subr.bf16.mxu0 %v8387_v0 }
 0xf90   :  { %7138 = vmatpush3.bf16.msra.mxu0 %v8500_v24 }
 0xf91   :  { %7139 = vmatprep.subr.bf16.mxu0 %v8387_v0 }
 0xf94   :  { %7141 = vmatpush3.bf16.msra.mxu0 %v8512_v27 }
 0xf95   :  { %7166 = vmatprep.subr.bf16.mxu0 %v8387_v0 }
0x104a   :  { %v1550_v46 = vpop.f32.mrb[18].mxu0 }
0x104b   :  { %v1551_v47 = vadd.f32 %v8542_v28, %v1550_v46  ;;  %v6252_v48 = vpop.f32.mrb[19].mxu0 }
0x104d   :  { %v1554_v49 = vmax.f32 %v1551_v47, 0.0  ;;  %v2221_v47 = vld [vmem:[#allocation2 + $0x4] sm:$0x3] }
0x104f   :  { %v1556_v51 = vadd.f32 %v1555_v50, %v1554_v49  ;;  %v33_v49 = vld [vmem:[%s9993_s3] sm:$0xff] }
0x1050   :  { %v37_v50 = vld [vmem:[%s9993_s3 + $0x20] sm:$0xff] }
0x1051   :  { %1557 = vst [vmem:[#allocation2 + $0x16] sm:$0x3] %v1556_v51  ;;  %6286 = vmatmul.mubr.f32.vlgmr.msra.gmra.mrb[18].mxu1 %v1556_v51 }
0x1052   :  { %7144 = vmatpush3.bf16.msra.mxu1 %v8428_v5  ;;  %6355 = vmatprep.mubr.msk.f32.mxu1 %vm8388_vm0, %v8389_v4 }
0x1053   :  { %7145 = vmatprep.subr.bf16.mxu1 %v8387_v0 }
0x1056   :  { %7147 = vmatpush3.bf16.msra.mxu1 %v8437_v7 }
0x1057   :  { %7148 = vmatprep.subr.bf16.mxu1 %v8387_v0 }
0x105a   :  { %7150 = vmatpush3.bf16.msra.mxu1 %v8452_v12 }
0x105b   :  { %7151 = vmatprep.subr.bf16.mxu1 %v8387_v0 }
0x105e   :  { %7153 = vmatpush3.bf16.msra.mxu1 %v8464_v15 }
0x105f   :  { %7154 = vmatprep.subr.bf16.mxu1 %v8387_v0 }
0x1062   :  { %7156 = vmatpush3.bf16.msra.mxu1 %v8476_v18 }
0x1063   :  { %7157 = vmatprep.subr.bf16.mxu1 %v8387_v0 }
0x1066   :  { %7159 = vmatpush3.bf16.msra.mxu1 %v8488_v21 }
0x1067   :  { %7160 = vmatprep.subr.bf16.mxu1 %v8387_v0 }
0x106a   :  { %7162 = vmatpush3.bf16.msra.mxu1 %v8500_v24 }
0x106b   :  { %7163 = vmatprep.subr.bf16.mxu1 %v8387_v0 }
0x106e   :  { %7165 = vmatpush3.bf16.msra.mxu1 %v8512_v27 }
0x106f   :  { %7190 = vmatprep.subr.bf16.mxu1 %v8387_v0 }
0x1124   :  { %v1624_v52 = vpop.f32.mrb[18].mxu1 }
0x1125   :  { %v1625_v53 = vadd.f32 %v8542_v28, %v1624_v52  ;;  %v6287_v54 = vpop.f32.mrb[19].mxu1  ;;  %v9129_v52 = vpack.c.bf16 %v37_v50, %v33_v49  ;;  %v74_v49 = vld [vmem:[%s9993_s3 + $0x148] sm:$0xff] }
0x1126   :  { %v46_v54 = vld [vmem:[%s9993_s3 + $0x68] sm:$0xff] }
0x1127   :  { %v1628_v55 = vmax.f32 %v1625_v53, 0.0  ;;  %v42_v53 = vld [vmem:[%s9993_s3 + $0x48] sm:$0xff] }
0x1128   :  { %v78_v50 = vld [vmem:[%s9993_s3 + $0x168] sm:$0xff] }
0x1129   :  { %v1630_v57 = vadd.f32 %v1629_v56, %v1628_v55  ;;  %v9140_v55 = vpack.c.bf16 %v46_v54, %v42_v53  ;;  %v41_v56 = vld [vmem:[%s9993_s3 + $0x40] sm:$0xff]  ;;  %v76_v53 = vld [vmem:[%s9993_s3 + $0x158] sm:$0xff]  ;;  %v9298_v54 = vpack.c.bf16 %v78_v50, %v74_v49 }
0x112b   :  { %1631 = vst [vmem:[#allocation2 + $0x14] sm:$0x3] %v1630_v57  ;;  %6321 = vmatmul.mubr.f32.vlgmr.msra.gmra.mrb[20].mxu0 %v1630_v57  ;;  %v45_v57 = vld [vmem:[%s9993_s3 + $0x60] sm:$0xff] }
0x112c   :  { %7168 = vmatpush3.bf16.msra.mxu0 %v8428_v5  ;;  %6390 = vmatprep.mubr.msk.f32.mxu0 %vm8388_vm0, %v8389_v4 }
0x112d   :  { %7169 = vmatprep.subr.bf16.mxu0 %v8387_v0 }
0x1130   :  { %7171 = vmatpush3.bf16.msra.mxu0 %v8437_v7 }
0x1131   :  { %7172 = vmatprep.subr.bf16.mxu0 %v8387_v0 }
0x1134   :  { %7174 = vmatpush3.bf16.msra.mxu0 %v8452_v12 }
0x1135   :  { %7175 = vmatprep.subr.bf16.mxu0 %v8387_v0 }
0x1138   :  { %7177 = vmatpush3.bf16.msra.mxu0 %v8464_v15 }
0x1139   :  { %7178 = vmatprep.subr.bf16.mxu0 %v8387_v0 }
0x113c   :  { %7180 = vmatpush3.bf16.msra.mxu0 %v8476_v18 }
0x113d   :  { %7181 = vmatprep.subr.bf16.mxu0 %v8387_v0 }
0x1140   :  { %7183 = vmatpush3.bf16.msra.mxu0 %v8488_v21 }
0x1141   :  { %7184 = vmatprep.subr.bf16.mxu0 %v8387_v0 }
0x1144   :  { %7186 = vmatpush3.bf16.msra.mxu0 %v8500_v24 }
0x1145   :  { %7187 = vmatprep.subr.bf16.mxu0 %v8387_v0 }
0x1148   :  { %7189 = vmatpush3.bf16.msra.mxu0 %v8512_v27 }
0x1149   :  { %7214 = vmatprep.subr.bf16.mxu0 %v8387_v0 }
0x11fe   :  { %v1698_v28 = vpop.f32.mrb[20].mxu0 }
0x11ff   :  { %v1699_v59 = vadd.f32 %v8972_v58, %v1698_v28  ;;  %v6322_v60 = vpop.f32.mrb[21].mxu0  ;;  %v9148_v28 = vpack.c.bf16 %v45_v57, %v41_v56  ;;  %v80_v56 = vld [vmem:[%s9993_s3 + $0x178] sm:$0xff]  ;;  %v73_v57 = vld [vmem:[%s9993_s3 + $0x140] sm:$0xff] }
0x1200   :  { %v54_v60 = vld [vmem:[%s9993_s3 + $0xa8] sm:$0xff] }
0x1201   :  { %v1702_v61 = vmax.f32 %v1699_v59, 0.0  ;;  %v50_v59 = vld [vmem:[%s9993_s3 + $0x88] sm:$0xff] }
0x1203   :  { %v1704_v63 = vadd.f32 %v1703_v62, %v1702_v61  ;;  %v9157_v61 = vpack.c.bf16 %v54_v60, %v50_v59  ;;  %v49_v62 = vld [vmem:[%s9993_s3 + $0x80] sm:$0xff]  ;;  %v9309_v60 = vpack.c.bf16 %v80_v56, %v76_v53 }
0x1204   :  { %v77_v59 = vld [vmem:[%s9993_s3 + $0x160] sm:$0xff] }
0x1205   :  { %1705 = vst [vmem:[#allocation2 + $0x12] sm:$0x3] %v1704_v63  ;;  %6356 = vmatmul.mubr.f32.vlgmr.msra.gmra.mrb[20].mxu1 %v1704_v63  ;;  %v53_v63 = vld [vmem:[%s9993_s3 + $0xa0] sm:$0xff] }
0x1206   :  { %7192 = vmatpush3.bf16.msra.mxu1 %v8428_v5  ;;  %6425 = vmatprep.mubr.msk.f32.mxu1 %vm8388_vm0, %v8389_v4 }
0x1207   :  { %7193 = vmatprep.subr.bf16.mxu1 %v8387_v0 }
0x120a   :  { %7195 = vmatpush3.bf16.msra.mxu1 %v8437_v7 }
0x120b   :  { %7196 = vmatprep.subr.bf16.mxu1 %v8387_v0 }
0x120e   :  { %7198 = vmatpush3.bf16.msra.mxu1 %v8452_v12 }
0x120f   :  { %7199 = vmatprep.subr.bf16.mxu1 %v8387_v0 }
0x1212   :  { %7201 = vmatpush3.bf16.msra.mxu1 %v8464_v15 }
0x1213   :  { %7202 = vmatprep.subr.bf16.mxu1 %v8387_v0 }
0x1216   :  { %7204 = vmatpush3.bf16.msra.mxu1 %v8476_v18 }
0x1217   :  { %7205 = vmatprep.subr.bf16.mxu1 %v8387_v0 }
0x121a   :  { %7207 = vmatpush3.bf16.msra.mxu1 %v8488_v21 }
0x121b   :  { %7208 = vmatprep.subr.bf16.mxu1 %v8387_v0 }
0x121e   :  { %7210 = vmatpush3.bf16.msra.mxu1 %v8500_v24 }
0x121f   :  { %7211 = vmatprep.subr.bf16.mxu1 %v8387_v0 }
0x1222   :  { %7213 = vmatpush3.bf16.msra.mxu1 %v8512_v27 }
0x1223   :  { %7238 = vmatprep.subr.bf16.mxu1 %v8387_v0 }
0x12d8   :  { %v1772_v1 = vpop.f32.mrb[20].mxu1 }
0x12d9   :  { %v1773_v2 = vadd.f32 %v8972_v58, %v1772_v1  ;;  %v6357_v3 = vpop.f32.mrb[21].mxu1  ;;  %v9166_v1 = vpack.c.bf16 %v53_v63, %v49_v62  ;;  %v9311_v62 = vpack.c.bf16 %v77_v59, %v73_v57  ;;  %v75_v63 = vld [vmem:[%s9993_s3 + $0x150] sm:$0xff] }
0x12da   :  { %v62_v3 = vld [vmem:[%s9993_s3 + $0xe8] sm:$0xff] }
0x12db   :  { %v1776_v6 = vmax.f32 %v1773_v2, 0.0  ;;  %v58_v2 = vld [vmem:[%s9993_s3 + $0xc8] sm:$0xff] }
0x12dd   :  { %v1778_v9 = vadd.f32 %v1777_v8, %v1776_v6  ;;  %v9175_v6 = vpack.c.bf16 %v62_v3, %v58_v2  ;;  %v57_v8 = vld [vmem:[%s9993_s3 + $0xc0] sm:$0xff]  ;;  %v79_v2 = vld [vmem:[%s9993_s3 + $0x170] sm:$0xff] }
0x12de   :  { %v9320_v3 = vpack.c.bf16 %v79_v2, %v75_v63  ;;  %v8390_v63 = vmov 1983009808  }
0x12df   :  { %1779 = vst [vmem:[#allocation2 + $0x10] sm:$0x3] %v1778_v9  ;;  %6391 = vmatmul.mubr.f32.vlgmr.msra.gmra.mrb[22].mxu0 %v1778_v9  ;;  %v61_v9 = vld [vmem:[%s9993_s3 + $0xe0] sm:$0xff]  ;;  %v2522_v2 = vunpack.c.l.s4 %v8390_v63 }
0x12e0   :  { %7216 = vmatpush3.bf16.msra.mxu0 %v8428_v5  ;;  %6460 = vmatprep.mubr.msk.f32.mxu0 %vm8388_vm0, %v8389_v4 }
0x12e1   :  { %7217 = vmatprep.subr.bf16.mxu0 %v8387_v0 }
0x12e4   :  { %7219 = vmatpush3.bf16.msra.mxu0 %v8437_v7 }
0x12e5   :  { %7220 = vmatprep.subr.bf16.mxu0 %v8387_v0 }
0x12e8   :  { %7222 = vmatpush3.bf16.msra.mxu0 %v8452_v12 }
0x12e9   :  { %7223 = vmatprep.subr.bf16.mxu0 %v8387_v0 }
0x12ec   :  { %7225 = vmatpush3.bf16.msra.mxu0 %v8464_v15 }
0x12ed   :  { %7226 = vmatprep.subr.bf16.mxu0 %v8387_v0 }
0x12f0   :  { %7228 = vmatpush3.bf16.msra.mxu0 %v8476_v18 }
0x12f1   :  { %7229 = vmatprep.subr.bf16.mxu0 %v8387_v0 }
0x12f4   :  { %7231 = vmatpush3.bf16.msra.mxu0 %v8488_v21 }
0x12f5   :  { %7232 = vmatprep.subr.bf16.mxu0 %v8387_v0 }
0x12f8   :  { %7234 = vmatpush3.bf16.msra.mxu0 %v8500_v24 }
0x12f9   :  { %7235 = vmatprep.subr.bf16.mxu0 %v8387_v0 }
0x12fc   :  { %7237 = vmatpush3.bf16.msra.mxu0 %v8512_v27 }
0x12fd   :  { %7262 = vmatprep.subr.bf16.mxu0 %v8387_v0 }
0x13b2   :  { %v1846_v10 = vpop.f32.mrb[22].mxu0 }
0x13b3   :  { %v1847_v11 = vadd.f32 %v8972_v58, %v1846_v10  ;;  %v6392_v13 = vpop.f32.mrb[23].mxu0  ;;  %v9184_v10 = vpack.c.bf16 %v61_v9, %v57_v8  ;;  %v82_v8 = vld [vmem:[%s9993_s3 + $0x188] sm:$0xff] }
0x13b4   :  { %v70_v13 = vld [vmem:[%s9993_s3 + $0x128] sm:$0xff] }
0x13b5   :  { %v1850_v14 = vmax.f32 %v1847_v11, 0.0  ;;  %v66_v11 = vld [vmem:[%s9993_s3 + $0x108] sm:$0xff] }
0x13b6   :  { %v86_v9 = vld [vmem:[%s9993_s3 + $0x1a8] sm:$0xff] }
0x13b7   :  { %v1852_v17 = vadd.f32 %v1851_v16, %v1850_v14  ;;  %v9193_v14 = vpack.c.bf16 %v70_v13, %v66_v11  ;;  %v65_v16 = vld [vmem:[%s9993_s3 + $0x100] sm:$0xff]  ;;  %v9331_v11 = vpack.c.bf16 %v86_v9, %v82_v8  ;;  %v84_v13 = vld [vmem:[%s9993_s3 + $0x198] sm:$0xff]  ;;  %v2524_v8 = vlaneseq }
0x13b8   :  { %v2523_v9 = vunpack.c.0.s8 %v2522_v2 }
0x13b9   :  { %1853 = vst [vmem:[#allocation2 + $0xe] sm:$0x3] %v1852_v17  ;;  %6426 = vmatmul.mubr.f32.vlgmr.msra.gmra.mrb[22].mxu1 %v1852_v17  ;;  %v69_v17 = vld [vmem:[%s9993_s3 + $0x120] sm:$0xff] }
0x13ba   :  { %7240 = vmatpush3.bf16.msra.mxu1 %v8428_v5  ;;  %6495 = vmatprep.mubr.msk.f32.mxu1 %vm8388_vm0, %v8389_v4 }
0x13bb   :  { %7241 = vmatprep.subr.bf16.mxu1 %v8387_v0 }
0x13be   :  { %7243 = vmatpush3.bf16.msra.mxu1 %v8437_v7 }
0x13bf   :  { %7244 = vmatprep.subr.bf16.mxu1 %v8387_v0 }
0x13c2   :  { %7246 = vmatpush3.bf16.msra.mxu1 %v8452_v12 }
0x13c3   :  { %7247 = vmatprep.subr.bf16.mxu1 %v8387_v0 }
0x13c6   :  { %7249 = vmatpush3.bf16.msra.mxu1 %v8464_v15 }
0x13c7   :  { %7250 = vmatprep.subr.bf16.mxu1 %v8387_v0 }
0x13ca   :  { %7252 = vmatpush3.bf16.msra.mxu1 %v8476_v18 }
0x13cb   :  { %7253 = vmatprep.subr.bf16.mxu1 %v8387_v0 }
0x13ce   :  { %7255 = vmatpush3.bf16.msra.mxu1 %v8488_v21 }
0x13cf   :  { %7256 = vmatprep.subr.bf16.mxu1 %v8387_v0 }
0x13d2   :  { %7258 = vmatpush3.bf16.msra.mxu1 %v8500_v24 }
0x13d3   :  { %7259 = vmatprep.subr.bf16.mxu1 %v8387_v0 }
0x13d6   :  { %7261 = vmatpush3.bf16.msra.mxu1 %v8512_v27 }
0x13d7   :  { %7286 = vmatprep.subr.bf16.mxu1 %v8387_v0 }
0x148c   :  { %v1920_v19 = vpop.f32.mrb[22].mxu1 }
0x148d   :  { %v1921_v20 = vadd.f32 %v8972_v58, %v1920_v19  ;;  %v6427_v22 = vpop.f32.mrb[23].mxu1  ;;  %v9202_v19 = vpack.c.bf16 %v69_v17, %v65_v16  ;;  %v88_v16 = vld [vmem:[%s9993_s3 + $0x1b8] sm:$0xff]  ;;  %v81_v17 = vld [vmem:[%s9993_s3 + $0x180] sm:$0xff] }
0x148f   :  { %v1924_v23 = vmax.f32 %v1921_v20, 0.0 }
0x1491   :  { %v1926_v26 = vadd.f32 %v1925_v25, %v1924_v23  ;;  %v35_v25 = vld [vmem:[%s9993_s3 + $0x10] sm:$0xff] }
0x1493   :  { %1927 = vst [vmem:[#allocation2 + $0xc] sm:$0x3] %v1926_v26  ;;  %6461 = vmatmul.mubr.f32.vlgmr.msra.gmra.mrb[24].mxu0 %v1926_v26  ;;  %v39_v26 = vld [vmem:[%s9993_s3 + $0x30] sm:$0xff] }
0x1494   :  { %7264 = vmatpush3.bf16.msra.mxu0 %v8428_v5  ;;  %6530 = vmatprep.mubr.msk.f32.mxu0 %vm8388_vm0, %v8389_v4 }
0x1495   :  { %7265 = vmatprep.subr.bf16.mxu0 %v8387_v0 }
0x1498   :  { %7267 = vmatpush3.bf16.msra.mxu0 %v8437_v7 }
0x1499   :  { %7268 = vmatprep.subr.bf16.mxu0 %v8387_v0 }
0x149a   :  { %v3373_v59 = vld [vmem:[#allocation2 + $0xc] sm:$0x3] }
0x149c   :  { %7270 = vmatpush3.bf16.msra.mxu0 %v8452_v12 }
0x149d   :  { %7271 = vmatprep.subr.bf16.mxu0 %v8387_v0 }
0x14a0   :  { %7273 = vmatpush3.bf16.msra.mxu0 %v8464_v15 }
0x14a1   :  { %7274 = vmatprep.subr.bf16.mxu0 %v8387_v0 }
0x14a4   :  { %7276 = vmatpush3.bf16.msra.mxu0 %v8476_v18 }
0x14a5   :  { %7277 = vmatprep.subr.bf16.mxu0 %v8387_v0 }
0x14a8   :  { %7279 = vmatpush3.bf16.msra.mxu0 %v8488_v21 }
0x14a9   :  { %7280 = vmatprep.subr.bf16.mxu0 %v8387_v0 }
0x14ac   :  { %7282 = vmatpush3.bf16.msra.mxu0 %v8500_v24 }
0x14ad   :  { %7283 = vmatprep.subr.bf16.mxu0 %v8387_v0 }
0x14b0   :  { %7285 = vmatpush3.bf16.msra.mxu0 %v8512_v27 }
0x14b1   :  { %7310 = vmatprep.subr.bf16.mxu0 %v8387_v0 }
0x1566   :  { %v1994_v29 = vpop.f32.mrb[24].mxu0 }
0x1567   :  { %v1995_v30 = vadd.f32 %v8972_v58, %v1994_v29  ;;  %v6462_v31 = vpop.f32.mrb[25].mxu0  ;;  %v44_v29 = vld [vmem:[%s9993_s3 + $0x58] sm:$0xff] }
0x1569   :  { %v1998_v32 = vmax.f32 %v1995_v30, 0.0  ;;  %v48_v30 = vld [vmem:[%s9993_s3 + $0x78] sm:$0xff] }
0x156b   :  { %v2000_v34 = vadd.f32 %v1999_v33, %v1998_v32  ;;  %v2295_v32 = vld [vmem:[#allocation2 + $0x2] sm:$0x3]  ;;  %v9219_v33 = vpack.c.bf16 %v39_v26, %v35_v25  ;;  %v87_v25 = vld [vmem:[%s9993_s3 + $0x1b0] sm:$0xff] }
0x156d   :  { %2001 = vst [vmem:[#allocation2 + $0xa] sm:$0x3] %v2000_v34  ;;  %6496 = vmatmul.mubr.f32.vlgmr.msra.gmra.mrb[24].mxu1 %v2000_v34 }
0x156e   :  { %7288 = vmatpush3.bf16.msra.mxu1 %v8428_v5  ;;  %6565 = vmatprep.mubr.msk.f32.mxu1 %vm8388_vm0, %v8389_v4 }
0x156f   :  { %7289 = vmatprep.subr.bf16.mxu1 %v8387_v0 }
0x1572   :  { %7291 = vmatpush3.bf16.msra.mxu1 %v8437_v7 }
0x1573   :  { %7292 = vmatprep.subr.bf16.mxu1 %v8387_v0 }
0x1574   :  { %v3206_v57 = vld [vmem:[#allocation2 + $0xa] sm:$0x3] }
0x1576   :  { %7294 = vmatpush3.bf16.msra.mxu1 %v8452_v12 }
0x1577   :  { %7295 = vmatprep.subr.bf16.mxu1 %v8387_v0 }
0x157a   :  { %7297 = vmatpush3.bf16.msra.mxu1 %v8464_v15 }
0x157b   :  { %7298 = vmatprep.subr.bf16.mxu1 %v8387_v0 }
0x157e   :  { %7300 = vmatpush3.bf16.msra.mxu1 %v8476_v18 }
0x157f   :  { %7301 = vmatprep.subr.bf16.mxu1 %v8387_v0 }
0x1582   :  { %7303 = vmatpush3.bf16.msra.mxu1 %v8488_v21 }
0x1583   :  { %7304 = vmatprep.subr.bf16.mxu1 %v8387_v0 }
0x1586   :  { %7306 = vmatpush3.bf16.msra.mxu1 %v8500_v24 }
0x1587   :  { %7307 = vmatprep.subr.bf16.mxu1 %v8387_v0 }
0x158a   :  { %7309 = vmatpush3.bf16.msra.mxu1 %v8512_v27 }
0x158b   :  { %7334 = vmatprep.subr.bf16.mxu1 %v8387_v0 }
0x1640   :  { %v2068_v35 = vpop.f32.mrb[24].mxu1 }
0x1641   :  { %v2069_v36 = vadd.f32 %v8972_v58, %v2068_v35  ;;  %v6497_v37 = vpop.f32.mrb[25].mxu1  ;;  %v9221_v35 = vpack.c.bf16 %v48_v30, %v44_v29  ;;  %v90_v30 = vld [vmem:[%s9993_s3 + $0x1c8] sm:$0xff] }
0x1642   :  { %v47_v37 = vld [vmem:[%s9993_s3 + $0x70] sm:$0xff] }
0x1643   :  { %v2072_v38 = vmax.f32 %v2069_v36, 0.0  ;;  %v43_v36 = vld [vmem:[%s9993_s3 + $0x50] sm:$0xff] }
0x1645   :  { %v2074_v40 = vadd.f32 %v2073_v39, %v2072_v38  ;;  %v52_v38 = vld [vmem:[%s9993_s3 + $0x98] sm:$0xff] }
0x1646   :  { %v56_v39 = vld [vmem:[%s9993_s3 + $0xb8] sm:$0xff] }
0x1647   :  { %2075 = vst [vmem:[#allocation2 + $0x8] sm:$0x3] %v2074_v40  ;;  %6531 = vmatmul.mubr.f32.vlgmr.msra.gmra.mrb[26].mxu0 %v2074_v40  ;;  %v9236_v40 = vpack.c.bf16 %v47_v37, %v43_v36  ;;  %v96_v36 = vld [vmem:[%s9993_s3 + $0x1f8] sm:$0xff]  ;;  %v89_v37 = vld [vmem:[%s9993_s3 + $0x1c0] sm:$0xff] }
0x1648   :  { %7312 = vmatpush3.bf16.msra.mxu0 %v8428_v5  ;;  %6600 = vmatprep.mubr.msk.f32.mxu0 %vm8388_vm0, %v8389_v4 }
0x1649   :  { %7313 = vmatprep.subr.bf16.mxu0 %v8387_v0 }
0x164c   :  { %7315 = vmatpush3.bf16.msra.mxu0 %v8437_v7 }
0x164d   :  { %7316 = vmatprep.subr.bf16.mxu0 %v8387_v0 }
0x164e   :  { %v3039_v56 = vld [vmem:[#allocation2 + $0x8] sm:$0x3] }
0x1650   :  { %7318 = vmatpush3.bf16.msra.mxu0 %v8452_v12 }
0x1651   :  { %7319 = vmatprep.subr.bf16.mxu0 %v8387_v0 }
0x1654   :  { %7321 = vmatpush3.bf16.msra.mxu0 %v8464_v15 }
0x1655   :  { %7322 = vmatprep.subr.bf16.mxu0 %v8387_v0 }
0x1658   :  { %7324 = vmatpush3.bf16.msra.mxu0 %v8476_v18 }
0x1659   :  { %7325 = vmatprep.subr.bf16.mxu0 %v8387_v0 }
0x165c   :  { %7327 = vmatpush3.bf16.msra.mxu0 %v8488_v21 }
0x165d   :  { %7328 = vmatprep.subr.bf16.mxu0 %v8387_v0 }
0x1660   :  { %7330 = vmatpush3.bf16.msra.mxu0 %v8500_v24 }
0x1661   :  { %7331 = vmatprep.subr.bf16.mxu0 %v8387_v0 }
0x1664   :  { %7333 = vmatpush3.bf16.msra.mxu0 %v8512_v27 }
0x171a   :  { %v2142_v41 = vpop.f32.mrb[26].mxu0 }
0x171b   :  { %v2143_v42 = vadd.f32 %v8972_v58, %v2142_v41  ;;  %v6532_v43 = vpop.f32.mrb[27].mxu0  ;;  %v9240_v41 = vpack.c.bf16 %v56_v39, %v52_v38  ;;  %v93_v38 = vld [vmem:[%s9993_s3 + $0x1e0] sm:$0xff] }
0x171c   :  { %v55_v43 = vld [vmem:[%s9993_s3 + $0xb0] sm:$0xff] }
0x171d   :  { %v2146_v44 = vmax.f32 %v2143_v42, 0.0  ;;  %v51_v42 = vld [vmem:[%s9993_s3 + $0x90] sm:$0xff] }
0x171f   :  { %v2148_v46 = vadd.f32 %v2147_v45, %v2146_v44  ;;  %v60_v44 = vld [vmem:[%s9993_s3 + $0xd8] sm:$0xff] }
0x1720   :  { %v64_v45 = vld [vmem:[%s9993_s3 + $0xf8] sm:$0xff] }
0x1721   :  { %2149 = vst [vmem:[#allocation2 + $0x6] sm:$0x3] %v2148_v46  ;;  %6566 = vmatmul.mubr.f32.vlgmr.msra.gmra.mrb[26].mxu1 %v2148_v46  ;;  %v9255_v46 = vpack.c.bf16 %v55_v43, %v51_v42  ;;  %v9383_v42 = vpack.c.bf16 %v93_v38, %v89_v37  ;;  %v91_v43 = vld [vmem:[%s9993_s3 + $0x1d0] sm:$0xff]  ;;  %v3540_v38 = vld [vmem:[#allocation2 + $0xe] sm:$0x3] }
0x1722   :  { %7336 = vmatpush3.bf16.msra.mxu1 %v8428_v5  ;;  %6635 = vmatprep.mubr.msk.f32.mxu1 %vm8388_vm0, %v8389_v4 }
0x1723   :  { %7337 = vmatprep.subr.bf16.mxu1 %v8387_v0 }
0x1726   :  { %7339 = vmatpush3.bf16.msra.mxu1 %v8437_v7 }
0x1727   :  { %7340 = vmatprep.subr.bf16.mxu1 %v8387_v0 }
0x1728   :  { %v2872_v53 = vld [vmem:[#allocation2 + $0x6] sm:$0x3] }
0x172a   :  { %7342 = vmatpush3.bf16.msra.mxu1 %v8452_v12 }
0x172b   :  { %7343 = vmatprep.subr.bf16.mxu1 %v8387_v0 }
0x172e   :  { %7345 = vmatpush3.bf16.msra.mxu1 %v8464_v15 }
0x172f   :  { %7346 = vmatprep.subr.bf16.mxu1 %v8387_v0 }
0x1732   :  { %7348 = vmatpush3.bf16.msra.mxu1 %v8476_v18  ;;  %v34_v18 = vld [vmem:[%s9993_s3 + $0x8] sm:$0xff] }
0x1733   :  { %7349 = vmatprep.subr.bf16.mxu1 %v8387_v0 }
0x1736   :  { %7351 = vmatpush3.bf16.msra.mxu1 %v8488_v21  ;;  %v36_v21 = vld [vmem:[%s9993_s3 + $0x18] sm:$0xff] }
0x1737   :  { %7352 = vmatprep.subr.bf16.mxu1 %v8387_v0 }
0x173a   :  { %7354 = vmatpush3.bf16.msra.mxu1 %v8500_v24 }
0x173b   :  { %7355 = vmatprep.subr.bf16.mxu1 %v8387_v0  ;;  %v38_v0 = vld [vmem:[%s9993_s3 + $0x28] sm:$0xff] }
0x173c   :  { %v9116_v24 = vpack.c.bf16 %v38_v0, %v34_v18  ;;  %v67_v0 = vld [vmem:[%s9993_s3 + $0x110] sm:$0xff] }
0x173e   :  { %7357 = vmatpush3.bf16.msra.mxu1 %v8512_v27  ;;  %v40_v27 = vld [vmem:[%s9993_s3 + $0x38] sm:$0xff]  ;;  %7359 = vmatprep.subr.bf16.mxu0 %v9116_v24 }
0x173f   :  { %v9127_v51 = vpack.c.bf16 %v40_v27, %v36_v21  ;;  %v71_v21 = vld [vmem:[%s9993_s3 + $0x130] sm:$0xff] }
0x1740   :  { %v9285_v27 = vpack.c.bf16 %v71_v21, %v67_v0 }
0x1741   :  { %7391 = vmatprep.subr.bf16.mxu1 %v9127_v51 }
0x17f4   :  { %v2216_v5 = vpop.f32.mrb[26].mxu1 }
0x17f5   :  { %v2217_v7 = vadd.f32 %v8972_v58, %v2216_v5  ;;  %v6567_v12 = vpop.f32.mrb[27].mxu1  ;;  %v9258_v5 = vpack.c.bf16 %v64_v45, %v60_v44  ;;  %v95_v44 = vld [vmem:[%s9993_s3 + $0x1f0] sm:$0xff] }
0x17f6   :  { %v63_v12 = vld [vmem:[%s9993_s3 + $0xf0] sm:$0xff]  ;;  %v9392_v45 = vpack.c.bf16 %v95_v44, %v91_v43 }
0x17f7   :  { %v2220_v15 = vmax.f32 %v2217_v7, 0.0  ;;  %v59_v7 = vld [vmem:[%s9993_s3 + $0xd0] sm:$0xff] }
0x17f9   :  { %v2222_v48 = vadd.f32 %v2221_v47, %v2220_v15  ;;  %v68_v15 = vld [vmem:[%s9993_s3 + $0x118] sm:$0xff] }
0x17fa   :  { %v72_v47 = vld [vmem:[%s9993_s3 + $0x138] sm:$0xff] }
0x17fb   :  { %2223 = vst [vmem:[#allocation2 + $0x4] sm:$0x3] %v2222_v48  ;;  %6601 = vmatmul.mubr.f32.vlgmr.msra.gmra.mrb[28].mxu0 %v2222_v48  ;;  %v9273_v48 = vpack.c.bf16 %v63_v12, %v59_v7  ;;  %v9276_v18 = vpack.c.bf16 %v72_v47, %v68_v15  ;;  %v2369_v47 = vld [vmem:[#allocation2] sm:$0x3] }
0x17fc   :  { %2437 = vmatprep.mubr.f32.mxu0 %v8389_v4  ;;  %7361 = vmatpush1.bf16.msra.mxu0 %v9129_v52 }
0x17fd   :  { %7363 = vmatprep.subr.bf16.mxu0 %v9140_v55 }
0x1800   :  { %7365 = vmatpush1.bf16.msra.mxu0 %v9148_v28 }
0x1801   :  { %7367 = vmatprep.subr.bf16.mxu0 %v9157_v61 }
0x1802   :  { %v2705_v50 = vld [vmem:[#allocation2 + $0x4] sm:$0x3] }
0x1804   :  { %7369 = vmatpush1.bf16.msra.mxu0 %v9166_v1 }
0x1805   :  { %7371 = vmatprep.subr.bf16.mxu0 %v9175_v6 }
0x1808   :  { %7373 = vmatpush1.bf16.msra.mxu0 %v9184_v10 }
0x1809   :  { %7375 = vmatprep.subr.bf16.mxu0 %v9193_v14 }
0x180c   :  { %7377 = vmatpush1.bf16.msra.mxu0 %v9202_v19 }
0x180d   :  { %7379 = vmatprep.subr.bf16.mxu0 %v9298_v54 }
0x1810   :  { %7381 = vmatpush1.bf16.msra.mxu0 %v9311_v62 }
0x1811   :  { %7383 = vmatprep.subr.bf16.mxu0 %v9331_v11 }
0x18ce   :  { %v2290_v20 = vpop.f32.mrb[28].mxu0 }
0x18cf   :  { %v2291_v22 = vadd.f32 %v8972_v58, %v2290_v20  ;;  %v6602_v23 = vpop.f32.mrb[29].mxu0  ;;  %v9342_v20 = vpack.c.bf16 %v88_v16, %v84_v13  ;;  %v2525_v13 = vshrl.u32 %v2524_v8, 7 }
0x18d0   :  { %v83_v23 = vld [vmem:[%s9993_s3 + $0x190] sm:$0xff] }
0x18d1   :  { %v2294_v31 = vmax.f32 %v2291_v22, 0.0  ;;  %v85_v22 = vld [vmem:[%s9993_s3 + $0x1a0] sm:$0xff]  ;;  %v9356_v29 = vpack.c.bf16 %v87_v25, %v83_v23 }
0x18d2   :  { %v9354_v26 = vpack.c.bf16 %v85_v22, %v81_v17  ;;  %v9626_v22 = vsub.s32 %v2523_v9, %v2525_v13  ;;  %v3874_v13 = vld [vmem:[#allocation2 + $0x12] sm:$0x3] }
0x18d3   :  { %v2296_v34 = vadd.f32 %v2295_v32, %v2294_v31  ;;  %v94_v31 = vld [vmem:[%s9993_s3 + $0x1e8] sm:$0xff]  ;;  %v92_v32 = vld [vmem:[%s9993_s3 + $0x1d8] sm:$0xff] }
0x18d4   :  { %7385 = vmatpush1.bf16.msra.mxu0 %v9354_v26  ;;  %v9381_v39 = vpack.c.bf16 %v96_v36, %v92_v32 }
0x18d5   :  { %2297 = vst [vmem:[#allocation2 + $0x2] sm:$0x3] %v2296_v34  ;;  %6636 = vmatmul.mubr.f32.vlgmr.msra.gmra.mrb[28].mxu1 %v2296_v34  ;;  %v9370_v34 = vpack.c.bf16 %v94_v31, %v90_v30 }
0x18d6   :  { %7393 = vmatpush1.bf16.msra.mxu1 %v9219_v33  ;;  %2508 = vmatprep.mubr.f32.mxu1 %v8389_v4 }
0x18d7   :  { %7395 = vmatprep.subr.bf16.mxu1 %v9221_v35  ;;  %7387 = vmatprep.subr.bf16.mxu0 %v9370_v34 }
0x18d8   :  { %7389 = vmatpush1.bf16.msra.mxu0 %v9383_v42 }
0x18d9   :  { %7423 = vmatprep.subr.bf16.mxu0 %v9116_v24 }
0x18da   :  { %7397 = vmatpush1.bf16.msra.mxu1 %v9236_v40 }
0x18db   :  { %7399 = vmatprep.subr.bf16.mxu1 %v9240_v41 }
0x18de   :  { %7401 = vmatpush1.bf16.msra.mxu1 %v9255_v46 }
0x18df   :  { %7403 = vmatprep.subr.bf16.mxu1 %v9258_v5 }
0x18e2   :  { %7405 = vmatpush1.bf16.msra.mxu1 %v9273_v48 }
0x18e3   :  { %7407 = vmatprep.subr.bf16.mxu1 %v9276_v18 }
0x18e6   :  { %7409 = vmatpush1.bf16.msra.mxu1 %v9285_v27 }
0x18e7   :  { %7411 = vmatprep.subr.bf16.mxu1 %v9309_v60 }
0x18ea   :  { %7413 = vmatpush1.bf16.msra.mxu1 %v9320_v3 }
0x18eb   :  { %7415 = vmatprep.subr.bf16.mxu1 %v9342_v20 }
0x18ee   :  { %7417 = vmatpush1.bf16.msra.mxu1 %v9356_v29 }
0x18ef   :  { %7419 = vmatprep.subr.bf16.mxu1 %v9381_v39 }
0x18f2   :  { %7421 = vmatpush1.bf16.msra.mxu1 %v9392_v45 }
0x18f3   :  { %7455 = vmatprep.subr.bf16.mxu1 %v9127_v51 }
0x19a8   :  { %v2364_v7 = vpop.f32.mrb[28].mxu1 }
0x19a9   :  { %v2365_v12 = vadd.f32 %v8972_v58, %v2364_v7  ;;  %v6637_v15 = vpop.f32.mrb[29].mxu1  ;;  %v2538_v58 = vld [vmem:[#allocation2 + $0x2] sm:$0x3] }
0x19ab   :  { %v2368_v0 = vmax.f32 %v2365_v12, 0.0 }
0x19ad   :  { %v2370_v21 = vadd.f32 %v2369_v47, %v2368_v0 }
0x19af   :  { %2371 = vst [vmem:[#allocation2] sm:$0x3] %v2370_v21 }
0x19b6   :  { %v2372_v49 = vld [vmem:[#allocation2] sm:$0x3] }
0x19b7   :  { %2438 = vmatmul.mubr.f32.vlgmr.msra.gmra.mrb[30].mxu0 %v2372_v49  ;;  %2509 = vmatmul.mubr.f32.vlgmr.msra.gmra.mrb[30].mxu1 %v2372_v49 }
0x19b8   :  { %7425 = vmatpush1.bf16.msra.mxu0 %v9129_v52  ;;  %7457 = vmatpush1.bf16.msra.mxu1 %v9219_v33 }
0x19b9   :  { %7427 = vmatprep.subr.bf16.mxu0 %v9140_v55  ;;  %7459 = vmatprep.subr.bf16.mxu1 %v9221_v35 }
0x19ba   :  { %2603 = vmatprep.mubr.f32.mxu0 %v8389_v4  ;;  %2674 = vmatprep.mubr.f32.mxu1 %v8389_v4 }
0x19bc   :  { %7429 = vmatpush1.bf16.msra.mxu0 %v9148_v28  ;;  %7461 = vmatpush1.bf16.msra.mxu1 %v9236_v40 }
0x19bd   :  { %7431 = vmatprep.subr.bf16.mxu0 %v9157_v61  ;;  %7463 = vmatprep.subr.bf16.mxu1 %v9240_v41 }
0x19c0   :  { %7433 = vmatpush1.bf16.msra.mxu0 %v9166_v1  ;;  %7465 = vmatpush1.bf16.msra.mxu1 %v9255_v46 }
0x19c1   :  { %7435 = vmatprep.subr.bf16.mxu0 %v9175_v6  ;;  %7467 = vmatprep.subr.bf16.mxu1 %v9258_v5 }
0x19c4   :  { %7437 = vmatpush1.bf16.msra.mxu0 %v9184_v10  ;;  %7469 = vmatpush1.bf16.msra.mxu1 %v9273_v48 }
0x19c5   :  { %7439 = vmatprep.subr.bf16.mxu0 %v9193_v14  ;;  %7471 = vmatprep.subr.bf16.mxu1 %v9276_v18 }
0x19c8   :  { %7441 = vmatpush1.bf16.msra.mxu0 %v9202_v19  ;;  %7473 = vmatpush1.bf16.msra.mxu1 %v9285_v27 }
0x19c9   :  { %7443 = vmatprep.subr.bf16.mxu0 %v9298_v54  ;;  %7475 = vmatprep.subr.bf16.mxu1 %v9309_v60 }
0x19cc   :  { %7445 = vmatpush1.bf16.msra.mxu0 %v9311_v62  ;;  %7477 = vmatpush1.bf16.msra.mxu1 %v9320_v3 }
0x19cd   :  { %7447 = vmatprep.subr.bf16.mxu0 %v9331_v11  ;;  %7479 = vmatprep.subr.bf16.mxu1 %v9342_v20 }
0x19d0   :  { %7449 = vmatpush1.bf16.msra.mxu0 %v9354_v26  ;;  %7481 = vmatpush1.bf16.msra.mxu1 %v9356_v29 }
0x19d1   :  { %7451 = vmatprep.subr.bf16.mxu0 %v9370_v34  ;;  %7483 = vmatprep.subr.bf16.mxu1 %v9381_v39 }
0x19d4   :  { %7453 = vmatpush1.bf16.msra.mxu0 %v9383_v42  ;;  %7485 = vmatpush1.bf16.msra.mxu1 %v9392_v45 }
0x19d5   :  { %7487 = vmatprep.subr.bf16.mxu0 %v9116_v24  ;;  %7519 = vmatprep.subr.bf16.mxu1 %v9127_v51 }
0x19d7   :  { %2604 = vmatmul.mubr.f32.vlgmr.msra.gmra.mrb[32].mxu0 %v2538_v58  ;;  %2675 = vmatmul.mubr.f32.vlgmr.msra.gmra.mrb[32].mxu1 %v2538_v58  ;;  %v3707_v58 = vld [vmem:[#allocation2 + $0x10] sm:$0x3] }
0x19d8   :  { %7489 = vmatpush1.bf16.msra.mxu0 %v9129_v52  ;;  %7521 = vmatpush1.bf16.msra.mxu1 %v9219_v33 }
0x19d9   :  { %7491 = vmatprep.subr.bf16.mxu0 %v9140_v55  ;;  %7523 = vmatprep.subr.bf16.mxu1 %v9221_v35 }
0x19da   :  { %2770 = vmatprep.mubr.f32.mxu0 %v8389_v4  ;;  %2841 = vmatprep.mubr.f32.mxu1 %v8389_v4 }
0x19dc   :  { %7493 = vmatpush1.bf16.msra.mxu0 %v9148_v28  ;;  %7525 = vmatpush1.bf16.msra.mxu1 %v9236_v40 }
0x19dd   :  { %7495 = vmatprep.subr.bf16.mxu0 %v9157_v61  ;;  %7527 = vmatprep.subr.bf16.mxu1 %v9240_v41 }
0x19e0   :  { %7497 = vmatpush1.bf16.msra.mxu0 %v9166_v1  ;;  %7529 = vmatpush1.bf16.msra.mxu1 %v9255_v46 }
0x19e1   :  { %7499 = vmatprep.subr.bf16.mxu0 %v9175_v6  ;;  %7531 = vmatprep.subr.bf16.mxu1 %v9258_v5 }
0x19e4   :  { %7501 = vmatpush1.bf16.msra.mxu0 %v9184_v10  ;;  %7533 = vmatpush1.bf16.msra.mxu1 %v9273_v48 }
0x19e5   :  { %7503 = vmatprep.subr.bf16.mxu0 %v9193_v14  ;;  %7535 = vmatprep.subr.bf16.mxu1 %v9276_v18 }
0x19e8   :  { %7505 = vmatpush1.bf16.msra.mxu0 %v9202_v19  ;;  %7537 = vmatpush1.bf16.msra.mxu1 %v9285_v27 }
0x19e9   :  { %7507 = vmatprep.subr.bf16.mxu0 %v9298_v54  ;;  %7539 = vmatprep.subr.bf16.mxu1 %v9309_v60 }
0x19ec   :  { %7509 = vmatpush1.bf16.msra.mxu0 %v9311_v62  ;;  %7541 = vmatpush1.bf16.msra.mxu1 %v9320_v3 }
0x19ed   :  { %7511 = vmatprep.subr.bf16.mxu0 %v9331_v11  ;;  %7543 = vmatprep.subr.bf16.mxu1 %v9342_v20 }
0x19f0   :  { %7513 = vmatpush1.bf16.msra.mxu0 %v9354_v26  ;;  %7545 = vmatpush1.bf16.msra.mxu1 %v9356_v29 }
0x19f1   :  { %7515 = vmatprep.subr.bf16.mxu0 %v9370_v34  ;;  %7547 = vmatprep.subr.bf16.mxu1 %v9381_v39 }
0x19f4   :  { %7517 = vmatpush1.bf16.msra.mxu0 %v9383_v42  ;;  %7549 = vmatpush1.bf16.msra.mxu1 %v9392_v45 }
0x19f5   :  { %7551 = vmatprep.subr.bf16.mxu0 %v9116_v24  ;;  %7583 = vmatprep.subr.bf16.mxu1 %v9127_v51 }
0x19f7   :  { %2771 = vmatmul.mubr.f32.vlgmr.msra.gmra.mrb[34].mxu0 %v2705_v50  ;;  %2842 = vmatmul.mubr.f32.vlgmr.msra.gmra.mrb[34].mxu1 %v2705_v50 }
0x19f8   :  { %7553 = vmatpush1.bf16.msra.mxu0 %v9129_v52  ;;  %7585 = vmatpush1.bf16.msra.mxu1 %v9219_v33 }
0x19f9   :  { %7555 = vmatprep.subr.bf16.mxu0 %v9140_v55  ;;  %7587 = vmatprep.subr.bf16.mxu1 %v9221_v35 }
0x19fa   :  { %2937 = vmatprep.mubr.f32.mxu0 %v8389_v4  ;;  %3008 = vmatprep.mubr.f32.mxu1 %v8389_v4 }
0x19fc   :  { %7557 = vmatpush1.bf16.msra.mxu0 %v9148_v28  ;;  %7589 = vmatpush1.bf16.msra.mxu1 %v9236_v40 }
0x19fd   :  { %7559 = vmatprep.subr.bf16.mxu0 %v9157_v61  ;;  %7591 = vmatprep.subr.bf16.mxu1 %v9240_v41 }
0x1a00   :  { %7561 = vmatpush1.bf16.msra.mxu0 %v9166_v1  ;;  %7593 = vmatpush1.bf16.msra.mxu1 %v9255_v46 }
0x1a01   :  { %7563 = vmatprep.subr.bf16.mxu0 %v9175_v6  ;;  %7595 = vmatprep.subr.bf16.mxu1 %v9258_v5 }
0x1a04   :  { %7565 = vmatpush1.bf16.msra.mxu0 %v9184_v10  ;;  %7597 = vmatpush1.bf16.msra.mxu1 %v9273_v48 }
0x1a05   :  { %7567 = vmatprep.subr.bf16.mxu0 %v9193_v14  ;;  %7599 = vmatprep.subr.bf16.mxu1 %v9276_v18 }
0x1a08   :  { %7569 = vmatpush1.bf16.msra.mxu0 %v9202_v19  ;;  %7601 = vmatpush1.bf16.msra.mxu1 %v9285_v27 }
0x1a09   :  { %7571 = vmatprep.subr.bf16.mxu0 %v9298_v54  ;;  %7603 = vmatprep.subr.bf16.mxu1 %v9309_v60 }
0x1a0c   :  { %7573 = vmatpush1.bf16.msra.mxu0 %v9311_v62  ;;  %7605 = vmatpush1.bf16.msra.mxu1 %v9320_v3 }
0x1a0d   :  { %7575 = vmatprep.subr.bf16.mxu0 %v9331_v11  ;;  %7607 = vmatprep.subr.bf16.mxu1 %v9342_v20 }
0x1a10   :  { %7577 = vmatpush1.bf16.msra.mxu0 %v9354_v26  ;;  %7609 = vmatpush1.bf16.msra.mxu1 %v9356_v29 }
0x1a11   :  { %7579 = vmatprep.subr.bf16.mxu0 %v9370_v34  ;;  %7611 = vmatprep.subr.bf16.mxu1 %v9381_v39 }
0x1a14   :  { %7581 = vmatpush1.bf16.msra.mxu0 %v9383_v42  ;;  %7613 = vmatpush1.bf16.msra.mxu1 %v9392_v45 }
0x1a15   :  { %7615 = vmatprep.subr.bf16.mxu0 %v9116_v24  ;;  %7647 = vmatprep.subr.bf16.mxu1 %v9127_v51 }
0x1a17   :  { %2938 = vmatmul.mubr.f32.vlgmr.msra.gmra.mrb[36].mxu0 %v2872_v53  ;;  %3009 = vmatmul.mubr.f32.vlgmr.msra.gmra.mrb[36].mxu1 %v2872_v53 }
0x1a18   :  { %7617 = vmatpush1.bf16.msra.mxu0 %v9129_v52  ;;  %7649 = vmatpush1.bf16.msra.mxu1 %v9219_v33 }
0x1a19   :  { %7619 = vmatprep.subr.bf16.mxu0 %v9140_v55  ;;  %7651 = vmatprep.subr.bf16.mxu1 %v9221_v35 }
0x1a1a   :  { %3104 = vmatprep.mubr.f32.mxu0 %v8389_v4  ;;  %3175 = vmatprep.mubr.f32.mxu1 %v8389_v4 }
0x1a1c   :  { %7621 = vmatpush1.bf16.msra.mxu0 %v9148_v28  ;;  %7653 = vmatpush1.bf16.msra.mxu1 %v9236_v40 }
0x1a1d   :  { %7623 = vmatprep.subr.bf16.mxu0 %v9157_v61  ;;  %7655 = vmatprep.subr.bf16.mxu1 %v9240_v41 }
0x1a20   :  { %7625 = vmatpush1.bf16.msra.mxu0 %v9166_v1  ;;  %7657 = vmatpush1.bf16.msra.mxu1 %v9255_v46 }
0x1a21   :  { %7627 = vmatprep.subr.bf16.mxu0 %v9175_v6  ;;  %7659 = vmatprep.subr.bf16.mxu1 %v9258_v5 }
0x1a24   :  { %7629 = vmatpush1.bf16.msra.mxu0 %v9184_v10  ;;  %7661 = vmatpush1.bf16.msra.mxu1 %v9273_v48 }
0x1a25   :  { %7631 = vmatprep.subr.bf16.mxu0 %v9193_v14  ;;  %7663 = vmatprep.subr.bf16.mxu1 %v9276_v18 }
0x1a28   :  { %7633 = vmatpush1.bf16.msra.mxu0 %v9202_v19  ;;  %7665 = vmatpush1.bf16.msra.mxu1 %v9285_v27 }
0x1a29   :  { %7635 = vmatprep.subr.bf16.mxu0 %v9298_v54  ;;  %7667 = vmatprep.subr.bf16.mxu1 %v9309_v60 }
0x1a2c   :  { %7637 = vmatpush1.bf16.msra.mxu0 %v9311_v62  ;;  %7669 = vmatpush1.bf16.msra.mxu1 %v9320_v3 }
0x1a2d   :  { %7639 = vmatprep.subr.bf16.mxu0 %v9331_v11  ;;  %7671 = vmatprep.subr.bf16.mxu1 %v9342_v20 }
0x1a30   :  { %7641 = vmatpush1.bf16.msra.mxu0 %v9354_v26  ;;  %7673 = vmatpush1.bf16.msra.mxu1 %v9356_v29 }
0x1a31   :  { %7643 = vmatprep.subr.bf16.mxu0 %v9370_v34  ;;  %7675 = vmatprep.subr.bf16.mxu1 %v9381_v39 }
0x1a34   :  { %7645 = vmatpush1.bf16.msra.mxu0 %v9383_v42  ;;  %7677 = vmatpush1.bf16.msra.mxu1 %v9392_v45 }
0x1a35   :  { %7679 = vmatprep.subr.bf16.mxu0 %v9116_v24  ;;  %7711 = vmatprep.subr.bf16.mxu1 %v9127_v51 }
0x1a37   :  { %3105 = vmatmul.mubr.f32.vlgmr.msra.gmra.mrb[38].mxu0 %v3039_v56  ;;  %3176 = vmatmul.mubr.f32.vlgmr.msra.gmra.mrb[38].mxu1 %v3039_v56 }
0x1a38   :  { %7681 = vmatpush1.bf16.msra.mxu0 %v9129_v52  ;;  %7713 = vmatpush1.bf16.msra.mxu1 %v9219_v33 }
0x1a39   :  { %7683 = vmatprep.subr.bf16.mxu0 %v9140_v55  ;;  %7715 = vmatprep.subr.bf16.mxu1 %v9221_v35 }
0x1a3a   :  { %3271 = vmatprep.mubr.f32.mxu0 %v8389_v4  ;;  %3342 = vmatprep.mubr.f32.mxu1 %v8389_v4 }
0x1a3c   :  { %7685 = vmatpush1.bf16.msra.mxu0 %v9148_v28  ;;  %7717 = vmatpush1.bf16.msra.mxu1 %v9236_v40 }
0x1a3d   :  { %7687 = vmatprep.subr.bf16.mxu0 %v9157_v61  ;;  %7719 = vmatprep.subr.bf16.mxu1 %v9240_v41 }
0x1a40   :  { %7689 = vmatpush1.bf16.msra.mxu0 %v9166_v1  ;;  %7721 = vmatpush1.bf16.msra.mxu1 %v9255_v46 }
0x1a41   :  { %7691 = vmatprep.subr.bf16.mxu0 %v9175_v6  ;;  %7723 = vmatprep.subr.bf16.mxu1 %v9258_v5 }
0x1a44   :  { %7693 = vmatpush1.bf16.msra.mxu0 %v9184_v10  ;;  %7725 = vmatpush1.bf16.msra.mxu1 %v9273_v48 }
0x1a45   :  { %7695 = vmatprep.subr.bf16.mxu0 %v9193_v14  ;;  %7727 = vmatprep.subr.bf16.mxu1 %v9276_v18 }
0x1a48   :  { %7697 = vmatpush1.bf16.msra.mxu0 %v9202_v19  ;;  %7729 = vmatpush1.bf16.msra.mxu1 %v9285_v27 }
0x1a49   :  { %7699 = vmatprep.subr.bf16.mxu0 %v9298_v54  ;;  %7731 = vmatprep.subr.bf16.mxu1 %v9309_v60 }
0x1a4c   :  { %7701 = vmatpush1.bf16.msra.mxu0 %v9311_v62  ;;  %7733 = vmatpush1.bf16.msra.mxu1 %v9320_v3 }
0x1a4d   :  { %7703 = vmatprep.subr.bf16.mxu0 %v9331_v11  ;;  %7735 = vmatprep.subr.bf16.mxu1 %v9342_v20 }
0x1a50   :  { %7705 = vmatpush1.bf16.msra.mxu0 %v9354_v26  ;;  %7737 = vmatpush1.bf16.msra.mxu1 %v9356_v29 }
0x1a51   :  { %7707 = vmatprep.subr.bf16.mxu0 %v9370_v34  ;;  %7739 = vmatprep.subr.bf16.mxu1 %v9381_v39 }
0x1a54   :  { %7709 = vmatpush1.bf16.msra.mxu0 %v9383_v42  ;;  %7741 = vmatpush1.bf16.msra.mxu1 %v9392_v45 }
0x1a55   :  { %7743 = vmatprep.subr.bf16.mxu0 %v9116_v24  ;;  %7775 = vmatprep.subr.bf16.mxu1 %v9127_v51 }
0x1a57   :  { %3272 = vmatmul.mubr.f32.vlgmr.msra.gmra.mrb[40].mxu0 %v3206_v57  ;;  %3343 = vmatmul.mubr.f32.vlgmr.msra.gmra.mrb[40].mxu1 %v3206_v57 }
0x1a58   :  { %7745 = vmatpush1.bf16.msra.mxu0 %v9129_v52  ;;  %7777 = vmatpush1.bf16.msra.mxu1 %v9219_v33 }
0x1a59   :  { %7747 = vmatprep.subr.bf16.mxu0 %v9140_v55  ;;  %7779 = vmatprep.subr.bf16.mxu1 %v9221_v35 }
0x1a5a   :  { %3438 = vmatprep.mubr.f32.mxu0 %v8389_v4  ;;  %3509 = vmatprep.mubr.f32.mxu1 %v8389_v4 }
0x1a5c   :  { %7749 = vmatpush1.bf16.msra.mxu0 %v9148_v28  ;;  %7781 = vmatpush1.bf16.msra.mxu1 %v9236_v40 }
0x1a5d   :  { %7751 = vmatprep.subr.bf16.mxu0 %v9157_v61  ;;  %7783 = vmatprep.subr.bf16.mxu1 %v9240_v41 }
0x1a60   :  { %7753 = vmatpush1.bf16.msra.mxu0 %v9166_v1  ;;  %7785 = vmatpush1.bf16.msra.mxu1 %v9255_v46 }
0x1a61   :  { %7755 = vmatprep.subr.bf16.mxu0 %v9175_v6  ;;  %7787 = vmatprep.subr.bf16.mxu1 %v9258_v5 }
0x1a64   :  { %7757 = vmatpush1.bf16.msra.mxu0 %v9184_v10  ;;  %7789 = vmatpush1.bf16.msra.mxu1 %v9273_v48 }
0x1a65   :  { %7759 = vmatprep.subr.bf16.mxu0 %v9193_v14  ;;  %7791 = vmatprep.subr.bf16.mxu1 %v9276_v18 }
0x1a68   :  { %7761 = vmatpush1.bf16.msra.mxu0 %v9202_v19  ;;  %7793 = vmatpush1.bf16.msra.mxu1 %v9285_v27 }
0x1a69   :  { %7763 = vmatprep.subr.bf16.mxu0 %v9298_v54  ;;  %7795 = vmatprep.subr.bf16.mxu1 %v9309_v60 }
0x1a6c   :  { %7765 = vmatpush1.bf16.msra.mxu0 %v9311_v62  ;;  %7797 = vmatpush1.bf16.msra.mxu1 %v9320_v3 }
0x1a6d   :  { %7767 = vmatprep.subr.bf16.mxu0 %v9331_v11  ;;  %7799 = vmatprep.subr.bf16.mxu1 %v9342_v20 }
0x1a70   :  { %7769 = vmatpush1.bf16.msra.mxu0 %v9354_v26  ;;  %7801 = vmatpush1.bf16.msra.mxu1 %v9356_v29 }
0x1a71   :  { %7771 = vmatprep.subr.bf16.mxu0 %v9370_v34  ;;  %7803 = vmatprep.subr.bf16.mxu1 %v9381_v39 }
0x1a74   :  { %7773 = vmatpush1.bf16.msra.mxu0 %v9383_v42  ;;  %7805 = vmatpush1.bf16.msra.mxu1 %v9392_v45 }
0x1a75   :  { %7807 = vmatprep.subr.bf16.mxu0 %v9116_v24  ;;  %7839 = vmatprep.subr.bf16.mxu1 %v9127_v51 }
0x1a77   :  { %3439 = vmatmul.mubr.f32.vlgmr.msra.gmra.mrb[42].mxu0 %v3373_v59  ;;  %3510 = vmatmul.mubr.f32.vlgmr.msra.gmra.mrb[42].mxu1 %v3373_v59 }
0x1a78   :  { %7809 = vmatpush1.bf16.msra.mxu0 %v9129_v52  ;;  %7841 = vmatpush1.bf16.msra.mxu1 %v9219_v33 }
0x1a79   :  { %7811 = vmatprep.subr.bf16.mxu0 %v9140_v55  ;;  %7843 = vmatprep.subr.bf16.mxu1 %v9221_v35 }
0x1a7a   :  { %3605 = vmatprep.mubr.f32.mxu0 %v8389_v4  ;;  %3676 = vmatprep.mubr.f32.mxu1 %v8389_v4 }
0x1a7c   :  { %7813 = vmatpush1.bf16.msra.mxu0 %v9148_v28  ;;  %7845 = vmatpush1.bf16.msra.mxu1 %v9236_v40 }
0x1a7d   :  { %7815 = vmatprep.subr.bf16.mxu0 %v9157_v61  ;;  %7847 = vmatprep.subr.bf16.mxu1 %v9240_v41 }
0x1a80   :  { %7817 = vmatpush1.bf16.msra.mxu0 %v9166_v1  ;;  %7849 = vmatpush1.bf16.msra.mxu1 %v9255_v46 }
0x1a81   :  { %7819 = vmatprep.subr.bf16.mxu0 %v9175_v6  ;;  %7851 = vmatprep.subr.bf16.mxu1 %v9258_v5 }
0x1a84   :  { %7821 = vmatpush1.bf16.msra.mxu0 %v9184_v10  ;;  %7853 = vmatpush1.bf16.msra.mxu1 %v9273_v48 }
0x1a85   :  { %7823 = vmatprep.subr.bf16.mxu0 %v9193_v14  ;;  %7855 = vmatprep.subr.bf16.mxu1 %v9276_v18 }
0x1a88   :  { %7825 = vmatpush1.bf16.msra.mxu0 %v9202_v19  ;;  %7857 = vmatpush1.bf16.msra.mxu1 %v9285_v27 }
0x1a89   :  { %7827 = vmatprep.subr.bf16.mxu0 %v9298_v54  ;;  %7859 = vmatprep.subr.bf16.mxu1 %v9309_v60 }
0x1a8a   :  { %v2439_v16 = vpop.f32.mrb[30].mxu0  ;;  %v2510_v17 = vpop.f32.mrb[30].mxu1 }
0x1a8b   :  { %v2441_v23 = vpop.f32.mrb[31].mxu0  ;;  %v2512_v25 = vpop.f32.mrb[31].mxu1 }
0x1a8c   :  { %v2519_v30 = vcombine.low %v2439_v16, %v2441_v23  ;;  %v2520_v31 = vcombine.low %v2510_v17, %v2512_v25  ;;  %7829 = vmatpush1.bf16.msra.mxu0 %v9311_v62  ;;  %7861 = vmatpush1.bf16.msra.mxu1 %v9320_v3 }
0x1a8d   :  { %7831 = vmatprep.subr.bf16.mxu0 %v9331_v11  ;;  %7863 = vmatprep.subr.bf16.mxu1 %v9342_v20 }
0x1a8e   :  { %v2527_v32 = vrot.slane %v2519_v30, %v9626_v22  ;;  %v2534_v36 = vrot.slane %v2520_v31, %v9626_v22 }
0x1a90   :  { %v2535_v37 = vcombine.low %v2527_v32, %v2534_v36  ;;  %7833 = vmatpush1.bf16.msra.mxu0 %v9354_v26  ;;  %7865 = vmatpush1.bf16.msra.mxu1 %v9356_v29 }
0x1a91   :  { %7835 = vmatprep.subr.bf16.mxu0 %v9370_v34  ;;  %7867 = vmatprep.subr.bf16.mxu1 %v9381_v39 }
0x1a92   :  { %2537 = vst [vmem:[%s9994_s4] sm:$0xff] %v2535_v37 }
0x1a94   :  { %7837 = vmatpush1.bf16.msra.mxu0 %v9383_v42  ;;  %7869 = vmatpush1.bf16.msra.mxu1 %v9392_v45 }
0x1a95   :  { %7871 = vmatprep.subr.bf16.mxu0 %v9116_v24  ;;  %7903 = vmatprep.subr.bf16.mxu1 %v9127_v51 }
0x1a97   :  { %3606 = vmatmul.mubr.f32.vlgmr.msra.gmra.mrb[44].mxu0 %v3540_v38  ;;  %3677 = vmatmul.mubr.f32.vlgmr.msra.gmra.mrb[44].mxu1 %v3540_v38  ;;  %v4041_v38 = vld [vmem:[#allocation2 + $0x14] sm:$0x3] }
0x1a98   :  { %7873 = vmatpush1.bf16.msra.mxu0 %v9129_v52  ;;  %7905 = vmatpush1.bf16.msra.mxu1 %v9219_v33 }
0x1a99   :  { %7875 = vmatprep.subr.bf16.mxu0 %v9140_v55  ;;  %7907 = vmatprep.subr.bf16.mxu1 %v9221_v35 }
0x1a9a   :  { %3772 = vmatprep.mubr.f32.mxu0 %v8389_v4  ;;  %3843 = vmatprep.mubr.f32.mxu1 %v8389_v4 }
0x1a9c   :  { %7877 = vmatpush1.bf16.msra.mxu0 %v9148_v28  ;;  %7909 = vmatpush1.bf16.msra.mxu1 %v9236_v40 }
0x1a9d   :  { %7879 = vmatprep.subr.bf16.mxu0 %v9157_v61  ;;  %7911 = vmatprep.subr.bf16.mxu1 %v9240_v41 }
0x1aa0   :  { %7881 = vmatpush1.bf16.msra.mxu0 %v9166_v1  ;;  %7913 = vmatpush1.bf16.msra.mxu1 %v9255_v46 }
0x1aa1   :  { %7883 = vmatprep.subr.bf16.mxu0 %v9175_v6  ;;  %7915 = vmatprep.subr.bf16.mxu1 %v9258_v5 }
0x1aa4   :  { %7885 = vmatpush1.bf16.msra.mxu0 %v9184_v10  ;;  %7917 = vmatpush1.bf16.msra.mxu1 %v9273_v48 }
0x1aa5   :  { %7887 = vmatprep.subr.bf16.mxu0 %v9193_v14  ;;  %7919 = vmatprep.subr.bf16.mxu1 %v9276_v18 }
0x1aa8   :  { %7889 = vmatpush1.bf16.msra.mxu0 %v9202_v19  ;;  %7921 = vmatpush1.bf16.msra.mxu1 %v9285_v27 }
0x1aa9   :  { %7891 = vmatprep.subr.bf16.mxu0 %v9298_v54  ;;  %7923 = vmatprep.subr.bf16.mxu1 %v9309_v60 }
0x1aaa   :  { %v2605_v43 = vpop.f32.mrb[32].mxu0  ;;  %v2676_v44 = vpop.f32.mrb[32].mxu1 }
0x1aab   :  { %v2607_v7 = vpop.f32.mrb[33].mxu0  ;;  %v2678_v12 = vpop.f32.mrb[33].mxu1 }
0x1aac   :  { %v2685_v15 = vcombine.low %v2605_v43, %v2607_v7  ;;  %v2686_v47 = vcombine.low %v2676_v44, %v2678_v12  ;;  %7893 = vmatpush1.bf16.msra.mxu0 %v9311_v62  ;;  %7925 = vmatpush1.bf16.msra.mxu1 %v9320_v3 }
0x1aad   :  { %7895 = vmatprep.subr.bf16.mxu0 %v9331_v11  ;;  %7927 = vmatprep.subr.bf16.mxu1 %v9342_v20 }
0x1aae   :  { %v2693_v0 = vrot.slane %v2685_v15, %v9626_v22  ;;  %v2700_v21 = vrot.slane %v2686_v47, %v9626_v22 }
0x1ab0   :  { %v2701_v49 = vcombine.low %v2693_v0, %v2700_v21  ;;  %7897 = vmatpush1.bf16.msra.mxu0 %v9354_v26  ;;  %7929 = vmatpush1.bf16.msra.mxu1 %v9356_v29 }
0x1ab1   :  { %7899 = vmatprep.subr.bf16.mxu0 %v9370_v34  ;;  %7931 = vmatprep.subr.bf16.mxu1 %v9381_v39 }
0x1ab2   :  { %5063 = vst [vmem:[%s9994_s4 + $0x8] sm:$0xff] %v2701_v49 }
0x1ab4   :  { %7901 = vmatpush1.bf16.msra.mxu0 %v9383_v42  ;;  %7933 = vmatpush1.bf16.msra.mxu1 %v9392_v45 }
0x1ab5   :  { %7935 = vmatprep.subr.bf16.mxu0 %v9116_v24  ;;  %7967 = vmatprep.subr.bf16.mxu1 %v9127_v51 }
0x1ab7   :  { %3773 = vmatmul.mubr.f32.vlgmr.msra.gmra.mrb[46].mxu0 %v3707_v58  ;;  %3844 = vmatmul.mubr.f32.vlgmr.msra.gmra.mrb[46].mxu1 %v3707_v58  ;;  %v4208_v58 = vld [vmem:[#allocation2 + $0x16] sm:$0x3] }
0x1ab8   :  { %7937 = vmatpush1.bf16.msra.mxu0 %v9129_v52  ;;  %7969 = vmatpush1.bf16.msra.mxu1 %v9219_v33 }
0x1ab9   :  { %7939 = vmatprep.subr.bf16.mxu0 %v9140_v55  ;;  %7971 = vmatprep.subr.bf16.mxu1 %v9221_v35 }
0x1aba   :  { %3939 = vmatprep.mubr.f32.mxu0 %v8389_v4  ;;  %4010 = vmatprep.mubr.f32.mxu1 %v8389_v4 }
0x1abc   :  { %7941 = vmatpush1.bf16.msra.mxu0 %v9148_v28  ;;  %7973 = vmatpush1.bf16.msra.mxu1 %v9236_v40 }
0x1abd   :  { %7943 = vmatprep.subr.bf16.mxu0 %v9157_v61  ;;  %7975 = vmatprep.subr.bf16.mxu1 %v9240_v41 }
0x1ac0   :  { %7945 = vmatpush1.bf16.msra.mxu0 %v9166_v1  ;;  %7977 = vmatpush1.bf16.msra.mxu1 %v9255_v46 }
0x1ac1   :  { %7947 = vmatprep.subr.bf16.mxu0 %v9175_v6  ;;  %7979 = vmatprep.subr.bf16.mxu1 %v9258_v5 }
0x1ac4   :  { %7949 = vmatpush1.bf16.msra.mxu0 %v9184_v10  ;;  %7981 = vmatpush1.bf16.msra.mxu1 %v9273_v48 }
0x1ac5   :  { %7951 = vmatprep.subr.bf16.mxu0 %v9193_v14  ;;  %7983 = vmatprep.subr.bf16.mxu1 %v9276_v18 }
0x1ac8   :  { %7953 = vmatpush1.bf16.msra.mxu0 %v9202_v19  ;;  %7985 = vmatpush1.bf16.msra.mxu1 %v9285_v27 }
0x1ac9   :  { %7955 = vmatprep.subr.bf16.mxu0 %v9298_v54  ;;  %7987 = vmatprep.subr.bf16.mxu1 %v9309_v60 }
0x1aca   :  { %v2772_v50 = vpop.f32.mrb[34].mxu0  ;;  %v2843_v53 = vpop.f32.mrb[34].mxu1 }
0x1acb   :  { %v2774_v56 = vpop.f32.mrb[35].mxu0  ;;  %v2845_v57 = vpop.f32.mrb[35].mxu1 }
0x1acc   :  { %v2852_v59 = vcombine.low %v2772_v50, %v2774_v56  ;;  %v2853_v63 = vcombine.low %v2843_v53, %v2845_v57  ;;  %7957 = vmatpush1.bf16.msra.mxu0 %v9311_v62  ;;  %7989 = vmatpush1.bf16.msra.mxu1 %v9320_v3 }
0x1acd   :  { %7959 = vmatprep.subr.bf16.mxu0 %v9331_v11  ;;  %7991 = vmatprep.subr.bf16.mxu1 %v9342_v20 }
0x1ace   :  { %v2860_v2 = vrot.slane %v2852_v59, %v9626_v22  ;;  %v2867_v8 = vrot.slane %v2853_v63, %v9626_v22 }
0x1ad0   :  { %v2868_v9 = vcombine.low %v2860_v2, %v2867_v8  ;;  %7961 = vmatpush1.bf16.msra.mxu0 %v9354_v26  ;;  %7993 = vmatpush1.bf16.msra.mxu1 %v9356_v29 }
0x1ad1   :  { %7963 = vmatprep.subr.bf16.mxu0 %v9370_v34  ;;  %7995 = vmatprep.subr.bf16.mxu1 %v9381_v39 }
0x1ad2   :  { %5064 = vst [vmem:[%s9994_s4 + $0x10] sm:$0xff] %v2868_v9 }
0x1ad4   :  { %7965 = vmatpush1.bf16.msra.mxu0 %v9383_v42  ;;  %7997 = vmatpush1.bf16.msra.mxu1 %v9392_v45 }
0x1ad5   :  { %7999 = vmatprep.subr.bf16.mxu0 %v9116_v24  ;;  %8031 = vmatprep.subr.bf16.mxu1 %v9127_v51 }
0x1ad7   :  { %3940 = vmatmul.mubr.f32.vlgmr.msra.gmra.mrb[48].mxu0 %v3874_v13  ;;  %4011 = vmatmul.mubr.f32.vlgmr.msra.gmra.mrb[48].mxu1 %v3874_v13  ;;  %v4375_v13 = vld [vmem:[#allocation2 + $0x18] sm:$0x3] }
0x1ad8   :  { %8001 = vmatpush1.bf16.msra.mxu0 %v9129_v52  ;;  %8033 = vmatpush1.bf16.msra.mxu1 %v9219_v33 }
0x1ad9   :  { %8003 = vmatprep.subr.bf16.mxu0 %v9140_v55  ;;  %8035 = vmatprep.subr.bf16.mxu1 %v9221_v35 }
0x1ada   :  { %4106 = vmatprep.mubr.f32.mxu0 %v8389_v4  ;;  %4177 = vmatprep.mubr.f32.mxu1 %v8389_v4 }
0x1adc   :  { %8005 = vmatpush1.bf16.msra.mxu0 %v9148_v28  ;;  %8037 = vmatpush1.bf16.msra.mxu1 %v9236_v40 }
0x1add   :  { %8007 = vmatprep.subr.bf16.mxu0 %v9157_v61  ;;  %8039 = vmatprep.subr.bf16.mxu1 %v9240_v41 }
0x1ae0   :  { %8009 = vmatpush1.bf16.msra.mxu0 %v9166_v1  ;;  %8041 = vmatpush1.bf16.msra.mxu1 %v9255_v46 }
0x1ae1   :  { %8011 = vmatprep.subr.bf16.mxu0 %v9175_v6  ;;  %8043 = vmatprep.subr.bf16.mxu1 %v9258_v5 }
0x1ae4   :  { %8013 = vmatpush1.bf16.msra.mxu0 %v9184_v10  ;;  %8045 = vmatpush1.bf16.msra.mxu1 %v9273_v48 }
0x1ae5   :  { %8015 = vmatprep.subr.bf16.mxu0 %v9193_v14  ;;  %8047 = vmatprep.subr.bf16.mxu1 %v9276_v18 }
0x1ae8   :  { %8017 = vmatpush1.bf16.msra.mxu0 %v9202_v19  ;;  %8049 = vmatpush1.bf16.msra.mxu1 %v9285_v27 }
0x1ae9   :  { %8019 = vmatprep.subr.bf16.mxu0 %v9298_v54  ;;  %8051 = vmatprep.subr.bf16.mxu1 %v9309_v60 }
0x1aea   :  { %v2939_v16 = vpop.f32.mrb[36].mxu0  ;;  %v3010_v17 = vpop.f32.mrb[36].mxu1 }
0x1aeb   :  { %v2941_v23 = vpop.f32.mrb[37].mxu0  ;;  %v3012_v25 = vpop.f32.mrb[37].mxu1 }
0x1aec   :  { %v3019_v30 = vcombine.low %v2939_v16, %v2941_v23  ;;  %v3020_v31 = vcombine.low %v3010_v17, %v3012_v25  ;;  %8021 = vmatpush1.bf16.msra.mxu0 %v9311_v62  ;;  %8053 = vmatpush1.bf16.msra.mxu1 %v9320_v3 }
0x1aed   :  { %8023 = vmatprep.subr.bf16.mxu0 %v9331_v11  ;;  %8055 = vmatprep.subr.bf16.mxu1 %v9342_v20 }
0x1aee   :  { %v3027_v32 = vrot.slane %v3019_v30, %v9626_v22  ;;  %v3034_v36 = vrot.slane %v3020_v31, %v9626_v22 }
0x1af0   :  { %v3035_v37 = vcombine.low %v3027_v32, %v3034_v36  ;;  %8025 = vmatpush1.bf16.msra.mxu0 %v9354_v26  ;;  %8057 = vmatpush1.bf16.msra.mxu1 %v9356_v29 }
0x1af1   :  { %8027 = vmatprep.subr.bf16.mxu0 %v9370_v34  ;;  %8059 = vmatprep.subr.bf16.mxu1 %v9381_v39 }
0x1af2   :  { %5065 = vst [vmem:[%s9994_s4 + $0x18] sm:$0xff] %v3035_v37 }
0x1af4   :  { %8029 = vmatpush1.bf16.msra.mxu0 %v9383_v42  ;;  %8061 = vmatpush1.bf16.msra.mxu1 %v9392_v45 }
0x1af5   :  { %8063 = vmatprep.subr.bf16.mxu0 %v9116_v24  ;;  %8095 = vmatprep.subr.bf16.mxu1 %v9127_v51 }
0x1af7   :  { %4107 = vmatmul.mubr.f32.vlgmr.msra.gmra.mrb[50].mxu0 %v4041_v38  ;;  %4178 = vmatmul.mubr.f32.vlgmr.msra.gmra.mrb[50].mxu1 %v4041_v38  ;;  %v4542_v38 = vld [vmem:[#allocation2 + $0x1a] sm:$0x3] }
0x1af8   :  { %8065 = vmatpush1.bf16.msra.mxu0 %v9129_v52  ;;  %8097 = vmatpush1.bf16.msra.mxu1 %v9219_v33 }
0x1af9   :  { %8067 = vmatprep.subr.bf16.mxu0 %v9140_v55  ;;  %8099 = vmatprep.subr.bf16.mxu1 %v9221_v35 }
0x1afa   :  { %4273 = vmatprep.mubr.f32.mxu0 %v8389_v4  ;;  %4344 = vmatprep.mubr.f32.mxu1 %v8389_v4 }
0x1afc   :  { %8069 = vmatpush1.bf16.msra.mxu0 %v9148_v28  ;;  %8101 = vmatpush1.bf16.msra.mxu1 %v9236_v40 }
0x1afd   :  { %8071 = vmatprep.subr.bf16.mxu0 %v9157_v61  ;;  %8103 = vmatprep.subr.bf16.mxu1 %v9240_v41 }
0x1b00   :  { %8073 = vmatpush1.bf16.msra.mxu0 %v9166_v1  ;;  %8105 = vmatpush1.bf16.msra.mxu1 %v9255_v46 }
0x1b01   :  { %8075 = vmatprep.subr.bf16.mxu0 %v9175_v6  ;;  %8107 = vmatprep.subr.bf16.mxu1 %v9258_v5 }
0x1b04   :  { %8077 = vmatpush1.bf16.msra.mxu0 %v9184_v10  ;;  %8109 = vmatpush1.bf16.msra.mxu1 %v9273_v48 }
0x1b05   :  { %8079 = vmatprep.subr.bf16.mxu0 %v9193_v14  ;;  %8111 = vmatprep.subr.bf16.mxu1 %v9276_v18 }
0x1b08   :  { %8081 = vmatpush1.bf16.msra.mxu0 %v9202_v19  ;;  %8113 = vmatpush1.bf16.msra.mxu1 %v9285_v27 }
0x1b09   :  { %8083 = vmatprep.subr.bf16.mxu0 %v9298_v54  ;;  %8115 = vmatprep.subr.bf16.mxu1 %v9309_v60 }
0x1b0a   :  { %v3106_v43 = vpop.f32.mrb[38].mxu0  ;;  %v3177_v44 = vpop.f32.mrb[38].mxu1 }
0x1b0b   :  { %v3108_v7 = vpop.f32.mrb[39].mxu0  ;;  %v3179_v12 = vpop.f32.mrb[39].mxu1 }
0x1b0c   :  { %v3186_v15 = vcombine.low %v3106_v43, %v3108_v7  ;;  %v3187_v47 = vcombine.low %v3177_v44, %v3179_v12  ;;  %8085 = vmatpush1.bf16.msra.mxu0 %v9311_v62  ;;  %8117 = vmatpush1.bf16.msra.mxu1 %v9320_v3 }
0x1b0d   :  { %8087 = vmatprep.subr.bf16.mxu0 %v9331_v11  ;;  %8119 = vmatprep.subr.bf16.mxu1 %v9342_v20 }
0x1b0e   :  { %v3194_v0 = vrot.slane %v3186_v15, %v9626_v22  ;;  %v3201_v21 = vrot.slane %v3187_v47, %v9626_v22 }
0x1b10   :  { %v3202_v49 = vcombine.low %v3194_v0, %v3201_v21  ;;  %8089 = vmatpush1.bf16.msra.mxu0 %v9354_v26  ;;  %8121 = vmatpush1.bf16.msra.mxu1 %v9356_v29 }
0x1b11   :  { %8091 = vmatprep.subr.bf16.mxu0 %v9370_v34  ;;  %8123 = vmatprep.subr.bf16.mxu1 %v9381_v39 }
0x1b12   :  { %5066 = vst [vmem:[%s9994_s4 + $0x20] sm:$0xff] %v3202_v49 }
0x1b14   :  { %8093 = vmatpush1.bf16.msra.mxu0 %v9383_v42  ;;  %8125 = vmatpush1.bf16.msra.mxu1 %v9392_v45 }
0x1b15   :  { %8127 = vmatprep.subr.bf16.mxu0 %v9116_v24  ;;  %8159 = vmatprep.subr.bf16.mxu1 %v9127_v51 }
0x1b17   :  { %4274 = vmatmul.mubr.f32.vlgmr.msra.gmra.mrb[52].mxu0 %v4208_v58  ;;  %4345 = vmatmul.mubr.f32.vlgmr.msra.gmra.mrb[52].mxu1 %v4208_v58  ;;  %v4709_v58 = vld [vmem:[#allocation2 + $0x1c] sm:$0x3] }
0x1b18   :  { %8129 = vmatpush1.bf16.msra.mxu0 %v9129_v52  ;;  %8161 = vmatpush1.bf16.msra.mxu1 %v9219_v33 }
0x1b19   :  { %8131 = vmatprep.subr.bf16.mxu0 %v9140_v55  ;;  %8163 = vmatprep.subr.bf16.mxu1 %v9221_v35 }
0x1b1a   :  { %4440 = vmatprep.mubr.f32.mxu0 %v8389_v4  ;;  %4511 = vmatprep.mubr.f32.mxu1 %v8389_v4 }
0x1b1c   :  { %8133 = vmatpush1.bf16.msra.mxu0 %v9148_v28  ;;  %8165 = vmatpush1.bf16.msra.mxu1 %v9236_v40 }
0x1b1d   :  { %8135 = vmatprep.subr.bf16.mxu0 %v9157_v61  ;;  %8167 = vmatprep.subr.bf16.mxu1 %v9240_v41 }
0x1b20   :  { %8137 = vmatpush1.bf16.msra.mxu0 %v9166_v1  ;;  %8169 = vmatpush1.bf16.msra.mxu1 %v9255_v46 }
0x1b21   :  { %8139 = vmatprep.subr.bf16.mxu0 %v9175_v6  ;;  %8171 = vmatprep.subr.bf16.mxu1 %v9258_v5 }
0x1b24   :  { %8141 = vmatpush1.bf16.msra.mxu0 %v9184_v10  ;;  %8173 = vmatpush1.bf16.msra.mxu1 %v9273_v48 }
0x1b25   :  { %8143 = vmatprep.subr.bf16.mxu0 %v9193_v14  ;;  %8175 = vmatprep.subr.bf16.mxu1 %v9276_v18 }
0x1b28   :  { %8145 = vmatpush1.bf16.msra.mxu0 %v9202_v19  ;;  %8177 = vmatpush1.bf16.msra.mxu1 %v9285_v27 }
0x1b29   :  { %8147 = vmatprep.subr.bf16.mxu0 %v9298_v54  ;;  %8179 = vmatprep.subr.bf16.mxu1 %v9309_v60 }
0x1b2a   :  { %v3273_v50 = vpop.f32.mrb[40].mxu0  ;;  %v3344_v53 = vpop.f32.mrb[40].mxu1 }
0x1b2b   :  { %v3275_v56 = vpop.f32.mrb[41].mxu0  ;;  %v3346_v57 = vpop.f32.mrb[41].mxu1 }
0x1b2c   :  { %v3353_v59 = vcombine.low %v3273_v50, %v3275_v56  ;;  %v3354_v63 = vcombine.low %v3344_v53, %v3346_v57  ;;  %8149 = vmatpush1.bf16.msra.mxu0 %v9311_v62  ;;  %8181 = vmatpush1.bf16.msra.mxu1 %v9320_v3 }
0x1b2d   :  { %8151 = vmatprep.subr.bf16.mxu0 %v9331_v11  ;;  %8183 = vmatprep.subr.bf16.mxu1 %v9342_v20 }
0x1b2e   :  { %v3361_v2 = vrot.slane %v3353_v59, %v9626_v22  ;;  %v3368_v8 = vrot.slane %v3354_v63, %v9626_v22 }
0x1b30   :  { %v3369_v9 = vcombine.low %v3361_v2, %v3368_v8  ;;  %8153 = vmatpush1.bf16.msra.mxu0 %v9354_v26  ;;  %8185 = vmatpush1.bf16.msra.mxu1 %v9356_v29 }
0x1b31   :  { %8155 = vmatprep.subr.bf16.mxu0 %v9370_v34  ;;  %8187 = vmatprep.subr.bf16.mxu1 %v9381_v39 }
0x1b32   :  { %5067 = vst [vmem:[%s9994_s4 + $0x28] sm:$0xff] %v3369_v9 }
0x1b34   :  { %8157 = vmatpush1.bf16.msra.mxu0 %v9383_v42  ;;  %8189 = vmatpush1.bf16.msra.mxu1 %v9392_v45 }
0x1b35   :  { %8191 = vmatprep.subr.bf16.mxu0 %v9116_v24  ;;  %8223 = vmatprep.subr.bf16.mxu1 %v9127_v51 }
0x1b37   :  { %4441 = vmatmul.mubr.f32.vlgmr.msra.gmra.mrb[54].mxu0 %v4375_v13  ;;  %4512 = vmatmul.mubr.f32.vlgmr.msra.gmra.mrb[54].mxu1 %v4375_v13 }
0x1b38   :  { %8193 = vmatpush1.bf16.msra.mxu0 %v9129_v52  ;;  %8225 = vmatpush1.bf16.msra.mxu1 %v9219_v33 }
0x1b39   :  { %8195 = vmatprep.subr.bf16.mxu0 %v9140_v55  ;;  %8227 = vmatprep.subr.bf16.mxu1 %v9221_v35 }
0x1b3a   :  { %4607 = vmatprep.mubr.f32.mxu0 %v8389_v4  ;;  %4678 = vmatprep.mubr.f32.mxu1 %v8389_v4 }
0x1b3c   :  { %8197 = vmatpush1.bf16.msra.mxu0 %v9148_v28  ;;  %8229 = vmatpush1.bf16.msra.mxu1 %v9236_v40 }
0x1b3d   :  { %8199 = vmatprep.subr.bf16.mxu0 %v9157_v61  ;;  %8231 = vmatprep.subr.bf16.mxu1 %v9240_v41 }
0x1b40   :  { %8201 = vmatpush1.bf16.msra.mxu0 %v9166_v1  ;;  %8233 = vmatpush1.bf16.msra.mxu1 %v9255_v46 }
0x1b41   :  { %8203 = vmatprep.subr.bf16.mxu0 %v9175_v6  ;;  %8235 = vmatprep.subr.bf16.mxu1 %v9258_v5 }
0x1b44   :  { %8205 = vmatpush1.bf16.msra.mxu0 %v9184_v10  ;;  %8237 = vmatpush1.bf16.msra.mxu1 %v9273_v48 }
0x1b45   :  { %8207 = vmatprep.subr.bf16.mxu0 %v9193_v14  ;;  %8239 = vmatprep.subr.bf16.mxu1 %v9276_v18 }
0x1b48   :  { %8209 = vmatpush1.bf16.msra.mxu0 %v9202_v19  ;;  %8241 = vmatpush1.bf16.msra.mxu1 %v9285_v27 }
0x1b49   :  { %8211 = vmatprep.subr.bf16.mxu0 %v9298_v54  ;;  %8243 = vmatprep.subr.bf16.mxu1 %v9309_v60 }
0x1b4a   :  { %v3440_v16 = vpop.f32.mrb[42].mxu0  ;;  %v3511_v17 = vpop.f32.mrb[42].mxu1 }
0x1b4b   :  { %v3442_v23 = vpop.f32.mrb[43].mxu0  ;;  %v3513_v25 = vpop.f32.mrb[43].mxu1 }
0x1b4c   :  { %v3520_v30 = vcombine.low %v3440_v16, %v3442_v23  ;;  %v3521_v31 = vcombine.low %v3511_v17, %v3513_v25  ;;  %8213 = vmatpush1.bf16.msra.mxu0 %v9311_v62  ;;  %8245 = vmatpush1.bf16.msra.mxu1 %v9320_v3 }
0x1b4d   :  { %8215 = vmatprep.subr.bf16.mxu0 %v9331_v11  ;;  %8247 = vmatprep.subr.bf16.mxu1 %v9342_v20 }
0x1b4e   :  { %v3528_v32 = vrot.slane %v3520_v30, %v9626_v22  ;;  %v3535_v36 = vrot.slane %v3521_v31, %v9626_v22 }
0x1b50   :  { %v3536_v37 = vcombine.low %v3528_v32, %v3535_v36  ;;  %8217 = vmatpush1.bf16.msra.mxu0 %v9354_v26  ;;  %8249 = vmatpush1.bf16.msra.mxu1 %v9356_v29 }
0x1b51   :  { %8219 = vmatprep.subr.bf16.mxu0 %v9370_v34  ;;  %8251 = vmatprep.subr.bf16.mxu1 %v9381_v39 }
0x1b52   :  { %5068 = vst [vmem:[%s9994_s4 + $0x30] sm:$0xff] %v3536_v37 }
0x1b54   :  { %8221 = vmatpush1.bf16.msra.mxu0 %v9383_v42  ;;  %8253 = vmatpush1.bf16.msra.mxu1 %v9392_v45 }
0x1b55   :  { %8255 = vmatprep.subr.bf16.mxu0 %v9116_v24  ;;  %8287 = vmatprep.subr.bf16.mxu1 %v9127_v51 }
0x1b57   :  { %4608 = vmatmul.mubr.f32.vlgmr.msra.gmra.mrb[56].mxu0 %v4542_v38  ;;  %4679 = vmatmul.mubr.f32.vlgmr.msra.gmra.mrb[56].mxu1 %v4542_v38 }
0x1b58   :  { %8257 = vmatpush1.bf16.msra.mxu0 %v9129_v52  ;;  %8289 = vmatpush1.bf16.msra.mxu1 %v9219_v33 }
0x1b59   :  { %8259 = vmatprep.subr.bf16.mxu0 %v9140_v55  ;;  %8291 = vmatprep.subr.bf16.mxu1 %v9221_v35 }
0x1b5a   :  { %4774 = vmatprep.mubr.f32.mxu0 %v8389_v4  ;;  %4845 = vmatprep.mubr.f32.mxu1 %v8389_v4 }
0x1b5c   :  { %8261 = vmatpush1.bf16.msra.mxu0 %v9148_v28  ;;  %8293 = vmatpush1.bf16.msra.mxu1 %v9236_v40 }
0x1b5d   :  { %8263 = vmatprep.subr.bf16.mxu0 %v9157_v61  ;;  %8295 = vmatprep.subr.bf16.mxu1 %v9240_v41 }
0x1b60   :  { %8265 = vmatpush1.bf16.msra.mxu0 %v9166_v1  ;;  %8297 = vmatpush1.bf16.msra.mxu1 %v9255_v46 }
0x1b61   :  { %8267 = vmatprep.subr.bf16.mxu0 %v9175_v6  ;;  %8299 = vmatprep.subr.bf16.mxu1 %v9258_v5 }
0x1b64   :  { %8269 = vmatpush1.bf16.msra.mxu0 %v9184_v10  ;;  %8301 = vmatpush1.bf16.msra.mxu1 %v9273_v48 }
0x1b65   :  { %8271 = vmatprep.subr.bf16.mxu0 %v9193_v14  ;;  %8303 = vmatprep.subr.bf16.mxu1 %v9276_v18 }
0x1b68   :  { %8273 = vmatpush1.bf16.msra.mxu0 %v9202_v19  ;;  %8305 = vmatpush1.bf16.msra.mxu1 %v9285_v27 }
0x1b69   :  { %8275 = vmatprep.subr.bf16.mxu0 %v9298_v54  ;;  %8307 = vmatprep.subr.bf16.mxu1 %v9309_v60 }
0x1b6a   :  { %v3607_v43 = vpop.f32.mrb[44].mxu0  ;;  %v3678_v44 = vpop.f32.mrb[44].mxu1 }
0x1b6b   :  { %v3609_v7 = vpop.f32.mrb[45].mxu0  ;;  %v3680_v12 = vpop.f32.mrb[45].mxu1 }
0x1b6c   :  { %v3687_v15 = vcombine.low %v3607_v43, %v3609_v7  ;;  %v3688_v47 = vcombine.low %v3678_v44, %v3680_v12  ;;  %8277 = vmatpush1.bf16.msra.mxu0 %v9311_v62  ;;  %8309 = vmatpush1.bf16.msra.mxu1 %v9320_v3 }
0x1b6d   :  { %8279 = vmatprep.subr.bf16.mxu0 %v9331_v11  ;;  %8311 = vmatprep.subr.bf16.mxu1 %v9342_v20 }
0x1b6e   :  { %v3695_v0 = vrot.slane %v3687_v15, %v9626_v22  ;;  %v3702_v21 = vrot.slane %v3688_v47, %v9626_v22 }
0x1b70   :  { %v3703_v49 = vcombine.low %v3695_v0, %v3702_v21  ;;  %8281 = vmatpush1.bf16.msra.mxu0 %v9354_v26  ;;  %8313 = vmatpush1.bf16.msra.mxu1 %v9356_v29 }
0x1b71   :  { %8283 = vmatprep.subr.bf16.mxu0 %v9370_v34  ;;  %8315 = vmatprep.subr.bf16.mxu1 %v9381_v39 }
0x1b72   :  { %5069 = vst [vmem:[%s9994_s4 + $0x38] sm:$0xff] %v3703_v49 }
0x1b74   :  { %8285 = vmatpush1.bf16.msra.mxu0 %v9383_v42  ;;  %8317 = vmatpush1.bf16.msra.mxu1 %v9392_v45 }
0x1b75   :  { %8319 = vmatprep.subr.bf16.mxu0 %v9116_v24  ;;  %8351 = vmatprep.subr.bf16.mxu1 %v9127_v51 }
0x1b77   :  { %4775 = vmatmul.mubr.f32.vlgmr.msra.gmra.mrb[58].mxu0 %v4709_v58  ;;  %4846 = vmatmul.mubr.f32.vlgmr.msra.gmra.mrb[58].mxu1 %v4709_v58 }
0x1b78   :  { %8321 = vmatpush1.bf16.msra.mxu0 %v9129_v52  ;;  %8353 = vmatpush1.bf16.msra.mxu1 %v9219_v33 }
0x1b79   :  { %8323 = vmatprep.subr.bf16.mxu0 %v9140_v55  ;;  %8355 = vmatprep.subr.bf16.mxu1 %v9221_v35 }
0x1b7a   :  { %4941 = vmatprep.mubr.f32.mxu0 %v8389_v4  ;;  %5012 = vmatprep.mubr.f32.mxu1 %v8389_v4 }
0x1b7c   :  { %8325 = vmatpush1.bf16.msra.mxu0 %v9148_v28  ;;  %8357 = vmatpush1.bf16.msra.mxu1 %v9236_v40 }
0x1b7d   :  { %8327 = vmatprep.subr.bf16.mxu0 %v9157_v61  ;;  %8359 = vmatprep.subr.bf16.mxu1 %v9240_v41 }
0x1b80   :  { %8329 = vmatpush1.bf16.msra.mxu0 %v9166_v1  ;;  %8361 = vmatpush1.bf16.msra.mxu1 %v9255_v46 }
0x1b81   :  { %8331 = vmatprep.subr.bf16.mxu0 %v9175_v6  ;;  %8363 = vmatprep.subr.bf16.mxu1 %v9258_v5 }
0x1b84   :  { %8333 = vmatpush1.bf16.msra.mxu0 %v9184_v10  ;;  %8365 = vmatpush1.bf16.msra.mxu1 %v9273_v48  ;;  %v4876_v10 = vld [vmem:[#allocation2 + $0x1e] sm:$0x3] }
0x1b85   :  { %8335 = vmatprep.subr.bf16.mxu0 %v9193_v14  ;;  %8367 = vmatprep.subr.bf16.mxu1 %v9276_v18 }
0x1b88   :  { %8337 = vmatpush1.bf16.msra.mxu0 %v9202_v19  ;;  %8369 = vmatpush1.bf16.msra.mxu1 %v9285_v27 }
0x1b89   :  { %8339 = vmatprep.subr.bf16.mxu0 %v9298_v54  ;;  %8371 = vmatprep.subr.bf16.mxu1 %v9309_v60 }
0x1b8a   :  { %v3774_v4 = vpop.f32.mrb[46].mxu0  ;;  %v3845_v24 = vpop.f32.mrb[46].mxu1 }
0x1b8b   :  { %v3776_v51 = vpop.f32.mrb[47].mxu0  ;;  %v3847_v52 = vpop.f32.mrb[47].mxu1 }
0x1b8c   :  { %v3854_v55 = vcombine.low %v3774_v4, %v3776_v51  ;;  %v3855_v28 = vcombine.low %v3845_v24, %v3847_v52  ;;  %8341 = vmatpush1.bf16.msra.mxu0 %v9311_v62  ;;  %8373 = vmatpush1.bf16.msra.mxu1 %v9320_v3 }
0x1b8d   :  { %8343 = vmatprep.subr.bf16.mxu0 %v9331_v11  ;;  %8375 = vmatprep.subr.bf16.mxu1 %v9342_v20 }
0x1b8e   :  { %v3862_v61 = vrot.slane %v3854_v55, %v9626_v22  ;;  %v3869_v1 = vrot.slane %v3855_v28, %v9626_v22 }
0x1b90   :  { %v3870_v6 = vcombine.low %v3862_v61, %v3869_v1  ;;  %8345 = vmatpush1.bf16.msra.mxu0 %v9354_v26  ;;  %8377 = vmatpush1.bf16.msra.mxu1 %v9356_v29 }
0x1b91   :  { %8347 = vmatprep.subr.bf16.mxu0 %v9370_v34  ;;  %8379 = vmatprep.subr.bf16.mxu1 %v9381_v39 }
0x1b92   :  { %5070 = vst [vmem:[%s9994_s4 + $0x40] sm:$0xff] %v3870_v6 }
0x1b94   :  { %8349 = vmatpush1.bf16.msra.mxu0 %v9383_v42  ;;  %8381 = vmatpush1.bf16.msra.mxu1 %v9392_v45 }
0x1b97   :  { %4942 = vmatmul.mubr.f32.vlgmr.msra.gmra.mrb[60].mxu0 %v4876_v10  ;;  %5013 = vmatmul.mubr.f32.vlgmr.msra.gmra.mrb[60].mxu1 %v4876_v10 }
0x1baa   :  { %v3941_v14 = vpop.f32.mrb[48].mxu0  ;;  %v4012_v19 = vpop.f32.mrb[48].mxu1 }
0x1bab   :  { %v3943_v33 = vpop.f32.mrb[49].mxu0  ;;  %v4014_v35 = vpop.f32.mrb[49].mxu1 }
0x1bac   :  { %v4021_v40 = vcombine.low %v3941_v14, %v3943_v33  ;;  %v4022_v41 = vcombine.low %v4012_v19, %v4014_v35 }
0x1bae   :  { %v4029_v46 = vrot.slane %v4021_v40, %v9626_v22  ;;  %v4036_v5 = vrot.slane %v4022_v41, %v9626_v22 }
0x1bb0   :  { %v4037_v48 = vcombine.low %v4029_v46, %v4036_v5 }
0x1bb2   :  { %5071 = vst [vmem:[%s9994_s4 + $0x48] sm:$0xff] %v4037_v48 }
0x1bca   :  { %v4108_v18 = vpop.f32.mrb[50].mxu0  ;;  %v4179_v27 = vpop.f32.mrb[50].mxu1 }
0x1bcb   :  { %v4110_v54 = vpop.f32.mrb[51].mxu0  ;;  %v4181_v60 = vpop.f32.mrb[51].mxu1 }
0x1bcc   :  { %v4188_v62 = vcombine.low %v4108_v18, %v4110_v54  ;;  %v4189_v3 = vcombine.low %v4179_v27, %v4181_v60 }
0x1bce   :  { %v4196_v11 = vrot.slane %v4188_v62, %v9626_v22  ;;  %v4203_v20 = vrot.slane %v4189_v3, %v9626_v22 }
0x1bd0   :  { %v4204_v26 = vcombine.low %v4196_v11, %v4203_v20 }
0x1bd2   :  { %5072 = vst [vmem:[%s9994_s4 + $0x50] sm:$0xff] %v4204_v26 }
0x1bea   :  { %v4275_v29 = vpop.f32.mrb[52].mxu0  ;;  %v4346_v34 = vpop.f32.mrb[52].mxu1 }
0x1beb   :  { %v4277_v39 = vpop.f32.mrb[53].mxu0  ;;  %v4348_v42 = vpop.f32.mrb[53].mxu1 }
0x1bec   :  { %v4355_v45 = vcombine.low %v4275_v29, %v4277_v39  ;;  %v4356_v50 = vcombine.low %v4346_v34, %v4348_v42 }
0x1bee   :  { %v4363_v53 = vrot.slane %v4355_v45, %v9626_v22  ;;  %v4370_v56 = vrot.slane %v4356_v50, %v9626_v22 }
0x1bf0   :  { %v4371_v57 = vcombine.low %v4363_v53, %v4370_v56 }
0x1bf2   :  { %5073 = vst [vmem:[%s9994_s4 + $0x58] sm:$0xff] %v4371_v57 }
0x1c0a   :  { %v4442_v59 = vpop.f32.mrb[54].mxu0  ;;  %v4513_v63 = vpop.f32.mrb[54].mxu1 }
0x1c0b   :  { %v4444_v2 = vpop.f32.mrb[55].mxu0  ;;  %v4515_v8 = vpop.f32.mrb[55].mxu1 }
0x1c0c   :  { %v4522_v9 = vcombine.low %v4442_v59, %v4444_v2  ;;  %v4523_v13 = vcombine.low %v4513_v63, %v4515_v8 }
0x1c0e   :  { %v4530_v16 = vrot.slane %v4522_v9, %v9626_v22  ;;  %v4537_v17 = vrot.slane %v4523_v13, %v9626_v22 }
0x1c10   :  { %v4538_v23 = vcombine.low %v4530_v16, %v4537_v17 }
0x1c12   :  { %5074 = vst [vmem:[%s9994_s4 + $0x60] sm:$0xff] %v4538_v23 }
0x1c2a   :  { %v4609_v25 = vpop.f32.mrb[56].mxu0  ;;  %v4680_v30 = vpop.f32.mrb[56].mxu1 }
0x1c2b   :  { %v4611_v31 = vpop.f32.mrb[57].mxu0  ;;  %v4682_v32 = vpop.f32.mrb[57].mxu1 }
0x1c2c   :  { %v4689_v36 = vcombine.low %v4609_v25, %v4611_v31  ;;  %v4690_v37 = vcombine.low %v4680_v30, %v4682_v32 }
0x1c2e   :  { %v4697_v38 = vrot.slane %v4689_v36, %v9626_v22  ;;  %v4704_v43 = vrot.slane %v4690_v37, %v9626_v22 }
0x1c30   :  { %v4705_v44 = vcombine.low %v4697_v38, %v4704_v43 }
0x1c32   :  { %5075 = vst [vmem:[%s9994_s4 + $0x68] sm:$0xff] %v4705_v44 }
0x1c4a   :  { %v4776_v7 = vpop.f32.mrb[58].mxu0  ;;  %v4847_v12 = vpop.f32.mrb[58].mxu1 }
0x1c4b   :  { %v4778_v15 = vpop.f32.mrb[59].mxu0  ;;  %v4849_v47 = vpop.f32.mrb[59].mxu1 }
0x1c4c   :  { %v4856_v0 = vcombine.low %v4776_v7, %v4778_v15  ;;  %v4857_v21 = vcombine.low %v4847_v12, %v4849_v47 }
0x1c4e   :  { %v4864_v49 = vrot.slane %v4856_v0, %v9626_v22  ;;  %v4871_v58 = vrot.slane %v4857_v21, %v9626_v22 }
0x1c50   :  { %v4872_v4 = vcombine.low %v4864_v49, %v4871_v58 }
0x1c52   :  { %5076 = vst [vmem:[%s9994_s4 + $0x70] sm:$0xff] %v4872_v4 }
0x1c6a   :  { %v4943_v24 = vpop.f32.mrb[60].mxu0  ;;  %v5014_v51 = vpop.f32.mrb[60].mxu1 }
0x1c6b   :  { %v4945_v52 = vpop.f32.mrb[61].mxu0  ;;  %v5016_v55 = vpop.f32.mrb[61].mxu1 }
0x1c6c   :  { %v5023_v28 = vcombine.low %v4943_v24, %v4945_v52  ;;  %v5024_v61 = vcombine.low %v5014_v51, %v5016_v55 }
0x1c6e   :  { %v5031_v1 = vrot.slane %v5023_v28, %v9626_v22  ;;  %v5038_v6 = vrot.slane %v5024_v61, %v9626_v22 }
0x1c70   :  { %v5039_v10 = vcombine.low %v5031_v1, %v5038_v6 }
0x1c72   :  { %5077 = vst [vmem:[%s9994_s4 + $0x78] sm:$0xff] %v5039_v10 }

</bundles_post_ra>
